<compile_context>
chip_gen: v6e
topology: v6e:2x2x1
jax: 0.10.0
libtpu: 0.0.40
codegen_flags: <defaults>
</compile_context>

<pallas_src>
import functools
import numpy as np
import jax
import jax.numpy as jnp
from jax import lax
from jax.experimental import pallas as pl
from jax.experimental.pallas import tpu as pltpu


# name -> (kh, kw, cin_multiplier, cout_multiplier)   (multipliers of the base channel C)
_CONV_SPECS = {
    'conv1_2':  (3, 3, 1, 1),
    'conv2_3':  (1, 3, 1, 1),
    'conv2_4':  (3, 1, 1, 1),
    'conv2_5':  (3, 3, 1, 1),
    'conv2_6':  (3, 3, 1, 1),
    'conv2_7':  (3, 3, 1, 1),
    'conv2_8':  (3, 3, 1, 1),
    'conv2_11': (3, 3, 4, 1),
    'conv3':    (3, 3, 1, 1),
    'conv3_1':  (3, 3, 1, 1),
    'dc_conv1': (1, 1, 1, 1),
    'dc_conv3': (3, 3, 1, 1),
    'dc_conv5': (5, 5, 1, 1),
    'dc_conv':  (3, 3, 3, 1),
    'ab_conv1': (3, 3, 2, 2),
    'ab_conv2': (3, 3, 2, 1),
}
_WKEYS = tuple(_CONV_SPECS.keys())


def _make_attention_kernel(C, H, W):
    S = H * W
    f32 = jnp.float32

    def kernel(*refs):
        x_ref = refs[0]
        w = {name: refs[1 + i][...] for i, name in enumerate(_WKEYS)}
        out_ref = refs[-1]

        xf = x_ref[0].astype(f32)                       # (C, S), lane-dense

        # ---- spatial index helpers (iota-built, shared by every op) -----------
        lane = lax.broadcasted_iota(jnp.int32, (1, S), 1)
        ho = jnp.zeros((1, S), jnp.int32)
        for h in range(1, H):                           # ho = lane // W (no vector div)
            ho = ho + (lane >= h * W).astype(jnp.int32)
        wo = lane - ho * W                              # lane % W
        ho_f = ho.astype(f32)
        wo_f = wo.astype(f32)
        # eqW[w, p] = (wo(p) == w),  eqH[h, p] = (ho(p) == h)
        eqW = lax.broadcasted_iota(jnp.int32, (W, S), 0) == wo
        eqH = lax.broadcasted_iota(jnp.int32, (H, S), 0) == ho
        eqH_f = jnp.where(eqH, 1.0, 0.0)

        # circular lane shift: out[:, p] = v[:, (p + s) % S]
        def shift(v, s):
            s = s % S
            if s == 0:
                return v
            return jnp.concatenate([v[:, s:], v[:, :s]], axis=1)

        mask_cache = {}

        def border_mask(di, dj):
            key = (di, dj)
            if key not in mask_cache:
                conds = []
                if dj > 0:
                    conds.append(wo <= W - 1 - dj)
                elif dj < 0:
                    conds.append(wo >= -dj)
                if di > 0:
                    conds.append(ho <= H - 1 - di)
                elif di < 0:
                    conds.append(ho >= -di)
                m = conds[0]
                for c2 in conds[1:]:
                    m = jnp.logical_and(m, c2)
                mask_cache[key] = m
            return mask_cache[key]

        # ---- full-resolution conv: one im2col patch, one MXU contraction ------
        def conv_same(v, name, relu=False):
            kh, kw, _, _ = _CONV_SPECS[name]
            ph, pw = kh // 2, kw // 2
            taps = []
            for i in range(kh):
                for j in range(kw):
                    di, dj = i - ph, j - pw
                    t = shift(v, di * W + dj)
                    if di or dj:
                        t = jnp.where(border_mask(di, dj), t, 0.0)
                    taps.append(t)
            patch = taps[0] if len(taps) == 1 else jnp.concatenate(taps, axis=0)
            acc = jnp.dot(w[name], patch, preferred_element_type=f32)
            if relu:
                acc = jnp.maximum(acc, 0.0)
            return acc                                  # (Cout, S)

        # ---- adaptive average pooling (PyTorch AdaptiveAvgPool2d binning) -----
        def hpool(v, k):                                # -> list of k (C, W) rows
            rows = []
            for a in range(k):
                s = (a * H) // k
                e = -(-((a + 1) * H) // k)              # ceil
                acc = v[:, s * W:(s + 1) * W]
                for hh in range(s + 1, e):
                    acc = acc + v[:, hh * W:(hh + 1) * W]
                rows.append(acc * (1.0 / (e - s)))
            return rows

        def wpool(v, k):                                # -> list of k (C, H) cols
            cols = []
            for a in range(k):
                s = (a * W) // k
                e = -(-((a + 1) * W) // k)
                m = jnp.logical_and(wo >= s, wo < e)
                vm = jnp.where(m, v, 0.0) * (1.0 / (e - s))
                cols.append(lax.dot_general(
                    vm, eqH_f, (((1,), (1,)), ((), ())),
                    preferred_element_type=f32))        # (C, H)
            return cols

        # ---- strip convs (valid along pooled axis, 'same' along the other) ----
        def strip_conv_rows(rows, name):                # rows: (Cin, W) each
            kh, kw, cin_m, _ = _CONV_SPECS[name]
            cin = cin_m * C
            pw = kw // 2
            if pw:
                z = jnp.zeros((cin, pw), f32)
                rows = [jnp.concatenate([z, r, z], axis=1) for r in rows]
            outs = []
            for r0 in range(len(rows) - kh + 1):
                taps = [rows[r0 + i][:, j:j + W]
                        for i in range(kh) for j in range(kw)]
                patch = taps[0] if len(taps) == 1 else jnp.concatenate(taps, axis=0)
                outs.append(jnp.dot(w[name], patch, preferred_element_type=f32))
            return outs                                 # list of (Cout, W)

        def strip_conv_cols(cols, name):                # cols: (Cin, H) each
            kh, kw, cin_m, _ = _CONV_SPECS[name]
            cin = cin_m * C
            ph = kh // 2
            if ph:
                z = jnp.zeros((cin, ph), f32)
                cols = [jnp.concatenate([z, c2, z], axis=1) for c2 in cols]
            outs = []
            for c0 in range(len(cols) - kw + 1):
                taps = [cols[c0 + j][:, i:i + H]
                        for i in range(kh) for j in range(kw)]
                patch = taps[0] if len(taps) == 1 else jnp.concatenate(taps, axis=0)
                outs.append(jnp.dot(w[name], patch, preferred_element_type=f32))
            return outs                                 # list of (Cout, H)

        # ---- bilinear (align_corners=True) upsampling back to (C, S) ----------
        def up_rows(rows):                              # rows: r x (C, W)
            r = len(rows)
            acc = None
            for a in range(r):
                if r == 1:
                    sel = jnp.where(eqW, 1.0, 0.0)
                else:
                    scale = (r - 1) / (H - 1)
                    wgt = jnp.maximum(1.0 - jnp.abs(ho_f * scale - float(a)), 0.0)
                    sel = jnp.where(eqW, wgt, 0.0)      # (W, S)
                term = jnp.dot(rows[a], sel, preferred_element_type=f32)
                acc = term if acc is None else acc + term
            return acc                                  # (C, S)

        def up_cols(cols):                              # cols: r x (C, H)
            r = len(cols)
            acc = None
            for b in range(r):
                if r == 1:
                    sel = eqH_f
                else:
                    scale = (r - 1) / (W - 1)
                    wgt = jnp.maximum(1.0 - jnp.abs(wo_f * scale - float(b)), 0.0)
                    sel = jnp.where(eqH, wgt, 0.0)      # (H, S)
                term = jnp.dot(cols[b], sel, preferred_element_type=f32)
                acc = term if acc is None else acc + term
            return acc                                  # (C, S)

        # ============================ StripPooling =============================
        x2 = conv_same(xf, 'conv1_2')
        x_conv = x2

        x2_4  = up_rows(strip_conv_rows(hpool(x2, 1), 'conv2_3'))
        x2_6  = up_rows(strip_conv_rows(hpool(x2, 3), 'conv2_5'))
        x2_8  = up_rows(strip_conv_rows(hpool(x2, 5), 'conv2_7'))
        x2_10 = up_rows(strip_conv_rows(hpool(x2, 7), 'conv2_7'))   # conv2_7 reused (as in reference forward)
        x2_5  = up_cols(strip_conv_cols(wpool(x2, 1), 'conv2_4'))
        x2_7  = up_cols(strip_conv_cols(wpool(x2, 3), 'conv2_6'))
        x2_9  = up_cols(strip_conv_cols(wpool(x2, 5), 'conv2_8'))
        x2_11 = up_cols(strip_conv_cols(wpool(x2, 7), 'conv2_8'))   # conv2_8 reused (as in reference forward)

        cat4 = jnp.concatenate(
            [x2_5 + x2_4, x2_6 + x2_7, x2_8 + x2_9, x2_10 + x2_11], axis=0)
        gate = conv_same(cat4, 'conv2_11')
        sp = jax.nn.sigmoid(gate) * x_conv              # fused sigmoid gate

        t = conv_same(sp, 'conv3', relu=True)           # conv3 = Conv + ReLU
        t = conv_same(t, 'conv3_1')
        sp = jax.nn.sigmoid(t) * sp                     # fused sigmoid gate

        # ============================ dilated_conv =============================
        d1 = conv_same(sp, 'dc_conv1')
        d3 = conv_same(sp, 'dc_conv3')
        d5 = conv_same(sp, 'dc_conv5')
        de = conv_same(jnp.concatenate([d1, d3, d5], axis=0), 'dc_conv')

        # ============================ fusion head ==============================
        c1 = conv_same(jnp.concatenate([sp, de], axis=0), 'ab_conv1')
        out = conv_same(c1, 'ab_conv2') + xf            # residual fused in-kernel

        out_ref[0] = out.astype(out_ref.dtype)

    return kernel


def attention_block_forward(x, params):
    """x: (N, C, H, W) float32 (PyTorch NCHW layout). Returns (N, C, H, W)."""
    N, C, H, W = x.shape
    S = H * W
    xf = x.reshape(N, C, S)                             # lane-dense spatial layout

    kernel = _make_attention_kernel(C, H, W)

    in_specs = [pl.BlockSpec((1, C, S), lambda n: (n, 0, 0))]
    args = [xf]
    for name in _WKEYS:
        wm = params[name]                               # (Cout, kh*kw*Cin)
        in_specs.append(pl.BlockSpec(wm.shape, lambda n: (0, 0)))
        args.append(wm)

    out = pl.pallas_call(
        kernel,
        out_shape=jax.ShapeDtypeStruct((N, C, S), jnp.float32),
        grid=(N,),
        in_specs=in_specs,
        out_specs=pl.BlockSpec((1, C, S), lambda n: (n, 0, 0)),
        compiler_params=pltpu.CompilerParams(
            dimension_semantics=("parallel",)),
    )(*args)
    return out.reshape(N, C, H, W)


# -----------------------------------------------------------------------------
# Deterministic parameters (nn.Conv2d default uniform(+/-1/sqrt(fan_in)), bias=False)
# stored pre-reshaped as (Cout, kh*kw*Cin) matmul matrices, K index = (i*kw+j)*Cin+ci.
# -----------------------------------------------------------------------------
def init_params(key, C):
    keys = jax.random.split(key, len(_WKEYS))
    params = {}
    for k, name in zip(keys, _WKEYS):
        kh, kw, cin_m, cout_m = _CONV_SPECS[name]
        cin, cout = cin_m * C, cout_m * C
        bound = 1.0 / np.sqrt(cin * kh * kw)
        w = jax.random.uniform(k, (cout, cin, kh, kw), jnp.float32,
                               minval=-bound, maxval=bound)     # PyTorch OIHW
        params[name] = jnp.transpose(w, (0, 2, 3, 1)).reshape(cout, kh * kw * cin)
    return params


if __name__ == "__main__":
    key = jax.random.PRNGKey(0)
    kx, kp = jax.random.split(key)

    N, C, H, W = 2, 4, 16, 16
    x = jax.random.normal(kx, (N, C, H, W), jnp.float32)        # PyTorch NCHW layout
    params = init_params(kp, C)

    fwd = jax.jit(functools.partial(attention_block_forward, params=params))
    out = jax.block_until_ready(fwd(x))

    assert out.shape == (N, C, H, W), out.shape
    assert bool(jnp.all(jnp.isfinite(out)))
    print("KERNEL_OK")
</pallas_src>

<mosaic_0001>
module attributes {stable_mosaic.version = 11 : i64} {
  func.func @kernel(%arg0: i32, %arg1: memref<1x4x256xf32, #tpu.memory_space<vmem>>, %arg2: memref<4x36xf32, #tpu.memory_space<vmem>>, %arg3: memref<4x12xf32, #tpu.memory_space<vmem>>, %arg4: memref<4x12xf32, #tpu.memory_space<vmem>>, %arg5: memref<4x36xf32, #tpu.memory_space<vmem>>, %arg6: memref<4x36xf32, #tpu.memory_space<vmem>>, %arg7: memref<4x36xf32, #tpu.memory_space<vmem>>, %arg8: memref<4x36xf32, #tpu.memory_space<vmem>>, %arg9: memref<4x144xf32, #tpu.memory_space<vmem>>, %arg10: memref<4x36xf32, #tpu.memory_space<vmem>>, %arg11: memref<4x36xf32, #tpu.memory_space<vmem>>, %arg12: memref<4x4xf32, #tpu.memory_space<vmem>>, %arg13: memref<4x36xf32, #tpu.memory_space<vmem>>, %arg14: memref<4x100xf32, #tpu.memory_space<vmem>>, %arg15: memref<4x108xf32, #tpu.memory_space<vmem>>, %arg16: memref<8x72xf32, #tpu.memory_space<vmem>>, %arg17: memref<4x72xf32, #tpu.memory_space<vmem>>, %arg18: memref<1x4x256xf32, #tpu.memory_space<vmem>>) attributes {dimension_semantics = [#tpu.dimension_semantics<parallel>], iteration_bounds = array<i64: 2>, scalar_prefetch = 0 : i64, scratch_operands = 0 : i64, tpu.core_type = #tpu.core_type<tc>, window_params = [{transform_indices = @transform_0, window_bounds = array<i64: 1, 4, 256>}, {pipeline_mode = #tpu.pipeline_mode<synchronous>, transform_indices = @transform_1, window_bounds = array<i64: 4, 36>}, {pipeline_mode = #tpu.pipeline_mode<synchronous>, transform_indices = @transform_2, window_bounds = array<i64: 4, 12>}, {pipeline_mode = #tpu.pipeline_mode<synchronous>, transform_indices = @transform_3, window_bounds = array<i64: 4, 12>}, {pipeline_mode = #tpu.pipeline_mode<synchronous>, transform_indices = @transform_4, window_bounds = array<i64: 4, 36>}, {pipeline_mode = #tpu.pipeline_mode<synchronous>, transform_indices = @transform_5, window_bounds = array<i64: 4, 36>}, {pipeline_mode = #tpu.pipeline_mode<synchronous>, transform_indices = @transform_6, window_bounds = array<i64: 4, 36>}, {pipeline_mode = #tpu.pipeline_mode<synchronous>, transform_indices = @transform_7, window_bounds = array<i64: 4, 36>}, {pipeline_mode = #tpu.pipeline_mode<synchronous>, transform_indices = @transform_8, window_bounds = array<i64: 4, 144>}, {pipeline_mode = #tpu.pipeline_mode<synchronous>, transform_indices = @transform_9, window_bounds = array<i64: 4, 36>}, {pipeline_mode = #tpu.pipeline_mode<synchronous>, transform_indices = @transform_10, window_bounds = array<i64: 4, 36>}, {pipeline_mode = #tpu.pipeline_mode<synchronous>, transform_indices = @transform_11, window_bounds = array<i64: 4, 4>}, {pipeline_mode = #tpu.pipeline_mode<synchronous>, transform_indices = @transform_12, window_bounds = array<i64: 4, 36>}, {pipeline_mode = #tpu.pipeline_mode<synchronous>, transform_indices = @transform_13, window_bounds = array<i64: 4, 100>}, {pipeline_mode = #tpu.pipeline_mode<synchronous>, transform_indices = @transform_14, window_bounds = array<i64: 4, 108>}, {pipeline_mode = #tpu.pipeline_mode<synchronous>, transform_indices = @transform_15, window_bounds = array<i64: 8, 72>}, {pipeline_mode = #tpu.pipeline_mode<synchronous>, transform_indices = @transform_16, window_bounds = array<i64: 4, 72>}, {transform_indices = @transform_17, window_bounds = array<i64: 1, 4, 256>}]} {
    %c0 = arith.constant 0 : index
    %c0_0 = arith.constant 0 : index
    %0 = vector.load %arg2[%c0, %c0_0] : memref<4x36xf32, #tpu.memory_space<vmem>>, vector<4x36xf32>
    %c0_1 = arith.constant 0 : index
    %c0_2 = arith.constant 0 : index
    %1 = vector.load %arg3[%c0_1, %c0_2] : memref<4x12xf32, #tpu.memory_space<vmem>>, vector<4x12xf32>
    %c0_3 = arith.constant 0 : index
    %c0_4 = arith.constant 0 : index
    %2 = vector.load %arg4[%c0_3, %c0_4] : memref<4x12xf32, #tpu.memory_space<vmem>>, vector<4x12xf32>
    %c0_5 = arith.constant 0 : index
    %c0_6 = arith.constant 0 : index
    %3 = vector.load %arg5[%c0_5, %c0_6] : memref<4x36xf32, #tpu.memory_space<vmem>>, vector<4x36xf32>
    %c0_7 = arith.constant 0 : index
    %c0_8 = arith.constant 0 : index
    %4 = vector.load %arg6[%c0_7, %c0_8] : memref<4x36xf32, #tpu.memory_space<vmem>>, vector<4x36xf32>
    %c0_9 = arith.constant 0 : index
    %c0_10 = arith.constant 0 : index
    %5 = vector.load %arg7[%c0_9, %c0_10] : memref<4x36xf32, #tpu.memory_space<vmem>>, vector<4x36xf32>
    %c0_11 = arith.constant 0 : index
    %c0_12 = arith.constant 0 : index
    %6 = vector.load %arg8[%c0_11, %c0_12] : memref<4x36xf32, #tpu.memory_space<vmem>>, vector<4x36xf32>
    %c0_13 = arith.constant 0 : index
    %c0_14 = arith.constant 0 : index
    %7 = vector.load %arg9[%c0_13, %c0_14] : memref<4x144xf32, #tpu.memory_space<vmem>>, vector<4x144xf32>
    %c0_15 = arith.constant 0 : index
    %c0_16 = arith.constant 0 : index
    %8 = vector.load %arg10[%c0_15, %c0_16] : memref<4x36xf32, #tpu.memory_space<vmem>>, vector<4x36xf32>
    %c0_17 = arith.constant 0 : index
    %c0_18 = arith.constant 0 : index
    %9 = vector.load %arg11[%c0_17, %c0_18] : memref<4x36xf32, #tpu.memory_space<vmem>>, vector<4x36xf32>
    %c0_19 = arith.constant 0 : index
    %c0_20 = arith.constant 0 : index
    %10 = vector.load %arg12[%c0_19, %c0_20] : memref<4x4xf32, #tpu.memory_space<vmem>>, vector<4x4xf32>
    %c0_21 = arith.constant 0 : index
    %c0_22 = arith.constant 0 : index
    %11 = vector.load %arg13[%c0_21, %c0_22] : memref<4x36xf32, #tpu.memory_space<vmem>>, vector<4x36xf32>
    %c0_23 = arith.constant 0 : index
    %c0_24 = arith.constant 0 : index
    %12 = vector.load %arg14[%c0_23, %c0_24] : memref<4x100xf32, #tpu.memory_space<vmem>>, vector<4x100xf32>
    %c0_25 = arith.constant 0 : index
    %c0_26 = arith.constant 0 : index
    %13 = vector.load %arg15[%c0_25, %c0_26] : memref<4x108xf32, #tpu.memory_space<vmem>>, vector<4x108xf32>
    %c0_27 = arith.constant 0 : index
    %c0_28 = arith.constant 0 : index
    %14 = vector.load %arg16[%c0_27, %c0_28] : memref<8x72xf32, #tpu.memory_space<vmem>>, vector<8x72xf32>
    %c0_29 = arith.constant 0 : index
    %c0_30 = arith.constant 0 : index
    %15 = vector.load %arg17[%c0_29, %c0_30] : memref<4x72xf32, #tpu.memory_space<vmem>>, vector<4x72xf32>
    %c0_31 = arith.constant 0 : index
    %c0_32 = arith.constant 0 : index
    %c0_33 = arith.constant 0 : index
    %16 = vector.load %arg1[%c0_31, %c0_32, %c0_33] : memref<1x4x256xf32, #tpu.memory_space<vmem>>, vector<1x4x256xf32>
    %17 = vector.shape_cast %16 : vector<1x4x256xf32> to vector<4x256xf32>
    %18 = tpu.iota {dimensions = array<i32: 1>} : vector<1x256xi32>
    %c0_i32 = arith.constant 0 : i32
    %19 = vector.broadcast %c0_i32 : i32 to vector<1x256xi32>
    %c16_i32 = arith.constant 16 : i32
    %20 = vector.broadcast %c16_i32 : i32 to vector<1x256xi32>
    %21 = arith.cmpi sge, %18, %20 : vector<1x256xi32>
    %22 = arith.extui %21 : vector<1x256xi1> to vector<1x256xi32>
    %23 = arith.addi %19, %22 : vector<1x256xi32>
    %c32_i32 = arith.constant 32 : i32
    %24 = vector.broadcast %c32_i32 : i32 to vector<1x256xi32>
    %25 = arith.cmpi sge, %18, %24 : vector<1x256xi32>
    %26 = arith.extui %25 : vector<1x256xi1> to vector<1x256xi32>
    %27 = arith.addi %23, %26 : vector<1x256xi32>
    %c48_i32 = arith.constant 48 : i32
    %28 = vector.broadcast %c48_i32 : i32 to vector<1x256xi32>
    %29 = arith.cmpi sge, %18, %28 : vector<1x256xi32>
    %30 = arith.extui %29 : vector<1x256xi1> to vector<1x256xi32>
    %31 = arith.addi %27, %30 : vector<1x256xi32>
    %c64_i32 = arith.constant 64 : i32
    %32 = vector.broadcast %c64_i32 : i32 to vector<1x256xi32>
    %33 = arith.cmpi sge, %18, %32 : vector<1x256xi32>
    %34 = arith.extui %33 : vector<1x256xi1> to vector<1x256xi32>
    %35 = arith.addi %31, %34 : vector<1x256xi32>
    %c80_i32 = arith.constant 80 : i32
    %36 = vector.broadcast %c80_i32 : i32 to vector<1x256xi32>
    %37 = arith.cmpi sge, %18, %36 : vector<1x256xi32>
    %38 = arith.extui %37 : vector<1x256xi1> to vector<1x256xi32>
    %39 = arith.addi %35, %38 : vector<1x256xi32>
    %c96_i32 = arith.constant 96 : i32
    %40 = vector.broadcast %c96_i32 : i32 to vector<1x256xi32>
    %41 = arith.cmpi sge, %18, %40 : vector<1x256xi32>
    %42 = arith.extui %41 : vector<1x256xi1> to vector<1x256xi32>
    %43 = arith.addi %39, %42 : vector<1x256xi32>
    %c112_i32 = arith.constant 112 : i32
    %44 = vector.broadcast %c112_i32 : i32 to vector<1x256xi32>
    %45 = arith.cmpi sge, %18, %44 : vector<1x256xi32>
    %46 = arith.extui %45 : vector<1x256xi1> to vector<1x256xi32>
    %47 = arith.addi %43, %46 : vector<1x256xi32>
    %c128_i32 = arith.constant 128 : i32
    %48 = vector.broadcast %c128_i32 : i32 to vector<1x256xi32>
    %49 = arith.cmpi sge, %18, %48 : vector<1x256xi32>
    %50 = arith.extui %49 : vector<1x256xi1> to vector<1x256xi32>
    %51 = arith.addi %47, %50 : vector<1x256xi32>
    %c144_i32 = arith.constant 144 : i32
    %52 = vector.broadcast %c144_i32 : i32 to vector<1x256xi32>
    %53 = arith.cmpi sge, %18, %52 : vector<1x256xi32>
    %54 = arith.extui %53 : vector<1x256xi1> to vector<1x256xi32>
    %55 = arith.addi %51, %54 : vector<1x256xi32>
    %c160_i32 = arith.constant 160 : i32
    %56 = vector.broadcast %c160_i32 : i32 to vector<1x256xi32>
    %57 = arith.cmpi sge, %18, %56 : vector<1x256xi32>
    %58 = arith.extui %57 : vector<1x256xi1> to vector<1x256xi32>
    %59 = arith.addi %55, %58 : vector<1x256xi32>
    %c176_i32 = arith.constant 176 : i32
    %60 = vector.broadcast %c176_i32 : i32 to vector<1x256xi32>
    %61 = arith.cmpi sge, %18, %60 : vector<1x256xi32>
    %62 = arith.extui %61 : vector<1x256xi1> to vector<1x256xi32>
    %63 = arith.addi %59, %62 : vector<1x256xi32>
    %c192_i32 = arith.constant 192 : i32
    %64 = vector.broadcast %c192_i32 : i32 to vector<1x256xi32>
    %65 = arith.cmpi sge, %18, %64 : vector<1x256xi32>
    %66 = arith.extui %65 : vector<1x256xi1> to vector<1x256xi32>
    %67 = arith.addi %63, %66 : vector<1x256xi32>
    %c208_i32 = arith.constant 208 : i32
    %68 = vector.broadcast %c208_i32 : i32 to vector<1x256xi32>
    %69 = arith.cmpi sge, %18, %68 : vector<1x256xi32>
    %70 = arith.extui %69 : vector<1x256xi1> to vector<1x256xi32>
    %71 = arith.addi %67, %70 : vector<1x256xi32>
    %c224_i32 = arith.constant 224 : i32
    %72 = vector.broadcast %c224_i32 : i32 to vector<1x256xi32>
    %73 = arith.cmpi sge, %18, %72 : vector<1x256xi32>
    %74 = arith.extui %73 : vector<1x256xi1> to vector<1x256xi32>
    %75 = arith.addi %71, %74 : vector<1x256xi32>
    %c240_i32 = arith.constant 240 : i32
    %76 = vector.broadcast %c240_i32 : i32 to vector<1x256xi32>
    %77 = arith.cmpi sge, %18, %76 : vector<1x256xi32>
    %78 = arith.extui %77 : vector<1x256xi1> to vector<1x256xi32>
    %79 = arith.addi %75, %78 : vector<1x256xi32>
    %c16_i32_34 = arith.constant 16 : i32
    %80 = vector.broadcast %c16_i32_34 : i32 to vector<1x256xi32>
    %81 = arith.muli %79, %80 : vector<1x256xi32>
    %82 = arith.subi %18, %81 : vector<1x256xi32>
    %83 = arith.sitofp %79 : vector<1x256xi32> to vector<1x256xf32>
    %84 = arith.sitofp %82 : vector<1x256xi32> to vector<1x256xf32>
    %85 = tpu.iota {dimensions = array<i32: 0>} : vector<16x256xi32>
    %86 = vector.broadcast %82 : vector<1x256xi32> to vector<16x256xi32>
    %87 = arith.cmpi eq, %85, %86 : vector<16x256xi32>
    %88 = tpu.iota {dimensions = array<i32: 0>} : vector<16x256xi32>
    %89 = vector.broadcast %79 : vector<1x256xi32> to vector<16x256xi32>
    %90 = arith.cmpi eq, %88, %89 : vector<16x256xi32>
    %cst = arith.constant 1.000000e+00 : f32
    %cst_35 = arith.constant 0.000000e+00 : f32
    %91 = vector.broadcast %cst : f32 to vector<16x256xf32>
    %92 = vector.broadcast %cst_35 : f32 to vector<16x256xf32>
    %93 = arith.select %90, %91, %92 : vector<16x256xi1>, vector<16x256xf32>
    %94 = vector.extract_strided_slice %17 {offsets = [0, 239], sizes = [4, 17], strides = [1, 1]} : vector<4x256xf32> to vector<4x17xf32>
    %95 = vector.extract_strided_slice %17 {offsets = [0, 0], sizes = [4, 239], strides = [1, 1]} : vector<4x256xf32> to vector<4x239xf32>
    %96 = tpu.concatenate %94, %95 in 1 : vector<4x17xf32>, vector<4x239xf32> -> vector<4x256xf32>
    %c1_i32 = arith.constant 1 : i32
    %97 = vector.broadcast %c1_i32 : i32 to vector<1x256xi32>
    %98 = arith.cmpi sge, %82, %97 : vector<1x256xi32>
    %c1_i32_36 = arith.constant 1 : i32
    %99 = vector.broadcast %c1_i32_36 : i32 to vector<1x256xi32>
    %100 = arith.cmpi sge, %79, %99 : vector<1x256xi32>
    %101 = arith.andi %98, %100 : vector<1x256xi1>
    %cst_37 = arith.constant 0.000000e+00 : f32
    %102 = vector.shape_cast %101 : vector<1x256xi1> to vector<1x256xi1>
    %103 = vector.broadcast %102 : vector<1x256xi1> to vector<4x256xi1>
    %104 = vector.broadcast %cst_37 : f32 to vector<4x256xf32>
    %105 = arith.select %103, %96, %104 : vector<4x256xi1>, vector<4x256xf32>
    %106 = vector.extract_strided_slice %17 {offsets = [0, 240], sizes = [4, 16], strides = [1, 1]} : vector<4x256xf32> to vector<4x16xf32>
    %107 = vector.extract_strided_slice %17 {offsets = [0, 0], sizes = [4, 240], strides = [1, 1]} : vector<4x256xf32> to vector<4x240xf32>
    %108 = tpu.concatenate %106, %107 in 1 : vector<4x16xf32>, vector<4x240xf32> -> vector<4x256xf32>
    %c1_i32_38 = arith.constant 1 : i32
    %109 = vector.broadcast %c1_i32_38 : i32 to vector<1x256xi32>
    %110 = arith.cmpi sge, %79, %109 : vector<1x256xi32>
    %cst_39 = arith.constant 0.000000e+00 : f32
    %111 = vector.shape_cast %110 : vector<1x256xi1> to vector<1x256xi1>
    %112 = vector.broadcast %111 : vector<1x256xi1> to vector<4x256xi1>
    %113 = vector.broadcast %cst_39 : f32 to vector<4x256xf32>
    %114 = arith.select %112, %108, %113 : vector<4x256xi1>, vector<4x256xf32>
    %115 = vector.extract_strided_slice %17 {offsets = [0, 241], sizes = [4, 15], strides = [1, 1]} : vector<4x256xf32> to vector<4x15xf32>
    %116 = vector.extract_strided_slice %17 {offsets = [0, 0], sizes = [4, 241], strides = [1, 1]} : vector<4x256xf32> to vector<4x241xf32>
    %117 = tpu.concatenate %115, %116 in 1 : vector<4x15xf32>, vector<4x241xf32> -> vector<4x256xf32>
    %c14_i32 = arith.constant 14 : i32
    %118 = vector.broadcast %c14_i32 : i32 to vector<1x256xi32>
    %119 = arith.cmpi sle, %82, %118 : vector<1x256xi32>
    %c1_i32_40 = arith.constant 1 : i32
    %120 = vector.broadcast %c1_i32_40 : i32 to vector<1x256xi32>
    %121 = arith.cmpi sge, %79, %120 : vector<1x256xi32>
    %122 = arith.andi %119, %121 : vector<1x256xi1>
    %cst_41 = arith.constant 0.000000e+00 : f32
    %123 = vector.shape_cast %122 : vector<1x256xi1> to vector<1x256xi1>
    %124 = vector.broadcast %123 : vector<1x256xi1> to vector<4x256xi1>
    %125 = vector.broadcast %cst_41 : f32 to vector<4x256xf32>
    %126 = arith.select %124, %117, %125 : vector<4x256xi1>, vector<4x256xf32>
    %127 = vector.extract_strided_slice %17 {offsets = [0, 255], sizes = [4, 1], strides = [1, 1]} : vector<4x256xf32> to vector<4x1xf32>
    %128 = vector.extract_strided_slice %17 {offsets = [0, 0], sizes = [4, 255], strides = [1, 1]} : vector<4x256xf32> to vector<4x255xf32>
    %129 = tpu.concatenate %127, %128 in 1 : vector<4x1xf32>, vector<4x255xf32> -> vector<4x256xf32>
    %c1_i32_42 = arith.constant 1 : i32
    %130 = vector.broadcast %c1_i32_42 : i32 to vector<1x256xi32>
    %131 = arith.cmpi sge, %82, %130 : vector<1x256xi32>
    %cst_43 = arith.constant 0.000000e+00 : f32
    %132 = vector.shape_cast %131 : vector<1x256xi1> to vector<1x256xi1>
    %133 = vector.broadcast %132 : vector<1x256xi1> to vector<4x256xi1>
    %134 = vector.broadcast %cst_43 : f32 to vector<4x256xf32>
    %135 = arith.select %133, %129, %134 : vector<4x256xi1>, vector<4x256xf32>
    %136 = vector.extract_strided_slice %17 {offsets = [0, 1], sizes = [4, 255], strides = [1, 1]} : vector<4x256xf32> to vector<4x255xf32>
    %137 = vector.extract_strided_slice %17 {offsets = [0, 0], sizes = [4, 1], strides = [1, 1]} : vector<4x256xf32> to vector<4x1xf32>
    %138 = tpu.concatenate %136, %137 in 1 : vector<4x255xf32>, vector<4x1xf32> -> vector<4x256xf32>
    %c14_i32_44 = arith.constant 14 : i32
    %139 = vector.broadcast %c14_i32_44 : i32 to vector<1x256xi32>
    %140 = arith.cmpi sle, %82, %139 : vector<1x256xi32>
    %cst_45 = arith.constant 0.000000e+00 : f32
    %141 = vector.shape_cast %140 : vector<1x256xi1> to vector<1x256xi1>
    %142 = vector.broadcast %141 : vector<1x256xi1> to vector<4x256xi1>
    %143 = vector.broadcast %cst_45 : f32 to vector<4x256xf32>
    %144 = arith.select %142, %138, %143 : vector<4x256xi1>, vector<4x256xf32>
    %145 = vector.extract_strided_slice %17 {offsets = [0, 15], sizes = [4, 241], strides = [1, 1]} : vector<4x256xf32> to vector<4x241xf32>
    %146 = vector.extract_strided_slice %17 {offsets = [0, 0], sizes = [4, 15], strides = [1, 1]} : vector<4x256xf32> to vector<4x15xf32>
    %147 = tpu.concatenate %145, %146 in 1 : vector<4x241xf32>, vector<4x15xf32> -> vector<4x256xf32>
    %c1_i32_46 = arith.constant 1 : i32
    %148 = vector.broadcast %c1_i32_46 : i32 to vector<1x256xi32>
    %149 = arith.cmpi sge, %82, %148 : vector<1x256xi32>
    %c14_i32_47 = arith.constant 14 : i32
    %150 = vector.broadcast %c14_i32_47 : i32 to vector<1x256xi32>
    %151 = arith.cmpi sle, %79, %150 : vector<1x256xi32>
    %152 = arith.andi %149, %151 : vector<1x256xi1>
    %cst_48 = arith.constant 0.000000e+00 : f32
    %153 = vector.shape_cast %152 : vector<1x256xi1> to vector<1x256xi1>
    %154 = vector.broadcast %153 : vector<1x256xi1> to vector<4x256xi1>
    %155 = vector.broadcast %cst_48 : f32 to vector<4x256xf32>
    %156 = arith.select %154, %147, %155 : vector<4x256xi1>, vector<4x256xf32>
    %157 = vector.extract_strided_slice %17 {offsets = [0, 16], sizes = [4, 240], strides = [1, 1]} : vector<4x256xf32> to vector<4x240xf32>
    %158 = vector.extract_strided_slice %17 {offsets = [0, 0], sizes = [4, 16], strides = [1, 1]} : vector<4x256xf32> to vector<4x16xf32>
    %159 = tpu.concatenate %157, %158 in 1 : vector<4x240xf32>, vector<4x16xf32> -> vector<4x256xf32>
    %c14_i32_49 = arith.constant 14 : i32
    %160 = vector.broadcast %c14_i32_49 : i32 to vector<1x256xi32>
    %161 = arith.cmpi sle, %79, %160 : vector<1x256xi32>
    %cst_50 = arith.constant 0.000000e+00 : f32
    %162 = vector.shape_cast %161 : vector<1x256xi1> to vector<1x256xi1>
    %163 = vector.broadcast %162 : vector<1x256xi1> to vector<4x256xi1>
    %164 = vector.broadcast %cst_50 : f32 to vector<4x256xf32>
    %165 = arith.select %163, %159, %164 : vector<4x256xi1>, vector<4x256xf32>
    %166 = vector.extract_strided_slice %17 {offsets = [0, 17], sizes = [4, 239], strides = [1, 1]} : vector<4x256xf32> to vector<4x239xf32>
    %167 = vector.extract_strided_slice %17 {offsets = [0, 0], sizes = [4, 17], strides = [1, 1]} : vector<4x256xf32> to vector<4x17xf32>
    %168 = tpu.concatenate %166, %167 in 1 : vector<4x239xf32>, vector<4x17xf32> -> vector<4x256xf32>
    %c14_i32_51 = arith.constant 14 : i32
    %169 = vector.broadcast %c14_i32_51 : i32 to vector<1x256xi32>
    %170 = arith.cmpi sle, %82, %169 : vector<1x256xi32>
    %c14_i32_52 = arith.constant 14 : i32
    %171 = vector.broadcast %c14_i32_52 : i32 to vector<1x256xi32>
    %172 = arith.cmpi sle, %79, %171 : vector<1x256xi32>
    %173 = arith.andi %170, %172 : vector<1x256xi1>
    %cst_53 = arith.constant 0.000000e+00 : f32
    %174 = vector.shape_cast %173 : vector<1x256xi1> to vector<1x256xi1>
    %175 = vector.broadcast %174 : vector<1x256xi1> to vector<4x256xi1>
    %176 = vector.broadcast %cst_53 : f32 to vector<4x256xf32>
    %177 = arith.select %175, %168, %176 : vector<4x256xi1>, vector<4x256xf32>
    %178 = tpu.concatenate %105, %114, %126, %135, %17, %144, %156, %165, %177 in 0 : vector<4x256xf32>, vector<4x256xf32>, vector<4x256xf32>, vector<4x256xf32>, vector<4x256xf32>, vector<4x256xf32>, vector<4x256xf32>, vector<4x256xf32>, vector<4x256xf32> -> vector<36x256xf32>
    %cst_54 = arith.constant dense<0.000000e+00> : vector<4x256xf32>
    %179 = tpu.matmul %0, %178, %cst_54 {dimension_numbers = #tpu.dot_dimension_numbers<[1], [0], [0], [1], [0, 0, 1, 1], [], []>} : vector<4x36xf32>, vector<36x256xf32>, vector<4x256xf32> -> vector<4x256xf32>
    %180 = vector.extract_strided_slice %179 {offsets = [0, 0], sizes = [4, 16], strides = [1, 1]} : vector<4x256xf32> to vector<4x16xf32>
    %181 = vector.extract_strided_slice %179 {offsets = [0, 16], sizes = [4, 16], strides = [1, 1]} : vector<4x256xf32> to vector<4x16xf32>
    %182 = arith.addf %180, %181 : vector<4x16xf32>
    %183 = vector.extract_strided_slice %179 {offsets = [0, 32], sizes = [4, 16], strides = [1, 1]} : vector<4x256xf32> to vector<4x16xf32>
    %184 = arith.addf %182, %183 : vector<4x16xf32>
    %185 = vector.extract_strided_slice %179 {offsets = [0, 48], sizes = [4, 16], strides = [1, 1]} : vector<4x256xf32> to vector<4x16xf32>
    %186 = arith.addf %184, %185 : vector<4x16xf32>
    %187 = vector.extract_strided_slice %179 {offsets = [0, 64], sizes = [4, 16], strides = [1, 1]} : vector<4x256xf32> to vector<4x16xf32>
    %188 = arith.addf %186, %187 : vector<4x16xf32>
    %189 = vector.extract_strided_slice %179 {offsets = [0, 80], sizes = [4, 16], strides = [1, 1]} : vector<4x256xf32> to vector<4x16xf32>
    %190 = arith.addf %188, %189 : vector<4x16xf32>
    %191 = vector.extract_strided_slice %179 {offsets = [0, 96], sizes = [4, 16], strides = [1, 1]} : vector<4x256xf32> to vector<4x16xf32>
    %192 = arith.addf %190, %191 : vector<4x16xf32>
    %193 = vector.extract_strided_slice %179 {offsets = [0, 112], sizes = [4, 16], strides = [1, 1]} : vector<4x256xf32> to vector<4x16xf32>
    %194 = arith.addf %192, %193 : vector<4x16xf32>
    %195 = vector.extract_strided_slice %179 {offsets = [0, 128], sizes = [4, 16], strides = [1, 1]} : vector<4x256xf32> to vector<4x16xf32>
    %196 = arith.addf %194, %195 : vector<4x16xf32>
    %197 = vector.extract_strided_slice %179 {offsets = [0, 144], sizes = [4, 16], strides = [1, 1]} : vector<4x256xf32> to vector<4x16xf32>
    %198 = arith.addf %196, %197 : vector<4x16xf32>
    %199 = vector.extract_strided_slice %179 {offsets = [0, 160], sizes = [4, 16], strides = [1, 1]} : vector<4x256xf32> to vector<4x16xf32>
    %200 = arith.addf %198, %199 : vector<4x16xf32>
    %201 = vector.extract_strided_slice %179 {offsets = [0, 176], sizes = [4, 16], strides = [1, 1]} : vector<4x256xf32> to vector<4x16xf32>
    %202 = arith.addf %200, %201 : vector<4x16xf32>
    %203 = vector.extract_strided_slice %179 {offsets = [0, 192], sizes = [4, 16], strides = [1, 1]} : vector<4x256xf32> to vector<4x16xf32>
    %204 = arith.addf %202, %203 : vector<4x16xf32>
    %205 = vector.extract_strided_slice %179 {offsets = [0, 208], sizes = [4, 16], strides = [1, 1]} : vector<4x256xf32> to vector<4x16xf32>
    %206 = arith.addf %204, %205 : vector<4x16xf32>
    %207 = vector.extract_strided_slice %179 {offsets = [0, 224], sizes = [4, 16], strides = [1, 1]} : vector<4x256xf32> to vector<4x16xf32>
    %208 = arith.addf %206, %207 : vector<4x16xf32>
    %209 = vector.extract_strided_slice %179 {offsets = [0, 240], sizes = [4, 16], strides = [1, 1]} : vector<4x256xf32> to vector<4x16xf32>
    %210 = arith.addf %208, %209 : vector<4x16xf32>
    %cst_55 = arith.constant 6.250000e-02 : f32
    %211 = vector.broadcast %cst_55 : f32 to vector<4x16xf32>
    %212 = arith.mulf %210, %211 : vector<4x16xf32>
    %cst_56 = arith.constant 0.000000e+00 : f32
    %213 = vector.broadcast %cst_56 : f32 to vector<4x1xf32>
    %214 = tpu.concatenate %213, %212, %213 in 1 : vector<4x1xf32>, vector<4x16xf32>, vector<4x1xf32> -> vector<4x18xf32>
    %215 = vector.extract_strided_slice %214 {offsets = [0, 0], sizes = [4, 16], strides = [1, 1]} : vector<4x18xf32> to vector<4x16xf32>
    %216 = vector.extract_strided_slice %214 {offsets = [0, 1], sizes = [4, 16], strides = [1, 1]} : vector<4x18xf32> to vector<4x16xf32>
    %217 = vector.extract_strided_slice %214 {offsets = [0, 2], sizes = [4, 16], strides = [1, 1]} : vector<4x18xf32> to vector<4x16xf32>
    %218 = tpu.concatenate %215, %216, %217 in 0 : vector<4x16xf32>, vector<4x16xf32>, vector<4x16xf32> -> vector<12x16xf32>
    %cst_57 = arith.constant dense<0.000000e+00> : vector<4x16xf32>
    %219 = tpu.matmul %1, %218, %cst_57 {dimension_numbers = #tpu.dot_dimension_numbers<[1], [0], [0], [1], [0, 0, 1, 1], [], []>} : vector<4x12xf32>, vector<12x16xf32>, vector<4x16xf32> -> vector<4x16xf32>
    %cst_58 = arith.constant 1.000000e+00 : f32
    %cst_59 = arith.constant 0.000000e+00 : f32
    %220 = vector.broadcast %cst_58 : f32 to vector<16x256xf32>
    %221 = vector.broadcast %cst_59 : f32 to vector<16x256xf32>
    %222 = arith.select %87, %220, %221 : vector<16x256xi1>, vector<16x256xf32>
    %cst_60 = arith.constant dense<0.000000e+00> : vector<4x256xf32>
    %223 = tpu.matmul %219, %222, %cst_60 {dimension_numbers = #tpu.dot_dimension_numbers<[1], [0], [0], [1], [0, 0, 1, 1], [], []>} : vector<4x16xf32>, vector<16x256xf32>, vector<4x256xf32> -> vector<4x256xf32>
    %224 = vector.extract_strided_slice %179 {offsets = [0, 0], sizes = [4, 16], strides = [1, 1]} : vector<4x256xf32> to vector<4x16xf32>
    %225 = vector.extract_strided_slice %179 {offsets = [0, 16], sizes = [4, 16], strides = [1, 1]} : vector<4x256xf32> to vector<4x16xf32>
    %226 = arith.addf %224, %225 : vector<4x16xf32>
    %227 = vector.extract_strided_slice %179 {offsets = [0, 32], sizes = [4, 16], strides = [1, 1]} : vector<4x256xf32> to vector<4x16xf32>
    %228 = arith.addf %226, %227 : vector<4x16xf32>
    %229 = vector.extract_strided_slice %179 {offsets = [0, 48], sizes = [4, 16], strides = [1, 1]} : vector<4x256xf32> to vector<4x16xf32>
    %230 = arith.addf %228, %229 : vector<4x16xf32>
    %231 = vector.extract_strided_slice %179 {offsets = [0, 64], sizes = [4, 16], strides = [1, 1]} : vector<4x256xf32> to vector<4x16xf32>
    %232 = arith.addf %230, %231 : vector<4x16xf32>
    %233 = vector.extract_strided_slice %179 {offsets = [0, 80], sizes = [4, 16], strides = [1, 1]} : vector<4x256xf32> to vector<4x16xf32>
    %234 = arith.addf %232, %233 : vector<4x16xf32>
    %cst_61 = arith.constant 0.166666672 : f32
    %235 = vector.broadcast %cst_61 : f32 to vector<4x16xf32>
    %236 = arith.mulf %234, %235 : vector<4x16xf32>
    %237 = vector.extract_strided_slice %179 {offsets = [0, 80], sizes = [4, 16], strides = [1, 1]} : vector<4x256xf32> to vector<4x16xf32>
    %238 = vector.extract_strided_slice %179 {offsets = [0, 96], sizes = [4, 16], strides = [1, 1]} : vector<4x256xf32> to vector<4x16xf32>
    %239 = arith.addf %237, %238 : vector<4x16xf32>
    %240 = vector.extract_strided_slice %179 {offsets = [0, 112], sizes = [4, 16], strides = [1, 1]} : vector<4x256xf32> to vector<4x16xf32>
    %241 = arith.addf %239, %240 : vector<4x16xf32>
    %242 = vector.extract_strided_slice %179 {offsets = [0, 128], sizes = [4, 16], strides = [1, 1]} : vector<4x256xf32> to vector<4x16xf32>
    %243 = arith.addf %241, %242 : vector<4x16xf32>
    %244 = vector.extract_strided_slice %179 {offsets = [0, 144], sizes = [4, 16], strides = [1, 1]} : vector<4x256xf32> to vector<4x16xf32>
    %245 = arith.addf %243, %244 : vector<4x16xf32>
    %246 = vector.extract_strided_slice %179 {offsets = [0, 160], sizes = [4, 16], strides = [1, 1]} : vector<4x256xf32> to vector<4x16xf32>
    %247 = arith.addf %245, %246 : vector<4x16xf32>
    %cst_62 = arith.constant 0.166666672 : f32
    %248 = vector.broadcast %cst_62 : f32 to vector<4x16xf32>
    %249 = arith.mulf %247, %248 : vector<4x16xf32>
    %250 = vector.extract_strided_slice %179 {offsets = [0, 160], sizes = [4, 16], strides = [1, 1]} : vector<4x256xf32> to vector<4x16xf32>
    %251 = vector.extract_strided_slice %179 {offsets = [0, 176], sizes = [4, 16], strides = [1, 1]} : vector<4x256xf32> to vector<4x16xf32>
    %252 = arith.addf %250, %251 : vector<4x16xf32>
    %253 = vector.extract_strided_slice %179 {offsets = [0, 192], sizes = [4, 16], strides = [1, 1]} : vector<4x256xf32> to vector<4x16xf32>
    %254 = arith.addf %252, %253 : vector<4x16xf32>
    %255 = vector.extract_strided_slice %179 {offsets = [0, 208], sizes = [4, 16], strides = [1, 1]} : vector<4x256xf32> to vector<4x16xf32>
    %256 = arith.addf %254, %255 : vector<4x16xf32>
    %257 = vector.extract_strided_slice %179 {offsets = [0, 224], sizes = [4, 16], strides = [1, 1]} : vector<4x256xf32> to vector<4x16xf32>
    %258 = arith.addf %256, %257 : vector<4x16xf32>
    %259 = vector.extract_strided_slice %179 {offsets = [0, 240], sizes = [4, 16], strides = [1, 1]} : vector<4x256xf32> to vector<4x16xf32>
    %260 = arith.addf %258, %259 : vector<4x16xf32>
    %cst_63 = arith.constant 0.166666672 : f32
    %261 = vector.broadcast %cst_63 : f32 to vector<4x16xf32>
    %262 = arith.mulf %260, %261 : vector<4x16xf32>
    %cst_64 = arith.constant 0.000000e+00 : f32
    %263 = vector.broadcast %cst_64 : f32 to vector<4x1xf32>
    %264 = tpu.concatenate %263, %236, %263 in 1 : vector<4x1xf32>, vector<4x16xf32>, vector<4x1xf32> -> vector<4x18xf32>
    %265 = tpu.concatenate %263, %249, %263 in 1 : vector<4x1xf32>, vector<4x16xf32>, vector<4x1xf32> -> vector<4x18xf32>
    %266 = tpu.concatenate %263, %262, %263 in 1 : vector<4x1xf32>, vector<4x16xf32>, vector<4x1xf32> -> vector<4x18xf32>
    %267 = vector.extract_strided_slice %264 {offsets = [0, 0], sizes = [4, 16], strides = [1, 1]} : vector<4x18xf32> to vector<4x16xf32>
    %268 = vector.extract_strided_slice %264 {offsets = [0, 1], sizes = [4, 16], strides = [1, 1]} : vector<4x18xf32> to vector<4x16xf32>
    %269 = vector.extract_strided_slice %264 {offsets = [0, 2], sizes = [4, 16], strides = [1, 1]} : vector<4x18xf32> to vector<4x16xf32>
    %270 = vector.extract_strided_slice %265 {offsets = [0, 0], sizes = [4, 16], strides = [1, 1]} : vector<4x18xf32> to vector<4x16xf32>
    %271 = vector.extract_strided_slice %265 {offsets = [0, 1], sizes = [4, 16], strides = [1, 1]} : vector<4x18xf32> to vector<4x16xf32>
    %272 = vector.extract_strided_slice %265 {offsets = [0, 2], sizes = [4, 16], strides = [1, 1]} : vector<4x18xf32> to vector<4x16xf32>
    %273 = vector.extract_strided_slice %266 {offsets = [0, 0], sizes = [4, 16], strides = [1, 1]} : vector<4x18xf32> to vector<4x16xf32>
    %274 = vector.extract_strided_slice %266 {offsets = [0, 1], sizes = [4, 16], strides = [1, 1]} : vector<4x18xf32> to vector<4x16xf32>
    %275 = vector.extract_strided_slice %266 {offsets = [0, 2], sizes = [4, 16], strides = [1, 1]} : vector<4x18xf32> to vector<4x16xf32>
    %276 = tpu.concatenate %267, %268, %269, %270, %271, %272, %273, %274, %275 in 0 : vector<4x16xf32>, vector<4x16xf32>, vector<4x16xf32>, vector<4x16xf32>, vector<4x16xf32>, vector<4x16xf32>, vector<4x16xf32>, vector<4x16xf32>, vector<4x16xf32> -> vector<36x16xf32>
    %cst_65 = arith.constant dense<0.000000e+00> : vector<4x16xf32>
    %277 = tpu.matmul %3, %276, %cst_65 {dimension_numbers = #tpu.dot_dimension_numbers<[1], [0], [0], [1], [0, 0, 1, 1], [], []>} : vector<4x36xf32>, vector<36x16xf32>, vector<4x16xf32> -> vector<4x16xf32>
    %cst_66 = arith.constant 1.000000e+00 : f32
    %cst_67 = arith.constant 0.000000e+00 : f32
    %278 = vector.broadcast %cst_66 : f32 to vector<16x256xf32>
    %279 = vector.broadcast %cst_67 : f32 to vector<16x256xf32>
    %280 = arith.select %87, %278, %279 : vector<16x256xi1>, vector<16x256xf32>
    %cst_68 = arith.constant dense<0.000000e+00> : vector<4x256xf32>
    %281 = tpu.matmul %277, %280, %cst_68 {dimension_numbers = #tpu.dot_dimension_numbers<[1], [0], [0], [1], [0, 0, 1, 1], [], []>} : vector<4x16xf32>, vector<16x256xf32>, vector<4x256xf32> -> vector<4x256xf32>
    %282 = vector.extract_strided_slice %179 {offsets = [0, 0], sizes = [4, 16], strides = [1, 1]} : vector<4x256xf32> to vector<4x16xf32>
    %283 = vector.extract_strided_slice %179 {offsets = [0, 16], sizes = [4, 16], strides = [1, 1]} : vector<4x256xf32> to vector<4x16xf32>
    %284 = arith.addf %282, %283 : vector<4x16xf32>
    %285 = vector.extract_strided_slice %179 {offsets = [0, 32], sizes = [4, 16], strides = [1, 1]} : vector<4x256xf32> to vector<4x16xf32>
    %286 = arith.addf %284, %285 : vector<4x16xf32>
    %287 = vector.extract_strided_slice %179 {offsets = [0, 48], sizes = [4, 16], strides = [1, 1]} : vector<4x256xf32> to vector<4x16xf32>
    %288 = arith.addf %286, %287 : vector<4x16xf32>
    %cst_69 = arith.constant 2.500000e-01 : f32
    %289 = vector.broadcast %cst_69 : f32 to vector<4x16xf32>
    %290 = arith.mulf %288, %289 : vector<4x16xf32>
    %291 = vector.extract_strided_slice %179 {offsets = [0, 48], sizes = [4, 16], strides = [1, 1]} : vector<4x256xf32> to vector<4x16xf32>
    %292 = vector.extract_strided_slice %179 {offsets = [0, 64], sizes = [4, 16], strides = [1, 1]} : vector<4x256xf32> to vector<4x16xf32>
    %293 = arith.addf %291, %292 : vector<4x16xf32>
    %294 = vector.extract_strided_slice %179 {offsets = [0, 80], sizes = [4, 16], strides = [1, 1]} : vector<4x256xf32> to vector<4x16xf32>
    %295 = arith.addf %293, %294 : vector<4x16xf32>
    %296 = vector.extract_strided_slice %179 {offsets = [0, 96], sizes = [4, 16], strides = [1, 1]} : vector<4x256xf32> to vector<4x16xf32>
    %297 = arith.addf %295, %296 : vector<4x16xf32>
    %cst_70 = arith.constant 2.500000e-01 : f32
    %298 = vector.broadcast %cst_70 : f32 to vector<4x16xf32>
    %299 = arith.mulf %297, %298 : vector<4x16xf32>
    %300 = vector.extract_strided_slice %179 {offsets = [0, 96], sizes = [4, 16], strides = [1, 1]} : vector<4x256xf32> to vector<4x16xf32>
    %301 = vector.extract_strided_slice %179 {offsets = [0, 112], sizes = [4, 16], strides = [1, 1]} : vector<4x256xf32> to vector<4x16xf32>
    %302 = arith.addf %300, %301 : vector<4x16xf32>
    %303 = vector.extract_strided_slice %179 {offsets = [0, 128], sizes = [4, 16], strides = [1, 1]} : vector<4x256xf32> to vector<4x16xf32>
    %304 = arith.addf %302, %303 : vector<4x16xf32>
    %305 = vector.extract_strided_slice %179 {offsets = [0, 144], sizes = [4, 16], strides = [1, 1]} : vector<4x256xf32> to vector<4x16xf32>
    %306 = arith.addf %304, %305 : vector<4x16xf32>
    %cst_71 = arith.constant 2.500000e-01 : f32
    %307 = vector.broadcast %cst_71 : f32 to vector<4x16xf32>
    %308 = arith.mulf %306, %307 : vector<4x16xf32>
    %309 = vector.extract_strided_slice %179 {offsets = [0, 144], sizes = [4, 16], strides = [1, 1]} : vector<4x256xf32> to vector<4x16xf32>
    %310 = vector.extract_strided_slice %179 {offsets = [0, 160], sizes = [4, 16], strides = [1, 1]} : vector<4x256xf32> to vector<4x16xf32>
    %311 = arith.addf %309, %310 : vector<4x16xf32>
    %312 = vector.extract_strided_slice %179 {offsets = [0, 176], sizes = [4, 16], strides = [1, 1]} : vector<4x256xf32> to vector<4x16xf32>
    %313 = arith.addf %311, %312 : vector<4x16xf32>
    %314 = vector.extract_strided_slice %179 {offsets = [0, 192], sizes = [4, 16], strides = [1, 1]} : vector<4x256xf32> to vector<4x16xf32>
    %315 = arith.addf %313, %314 : vector<4x16xf32>
    %cst_72 = arith.constant 2.500000e-01 : f32
    %316 = vector.broadcast %cst_72 : f32 to vector<4x16xf32>
    %317 = arith.mulf %315, %316 : vector<4x16xf32>
    %318 = vector.extract_strided_slice %179 {offsets = [0, 192], sizes = [4, 16], strides = [1, 1]} : vector<4x256xf32> to vector<4x16xf32>
    %319 = vector.extract_strided_slice %179 {offsets = [0, 208], sizes = [4, 16], strides = [1, 1]} : vector<4x256xf32> to vector<4x16xf32>
    %320 = arith.addf %318, %319 : vector<4x16xf32>
    %321 = vector.extract_strided_slice %179 {offsets = [0, 224], sizes = [4, 16], strides = [1, 1]} : vector<4x256xf32> to vector<4x16xf32>
    %322 = arith.addf %320, %321 : vector<4x16xf32>
    %323 = vector.extract_strided_slice %179 {offsets = [0, 240], sizes = [4, 16], strides = [1, 1]} : vector<4x256xf32> to vector<4x16xf32>
    %324 = arith.addf %322, %323 : vector<4x16xf32>
    %cst_73 = arith.constant 2.500000e-01 : f32
    %325 = vector.broadcast %cst_73 : f32 to vector<4x16xf32>
    %326 = arith.mulf %324, %325 : vector<4x16xf32>
    %cst_74 = arith.constant 0.000000e+00 : f32
    %327 = vector.broadcast %cst_74 : f32 to vector<4x1xf32>
    %328 = tpu.concatenate %327, %290, %327 in 1 : vector<4x1xf32>, vector<4x16xf32>, vector<4x1xf32> -> vector<4x18xf32>
    %329 = tpu.concatenate %327, %299, %327 in 1 : vector<4x1xf32>, vector<4x16xf32>, vector<4x1xf32> -> vector<4x18xf32>
    %330 = tpu.concatenate %327, %308, %327 in 1 : vector<4x1xf32>, vector<4x16xf32>, vector<4x1xf32> -> vector<4x18xf32>
    %331 = tpu.concatenate %327, %317, %327 in 1 : vector<4x1xf32>, vector<4x16xf32>, vector<4x1xf32> -> vector<4x18xf32>
    %332 = tpu.concatenate %327, %326, %327 in 1 : vector<4x1xf32>, vector<4x16xf32>, vector<4x1xf32> -> vector<4x18xf32>
    %333 = vector.extract_strided_slice %328 {offsets = [0, 0], sizes = [4, 16], strides = [1, 1]} : vector<4x18xf32> to vector<4x16xf32>
    %334 = vector.extract_strided_slice %328 {offsets = [0, 1], sizes = [4, 16], strides = [1, 1]} : vector<4x18xf32> to vector<4x16xf32>
    %335 = vector.extract_strided_slice %328 {offsets = [0, 2], sizes = [4, 16], strides = [1, 1]} : vector<4x18xf32> to vector<4x16xf32>
    %336 = vector.extract_strided_slice %329 {offsets = [0, 0], sizes = [4, 16], strides = [1, 1]} : vector<4x18xf32> to vector<4x16xf32>
    %337 = vector.extract_strided_slice %329 {offsets = [0, 1], sizes = [4, 16], strides = [1, 1]} : vector<4x18xf32> to vector<4x16xf32>
    %338 = vector.extract_strided_slice %329 {offsets = [0, 2], sizes = [4, 16], strides = [1, 1]} : vector<4x18xf32> to vector<4x16xf32>
    %339 = vector.extract_strided_slice %330 {offsets = [0, 0], sizes = [4, 16], strides = [1, 1]} : vector<4x18xf32> to vector<4x16xf32>
    %340 = vector.extract_strided_slice %330 {offsets = [0, 1], sizes = [4, 16], strides = [1, 1]} : vector<4x18xf32> to vector<4x16xf32>
    %341 = vector.extract_strided_slice %330 {offsets = [0, 2], sizes = [4, 16], strides = [1, 1]} : vector<4x18xf32> to vector<4x16xf32>
    %342 = tpu.concatenate %333, %334, %335, %336, %337, %338, %339, %340, %341 in 0 : vector<4x16xf32>, vector<4x16xf32>, vector<4x16xf32>, vector<4x16xf32>, vector<4x16xf32>, vector<4x16xf32>, vector<4x16xf32>, vector<4x16xf32>, vector<4x16xf32> -> vector<36x16xf32>
    %cst_75 = arith.constant dense<0.000000e+00> : vector<4x16xf32>
    %343 = tpu.matmul %5, %342, %cst_75 {dimension_numbers = #tpu.dot_dimension_numbers<[1], [0], [0], [1], [0, 0, 1, 1], [], []>} : vector<4x36xf32>, vector<36x16xf32>, vector<4x16xf32> -> vector<4x16xf32>
    %344 = vector.extract_strided_slice %329 {offsets = [0, 0], sizes = [4, 16], strides = [1, 1]} : vector<4x18xf32> to vector<4x16xf32>
    %345 = vector.extract_strided_slice %329 {offsets = [0, 1], sizes = [4, 16], strides = [1, 1]} : vector<4x18xf32> to vector<4x16xf32>
    %346 = vector.extract_strided_slice %329 {offsets = [0, 2], sizes = [4, 16], strides = [1, 1]} : vector<4x18xf32> to vector<4x16xf32>
    %347 = vector.extract_strided_slice %330 {offsets = [0, 0], sizes = [4, 16], strides = [1, 1]} : vector<4x18xf32> to vector<4x16xf32>
    %348 = vector.extract_strided_slice %330 {offsets = [0, 1], sizes = [4, 16], strides = [1, 1]} : vector<4x18xf32> to vector<4x16xf32>
    %349 = vector.extract_strided_slice %330 {offsets = [0, 2], sizes = [4, 16], strides = [1, 1]} : vector<4x18xf32> to vector<4x16xf32>
    %350 = vector.extract_strided_slice %331 {offsets = [0, 0], sizes = [4, 16], strides = [1, 1]} : vector<4x18xf32> to vector<4x16xf32>
    %351 = vector.extract_strided_slice %331 {offsets = [0, 1], sizes = [4, 16], strides = [1, 1]} : vector<4x18xf32> to vector<4x16xf32>
    %352 = vector.extract_strided_slice %331 {offsets = [0, 2], sizes = [4, 16], strides = [1, 1]} : vector<4x18xf32> to vector<4x16xf32>
    %353 = tpu.concatenate %344, %345, %346, %347, %348, %349, %350, %351, %352 in 0 : vector<4x16xf32>, vector<4x16xf32>, vector<4x16xf32>, vector<4x16xf32>, vector<4x16xf32>, vector<4x16xf32>, vector<4x16xf32>, vector<4x16xf32>, vector<4x16xf32> -> vector<36x16xf32>
    %cst_76 = arith.constant dense<0.000000e+00> : vector<4x16xf32>
    %354 = tpu.matmul %5, %353, %cst_76 {dimension_numbers = #tpu.dot_dimension_numbers<[1], [0], [0], [1], [0, 0, 1, 1], [], []>} : vector<4x36xf32>, vector<36x16xf32>, vector<4x16xf32> -> vector<4x16xf32>
    %355 = vector.extract_strided_slice %330 {offsets = [0, 0], sizes = [4, 16], strides = [1, 1]} : vector<4x18xf32> to vector<4x16xf32>
    %356 = vector.extract_strided_slice %330 {offsets = [0, 1], sizes = [4, 16], strides = [1, 1]} : vector<4x18xf32> to vector<4x16xf32>
    %357 = vector.extract_strided_slice %330 {offsets = [0, 2], sizes = [4, 16], strides = [1, 1]} : vector<4x18xf32> to vector<4x16xf32>
    %358 = vector.extract_strided_slice %331 {offsets = [0, 0], sizes = [4, 16], strides = [1, 1]} : vector<4x18xf32> to vector<4x16xf32>
    %359 = vector.extract_strided_slice %331 {offsets = [0, 1], sizes = [4, 16], strides = [1, 1]} : vector<4x18xf32> to vector<4x16xf32>
    %360 = vector.extract_strided_slice %331 {offsets = [0, 2], sizes = [4, 16], strides = [1, 1]} : vector<4x18xf32> to vector<4x16xf32>
    %361 = vector.extract_strided_slice %332 {offsets = [0, 0], sizes = [4, 16], strides = [1, 1]} : vector<4x18xf32> to vector<4x16xf32>
    %362 = vector.extract_strided_slice %332 {offsets = [0, 1], sizes = [4, 16], strides = [1, 1]} : vector<4x18xf32> to vector<4x16xf32>
    %363 = vector.extract_strided_slice %332 {offsets = [0, 2], sizes = [4, 16], strides = [1, 1]} : vector<4x18xf32> to vector<4x16xf32>
    %364 = tpu.concatenate %355, %356, %357, %358, %359, %360, %361, %362, %363 in 0 : vector<4x16xf32>, vector<4x16xf32>, vector<4x16xf32>, vector<4x16xf32>, vector<4x16xf32>, vector<4x16xf32>, vector<4x16xf32>, vector<4x16xf32>, vector<4x16xf32> -> vector<36x16xf32>
    %cst_77 = arith.constant dense<0.000000e+00> : vector<4x16xf32>
    %365 = tpu.matmul %5, %364, %cst_77 {dimension_numbers = #tpu.dot_dimension_numbers<[1], [0], [0], [1], [0, 0, 1, 1], [], []>} : vector<4x36xf32>, vector<36x16xf32>, vector<4x16xf32> -> vector<4x16xf32>
    %cst_78 = arith.constant 0.13333334 : f32
    %366 = vector.broadcast %cst_78 : f32 to vector<1x256xf32>
    %367 = arith.mulf %83, %366 : vector<1x256xf32>
    %cst_79 = arith.constant 0.000000e+00 : f32
    %368 = vector.broadcast %cst_79 : f32 to vector<1x256xf32>
    %369 = arith.subf %367, %368 : vector<1x256xf32>
    %370 = math.absf %369 : vector<1x256xf32>
    %cst_80 = arith.constant 1.000000e+00 : f32
    %371 = vector.broadcast %cst_80 : f32 to vector<1x256xf32>
    %372 = arith.subf %371, %370 : vector<1x256xf32>
    %cst_81 = arith.constant 0.000000e+00 : f32
    %373 = vector.broadcast %cst_81 : f32 to vector<1x256xf32>
    %374 = arith.maximumf %372, %373 : vector<1x256xf32>
    %cst_82 = arith.constant 0.000000e+00 : f32
    %375 = vector.shape_cast %374 : vector<1x256xf32> to vector<1x256xf32>
    %376 = vector.broadcast %375 : vector<1x256xf32> to vector<16x256xf32>
    %377 = vector.broadcast %cst_82 : f32 to vector<16x256xf32>
    %378 = arith.select %87, %376, %377 : vector<16x256xi1>, vector<16x256xf32>
    %cst_83 = arith.constant dense<0.000000e+00> : vector<4x256xf32>
    %379 = tpu.matmul %343, %378, %cst_83 {dimension_numbers = #tpu.dot_dimension_numbers<[1], [0], [0], [1], [0, 0, 1, 1], [], []>} : vector<4x16xf32>, vector<16x256xf32>, vector<4x256xf32> -> vector<4x256xf32>
    %cst_84 = arith.constant 0.13333334 : f32
    %380 = vector.broadcast %cst_84 : f32 to vector<1x256xf32>
    %381 = arith.mulf %83, %380 : vector<1x256xf32>
    %cst_85 = arith.constant 1.000000e+00 : f32
    %382 = vector.broadcast %cst_85 : f32 to vector<1x256xf32>
    %383 = arith.subf %381, %382 : vector<1x256xf32>
    %384 = math.absf %383 : vector<1x256xf32>
    %cst_86 = arith.constant 1.000000e+00 : f32
    %385 = vector.broadcast %cst_86 : f32 to vector<1x256xf32>
    %386 = arith.subf %385, %384 : vector<1x256xf32>
    %cst_87 = arith.constant 0.000000e+00 : f32
    %387 = vector.broadcast %cst_87 : f32 to vector<1x256xf32>
    %388 = arith.maximumf %386, %387 : vector<1x256xf32>
    %cst_88 = arith.constant 0.000000e+00 : f32
    %389 = vector.shape_cast %388 : vector<1x256xf32> to vector<1x256xf32>
    %390 = vector.broadcast %389 : vector<1x256xf32> to vector<16x256xf32>
    %391 = vector.broadcast %cst_88 : f32 to vector<16x256xf32>
    %392 = arith.select %87, %390, %391 : vector<16x256xi1>, vector<16x256xf32>
    %cst_89 = arith.constant dense<0.000000e+00> : vector<4x256xf32>
    %393 = tpu.matmul %354, %392, %cst_89 {dimension_numbers = #tpu.dot_dimension_numbers<[1], [0], [0], [1], [0, 0, 1, 1], [], []>} : vector<4x16xf32>, vector<16x256xf32>, vector<4x256xf32> -> vector<4x256xf32>
    %394 = arith.addf %379, %393 : vector<4x256xf32>
    %cst_90 = arith.constant 0.13333334 : f32
    %395 = vector.broadcast %cst_90 : f32 to vector<1x256xf32>
    %396 = arith.mulf %83, %395 : vector<1x256xf32>
    %cst_91 = arith.constant 2.000000e+00 : f32
    %397 = vector.broadcast %cst_91 : f32 to vector<1x256xf32>
    %398 = arith.subf %396, %397 : vector<1x256xf32>
    %399 = math.absf %398 : vector<1x256xf32>
    %cst_92 = arith.constant 1.000000e+00 : f32
    %400 = vector.broadcast %cst_92 : f32 to vector<1x256xf32>
    %401 = arith.subf %400, %399 : vector<1x256xf32>
    %cst_93 = arith.constant 0.000000e+00 : f32
    %402 = vector.broadcast %cst_93 : f32 to vector<1x256xf32>
    %403 = arith.maximumf %401, %402 : vector<1x256xf32>
    %cst_94 = arith.constant 0.000000e+00 : f32
    %404 = vector.shape_cast %403 : vector<1x256xf32> to vector<1x256xf32>
    %405 = vector.broadcast %404 : vector<1x256xf32> to vector<16x256xf32>
    %406 = vector.broadcast %cst_94 : f32 to vector<16x256xf32>
    %407 = arith.select %87, %405, %406 : vector<16x256xi1>, vector<16x256xf32>
    %cst_95 = arith.constant dense<0.000000e+00> : vector<4x256xf32>
    %408 = tpu.matmul %365, %407, %cst_95 {dimension_numbers = #tpu.dot_dimension_numbers<[1], [0], [0], [1], [0, 0, 1, 1], [], []>} : vector<4x16xf32>, vector<16x256xf32>, vector<4x256xf32> -> vector<4x256xf32>
    %409 = arith.addf %394, %408 : vector<4x256xf32>
    %410 = vector.extract_strided_slice %179 {offsets = [0, 0], sizes = [4, 16], strides = [1, 1]} : vector<4x256xf32> to vector<4x16xf32>
    %411 = vector.extract_strided_slice %179 {offsets = [0, 16], sizes = [4, 16], strides = [1, 1]} : vector<4x256xf32> to vector<4x16xf32>
    %412 = arith.addf %410, %411 : vector<4x16xf32>
    %413 = vector.extract_strided_slice %179 {offsets = [0, 32], sizes = [4, 16], strides = [1, 1]} : vector<4x256xf32> to vector<4x16xf32>
    %414 = arith.addf %412, %413 : vector<4x16xf32>
    %cst_96 = arith.constant 0.333333343 : f32
    %415 = vector.broadcast %cst_96 : f32 to vector<4x16xf32>
    %416 = arith.mulf %414, %415 : vector<4x16xf32>
    %417 = vector.extract_strided_slice %179 {offsets = [0, 32], sizes = [4, 16], strides = [1, 1]} : vector<4x256xf32> to vector<4x16xf32>
    %418 = vector.extract_strided_slice %179 {offsets = [0, 48], sizes = [4, 16], strides = [1, 1]} : vector<4x256xf32> to vector<4x16xf32>
    %419 = arith.addf %417, %418 : vector<4x16xf32>
    %420 = vector.extract_strided_slice %179 {offsets = [0, 64], sizes = [4, 16], strides = [1, 1]} : vector<4x256xf32> to vector<4x16xf32>
    %421 = arith.addf %419, %420 : vector<4x16xf32>
    %cst_97 = arith.constant 0.333333343 : f32
    %422 = vector.broadcast %cst_97 : f32 to vector<4x16xf32>
    %423 = arith.mulf %421, %422 : vector<4x16xf32>
    %424 = vector.extract_strided_slice %179 {offsets = [0, 64], sizes = [4, 16], strides = [1, 1]} : vector<4x256xf32> to vector<4x16xf32>
    %425 = vector.extract_strided_slice %179 {offsets = [0, 80], sizes = [4, 16], strides = [1, 1]} : vector<4x256xf32> to vector<4x16xf32>
    %426 = arith.addf %424, %425 : vector<4x16xf32>
    %427 = vector.extract_strided_slice %179 {offsets = [0, 96], sizes = [4, 16], strides = [1, 1]} : vector<4x256xf32> to vector<4x16xf32>
    %428 = arith.addf %426, %427 : vector<4x16xf32>
    %cst_98 = arith.constant 0.333333343 : f32
    %429 = vector.broadcast %cst_98 : f32 to vector<4x16xf32>
    %430 = arith.mulf %428, %429 : vector<4x16xf32>
    %431 = vector.extract_strided_slice %179 {offsets = [0, 96], sizes = [4, 16], strides = [1, 1]} : vector<4x256xf32> to vector<4x16xf32>
    %432 = vector.extract_strided_slice %179 {offsets = [0, 112], sizes = [4, 16], strides = [1, 1]} : vector<4x256xf32> to vector<4x16xf32>
    %433 = arith.addf %431, %432 : vector<4x16xf32>
    %434 = vector.extract_strided_slice %179 {offsets = [0, 128], sizes = [4, 16], strides = [1, 1]} : vector<4x256xf32> to vector<4x16xf32>
    %435 = arith.addf %433, %434 : vector<4x16xf32>
    %436 = vector.extract_strided_slice %179 {offsets = [0, 144], sizes = [4, 16], strides = [1, 1]} : vector<4x256xf32> to vector<4x16xf32>
    %437 = arith.addf %435, %436 : vector<4x16xf32>
    %cst_99 = arith.constant 2.500000e-01 : f32
    %438 = vector.broadcast %cst_99 : f32 to vector<4x16xf32>
    %439 = arith.mulf %437, %438 : vector<4x16xf32>
    %440 = vector.extract_strided_slice %179 {offsets = [0, 144], sizes = [4, 16], strides = [1, 1]} : vector<4x256xf32> to vector<4x16xf32>
    %441 = vector.extract_strided_slice %179 {offsets = [0, 160], sizes = [4, 16], strides = [1, 1]} : vector<4x256xf32> to vector<4x16xf32>
    %442 = arith.addf %440, %441 : vector<4x16xf32>
    %443 = vector.extract_strided_slice %179 {offsets = [0, 176], sizes = [4, 16], strides = [1, 1]} : vector<4x256xf32> to vector<4x16xf32>
    %444 = arith.addf %442, %443 : vector<4x16xf32>
    %cst_100 = arith.constant 0.333333343 : f32
    %445 = vector.broadcast %cst_100 : f32 to vector<4x16xf32>
    %446 = arith.mulf %444, %445 : vector<4x16xf32>
    %447 = vector.extract_strided_slice %179 {offsets = [0, 176], sizes = [4, 16], strides = [1, 1]} : vector<4x256xf32> to vector<4x16xf32>
    %448 = vector.extract_strided_slice %179 {offsets = [0, 192], sizes = [4, 16], strides = [1, 1]} : vector<4x256xf32> to vector<4x16xf32>
    %449 = arith.addf %447, %448 : vector<4x16xf32>
    %450 = vector.extract_strided_slice %179 {offsets = [0, 208], sizes = [4, 16], strides = [1, 1]} : vector<4x256xf32> to vector<4x16xf32>
    %451 = arith.addf %449, %450 : vector<4x16xf32>
    %cst_101 = arith.constant 0.333333343 : f32
    %452 = vector.broadcast %cst_101 : f32 to vector<4x16xf32>
    %453 = arith.mulf %451, %452 : vector<4x16xf32>
    %454 = vector.extract_strided_slice %179 {offsets = [0, 208], sizes = [4, 16], strides = [1, 1]} : vector<4x256xf32> to vector<4x16xf32>
    %455 = vector.extract_strided_slice %179 {offsets = [0, 224], sizes = [4, 16], strides = [1, 1]} : vector<4x256xf32> to vector<4x16xf32>
    %456 = arith.addf %454, %455 : vector<4x16xf32>
    %457 = vector.extract_strided_slice %179 {offsets = [0, 240], sizes = [4, 16], strides = [1, 1]} : vector<4x256xf32> to vector<4x16xf32>
    %458 = arith.addf %456, %457 : vector<4x16xf32>
    %cst_102 = arith.constant 0.333333343 : f32
    %459 = vector.broadcast %cst_102 : f32 to vector<4x16xf32>
    %460 = arith.mulf %458, %459 : vector<4x16xf32>
    %cst_103 = arith.constant 0.000000e+00 : f32
    %461 = vector.broadcast %cst_103 : f32 to vector<4x1xf32>
    %462 = tpu.concatenate %461, %416, %461 in 1 : vector<4x1xf32>, vector<4x16xf32>, vector<4x1xf32> -> vector<4x18xf32>
    %463 = tpu.concatenate %461, %423, %461 in 1 : vector<4x1xf32>, vector<4x16xf32>, vector<4x1xf32> -> vector<4x18xf32>
    %464 = tpu.concatenate %461, %430, %461 in 1 : vector<4x1xf32>, vector<4x16xf32>, vector<4x1xf32> -> vector<4x18xf32>
    %465 = tpu.concatenate %461, %439, %461 in 1 : vector<4x1xf32>, vector<4x16xf32>, vector<4x1xf32> -> vector<4x18xf32>
    %466 = tpu.concatenate %461, %446, %461 in 1 : vector<4x1xf32>, vector<4x16xf32>, vector<4x1xf32> -> vector<4x18xf32>
    %467 = tpu.concatenate %461, %453, %461 in 1 : vector<4x1xf32>, vector<4x16xf32>, vector<4x1xf32> -> vector<4x18xf32>
    %468 = tpu.concatenate %461, %460, %461 in 1 : vector<4x1xf32>, vector<4x16xf32>, vector<4x1xf32> -> vector<4x18xf32>
    %469 = vector.extract_strided_slice %462 {offsets = [0, 0], sizes = [4, 16], strides = [1, 1]} : vector<4x18xf32> to vector<4x16xf32>
    %470 = vector.extract_strided_slice %462 {offsets = [0, 1], sizes = [4, 16], strides = [1, 1]} : vector<4x18xf32> to vector<4x16xf32>
    %471 = vector.extract_strided_slice %462 {offsets = [0, 2], sizes = [4, 16], strides = [1, 1]} : vector<4x18xf32> to vector<4x16xf32>
    %472 = vector.extract_strided_slice %463 {offsets = [0, 0], sizes = [4, 16], strides = [1, 1]} : vector<4x18xf32> to vector<4x16xf32>
    %473 = vector.extract_strided_slice %463 {offsets = [0, 1], sizes = [4, 16], strides = [1, 1]} : vector<4x18xf32> to vector<4x16xf32>
    %474 = vector.extract_strided_slice %463 {offsets = [0, 2], sizes = [4, 16], strides = [1, 1]} : vector<4x18xf32> to vector<4x16xf32>
    %475 = vector.extract_strided_slice %464 {offsets = [0, 0], sizes = [4, 16], strides = [1, 1]} : vector<4x18xf32> to vector<4x16xf32>
    %476 = vector.extract_strided_slice %464 {offsets = [0, 1], sizes = [4, 16], strides = [1, 1]} : vector<4x18xf32> to vector<4x16xf32>
    %477 = vector.extract_strided_slice %464 {offsets = [0, 2], sizes = [4, 16], strides = [1, 1]} : vector<4x18xf32> to vector<4x16xf32>
    %478 = tpu.concatenate %469, %470, %471, %472, %473, %474, %475, %476, %477 in 0 : vector<4x16xf32>, vector<4x16xf32>, vector<4x16xf32>, vector<4x16xf32>, vector<4x16xf32>, vector<4x16xf32>, vector<4x16xf32>, vector<4x16xf32>, vector<4x16xf32> -> vector<36x16xf32>
    %cst_104 = arith.constant dense<0.000000e+00> : vector<4x16xf32>
    %479 = tpu.matmul %5, %478, %cst_104 {dimension_numbers = #tpu.dot_dimension_numbers<[1], [0], [0], [1], [0, 0, 1, 1], [], []>} : vector<4x36xf32>, vector<36x16xf32>, vector<4x16xf32> -> vector<4x16xf32>
    %480 = vector.extract_strided_slice %463 {offsets = [0, 0], sizes = [4, 16], strides = [1, 1]} : vector<4x18xf32> to vector<4x16xf32>
    %481 = vector.extract_strided_slice %463 {offsets = [0, 1], sizes = [4, 16], strides = [1, 1]} : vector<4x18xf32> to vector<4x16xf32>
    %482 = vector.extract_strided_slice %463 {offsets = [0, 2], sizes = [4, 16], strides = [1, 1]} : vector<4x18xf32> to vector<4x16xf32>
    %483 = vector.extract_strided_slice %464 {offsets = [0, 0], sizes = [4, 16], strides = [1, 1]} : vector<4x18xf32> to vector<4x16xf32>
    %484 = vector.extract_strided_slice %464 {offsets = [0, 1], sizes = [4, 16], strides = [1, 1]} : vector<4x18xf32> to vector<4x16xf32>
    %485 = vector.extract_strided_slice %464 {offsets = [0, 2], sizes = [4, 16], strides = [1, 1]} : vector<4x18xf32> to vector<4x16xf32>
    %486 = vector.extract_strided_slice %465 {offsets = [0, 0], sizes = [4, 16], strides = [1, 1]} : vector<4x18xf32> to vector<4x16xf32>
    %487 = vector.extract_strided_slice %465 {offsets = [0, 1], sizes = [4, 16], strides = [1, 1]} : vector<4x18xf32> to vector<4x16xf32>
    %488 = vector.extract_strided_slice %465 {offsets = [0, 2], sizes = [4, 16], strides = [1, 1]} : vector<4x18xf32> to vector<4x16xf32>
    %489 = tpu.concatenate %480, %481, %482, %483, %484, %485, %486, %487, %488 in 0 : vector<4x16xf32>, vector<4x16xf32>, vector<4x16xf32>, vector<4x16xf32>, vector<4x16xf32>, vector<4x16xf32>, vector<4x16xf32>, vector<4x16xf32>, vector<4x16xf32> -> vector<36x16xf32>
    %cst_105 = arith.constant dense<0.000000e+00> : vector<4x16xf32>
    %490 = tpu.matmul %5, %489, %cst_105 {dimension_numbers = #tpu.dot_dimension_numbers<[1], [0], [0], [1], [0, 0, 1, 1], [], []>} : vector<4x36xf32>, vector<36x16xf32>, vector<4x16xf32> -> vector<4x16xf32>
    %491 = vector.extract_strided_slice %464 {offsets = [0, 0], sizes = [4, 16], strides = [1, 1]} : vector<4x18xf32> to vector<4x16xf32>
    %492 = vector.extract_strided_slice %464 {offsets = [0, 1], sizes = [4, 16], strides = [1, 1]} : vector<4x18xf32> to vector<4x16xf32>
    %493 = vector.extract_strided_slice %464 {offsets = [0, 2], sizes = [4, 16], strides = [1, 1]} : vector<4x18xf32> to vector<4x16xf32>
    %494 = vector.extract_strided_slice %465 {offsets = [0, 0], sizes = [4, 16], strides = [1, 1]} : vector<4x18xf32> to vector<4x16xf32>
    %495 = vector.extract_strided_slice %465 {offsets = [0, 1], sizes = [4, 16], strides = [1, 1]} : vector<4x18xf32> to vector<4x16xf32>
    %496 = vector.extract_strided_slice %465 {offsets = [0, 2], sizes = [4, 16], strides = [1, 1]} : vector<4x18xf32> to vector<4x16xf32>
    %497 = vector.extract_strided_slice %466 {offsets = [0, 0], sizes = [4, 16], strides = [1, 1]} : vector<4x18xf32> to vector<4x16xf32>
    %498 = vector.extract_strided_slice %466 {offsets = [0, 1], sizes = [4, 16], strides = [1, 1]} : vector<4x18xf32> to vector<4x16xf32>
    %499 = vector.extract_strided_slice %466 {offsets = [0, 2], sizes = [4, 16], strides = [1, 1]} : vector<4x18xf32> to vector<4x16xf32>
    %500 = tpu.concatenate %491, %492, %493, %494, %495, %496, %497, %498, %499 in 0 : vector<4x16xf32>, vector<4x16xf32>, vector<4x16xf32>, vector<4x16xf32>, vector<4x16xf32>, vector<4x16xf32>, vector<4x16xf32>, vector<4x16xf32>, vector<4x16xf32> -> vector<36x16xf32>
    %cst_106 = arith.constant dense<0.000000e+00> : vector<4x16xf32>
    %501 = tpu.matmul %5, %500, %cst_106 {dimension_numbers = #tpu.dot_dimension_numbers<[1], [0], [0], [1], [0, 0, 1, 1], [], []>} : vector<4x36xf32>, vector<36x16xf32>, vector<4x16xf32> -> vector<4x16xf32>
    %502 = vector.extract_strided_slice %465 {offsets = [0, 0], sizes = [4, 16], strides = [1, 1]} : vector<4x18xf32> to vector<4x16xf32>
    %503 = vector.extract_strided_slice %465 {offsets = [0, 1], sizes = [4, 16], strides = [1, 1]} : vector<4x18xf32> to vector<4x16xf32>
    %504 = vector.extract_strided_slice %465 {offsets = [0, 2], sizes = [4, 16], strides = [1, 1]} : vector<4x18xf32> to vector<4x16xf32>
    %505 = vector.extract_strided_slice %466 {offsets = [0, 0], sizes = [4, 16], strides = [1, 1]} : vector<4x18xf32> to vector<4x16xf32>
    %506 = vector.extract_strided_slice %466 {offsets = [0, 1], sizes = [4, 16], strides = [1, 1]} : vector<4x18xf32> to vector<4x16xf32>
    %507 = vector.extract_strided_slice %466 {offsets = [0, 2], sizes = [4, 16], strides = [1, 1]} : vector<4x18xf32> to vector<4x16xf32>
    %508 = vector.extract_strided_slice %467 {offsets = [0, 0], sizes = [4, 16], strides = [1, 1]} : vector<4x18xf32> to vector<4x16xf32>
    %509 = vector.extract_strided_slice %467 {offsets = [0, 1], sizes = [4, 16], strides = [1, 1]} : vector<4x18xf32> to vector<4x16xf32>
    %510 = vector.extract_strided_slice %467 {offsets = [0, 2], sizes = [4, 16], strides = [1, 1]} : vector<4x18xf32> to vector<4x16xf32>
    %511 = tpu.concatenate %502, %503, %504, %505, %506, %507, %508, %509, %510 in 0 : vector<4x16xf32>, vector<4x16xf32>, vector<4x16xf32>, vector<4x16xf32>, vector<4x16xf32>, vector<4x16xf32>, vector<4x16xf32>, vector<4x16xf32>, vector<4x16xf32> -> vector<36x16xf32>
    %cst_107 = arith.constant dense<0.000000e+00> : vector<4x16xf32>
    %512 = tpu.matmul %5, %511, %cst_107 {dimension_numbers = #tpu.dot_dimension_numbers<[1], [0], [0], [1], [0, 0, 1, 1], [], []>} : vector<4x36xf32>, vector<36x16xf32>, vector<4x16xf32> -> vector<4x16xf32>
    %513 = vector.extract_strided_slice %466 {offsets = [0, 0], sizes = [4, 16], strides = [1, 1]} : vector<4x18xf32> to vector<4x16xf32>
    %514 = vector.extract_strided_slice %466 {offsets = [0, 1], sizes = [4, 16], strides = [1, 1]} : vector<4x18xf32> to vector<4x16xf32>
    %515 = vector.extract_strided_slice %466 {offsets = [0, 2], sizes = [4, 16], strides = [1, 1]} : vector<4x18xf32> to vector<4x16xf32>
    %516 = vector.extract_strided_slice %467 {offsets = [0, 0], sizes = [4, 16], strides = [1, 1]} : vector<4x18xf32> to vector<4x16xf32>
    %517 = vector.extract_strided_slice %467 {offsets = [0, 1], sizes = [4, 16], strides = [1, 1]} : vector<4x18xf32> to vector<4x16xf32>
    %518 = vector.extract_strided_slice %467 {offsets = [0, 2], sizes = [4, 16], strides = [1, 1]} : vector<4x18xf32> to vector<4x16xf32>
    %519 = vector.extract_strided_slice %468 {offsets = [0, 0], sizes = [4, 16], strides = [1, 1]} : vector<4x18xf32> to vector<4x16xf32>
    %520 = vector.extract_strided_slice %468 {offsets = [0, 1], sizes = [4, 16], strides = [1, 1]} : vector<4x18xf32> to vector<4x16xf32>
    %521 = vector.extract_strided_slice %468 {offsets = [0, 2], sizes = [4, 16], strides = [1, 1]} : vector<4x18xf32> to vector<4x16xf32>
    %522 = tpu.concatenate %513, %514, %515, %516, %517, %518, %519, %520, %521 in 0 : vector<4x16xf32>, vector<4x16xf32>, vector<4x16xf32>, vector<4x16xf32>, vector<4x16xf32>, vector<4x16xf32>, vector<4x16xf32>, vector<4x16xf32>, vector<4x16xf32> -> vector<36x16xf32>
    %cst_108 = arith.constant dense<0.000000e+00> : vector<4x16xf32>
    %523 = tpu.matmul %5, %522, %cst_108 {dimension_numbers = #tpu.dot_dimension_numbers<[1], [0], [0], [1], [0, 0, 1, 1], [], []>} : vector<4x36xf32>, vector<36x16xf32>, vector<4x16xf32> -> vector<4x16xf32>
    %cst_109 = arith.constant 0.266666681 : f32
    %524 = vector.broadcast %cst_109 : f32 to vector<1x256xf32>
    %525 = arith.mulf %83, %524 : vector<1x256xf32>
    %cst_110 = arith.constant 0.000000e+00 : f32
    %526 = vector.broadcast %cst_110 : f32 to vector<1x256xf32>
    %527 = arith.subf %525, %526 : vector<1x256xf32>
    %528 = math.absf %527 : vector<1x256xf32>
    %cst_111 = arith.constant 1.000000e+00 : f32
    %529 = vector.broadcast %cst_111 : f32 to vector<1x256xf32>
    %530 = arith.subf %529, %528 : vector<1x256xf32>
    %cst_112 = arith.constant 0.000000e+00 : f32
    %531 = vector.broadcast %cst_112 : f32 to vector<1x256xf32>
    %532 = arith.maximumf %530, %531 : vector<1x256xf32>
    %cst_113 = arith.constant 0.000000e+00 : f32
    %533 = vector.shape_cast %532 : vector<1x256xf32> to vector<1x256xf32>
    %534 = vector.broadcast %533 : vector<1x256xf32> to vector<16x256xf32>
    %535 = vector.broadcast %cst_113 : f32 to vector<16x256xf32>
    %536 = arith.select %87, %534, %535 : vector<16x256xi1>, vector<16x256xf32>
    %cst_114 = arith.constant dense<0.000000e+00> : vector<4x256xf32>
    %537 = tpu.matmul %479, %536, %cst_114 {dimension_numbers = #tpu.dot_dimension_numbers<[1], [0], [0], [1], [0, 0, 1, 1], [], []>} : vector<4x16xf32>, vector<16x256xf32>, vector<4x256xf32> -> vector<4x256xf32>
    %cst_115 = arith.constant 0.266666681 : f32
    %538 = vector.broadcast %cst_115 : f32 to vector<1x256xf32>
    %539 = arith.mulf %83, %538 : vector<1x256xf32>
    %cst_116 = arith.constant 1.000000e+00 : f32
    %540 = vector.broadcast %cst_116 : f32 to vector<1x256xf32>
    %541 = arith.subf %539, %540 : vector<1x256xf32>
    %542 = math.absf %541 : vector<1x256xf32>
    %cst_117 = arith.constant 1.000000e+00 : f32
    %543 = vector.broadcast %cst_117 : f32 to vector<1x256xf32>
    %544 = arith.subf %543, %542 : vector<1x256xf32>
    %cst_118 = arith.constant 0.000000e+00 : f32
    %545 = vector.broadcast %cst_118 : f32 to vector<1x256xf32>
    %546 = arith.maximumf %544, %545 : vector<1x256xf32>
    %cst_119 = arith.constant 0.000000e+00 : f32
    %547 = vector.shape_cast %546 : vector<1x256xf32> to vector<1x256xf32>
    %548 = vector.broadcast %547 : vector<1x256xf32> to vector<16x256xf32>
    %549 = vector.broadcast %cst_119 : f32 to vector<16x256xf32>
    %550 = arith.select %87, %548, %549 : vector<16x256xi1>, vector<16x256xf32>
    %cst_120 = arith.constant dense<0.000000e+00> : vector<4x256xf32>
    %551 = tpu.matmul %490, %550, %cst_120 {dimension_numbers = #tpu.dot_dimension_numbers<[1], [0], [0], [1], [0, 0, 1, 1], [], []>} : vector<4x16xf32>, vector<16x256xf32>, vector<4x256xf32> -> vector<4x256xf32>
    %552 = arith.addf %537, %551 : vector<4x256xf32>
    %cst_121 = arith.constant 0.266666681 : f32
    %553 = vector.broadcast %cst_121 : f32 to vector<1x256xf32>
    %554 = arith.mulf %83, %553 : vector<1x256xf32>
    %cst_122 = arith.constant 2.000000e+00 : f32
    %555 = vector.broadcast %cst_122 : f32 to vector<1x256xf32>
    %556 = arith.subf %554, %555 : vector<1x256xf32>
    %557 = math.absf %556 : vector<1x256xf32>
    %cst_123 = arith.constant 1.000000e+00 : f32
    %558 = vector.broadcast %cst_123 : f32 to vector<1x256xf32>
    %559 = arith.subf %558, %557 : vector<1x256xf32>
    %cst_124 = arith.constant 0.000000e+00 : f32
    %560 = vector.broadcast %cst_124 : f32 to vector<1x256xf32>
    %561 = arith.maximumf %559, %560 : vector<1x256xf32>
    %cst_125 = arith.constant 0.000000e+00 : f32
    %562 = vector.shape_cast %561 : vector<1x256xf32> to vector<1x256xf32>
    %563 = vector.broadcast %562 : vector<1x256xf32> to vector<16x256xf32>
    %564 = vector.broadcast %cst_125 : f32 to vector<16x256xf32>
    %565 = arith.select %87, %563, %564 : vector<16x256xi1>, vector<16x256xf32>
    %cst_126 = arith.constant dense<0.000000e+00> : vector<4x256xf32>
    %566 = tpu.matmul %501, %565, %cst_126 {dimension_numbers = #tpu.dot_dimension_numbers<[1], [0], [0], [1], [0, 0, 1, 1], [], []>} : vector<4x16xf32>, vector<16x256xf32>, vector<4x256xf32> -> vector<4x256xf32>
    %567 = arith.addf %552, %566 : vector<4x256xf32>
    %cst_127 = arith.constant 0.266666681 : f32
    %568 = vector.broadcast %cst_127 : f32 to vector<1x256xf32>
    %569 = arith.mulf %83, %568 : vector<1x256xf32>
    %cst_128 = arith.constant 3.000000e+00 : f32
    %570 = vector.broadcast %cst_128 : f32 to vector<1x256xf32>
    %571 = arith.subf %569, %570 : vector<1x256xf32>
    %572 = math.absf %571 : vector<1x256xf32>
    %cst_129 = arith.constant 1.000000e+00 : f32
    %573 = vector.broadcast %cst_129 : f32 to vector<1x256xf32>
    %574 = arith.subf %573, %572 : vector<1x256xf32>
    %cst_130 = arith.constant 0.000000e+00 : f32
    %575 = vector.broadcast %cst_130 : f32 to vector<1x256xf32>
    %576 = arith.maximumf %574, %575 : vector<1x256xf32>
    %cst_131 = arith.constant 0.000000e+00 : f32
    %577 = vector.shape_cast %576 : vector<1x256xf32> to vector<1x256xf32>
    %578 = vector.broadcast %577 : vector<1x256xf32> to vector<16x256xf32>
    %579 = vector.broadcast %cst_131 : f32 to vector<16x256xf32>
    %580 = arith.select %87, %578, %579 : vector<16x256xi1>, vector<16x256xf32>
    %cst_132 = arith.constant dense<0.000000e+00> : vector<4x256xf32>
    %581 = tpu.matmul %512, %580, %cst_132 {dimension_numbers = #tpu.dot_dimension_numbers<[1], [0], [0], [1], [0, 0, 1, 1], [], []>} : vector<4x16xf32>, vector<16x256xf32>, vector<4x256xf32> -> vector<4x256xf32>
    %582 = arith.addf %567, %581 : vector<4x256xf32>
    %cst_133 = arith.constant 0.266666681 : f32
    %583 = vector.broadcast %cst_133 : f32 to vector<1x256xf32>
    %584 = arith.mulf %83, %583 : vector<1x256xf32>
    %cst_134 = arith.constant 4.000000e+00 : f32
    %585 = vector.broadcast %cst_134 : f32 to vector<1x256xf32>
    %586 = arith.subf %584, %585 : vector<1x256xf32>
    %587 = math.absf %586 : vector<1x256xf32>
    %cst_135 = arith.constant 1.000000e+00 : f32
    %588 = vector.broadcast %cst_135 : f32 to vector<1x256xf32>
    %589 = arith.subf %588, %587 : vector<1x256xf32>
    %cst_136 = arith.constant 0.000000e+00 : f32
    %590 = vector.broadcast %cst_136 : f32 to vector<1x256xf32>
    %591 = arith.maximumf %589, %590 : vector<1x256xf32>
    %cst_137 = arith.constant 0.000000e+00 : f32
    %592 = vector.shape_cast %591 : vector<1x256xf32> to vector<1x256xf32>
    %593 = vector.broadcast %592 : vector<1x256xf32> to vector<16x256xf32>
    %594 = vector.broadcast %cst_137 : f32 to vector<16x256xf32>
    %595 = arith.select %87, %593, %594 : vector<16x256xi1>, vector<16x256xf32>
    %cst_138 = arith.constant dense<0.000000e+00> : vector<4x256xf32>
    %596 = tpu.matmul %523, %595, %cst_138 {dimension_numbers = #tpu.dot_dimension_numbers<[1], [0], [0], [1], [0, 0, 1, 1], [], []>} : vector<4x16xf32>, vector<16x256xf32>, vector<4x256xf32> -> vector<4x256xf32>
    %597 = arith.addf %582, %596 : vector<4x256xf32>
    %c0_i32_139 = arith.constant 0 : i32
    %598 = vector.broadcast %c0_i32_139 : i32 to vector<1x256xi32>
    %599 = arith.cmpi sge, %82, %598 : vector<1x256xi32>
    %c16_i32_140 = arith.constant 16 : i32
    %600 = vector.broadcast %c16_i32_140 : i32 to vector<1x256xi32>
    %601 = arith.cmpi slt, %82, %600 : vector<1x256xi32>
    %602 = arith.andi %599, %601 : vector<1x256xi1>
    %cst_141 = arith.constant 0.000000e+00 : f32
    %603 = vector.shape_cast %602 : vector<1x256xi1> to vector<1x256xi1>
    %604 = vector.broadcast %603 : vector<1x256xi1> to vector<4x256xi1>
    %605 = vector.broadcast %cst_141 : f32 to vector<4x256xf32>
    %606 = arith.select %604, %179, %605 : vector<4x256xi1>, vector<4x256xf32>
    %cst_142 = arith.constant 6.250000e-02 : f32
    %607 = vector.broadcast %cst_142 : f32 to vector<4x256xf32>
    %608 = arith.mulf %606, %607 : vector<4x256xf32>
    %cst_143 = arith.constant dense<0.000000e+00> : vector<4x16xf32>
    %609 = tpu.matmul %608, %93, %cst_143 {dimension_numbers = #tpu.dot_dimension_numbers<[1], [1], [0], [0], [0, 0, 1, 0], [], []>} : vector<4x256xf32>, vector<16x256xf32>, vector<4x16xf32> -> vector<4x16xf32>
    %cst_144 = arith.constant 0.000000e+00 : f32
    %610 = vector.broadcast %cst_144 : f32 to vector<4x1xf32>
    %611 = tpu.concatenate %610, %609, %610 in 1 : vector<4x1xf32>, vector<4x16xf32>, vector<4x1xf32> -> vector<4x18xf32>
    %612 = vector.extract_strided_slice %611 {offsets = [0, 0], sizes = [4, 16], strides = [1, 1]} : vector<4x18xf32> to vector<4x16xf32>
    %613 = vector.extract_strided_slice %611 {offsets = [0, 1], sizes = [4, 16], strides = [1, 1]} : vector<4x18xf32> to vector<4x16xf32>
    %614 = vector.extract_strided_slice %611 {offsets = [0, 2], sizes = [4, 16], strides = [1, 1]} : vector<4x18xf32> to vector<4x16xf32>
    %615 = tpu.concatenate %612, %613, %614 in 0 : vector<4x16xf32>, vector<4x16xf32>, vector<4x16xf32> -> vector<12x16xf32>
    %cst_145 = arith.constant dense<0.000000e+00> : vector<4x16xf32>
    %616 = tpu.matmul %2, %615, %cst_145 {dimension_numbers = #tpu.dot_dimension_numbers<[1], [0], [0], [1], [0, 0, 1, 1], [], []>} : vector<4x12xf32>, vector<12x16xf32>, vector<4x16xf32> -> vector<4x16xf32>
    %cst_146 = arith.constant dense<0.000000e+00> : vector<4x256xf32>
    %617 = tpu.matmul %616, %93, %cst_146 {dimension_numbers = #tpu.dot_dimension_numbers<[1], [0], [0], [1], [0, 0, 1, 1], [], []>} : vector<4x16xf32>, vector<16x256xf32>, vector<4x256xf32> -> vector<4x256xf32>
    %c0_i32_147 = arith.constant 0 : i32
    %618 = vector.broadcast %c0_i32_147 : i32 to vector<1x256xi32>
    %619 = arith.cmpi sge, %82, %618 : vector<1x256xi32>
    %c6_i32 = arith.constant 6 : i32
    %620 = vector.broadcast %c6_i32 : i32 to vector<1x256xi32>
    %621 = arith.cmpi slt, %82, %620 : vector<1x256xi32>
    %622 = arith.andi %619, %621 : vector<1x256xi1>
    %cst_148 = arith.constant 0.000000e+00 : f32
    %623 = vector.shape_cast %622 : vector<1x256xi1> to vector<1x256xi1>
    %624 = vector.broadcast %623 : vector<1x256xi1> to vector<4x256xi1>
    %625 = vector.broadcast %cst_148 : f32 to vector<4x256xf32>
    %626 = arith.select %624, %179, %625 : vector<4x256xi1>, vector<4x256xf32>
    %cst_149 = arith.constant 0.166666672 : f32
    %627 = vector.broadcast %cst_149 : f32 to vector<4x256xf32>
    %628 = arith.mulf %626, %627 : vector<4x256xf32>
    %cst_150 = arith.constant dense<0.000000e+00> : vector<4x16xf32>
    %629 = tpu.matmul %628, %93, %cst_150 {dimension_numbers = #tpu.dot_dimension_numbers<[1], [1], [0], [0], [0, 0, 1, 0], [], []>} : vector<4x256xf32>, vector<16x256xf32>, vector<4x16xf32> -> vector<4x16xf32>
    %c5_i32 = arith.constant 5 : i32
    %630 = vector.broadcast %c5_i32 : i32 to vector<1x256xi32>
    %631 = arith.cmpi sge, %82, %630 : vector<1x256xi32>
    %c11_i32 = arith.constant 11 : i32
    %632 = vector.broadcast %c11_i32 : i32 to vector<1x256xi32>
    %633 = arith.cmpi slt, %82, %632 : vector<1x256xi32>
    %634 = arith.andi %631, %633 : vector<1x256xi1>
    %cst_151 = arith.constant 0.000000e+00 : f32
    %635 = vector.shape_cast %634 : vector<1x256xi1> to vector<1x256xi1>
    %636 = vector.broadcast %635 : vector<1x256xi1> to vector<4x256xi1>
    %637 = vector.broadcast %cst_151 : f32 to vector<4x256xf32>
    %638 = arith.select %636, %179, %637 : vector<4x256xi1>, vector<4x256xf32>
    %cst_152 = arith.constant 0.166666672 : f32
    %639 = vector.broadcast %cst_152 : f32 to vector<4x256xf32>
    %640 = arith.mulf %638, %639 : vector<4x256xf32>
    %cst_153 = arith.constant dense<0.000000e+00> : vector<4x16xf32>
    %641 = tpu.matmul %640, %93, %cst_153 {dimension_numbers = #tpu.dot_dimension_numbers<[1], [1], [0], [0], [0, 0, 1, 0], [], []>} : vector<4x256xf32>, vector<16x256xf32>, vector<4x16xf32> -> vector<4x16xf32>
    %c10_i32 = arith.constant 10 : i32
    %642 = vector.broadcast %c10_i32 : i32 to vector<1x256xi32>
    %643 = arith.cmpi sge, %82, %642 : vector<1x256xi32>
    %c16_i32_154 = arith.constant 16 : i32
    %644 = vector.broadcast %c16_i32_154 : i32 to vector<1x256xi32>
    %645 = arith.cmpi slt, %82, %644 : vector<1x256xi32>
    %646 = arith.andi %643, %645 : vector<1x256xi1>
    %cst_155 = arith.constant 0.000000e+00 : f32
    %647 = vector.shape_cast %646 : vector<1x256xi1> to vector<1x256xi1>
    %648 = vector.broadcast %647 : vector<1x256xi1> to vector<4x256xi1>
    %649 = vector.broadcast %cst_155 : f32 to vector<4x256xf32>
    %650 = arith.select %648, %179, %649 : vector<4x256xi1>, vector<4x256xf32>
    %cst_156 = arith.constant 0.166666672 : f32
    %651 = vector.broadcast %cst_156 : f32 to vector<4x256xf32>
    %652 = arith.mulf %650, %651 : vector<4x256xf32>
    %cst_157 = arith.constant dense<0.000000e+00> : vector<4x16xf32>
    %653 = tpu.matmul %652, %93, %cst_157 {dimension_numbers = #tpu.dot_dimension_numbers<[1], [1], [0], [0], [0, 0, 1, 0], [], []>} : vector<4x256xf32>, vector<16x256xf32>, vector<4x16xf32> -> vector<4x16xf32>
    %cst_158 = arith.constant 0.000000e+00 : f32
    %654 = vector.broadcast %cst_158 : f32 to vector<4x1xf32>
    %655 = tpu.concatenate %654, %629, %654 in 1 : vector<4x1xf32>, vector<4x16xf32>, vector<4x1xf32> -> vector<4x18xf32>
    %656 = tpu.concatenate %654, %641, %654 in 1 : vector<4x1xf32>, vector<4x16xf32>, vector<4x1xf32> -> vector<4x18xf32>
    %657 = tpu.concatenate %654, %653, %654 in 1 : vector<4x1xf32>, vector<4x16xf32>, vector<4x1xf32> -> vector<4x18xf32>
    %658 = vector.extract_strided_slice %655 {offsets = [0, 0], sizes = [4, 16], strides = [1, 1]} : vector<4x18xf32> to vector<4x16xf32>
    %659 = vector.extract_strided_slice %656 {offsets = [0, 0], sizes = [4, 16], strides = [1, 1]} : vector<4x18xf32> to vector<4x16xf32>
    %660 = vector.extract_strided_slice %657 {offsets = [0, 0], sizes = [4, 16], strides = [1, 1]} : vector<4x18xf32> to vector<4x16xf32>
    %661 = vector.extract_strided_slice %655 {offsets = [0, 1], sizes = [4, 16], strides = [1, 1]} : vector<4x18xf32> to vector<4x16xf32>
    %662 = vector.extract_strided_slice %656 {offsets = [0, 1], sizes = [4, 16], strides = [1, 1]} : vector<4x18xf32> to vector<4x16xf32>
    %663 = vector.extract_strided_slice %657 {offsets = [0, 1], sizes = [4, 16], strides = [1, 1]} : vector<4x18xf32> to vector<4x16xf32>
    %664 = vector.extract_strided_slice %655 {offsets = [0, 2], sizes = [4, 16], strides = [1, 1]} : vector<4x18xf32> to vector<4x16xf32>
    %665 = vector.extract_strided_slice %656 {offsets = [0, 2], sizes = [4, 16], strides = [1, 1]} : vector<4x18xf32> to vector<4x16xf32>
    %666 = vector.extract_strided_slice %657 {offsets = [0, 2], sizes = [4, 16], strides = [1, 1]} : vector<4x18xf32> to vector<4x16xf32>
    %667 = tpu.concatenate %658, %659, %660, %661, %662, %663, %664, %665, %666 in 0 : vector<4x16xf32>, vector<4x16xf32>, vector<4x16xf32>, vector<4x16xf32>, vector<4x16xf32>, vector<4x16xf32>, vector<4x16xf32>, vector<4x16xf32>, vector<4x16xf32> -> vector<36x16xf32>
    %cst_159 = arith.constant dense<0.000000e+00> : vector<4x16xf32>
    %668 = tpu.matmul %4, %667, %cst_159 {dimension_numbers = #tpu.dot_dimension_numbers<[1], [0], [0], [1], [0, 0, 1, 1], [], []>} : vector<4x36xf32>, vector<36x16xf32>, vector<4x16xf32> -> vector<4x16xf32>
    %cst_160 = arith.constant dense<0.000000e+00> : vector<4x256xf32>
    %669 = tpu.matmul %668, %93, %cst_160 {dimension_numbers = #tpu.dot_dimension_numbers<[1], [0], [0], [1], [0, 0, 1, 1], [], []>} : vector<4x16xf32>, vector<16x256xf32>, vector<4x256xf32> -> vector<4x256xf32>
    %c0_i32_161 = arith.constant 0 : i32
    %670 = vector.broadcast %c0_i32_161 : i32 to vector<1x256xi32>
    %671 = arith.cmpi sge, %82, %670 : vector<1x256xi32>
    %c4_i32 = arith.constant 4 : i32
    %672 = vector.broadcast %c4_i32 : i32 to vector<1x256xi32>
    %673 = arith.cmpi slt, %82, %672 : vector<1x256xi32>
    %674 = arith.andi %671, %673 : vector<1x256xi1>
    %cst_162 = arith.constant 0.000000e+00 : f32
    %675 = vector.shape_cast %674 : vector<1x256xi1> to vector<1x256xi1>
    %676 = vector.broadcast %675 : vector<1x256xi1> to vector<4x256xi1>
    %677 = vector.broadcast %cst_162 : f32 to vector<4x256xf32>
    %678 = arith.select %676, %179, %677 : vector<4x256xi1>, vector<4x256xf32>
    %cst_163 = arith.constant 2.500000e-01 : f32
    %679 = vector.broadcast %cst_163 : f32 to vector<4x256xf32>
    %680 = arith.mulf %678, %679 : vector<4x256xf32>
    %cst_164 = arith.constant dense<0.000000e+00> : vector<4x16xf32>
    %681 = tpu.matmul %680, %93, %cst_164 {dimension_numbers = #tpu.dot_dimension_numbers<[1], [1], [0], [0], [0, 0, 1, 0], [], []>} : vector<4x256xf32>, vector<16x256xf32>, vector<4x16xf32> -> vector<4x16xf32>
    %c3_i32 = arith.constant 3 : i32
    %682 = vector.broadcast %c3_i32 : i32 to vector<1x256xi32>
    %683 = arith.cmpi sge, %82, %682 : vector<1x256xi32>
    %c7_i32 = arith.constant 7 : i32
    %684 = vector.broadcast %c7_i32 : i32 to vector<1x256xi32>
    %685 = arith.cmpi slt, %82, %684 : vector<1x256xi32>
    %686 = arith.andi %683, %685 : vector<1x256xi1>
    %cst_165 = arith.constant 0.000000e+00 : f32
    %687 = vector.shape_cast %686 : vector<1x256xi1> to vector<1x256xi1>
    %688 = vector.broadcast %687 : vector<1x256xi1> to vector<4x256xi1>
    %689 = vector.broadcast %cst_165 : f32 to vector<4x256xf32>
    %690 = arith.select %688, %179, %689 : vector<4x256xi1>, vector<4x256xf32>
    %cst_166 = arith.constant 2.500000e-01 : f32
    %691 = vector.broadcast %cst_166 : f32 to vector<4x256xf32>
    %692 = arith.mulf %690, %691 : vector<4x256xf32>
    %cst_167 = arith.constant dense<0.000000e+00> : vector<4x16xf32>
    %693 = tpu.matmul %692, %93, %cst_167 {dimension_numbers = #tpu.dot_dimension_numbers<[1], [1], [0], [0], [0, 0, 1, 0], [], []>} : vector<4x256xf32>, vector<16x256xf32>, vector<4x16xf32> -> vector<4x16xf32>
    %c6_i32_168 = arith.constant 6 : i32
    %694 = vector.broadcast %c6_i32_168 : i32 to vector<1x256xi32>
    %695 = arith.cmpi sge, %82, %694 : vector<1x256xi32>
    %c10_i32_169 = arith.constant 10 : i32
    %696 = vector.broadcast %c10_i32_169 : i32 to vector<1x256xi32>
    %697 = arith.cmpi slt, %82, %696 : vector<1x256xi32>
    %698 = arith.andi %695, %697 : vector<1x256xi1>
    %cst_170 = arith.constant 0.000000e+00 : f32
    %699 = vector.shape_cast %698 : vector<1x256xi1> to vector<1x256xi1>
    %700 = vector.broadcast %699 : vector<1x256xi1> to vector<4x256xi1>
    %701 = vector.broadcast %cst_170 : f32 to vector<4x256xf32>
    %702 = arith.select %700, %179, %701 : vector<4x256xi1>, vector<4x256xf32>
    %cst_171 = arith.constant 2.500000e-01 : f32
    %703 = vector.broadcast %cst_171 : f32 to vector<4x256xf32>
    %704 = arith.mulf %702, %703 : vector<4x256xf32>
    %cst_172 = arith.constant dense<0.000000e+00> : vector<4x16xf32>
    %705 = tpu.matmul %704, %93, %cst_172 {dimension_numbers = #tpu.dot_dimension_numbers<[1], [1], [0], [0], [0, 0, 1, 0], [], []>} : vector<4x256xf32>, vector<16x256xf32>, vector<4x16xf32> -> vector<4x16xf32>
    %c9_i32 = arith.constant 9 : i32
    %706 = vector.broadcast %c9_i32 : i32 to vector<1x256xi32>
    %707 = arith.cmpi sge, %82, %706 : vector<1x256xi32>
    %c13_i32 = arith.constant 13 : i32
    %708 = vector.broadcast %c13_i32 : i32 to vector<1x256xi32>
    %709 = arith.cmpi slt, %82, %708 : vector<1x256xi32>
    %710 = arith.andi %707, %709 : vector<1x256xi1>
    %cst_173 = arith.constant 0.000000e+00 : f32
    %711 = vector.shape_cast %710 : vector<1x256xi1> to vector<1x256xi1>
    %712 = vector.broadcast %711 : vector<1x256xi1> to vector<4x256xi1>
    %713 = vector.broadcast %cst_173 : f32 to vector<4x256xf32>
    %714 = arith.select %712, %179, %713 : vector<4x256xi1>, vector<4x256xf32>
    %cst_174 = arith.constant 2.500000e-01 : f32
    %715 = vector.broadcast %cst_174 : f32 to vector<4x256xf32>
    %716 = arith.mulf %714, %715 : vector<4x256xf32>
    %cst_175 = arith.constant dense<0.000000e+00> : vector<4x16xf32>
    %717 = tpu.matmul %716, %93, %cst_175 {dimension_numbers = #tpu.dot_dimension_numbers<[1], [1], [0], [0], [0, 0, 1, 0], [], []>} : vector<4x256xf32>, vector<16x256xf32>, vector<4x16xf32> -> vector<4x16xf32>
    %c12_i32 = arith.constant 12 : i32
    %718 = vector.broadcast %c12_i32 : i32 to vector<1x256xi32>
    %719 = arith.cmpi sge, %82, %718 : vector<1x256xi32>
    %c16_i32_176 = arith.constant 16 : i32
    %720 = vector.broadcast %c16_i32_176 : i32 to vector<1x256xi32>
    %721 = arith.cmpi slt, %82, %720 : vector<1x256xi32>
    %722 = arith.andi %719, %721 : vector<1x256xi1>
    %cst_177 = arith.constant 0.000000e+00 : f32
    %723 = vector.shape_cast %722 : vector<1x256xi1> to vector<1x256xi1>
    %724 = vector.broadcast %723 : vector<1x256xi1> to vector<4x256xi1>
    %725 = vector.broadcast %cst_177 : f32 to vector<4x256xf32>
    %726 = arith.select %724, %179, %725 : vector<4x256xi1>, vector<4x256xf32>
    %cst_178 = arith.constant 2.500000e-01 : f32
    %727 = vector.broadcast %cst_178 : f32 to vector<4x256xf32>
    %728 = arith.mulf %726, %727 : vector<4x256xf32>
    %cst_179 = arith.constant dense<0.000000e+00> : vector<4x16xf32>
    %729 = tpu.matmul %728, %93, %cst_179 {dimension_numbers = #tpu.dot_dimension_numbers<[1], [1], [0], [0], [0, 0, 1, 0], [], []>} : vector<4x256xf32>, vector<16x256xf32>, vector<4x16xf32> -> vector<4x16xf32>
    %cst_180 = arith.constant 0.000000e+00 : f32
    %730 = vector.broadcast %cst_180 : f32 to vector<4x1xf32>
    %731 = tpu.concatenate %730, %681, %730 in 1 : vector<4x1xf32>, vector<4x16xf32>, vector<4x1xf32> -> vector<4x18xf32>
    %732 = tpu.concatenate %730, %693, %730 in 1 : vector<4x1xf32>, vector<4x16xf32>, vector<4x1xf32> -> vector<4x18xf32>
    %733 = tpu.concatenate %730, %705, %730 in 1 : vector<4x1xf32>, vector<4x16xf32>, vector<4x1xf32> -> vector<4x18xf32>
    %734 = tpu.concatenate %730, %717, %730 in 1 : vector<4x1xf32>, vector<4x16xf32>, vector<4x1xf32> -> vector<4x18xf32>
    %735 = tpu.concatenate %730, %729, %730 in 1 : vector<4x1xf32>, vector<4x16xf32>, vector<4x1xf32> -> vector<4x18xf32>
    %736 = vector.extract_strided_slice %731 {offsets = [0, 0], sizes = [4, 16], strides = [1, 1]} : vector<4x18xf32> to vector<4x16xf32>
    %737 = vector.extract_strided_slice %732 {offsets = [0, 0], sizes = [4, 16], strides = [1, 1]} : vector<4x18xf32> to vector<4x16xf32>
    %738 = vector.extract_strided_slice %733 {offsets = [0, 0], sizes = [4, 16], strides = [1, 1]} : vector<4x18xf32> to vector<4x16xf32>
    %739 = vector.extract_strided_slice %731 {offsets = [0, 1], sizes = [4, 16], strides = [1, 1]} : vector<4x18xf32> to vector<4x16xf32>
    %740 = vector.extract_strided_slice %732 {offsets = [0, 1], sizes = [4, 16], strides = [1, 1]} : vector<4x18xf32> to vector<4x16xf32>
    %741 = vector.extract_strided_slice %733 {offsets = [0, 1], sizes = [4, 16], strides = [1, 1]} : vector<4x18xf32> to vector<4x16xf32>
    %742 = vector.extract_strided_slice %731 {offsets = [0, 2], sizes = [4, 16], strides = [1, 1]} : vector<4x18xf32> to vector<4x16xf32>
    %743 = vector.extract_strided_slice %732 {offsets = [0, 2], sizes = [4, 16], strides = [1, 1]} : vector<4x18xf32> to vector<4x16xf32>
    %744 = vector.extract_strided_slice %733 {offsets = [0, 2], sizes = [4, 16], strides = [1, 1]} : vector<4x18xf32> to vector<4x16xf32>
    %745 = tpu.concatenate %736, %737, %738, %739, %740, %741, %742, %743, %744 in 0 : vector<4x16xf32>, vector<4x16xf32>, vector<4x16xf32>, vector<4x16xf32>, vector<4x16xf32>, vector<4x16xf32>, vector<4x16xf32>, vector<4x16xf32>, vector<4x16xf32> -> vector<36x16xf32>
    %cst_181 = arith.constant dense<0.000000e+00> : vector<4x16xf32>
    %746 = tpu.matmul %6, %745, %cst_181 {dimension_numbers = #tpu.dot_dimension_numbers<[1], [0], [0], [1], [0, 0, 1, 1], [], []>} : vector<4x36xf32>, vector<36x16xf32>, vector<4x16xf32> -> vector<4x16xf32>
    %747 = vector.extract_strided_slice %732 {offsets = [0, 0], sizes = [4, 16], strides = [1, 1]} : vector<4x18xf32> to vector<4x16xf32>
    %748 = vector.extract_strided_slice %733 {offsets = [0, 0], sizes = [4, 16], strides = [1, 1]} : vector<4x18xf32> to vector<4x16xf32>
    %749 = vector.extract_strided_slice %734 {offsets = [0, 0], sizes = [4, 16], strides = [1, 1]} : vector<4x18xf32> to vector<4x16xf32>
    %750 = vector.extract_strided_slice %732 {offsets = [0, 1], sizes = [4, 16], strides = [1, 1]} : vector<4x18xf32> to vector<4x16xf32>
    %751 = vector.extract_strided_slice %733 {offsets = [0, 1], sizes = [4, 16], strides = [1, 1]} : vector<4x18xf32> to vector<4x16xf32>
    %752 = vector.extract_strided_slice %734 {offsets = [0, 1], sizes = [4, 16], strides = [1, 1]} : vector<4x18xf32> to vector<4x16xf32>
    %753 = vector.extract_strided_slice %732 {offsets = [0, 2], sizes = [4, 16], strides = [1, 1]} : vector<4x18xf32> to vector<4x16xf32>
    %754 = vector.extract_strided_slice %733 {offsets = [0, 2], sizes = [4, 16], strides = [1, 1]} : vector<4x18xf32> to vector<4x16xf32>
    %755 = vector.extract_strided_slice %734 {offsets = [0, 2], sizes = [4, 16], strides = [1, 1]} : vector<4x18xf32> to vector<4x16xf32>
    %756 = tpu.concatenate %747, %748, %749, %750, %751, %752, %753, %754, %755 in 0 : vector<4x16xf32>, vector<4x16xf32>, vector<4x16xf32>, vector<4x16xf32>, vector<4x16xf32>, vector<4x16xf32>, vector<4x16xf32>, vector<4x16xf32>, vector<4x16xf32> -> vector<36x16xf32>
    %cst_182 = arith.constant dense<0.000000e+00> : vector<4x16xf32>
    %757 = tpu.matmul %6, %756, %cst_182 {dimension_numbers = #tpu.dot_dimension_numbers<[1], [0], [0], [1], [0, 0, 1, 1], [], []>} : vector<4x36xf32>, vector<36x16xf32>, vector<4x16xf32> -> vector<4x16xf32>
    %758 = vector.extract_strided_slice %733 {offsets = [0, 0], sizes = [4, 16], strides = [1, 1]} : vector<4x18xf32> to vector<4x16xf32>
    %759 = vector.extract_strided_slice %734 {offsets = [0, 0], sizes = [4, 16], strides = [1, 1]} : vector<4x18xf32> to vector<4x16xf32>
    %760 = vector.extract_strided_slice %735 {offsets = [0, 0], sizes = [4, 16], strides = [1, 1]} : vector<4x18xf32> to vector<4x16xf32>
    %761 = vector.extract_strided_slice %733 {offsets = [0, 1], sizes = [4, 16], strides = [1, 1]} : vector<4x18xf32> to vector<4x16xf32>
    %762 = vector.extract_strided_slice %734 {offsets = [0, 1], sizes = [4, 16], strides = [1, 1]} : vector<4x18xf32> to vector<4x16xf32>
    %763 = vector.extract_strided_slice %735 {offsets = [0, 1], sizes = [4, 16], strides = [1, 1]} : vector<4x18xf32> to vector<4x16xf32>
    %764 = vector.extract_strided_slice %733 {offsets = [0, 2], sizes = [4, 16], strides = [1, 1]} : vector<4x18xf32> to vector<4x16xf32>
    %765 = vector.extract_strided_slice %734 {offsets = [0, 2], sizes = [4, 16], strides = [1, 1]} : vector<4x18xf32> to vector<4x16xf32>
    %766 = vector.extract_strided_slice %735 {offsets = [0, 2], sizes = [4, 16], strides = [1, 1]} : vector<4x18xf32> to vector<4x16xf32>
    %767 = tpu.concatenate %758, %759, %760, %761, %762, %763, %764, %765, %766 in 0 : vector<4x16xf32>, vector<4x16xf32>, vector<4x16xf32>, vector<4x16xf32>, vector<4x16xf32>, vector<4x16xf32>, vector<4x16xf32>, vector<4x16xf32>, vector<4x16xf32> -> vector<36x16xf32>
    %cst_183 = arith.constant dense<0.000000e+00> : vector<4x16xf32>
    %768 = tpu.matmul %6, %767, %cst_183 {dimension_numbers = #tpu.dot_dimension_numbers<[1], [0], [0], [1], [0, 0, 1, 1], [], []>} : vector<4x36xf32>, vector<36x16xf32>, vector<4x16xf32> -> vector<4x16xf32>
    %cst_184 = arith.constant 0.13333334 : f32
    %769 = vector.broadcast %cst_184 : f32 to vector<1x256xf32>
    %770 = arith.mulf %84, %769 : vector<1x256xf32>
    %cst_185 = arith.constant 0.000000e+00 : f32
    %771 = vector.broadcast %cst_185 : f32 to vector<1x256xf32>
    %772 = arith.subf %770, %771 : vector<1x256xf32>
    %773 = math.absf %772 : vector<1x256xf32>
    %cst_186 = arith.constant 1.000000e+00 : f32
    %774 = vector.broadcast %cst_186 : f32 to vector<1x256xf32>
    %775 = arith.subf %774, %773 : vector<1x256xf32>
    %cst_187 = arith.constant 0.000000e+00 : f32
    %776 = vector.broadcast %cst_187 : f32 to vector<1x256xf32>
    %777 = arith.maximumf %775, %776 : vector<1x256xf32>
    %cst_188 = arith.constant 0.000000e+00 : f32
    %778 = vector.shape_cast %777 : vector<1x256xf32> to vector<1x256xf32>
    %779 = vector.broadcast %778 : vector<1x256xf32> to vector<16x256xf32>
    %780 = vector.broadcast %cst_188 : f32 to vector<16x256xf32>
    %781 = arith.select %90, %779, %780 : vector<16x256xi1>, vector<16x256xf32>
    %cst_189 = arith.constant dense<0.000000e+00> : vector<4x256xf32>
    %782 = tpu.matmul %746, %781, %cst_189 {dimension_numbers = #tpu.dot_dimension_numbers<[1], [0], [0], [1], [0, 0, 1, 1], [], []>} : vector<4x16xf32>, vector<16x256xf32>, vector<4x256xf32> -> vector<4x256xf32>
    %cst_190 = arith.constant 0.13333334 : f32
    %783 = vector.broadcast %cst_190 : f32 to vector<1x256xf32>
    %784 = arith.mulf %84, %783 : vector<1x256xf32>
    %cst_191 = arith.constant 1.000000e+00 : f32
    %785 = vector.broadcast %cst_191 : f32 to vector<1x256xf32>
    %786 = arith.subf %784, %785 : vector<1x256xf32>
    %787 = math.absf %786 : vector<1x256xf32>
    %cst_192 = arith.constant 1.000000e+00 : f32
    %788 = vector.broadcast %cst_192 : f32 to vector<1x256xf32>
    %789 = arith.subf %788, %787 : vector<1x256xf32>
    %cst_193 = arith.constant 0.000000e+00 : f32
    %790 = vector.broadcast %cst_193 : f32 to vector<1x256xf32>
    %791 = arith.maximumf %789, %790 : vector<1x256xf32>
    %cst_194 = arith.constant 0.000000e+00 : f32
    %792 = vector.shape_cast %791 : vector<1x256xf32> to vector<1x256xf32>
    %793 = vector.broadcast %792 : vector<1x256xf32> to vector<16x256xf32>
    %794 = vector.broadcast %cst_194 : f32 to vector<16x256xf32>
    %795 = arith.select %90, %793, %794 : vector<16x256xi1>, vector<16x256xf32>
    %cst_195 = arith.constant dense<0.000000e+00> : vector<4x256xf32>
    %796 = tpu.matmul %757, %795, %cst_195 {dimension_numbers = #tpu.dot_dimension_numbers<[1], [0], [0], [1], [0, 0, 1, 1], [], []>} : vector<4x16xf32>, vector<16x256xf32>, vector<4x256xf32> -> vector<4x256xf32>
    %797 = arith.addf %782, %796 : vector<4x256xf32>
    %cst_196 = arith.constant 0.13333334 : f32
    %798 = vector.broadcast %cst_196 : f32 to vector<1x256xf32>
    %799 = arith.mulf %84, %798 : vector<1x256xf32>
    %cst_197 = arith.constant 2.000000e+00 : f32
    %800 = vector.broadcast %cst_197 : f32 to vector<1x256xf32>
    %801 = arith.subf %799, %800 : vector<1x256xf32>
    %802 = math.absf %801 : vector<1x256xf32>
    %cst_198 = arith.constant 1.000000e+00 : f32
    %803 = vector.broadcast %cst_198 : f32 to vector<1x256xf32>
    %804 = arith.subf %803, %802 : vector<1x256xf32>
    %cst_199 = arith.constant 0.000000e+00 : f32
    %805 = vector.broadcast %cst_199 : f32 to vector<1x256xf32>
    %806 = arith.maximumf %804, %805 : vector<1x256xf32>
    %cst_200 = arith.constant 0.000000e+00 : f32
    %807 = vector.shape_cast %806 : vector<1x256xf32> to vector<1x256xf32>
    %808 = vector.broadcast %807 : vector<1x256xf32> to vector<16x256xf32>
    %809 = vector.broadcast %cst_200 : f32 to vector<16x256xf32>
    %810 = arith.select %90, %808, %809 : vector<16x256xi1>, vector<16x256xf32>
    %cst_201 = arith.constant dense<0.000000e+00> : vector<4x256xf32>
    %811 = tpu.matmul %768, %810, %cst_201 {dimension_numbers = #tpu.dot_dimension_numbers<[1], [0], [0], [1], [0, 0, 1, 1], [], []>} : vector<4x16xf32>, vector<16x256xf32>, vector<4x256xf32> -> vector<4x256xf32>
    %812 = arith.addf %797, %811 : vector<4x256xf32>
    %c0_i32_202 = arith.constant 0 : i32
    %813 = vector.broadcast %c0_i32_202 : i32 to vector<1x256xi32>
    %814 = arith.cmpi sge, %82, %813 : vector<1x256xi32>
    %c3_i32_203 = arith.constant 3 : i32
    %815 = vector.broadcast %c3_i32_203 : i32 to vector<1x256xi32>
    %816 = arith.cmpi slt, %82, %815 : vector<1x256xi32>
    %817 = arith.andi %814, %816 : vector<1x256xi1>
    %cst_204 = arith.constant 0.000000e+00 : f32
    %818 = vector.shape_cast %817 : vector<1x256xi1> to vector<1x256xi1>
    %819 = vector.broadcast %818 : vector<1x256xi1> to vector<4x256xi1>
    %820 = vector.broadcast %cst_204 : f32 to vector<4x256xf32>
    %821 = arith.select %819, %179, %820 : vector<4x256xi1>, vector<4x256xf32>
    %cst_205 = arith.constant 0.333333343 : f32
    %822 = vector.broadcast %cst_205 : f32 to vector<4x256xf32>
    %823 = arith.mulf %821, %822 : vector<4x256xf32>
    %cst_206 = arith.constant dense<0.000000e+00> : vector<4x16xf32>
    %824 = tpu.matmul %823, %93, %cst_206 {dimension_numbers = #tpu.dot_dimension_numbers<[1], [1], [0], [0], [0, 0, 1, 0], [], []>} : vector<4x256xf32>, vector<16x256xf32>, vector<4x16xf32> -> vector<4x16xf32>
    %c2_i32 = arith.constant 2 : i32
    %825 = vector.broadcast %c2_i32 : i32 to vector<1x256xi32>
    %826 = arith.cmpi sge, %82, %825 : vector<1x256xi32>
    %c5_i32_207 = arith.constant 5 : i32
    %827 = vector.broadcast %c5_i32_207 : i32 to vector<1x256xi32>
    %828 = arith.cmpi slt, %82, %827 : vector<1x256xi32>
    %829 = arith.andi %826, %828 : vector<1x256xi1>
    %cst_208 = arith.constant 0.000000e+00 : f32
    %830 = vector.shape_cast %829 : vector<1x256xi1> to vector<1x256xi1>
    %831 = vector.broadcast %830 : vector<1x256xi1> to vector<4x256xi1>
    %832 = vector.broadcast %cst_208 : f32 to vector<4x256xf32>
    %833 = arith.select %831, %179, %832 : vector<4x256xi1>, vector<4x256xf32>
    %cst_209 = arith.constant 0.333333343 : f32
    %834 = vector.broadcast %cst_209 : f32 to vector<4x256xf32>
    %835 = arith.mulf %833, %834 : vector<4x256xf32>
    %cst_210 = arith.constant dense<0.000000e+00> : vector<4x16xf32>
    %836 = tpu.matmul %835, %93, %cst_210 {dimension_numbers = #tpu.dot_dimension_numbers<[1], [1], [0], [0], [0, 0, 1, 0], [], []>} : vector<4x256xf32>, vector<16x256xf32>, vector<4x16xf32> -> vector<4x16xf32>
    %c4_i32_211 = arith.constant 4 : i32
    %837 = vector.broadcast %c4_i32_211 : i32 to vector<1x256xi32>
    %838 = arith.cmpi sge, %82, %837 : vector<1x256xi32>
    %c7_i32_212 = arith.constant 7 : i32
    %839 = vector.broadcast %c7_i32_212 : i32 to vector<1x256xi32>
    %840 = arith.cmpi slt, %82, %839 : vector<1x256xi32>
    %841 = arith.andi %838, %840 : vector<1x256xi1>
    %cst_213 = arith.constant 0.000000e+00 : f32
    %842 = vector.shape_cast %841 : vector<1x256xi1> to vector<1x256xi1>
    %843 = vector.broadcast %842 : vector<1x256xi1> to vector<4x256xi1>
    %844 = vector.broadcast %cst_213 : f32 to vector<4x256xf32>
    %845 = arith.select %843, %179, %844 : vector<4x256xi1>, vector<4x256xf32>
    %cst_214 = arith.constant 0.333333343 : f32
    %846 = vector.broadcast %cst_214 : f32 to vector<4x256xf32>
    %847 = arith.mulf %845, %846 : vector<4x256xf32>
    %cst_215 = arith.constant dense<0.000000e+00> : vector<4x16xf32>
    %848 = tpu.matmul %847, %93, %cst_215 {dimension_numbers = #tpu.dot_dimension_numbers<[1], [1], [0], [0], [0, 0, 1, 0], [], []>} : vector<4x256xf32>, vector<16x256xf32>, vector<4x16xf32> -> vector<4x16xf32>
    %c6_i32_216 = arith.constant 6 : i32
    %849 = vector.broadcast %c6_i32_216 : i32 to vector<1x256xi32>
    %850 = arith.cmpi sge, %82, %849 : vector<1x256xi32>
    %c10_i32_217 = arith.constant 10 : i32
    %851 = vector.broadcast %c10_i32_217 : i32 to vector<1x256xi32>
    %852 = arith.cmpi slt, %82, %851 : vector<1x256xi32>
    %853 = arith.andi %850, %852 : vector<1x256xi1>
    %cst_218 = arith.constant 0.000000e+00 : f32
    %854 = vector.shape_cast %853 : vector<1x256xi1> to vector<1x256xi1>
    %855 = vector.broadcast %854 : vector<1x256xi1> to vector<4x256xi1>
    %856 = vector.broadcast %cst_218 : f32 to vector<4x256xf32>
    %857 = arith.select %855, %179, %856 : vector<4x256xi1>, vector<4x256xf32>
    %cst_219 = arith.constant 2.500000e-01 : f32
    %858 = vector.broadcast %cst_219 : f32 to vector<4x256xf32>
    %859 = arith.mulf %857, %858 : vector<4x256xf32>
    %cst_220 = arith.constant dense<0.000000e+00> : vector<4x16xf32>
    %860 = tpu.matmul %859, %93, %cst_220 {dimension_numbers = #tpu.dot_dimension_numbers<[1], [1], [0], [0], [0, 0, 1, 0], [], []>} : vector<4x256xf32>, vector<16x256xf32>, vector<4x16xf32> -> vector<4x16xf32>
    %c9_i32_221 = arith.constant 9 : i32
    %861 = vector.broadcast %c9_i32_221 : i32 to vector<1x256xi32>
    %862 = arith.cmpi sge, %82, %861 : vector<1x256xi32>
    %c12_i32_222 = arith.constant 12 : i32
    %863 = vector.broadcast %c12_i32_222 : i32 to vector<1x256xi32>
    %864 = arith.cmpi slt, %82, %863 : vector<1x256xi32>
    %865 = arith.andi %862, %864 : vector<1x256xi1>
    %cst_223 = arith.constant 0.000000e+00 : f32
    %866 = vector.shape_cast %865 : vector<1x256xi1> to vector<1x256xi1>
    %867 = vector.broadcast %866 : vector<1x256xi1> to vector<4x256xi1>
    %868 = vector.broadcast %cst_223 : f32 to vector<4x256xf32>
    %869 = arith.select %867, %179, %868 : vector<4x256xi1>, vector<4x256xf32>
    %cst_224 = arith.constant 0.333333343 : f32
    %870 = vector.broadcast %cst_224 : f32 to vector<4x256xf32>
    %871 = arith.mulf %869, %870 : vector<4x256xf32>
    %cst_225 = arith.constant dense<0.000000e+00> : vector<4x16xf32>
    %872 = tpu.matmul %871, %93, %cst_225 {dimension_numbers = #tpu.dot_dimension_numbers<[1], [1], [0], [0], [0, 0, 1, 0], [], []>} : vector<4x256xf32>, vector<16x256xf32>, vector<4x16xf32> -> vector<4x16xf32>
    %c11_i32_226 = arith.constant 11 : i32
    %873 = vector.broadcast %c11_i32_226 : i32 to vector<1x256xi32>
    %874 = arith.cmpi sge, %82, %873 : vector<1x256xi32>
    %c14_i32_227 = arith.constant 14 : i32
    %875 = vector.broadcast %c14_i32_227 : i32 to vector<1x256xi32>
    %876 = arith.cmpi slt, %82, %875 : vector<1x256xi32>
    %877 = arith.andi %874, %876 : vector<1x256xi1>
    %cst_228 = arith.constant 0.000000e+00 : f32
    %878 = vector.shape_cast %877 : vector<1x256xi1> to vector<1x256xi1>
    %879 = vector.broadcast %878 : vector<1x256xi1> to vector<4x256xi1>
    %880 = vector.broadcast %cst_228 : f32 to vector<4x256xf32>
    %881 = arith.select %879, %179, %880 : vector<4x256xi1>, vector<4x256xf32>
    %cst_229 = arith.constant 0.333333343 : f32
    %882 = vector.broadcast %cst_229 : f32 to vector<4x256xf32>
    %883 = arith.mulf %881, %882 : vector<4x256xf32>
    %cst_230 = arith.constant dense<0.000000e+00> : vector<4x16xf32>
    %884 = tpu.matmul %883, %93, %cst_230 {dimension_numbers = #tpu.dot_dimension_numbers<[1], [1], [0], [0], [0, 0, 1, 0], [], []>} : vector<4x256xf32>, vector<16x256xf32>, vector<4x16xf32> -> vector<4x16xf32>
    %c13_i32_231 = arith.constant 13 : i32
    %885 = vector.broadcast %c13_i32_231 : i32 to vector<1x256xi32>
    %886 = arith.cmpi sge, %82, %885 : vector<1x256xi32>
    %c16_i32_232 = arith.constant 16 : i32
    %887 = vector.broadcast %c16_i32_232 : i32 to vector<1x256xi32>
    %888 = arith.cmpi slt, %82, %887 : vector<1x256xi32>
    %889 = arith.andi %886, %888 : vector<1x256xi1>
    %cst_233 = arith.constant 0.000000e+00 : f32
    %890 = vector.shape_cast %889 : vector<1x256xi1> to vector<1x256xi1>
    %891 = vector.broadcast %890 : vector<1x256xi1> to vector<4x256xi1>
    %892 = vector.broadcast %cst_233 : f32 to vector<4x256xf32>
    %893 = arith.select %891, %179, %892 : vector<4x256xi1>, vector<4x256xf32>
    %cst_234 = arith.constant 0.333333343 : f32
    %894 = vector.broadcast %cst_234 : f32 to vector<4x256xf32>
    %895 = arith.mulf %893, %894 : vector<4x256xf32>
    %cst_235 = arith.constant dense<0.000000e+00> : vector<4x16xf32>
    %896 = tpu.matmul %895, %93, %cst_235 {dimension_numbers = #tpu.dot_dimension_numbers<[1], [1], [0], [0], [0, 0, 1, 0], [], []>} : vector<4x256xf32>, vector<16x256xf32>, vector<4x16xf32> -> vector<4x16xf32>
    %cst_236 = arith.constant 0.000000e+00 : f32
    %897 = vector.broadcast %cst_236 : f32 to vector<4x1xf32>
    %898 = tpu.concatenate %897, %824, %897 in 1 : vector<4x1xf32>, vector<4x16xf32>, vector<4x1xf32> -> vector<4x18xf32>
    %899 = tpu.concatenate %897, %836, %897 in 1 : vector<4x1xf32>, vector<4x16xf32>, vector<4x1xf32> -> vector<4x18xf32>
    %900 = tpu.concatenate %897, %848, %897 in 1 : vector<4x1xf32>, vector<4x16xf32>, vector<4x1xf32> -> vector<4x18xf32>
    %901 = tpu.concatenate %897, %860, %897 in 1 : vector<4x1xf32>, vector<4x16xf32>, vector<4x1xf32> -> vector<4x18xf32>
    %902 = tpu.concatenate %897, %872, %897 in 1 : vector<4x1xf32>, vector<4x16xf32>, vector<4x1xf32> -> vector<4x18xf32>
    %903 = tpu.concatenate %897, %884, %897 in 1 : vector<4x1xf32>, vector<4x16xf32>, vector<4x1xf32> -> vector<4x18xf32>
    %904 = tpu.concatenate %897, %896, %897 in 1 : vector<4x1xf32>, vector<4x16xf32>, vector<4x1xf32> -> vector<4x18xf32>
    %905 = vector.extract_strided_slice %898 {offsets = [0, 0], sizes = [4, 16], strides = [1, 1]} : vector<4x18xf32> to vector<4x16xf32>
    %906 = vector.extract_strided_slice %899 {offsets = [0, 0], sizes = [4, 16], strides = [1, 1]} : vector<4x18xf32> to vector<4x16xf32>
    %907 = vector.extract_strided_slice %900 {offsets = [0, 0], sizes = [4, 16], strides = [1, 1]} : vector<4x18xf32> to vector<4x16xf32>
    %908 = vector.extract_strided_slice %898 {offsets = [0, 1], sizes = [4, 16], strides = [1, 1]} : vector<4x18xf32> to vector<4x16xf32>
    %909 = vector.extract_strided_slice %899 {offsets = [0, 1], sizes = [4, 16], strides = [1, 1]} : vector<4x18xf32> to vector<4x16xf32>
    %910 = vector.extract_strided_slice %900 {offsets = [0, 1], sizes = [4, 16], strides = [1, 1]} : vector<4x18xf32> to vector<4x16xf32>
    %911 = vector.extract_strided_slice %898 {offsets = [0, 2], sizes = [4, 16], strides = [1, 1]} : vector<4x18xf32> to vector<4x16xf32>
    %912 = vector.extract_strided_slice %899 {offsets = [0, 2], sizes = [4, 16], strides = [1, 1]} : vector<4x18xf32> to vector<4x16xf32>
    %913 = vector.extract_strided_slice %900 {offsets = [0, 2], sizes = [4, 16], strides = [1, 1]} : vector<4x18xf32> to vector<4x16xf32>
    %914 = tpu.concatenate %905, %906, %907, %908, %909, %910, %911, %912, %913 in 0 : vector<4x16xf32>, vector<4x16xf32>, vector<4x16xf32>, vector<4x16xf32>, vector<4x16xf32>, vector<4x16xf32>, vector<4x16xf32>, vector<4x16xf32>, vector<4x16xf32> -> vector<36x16xf32>
    %cst_237 = arith.constant dense<0.000000e+00> : vector<4x16xf32>
    %915 = tpu.matmul %6, %914, %cst_237 {dimension_numbers = #tpu.dot_dimension_numbers<[1], [0], [0], [1], [0, 0, 1, 1], [], []>} : vector<4x36xf32>, vector<36x16xf32>, vector<4x16xf32> -> vector<4x16xf32>
    %916 = vector.extract_strided_slice %899 {offsets = [0, 0], sizes = [4, 16], strides = [1, 1]} : vector<4x18xf32> to vector<4x16xf32>
    %917 = vector.extract_strided_slice %900 {offsets = [0, 0], sizes = [4, 16], strides = [1, 1]} : vector<4x18xf32> to vector<4x16xf32>
    %918 = vector.extract_strided_slice %901 {offsets = [0, 0], sizes = [4, 16], strides = [1, 1]} : vector<4x18xf32> to vector<4x16xf32>
    %919 = vector.extract_strided_slice %899 {offsets = [0, 1], sizes = [4, 16], strides = [1, 1]} : vector<4x18xf32> to vector<4x16xf32>
    %920 = vector.extract_strided_slice %900 {offsets = [0, 1], sizes = [4, 16], strides = [1, 1]} : vector<4x18xf32> to vector<4x16xf32>
    %921 = vector.extract_strided_slice %901 {offsets = [0, 1], sizes = [4, 16], strides = [1, 1]} : vector<4x18xf32> to vector<4x16xf32>
    %922 = vector.extract_strided_slice %899 {offsets = [0, 2], sizes = [4, 16], strides = [1, 1]} : vector<4x18xf32> to vector<4x16xf32>
    %923 = vector.extract_strided_slice %900 {offsets = [0, 2], sizes = [4, 16], strides = [1, 1]} : vector<4x18xf32> to vector<4x16xf32>
    %924 = vector.extract_strided_slice %901 {offsets = [0, 2], sizes = [4, 16], strides = [1, 1]} : vector<4x18xf32> to vector<4x16xf32>
    %925 = tpu.concatenate %916, %917, %918, %919, %920, %921, %922, %923, %924 in 0 : vector<4x16xf32>, vector<4x16xf32>, vector<4x16xf32>, vector<4x16xf32>, vector<4x16xf32>, vector<4x16xf32>, vector<4x16xf32>, vector<4x16xf32>, vector<4x16xf32> -> vector<36x16xf32>
    %cst_238 = arith.constant dense<0.000000e+00> : vector<4x16xf32>
    %926 = tpu.matmul %6, %925, %cst_238 {dimension_numbers = #tpu.dot_dimension_numbers<[1], [0], [0], [1], [0, 0, 1, 1], [], []>} : vector<4x36xf32>, vector<36x16xf32>, vector<4x16xf32> -> vector<4x16xf32>
    %927 = vector.extract_strided_slice %900 {offsets = [0, 0], sizes = [4, 16], strides = [1, 1]} : vector<4x18xf32> to vector<4x16xf32>
    %928 = vector.extract_strided_slice %901 {offsets = [0, 0], sizes = [4, 16], strides = [1, 1]} : vector<4x18xf32> to vector<4x16xf32>
    %929 = vector.extract_strided_slice %902 {offsets = [0, 0], sizes = [4, 16], strides = [1, 1]} : vector<4x18xf32> to vector<4x16xf32>
    %930 = vector.extract_strided_slice %900 {offsets = [0, 1], sizes = [4, 16], strides = [1, 1]} : vector<4x18xf32> to vector<4x16xf32>
    %931 = vector.extract_strided_slice %901 {offsets = [0, 1], sizes = [4, 16], strides = [1, 1]} : vector<4x18xf32> to vector<4x16xf32>
    %932 = vector.extract_strided_slice %902 {offsets = [0, 1], sizes = [4, 16], strides = [1, 1]} : vector<4x18xf32> to vector<4x16xf32>
    %933 = vector.extract_strided_slice %900 {offsets = [0, 2], sizes = [4, 16], strides = [1, 1]} : vector<4x18xf32> to vector<4x16xf32>
    %934 = vector.extract_strided_slice %901 {offsets = [0, 2], sizes = [4, 16], strides = [1, 1]} : vector<4x18xf32> to vector<4x16xf32>
    %935 = vector.extract_strided_slice %902 {offsets = [0, 2], sizes = [4, 16], strides = [1, 1]} : vector<4x18xf32> to vector<4x16xf32>
    %936 = tpu.concatenate %927, %928, %929, %930, %931, %932, %933, %934, %935 in 0 : vector<4x16xf32>, vector<4x16xf32>, vector<4x16xf32>, vector<4x16xf32>, vector<4x16xf32>, vector<4x16xf32>, vector<4x16xf32>, vector<4x16xf32>, vector<4x16xf32> -> vector<36x16xf32>
    %cst_239 = arith.constant dense<0.000000e+00> : vector<4x16xf32>
    %937 = tpu.matmul %6, %936, %cst_239 {dimension_numbers = #tpu.dot_dimension_numbers<[1], [0], [0], [1], [0, 0, 1, 1], [], []>} : vector<4x36xf32>, vector<36x16xf32>, vector<4x16xf32> -> vector<4x16xf32>
    %938 = vector.extract_strided_slice %901 {offsets = [0, 0], sizes = [4, 16], strides = [1, 1]} : vector<4x18xf32> to vector<4x16xf32>
    %939 = vector.extract_strided_slice %902 {offsets = [0, 0], sizes = [4, 16], strides = [1, 1]} : vector<4x18xf32> to vector<4x16xf32>
    %940 = vector.extract_strided_slice %903 {offsets = [0, 0], sizes = [4, 16], strides = [1, 1]} : vector<4x18xf32> to vector<4x16xf32>
    %941 = vector.extract_strided_slice %901 {offsets = [0, 1], sizes = [4, 16], strides = [1, 1]} : vector<4x18xf32> to vector<4x16xf32>
    %942 = vector.extract_strided_slice %902 {offsets = [0, 1], sizes = [4, 16], strides = [1, 1]} : vector<4x18xf32> to vector<4x16xf32>
    %943 = vector.extract_strided_slice %903 {offsets = [0, 1], sizes = [4, 16], strides = [1, 1]} : vector<4x18xf32> to vector<4x16xf32>
    %944 = vector.extract_strided_slice %901 {offsets = [0, 2], sizes = [4, 16], strides = [1, 1]} : vector<4x18xf32> to vector<4x16xf32>
    %945 = vector.extract_strided_slice %902 {offsets = [0, 2], sizes = [4, 16], strides = [1, 1]} : vector<4x18xf32> to vector<4x16xf32>
    %946 = vector.extract_strided_slice %903 {offsets = [0, 2], sizes = [4, 16], strides = [1, 1]} : vector<4x18xf32> to vector<4x16xf32>
    %947 = tpu.concatenate %938, %939, %940, %941, %942, %943, %944, %945, %946 in 0 : vector<4x16xf32>, vector<4x16xf32>, vector<4x16xf32>, vector<4x16xf32>, vector<4x16xf32>, vector<4x16xf32>, vector<4x16xf32>, vector<4x16xf32>, vector<4x16xf32> -> vector<36x16xf32>
    %cst_240 = arith.constant dense<0.000000e+00> : vector<4x16xf32>
    %948 = tpu.matmul %6, %947, %cst_240 {dimension_numbers = #tpu.dot_dimension_numbers<[1], [0], [0], [1], [0, 0, 1, 1], [], []>} : vector<4x36xf32>, vector<36x16xf32>, vector<4x16xf32> -> vector<4x16xf32>
    %949 = vector.extract_strided_slice %902 {offsets = [0, 0], sizes = [4, 16], strides = [1, 1]} : vector<4x18xf32> to vector<4x16xf32>
    %950 = vector.extract_strided_slice %903 {offsets = [0, 0], sizes = [4, 16], strides = [1, 1]} : vector<4x18xf32> to vector<4x16xf32>
    %951 = vector.extract_strided_slice %904 {offsets = [0, 0], sizes = [4, 16], strides = [1, 1]} : vector<4x18xf32> to vector<4x16xf32>
    %952 = vector.extract_strided_slice %902 {offsets = [0, 1], sizes = [4, 16], strides = [1, 1]} : vector<4x18xf32> to vector<4x16xf32>
    %953 = vector.extract_strided_slice %903 {offsets = [0, 1], sizes = [4, 16], strides = [1, 1]} : vector<4x18xf32> to vector<4x16xf32>
    %954 = vector.extract_strided_slice %904 {offsets = [0, 1], sizes = [4, 16], strides = [1, 1]} : vector<4x18xf32> to vector<4x16xf32>
    %955 = vector.extract_strided_slice %902 {offsets = [0, 2], sizes = [4, 16], strides = [1, 1]} : vector<4x18xf32> to vector<4x16xf32>
    %956 = vector.extract_strided_slice %903 {offsets = [0, 2], sizes = [4, 16], strides = [1, 1]} : vector<4x18xf32> to vector<4x16xf32>
    %957 = vector.extract_strided_slice %904 {offsets = [0, 2], sizes = [4, 16], strides = [1, 1]} : vector<4x18xf32> to vector<4x16xf32>
    %958 = tpu.concatenate %949, %950, %951, %952, %953, %954, %955, %956, %957 in 0 : vector<4x16xf32>, vector<4x16xf32>, vector<4x16xf32>, vector<4x16xf32>, vector<4x16xf32>, vector<4x16xf32>, vector<4x16xf32>, vector<4x16xf32>, vector<4x16xf32> -> vector<36x16xf32>
    %cst_241 = arith.constant dense<0.000000e+00> : vector<4x16xf32>
    %959 = tpu.matmul %6, %958, %cst_241 {dimension_numbers = #tpu.dot_dimension_numbers<[1], [0], [0], [1], [0, 0, 1, 1], [], []>} : vector<4x36xf32>, vector<36x16xf32>, vector<4x16xf32> -> vector<4x16xf32>
    %cst_242 = arith.constant 0.266666681 : f32
    %960 = vector.broadcast %cst_242 : f32 to vector<1x256xf32>
    %961 = arith.mulf %84, %960 : vector<1x256xf32>
    %cst_243 = arith.constant 0.000000e+00 : f32
    %962 = vector.broadcast %cst_243 : f32 to vector<1x256xf32>
    %963 = arith.subf %961, %962 : vector<1x256xf32>
    %964 = math.absf %963 : vector<1x256xf32>
    %cst_244 = arith.constant 1.000000e+00 : f32
    %965 = vector.broadcast %cst_244 : f32 to vector<1x256xf32>
    %966 = arith.subf %965, %964 : vector<1x256xf32>
    %cst_245 = arith.constant 0.000000e+00 : f32
    %967 = vector.broadcast %cst_245 : f32 to vector<1x256xf32>
    %968 = arith.maximumf %966, %967 : vector<1x256xf32>
    %cst_246 = arith.constant 0.000000e+00 : f32
    %969 = vector.shape_cast %968 : vector<1x256xf32> to vector<1x256xf32>
    %970 = vector.broadcast %969 : vector<1x256xf32> to vector<16x256xf32>
    %971 = vector.broadcast %cst_246 : f32 to vector<16x256xf32>
    %972 = arith.select %90, %970, %971 : vector<16x256xi1>, vector<16x256xf32>
    %cst_247 = arith.constant dense<0.000000e+00> : vector<4x256xf32>
    %973 = tpu.matmul %915, %972, %cst_247 {dimension_numbers = #tpu.dot_dimension_numbers<[1], [0], [0], [1], [0, 0, 1, 1], [], []>} : vector<4x16xf32>, vector<16x256xf32>, vector<4x256xf32> -> vector<4x256xf32>
    %cst_248 = arith.constant 0.266666681 : f32
    %974 = vector.broadcast %cst_248 : f32 to vector<1x256xf32>
    %975 = arith.mulf %84, %974 : vector<1x256xf32>
    %cst_249 = arith.constant 1.000000e+00 : f32
    %976 = vector.broadcast %cst_249 : f32 to vector<1x256xf32>
    %977 = arith.subf %975, %976 : vector<1x256xf32>
    %978 = math.absf %977 : vector<1x256xf32>
    %cst_250 = arith.constant 1.000000e+00 : f32
    %979 = vector.broadcast %cst_250 : f32 to vector<1x256xf32>
    %980 = arith.subf %979, %978 : vector<1x256xf32>
    %cst_251 = arith.constant 0.000000e+00 : f32
    %981 = vector.broadcast %cst_251 : f32 to vector<1x256xf32>
    %982 = arith.maximumf %980, %981 : vector<1x256xf32>
    %cst_252 = arith.constant 0.000000e+00 : f32
    %983 = vector.shape_cast %982 : vector<1x256xf32> to vector<1x256xf32>
    %984 = vector.broadcast %983 : vector<1x256xf32> to vector<16x256xf32>
    %985 = vector.broadcast %cst_252 : f32 to vector<16x256xf32>
    %986 = arith.select %90, %984, %985 : vector<16x256xi1>, vector<16x256xf32>
    %cst_253 = arith.constant dense<0.000000e+00> : vector<4x256xf32>
    %987 = tpu.matmul %926, %986, %cst_253 {dimension_numbers = #tpu.dot_dimension_numbers<[1], [0], [0], [1], [0, 0, 1, 1], [], []>} : vector<4x16xf32>, vector<16x256xf32>, vector<4x256xf32> -> vector<4x256xf32>
    %988 = arith.addf %973, %987 : vector<4x256xf32>
    %cst_254 = arith.constant 0.266666681 : f32
    %989 = vector.broadcast %cst_254 : f32 to vector<1x256xf32>
    %990 = arith.mulf %84, %989 : vector<1x256xf32>
    %cst_255 = arith.constant 2.000000e+00 : f32
    %991 = vector.broadcast %cst_255 : f32 to vector<1x256xf32>
    %992 = arith.subf %990, %991 : vector<1x256xf32>
    %993 = math.absf %992 : vector<1x256xf32>
    %cst_256 = arith.constant 1.000000e+00 : f32
    %994 = vector.broadcast %cst_256 : f32 to vector<1x256xf32>
    %995 = arith.subf %994, %993 : vector<1x256xf32>
    %cst_257 = arith.constant 0.000000e+00 : f32
    %996 = vector.broadcast %cst_257 : f32 to vector<1x256xf32>
    %997 = arith.maximumf %995, %996 : vector<1x256xf32>
    %cst_258 = arith.constant 0.000000e+00 : f32
    %998 = vector.shape_cast %997 : vector<1x256xf32> to vector<1x256xf32>
    %999 = vector.broadcast %998 : vector<1x256xf32> to vector<16x256xf32>
    %1000 = vector.broadcast %cst_258 : f32 to vector<16x256xf32>
    %1001 = arith.select %90, %999, %1000 : vector<16x256xi1>, vector<16x256xf32>
    %cst_259 = arith.constant dense<0.000000e+00> : vector<4x256xf32>
    %1002 = tpu.matmul %937, %1001, %cst_259 {dimension_numbers = #tpu.dot_dimension_numbers<[1], [0], [0], [1], [0, 0, 1, 1], [], []>} : vector<4x16xf32>, vector<16x256xf32>, vector<4x256xf32> -> vector<4x256xf32>
    %1003 = arith.addf %988, %1002 : vector<4x256xf32>
    %cst_260 = arith.constant 0.266666681 : f32
    %1004 = vector.broadcast %cst_260 : f32 to vector<1x256xf32>
    %1005 = arith.mulf %84, %1004 : vector<1x256xf32>
    %cst_261 = arith.constant 3.000000e+00 : f32
    %1006 = vector.broadcast %cst_261 : f32 to vector<1x256xf32>
    %1007 = arith.subf %1005, %1006 : vector<1x256xf32>
    %1008 = math.absf %1007 : vector<1x256xf32>
    %cst_262 = arith.constant 1.000000e+00 : f32
    %1009 = vector.broadcast %cst_262 : f32 to vector<1x256xf32>
    %1010 = arith.subf %1009, %1008 : vector<1x256xf32>
    %cst_263 = arith.constant 0.000000e+00 : f32
    %1011 = vector.broadcast %cst_263 : f32 to vector<1x256xf32>
    %1012 = arith.maximumf %1010, %1011 : vector<1x256xf32>
    %cst_264 = arith.constant 0.000000e+00 : f32
    %1013 = vector.shape_cast %1012 : vector<1x256xf32> to vector<1x256xf32>
    %1014 = vector.broadcast %1013 : vector<1x256xf32> to vector<16x256xf32>
    %1015 = vector.broadcast %cst_264 : f32 to vector<16x256xf32>
    %1016 = arith.select %90, %1014, %1015 : vector<16x256xi1>, vector<16x256xf32>
    %cst_265 = arith.constant dense<0.000000e+00> : vector<4x256xf32>
    %1017 = tpu.matmul %948, %1016, %cst_265 {dimension_numbers = #tpu.dot_dimension_numbers<[1], [0], [0], [1], [0, 0, 1, 1], [], []>} : vector<4x16xf32>, vector<16x256xf32>, vector<4x256xf32> -> vector<4x256xf32>
    %1018 = arith.addf %1003, %1017 : vector<4x256xf32>
    %cst_266 = arith.constant 0.266666681 : f32
    %1019 = vector.broadcast %cst_266 : f32 to vector<1x256xf32>
    %1020 = arith.mulf %84, %1019 : vector<1x256xf32>
    %cst_267 = arith.constant 4.000000e+00 : f32
    %1021 = vector.broadcast %cst_267 : f32 to vector<1x256xf32>
    %1022 = arith.subf %1020, %1021 : vector<1x256xf32>
    %1023 = math.absf %1022 : vector<1x256xf32>
    %cst_268 = arith.constant 1.000000e+00 : f32
    %1024 = vector.broadcast %cst_268 : f32 to vector<1x256xf32>
    %1025 = arith.subf %1024, %1023 : vector<1x256xf32>
    %cst_269 = arith.constant 0.000000e+00 : f32
    %1026 = vector.broadcast %cst_269 : f32 to vector<1x256xf32>
    %1027 = arith.maximumf %1025, %1026 : vector<1x256xf32>
    %cst_270 = arith.constant 0.000000e+00 : f32
    %1028 = vector.shape_cast %1027 : vector<1x256xf32> to vector<1x256xf32>
    %1029 = vector.broadcast %1028 : vector<1x256xf32> to vector<16x256xf32>
    %1030 = vector.broadcast %cst_270 : f32 to vector<16x256xf32>
    %1031 = arith.select %90, %1029, %1030 : vector<16x256xi1>, vector<16x256xf32>
    %cst_271 = arith.constant dense<0.000000e+00> : vector<4x256xf32>
    %1032 = tpu.matmul %959, %1031, %cst_271 {dimension_numbers = #tpu.dot_dimension_numbers<[1], [0], [0], [1], [0, 0, 1, 1], [], []>} : vector<4x16xf32>, vector<16x256xf32>, vector<4x256xf32> -> vector<4x256xf32>
    %1033 = arith.addf %1018, %1032 : vector<4x256xf32>
    %1034 = arith.addf %617, %223 : vector<4x256xf32>
    %1035 = arith.addf %281, %669 : vector<4x256xf32>
    %1036 = arith.addf %409, %812 : vector<4x256xf32>
    %1037 = arith.addf %597, %1033 : vector<4x256xf32>
    %1038 = tpu.concatenate %1034, %1035, %1036, %1037 in 0 : vector<4x256xf32>, vector<4x256xf32>, vector<4x256xf32>, vector<4x256xf32> -> vector<16x256xf32>
    %1039 = vector.extract_strided_slice %1038 {offsets = [0, 239], sizes = [16, 17], strides = [1, 1]} : vector<16x256xf32> to vector<16x17xf32>
    %1040 = vector.extract_strided_slice %1038 {offsets = [0, 0], sizes = [16, 239], strides = [1, 1]} : vector<16x256xf32> to vector<16x239xf32>
    %1041 = tpu.concatenate %1039, %1040 in 1 : vector<16x17xf32>, vector<16x239xf32> -> vector<16x256xf32>
    %cst_272 = arith.constant 0.000000e+00 : f32
    %1042 = vector.shape_cast %101 : vector<1x256xi1> to vector<1x256xi1>
    %1043 = vector.broadcast %1042 : vector<1x256xi1> to vector<16x256xi1>
    %1044 = vector.broadcast %cst_272 : f32 to vector<16x256xf32>
    %1045 = arith.select %1043, %1041, %1044 : vector<16x256xi1>, vector<16x256xf32>
    %1046 = vector.extract_strided_slice %1038 {offsets = [0, 240], sizes = [16, 16], strides = [1, 1]} : vector<16x256xf32> to vector<16x16xf32>
    %1047 = vector.extract_strided_slice %1038 {offsets = [0, 0], sizes = [16, 240], strides = [1, 1]} : vector<16x256xf32> to vector<16x240xf32>
    %1048 = tpu.concatenate %1046, %1047 in 1 : vector<16x16xf32>, vector<16x240xf32> -> vector<16x256xf32>
    %cst_273 = arith.constant 0.000000e+00 : f32
    %1049 = vector.shape_cast %110 : vector<1x256xi1> to vector<1x256xi1>
    %1050 = vector.broadcast %1049 : vector<1x256xi1> to vector<16x256xi1>
    %1051 = vector.broadcast %cst_273 : f32 to vector<16x256xf32>
    %1052 = arith.select %1050, %1048, %1051 : vector<16x256xi1>, vector<16x256xf32>
    %1053 = vector.extract_strided_slice %1038 {offsets = [0, 241], sizes = [16, 15], strides = [1, 1]} : vector<16x256xf32> to vector<16x15xf32>
    %1054 = vector.extract_strided_slice %1038 {offsets = [0, 0], sizes = [16, 241], strides = [1, 1]} : vector<16x256xf32> to vector<16x241xf32>
    %1055 = tpu.concatenate %1053, %1054 in 1 : vector<16x15xf32>, vector<16x241xf32> -> vector<16x256xf32>
    %cst_274 = arith.constant 0.000000e+00 : f32
    %1056 = vector.shape_cast %122 : vector<1x256xi1> to vector<1x256xi1>
    %1057 = vector.broadcast %1056 : vector<1x256xi1> to vector<16x256xi1>
    %1058 = vector.broadcast %cst_274 : f32 to vector<16x256xf32>
    %1059 = arith.select %1057, %1055, %1058 : vector<16x256xi1>, vector<16x256xf32>
    %1060 = vector.extract_strided_slice %1038 {offsets = [0, 255], sizes = [16, 1], strides = [1, 1]} : vector<16x256xf32> to vector<16x1xf32>
    %1061 = vector.extract_strided_slice %1038 {offsets = [0, 0], sizes = [16, 255], strides = [1, 1]} : vector<16x256xf32> to vector<16x255xf32>
    %1062 = tpu.concatenate %1060, %1061 in 1 : vector<16x1xf32>, vector<16x255xf32> -> vector<16x256xf32>
    %cst_275 = arith.constant 0.000000e+00 : f32
    %1063 = vector.shape_cast %131 : vector<1x256xi1> to vector<1x256xi1>
    %1064 = vector.broadcast %1063 : vector<1x256xi1> to vector<16x256xi1>
    %1065 = vector.broadcast %cst_275 : f32 to vector<16x256xf32>
    %1066 = arith.select %1064, %1062, %1065 : vector<16x256xi1>, vector<16x256xf32>
    %1067 = vector.extract_strided_slice %1038 {offsets = [0, 1], sizes = [16, 255], strides = [1, 1]} : vector<16x256xf32> to vector<16x255xf32>
    %1068 = vector.extract_strided_slice %1038 {offsets = [0, 0], sizes = [16, 1], strides = [1, 1]} : vector<16x256xf32> to vector<16x1xf32>
    %1069 = tpu.concatenate %1067, %1068 in 1 : vector<16x255xf32>, vector<16x1xf32> -> vector<16x256xf32>
    %cst_276 = arith.constant 0.000000e+00 : f32
    %1070 = vector.shape_cast %140 : vector<1x256xi1> to vector<1x256xi1>
    %1071 = vector.broadcast %1070 : vector<1x256xi1> to vector<16x256xi1>
    %1072 = vector.broadcast %cst_276 : f32 to vector<16x256xf32>
    %1073 = arith.select %1071, %1069, %1072 : vector<16x256xi1>, vector<16x256xf32>
    %1074 = vector.extract_strided_slice %1038 {offsets = [0, 15], sizes = [16, 241], strides = [1, 1]} : vector<16x256xf32> to vector<16x241xf32>
    %1075 = vector.extract_strided_slice %1038 {offsets = [0, 0], sizes = [16, 15], strides = [1, 1]} : vector<16x256xf32> to vector<16x15xf32>
    %1076 = tpu.concatenate %1074, %1075 in 1 : vector<16x241xf32>, vector<16x15xf32> -> vector<16x256xf32>
    %cst_277 = arith.constant 0.000000e+00 : f32
    %1077 = vector.shape_cast %152 : vector<1x256xi1> to vector<1x256xi1>
    %1078 = vector.broadcast %1077 : vector<1x256xi1> to vector<16x256xi1>
    %1079 = vector.broadcast %cst_277 : f32 to vector<16x256xf32>
    %1080 = arith.select %1078, %1076, %1079 : vector<16x256xi1>, vector<16x256xf32>
    %1081 = vector.extract_strided_slice %1038 {offsets = [0, 16], sizes = [16, 240], strides = [1, 1]} : vector<16x256xf32> to vector<16x240xf32>
    %1082 = vector.extract_strided_slice %1038 {offsets = [0, 0], sizes = [16, 16], strides = [1, 1]} : vector<16x256xf32> to vector<16x16xf32>
    %1083 = tpu.concatenate %1081, %1082 in 1 : vector<16x240xf32>, vector<16x16xf32> -> vector<16x256xf32>
    %cst_278 = arith.constant 0.000000e+00 : f32
    %1084 = vector.shape_cast %161 : vector<1x256xi1> to vector<1x256xi1>
    %1085 = vector.broadcast %1084 : vector<1x256xi1> to vector<16x256xi1>
    %1086 = vector.broadcast %cst_278 : f32 to vector<16x256xf32>
    %1087 = arith.select %1085, %1083, %1086 : vector<16x256xi1>, vector<16x256xf32>
    %1088 = vector.extract_strided_slice %1038 {offsets = [0, 17], sizes = [16, 239], strides = [1, 1]} : vector<16x256xf32> to vector<16x239xf32>
    %1089 = vector.extract_strided_slice %1038 {offsets = [0, 0], sizes = [16, 17], strides = [1, 1]} : vector<16x256xf32> to vector<16x17xf32>
    %1090 = tpu.concatenate %1088, %1089 in 1 : vector<16x239xf32>, vector<16x17xf32> -> vector<16x256xf32>
    %cst_279 = arith.constant 0.000000e+00 : f32
    %1091 = vector.shape_cast %173 : vector<1x256xi1> to vector<1x256xi1>
    %1092 = vector.broadcast %1091 : vector<1x256xi1> to vector<16x256xi1>
    %1093 = vector.broadcast %cst_279 : f32 to vector<16x256xf32>
    %1094 = arith.select %1092, %1090, %1093 : vector<16x256xi1>, vector<16x256xf32>
    %1095 = tpu.concatenate %1045, %1052, %1059, %1066, %1038, %1073, %1080, %1087, %1094 in 0 : vector<16x256xf32>, vector<16x256xf32>, vector<16x256xf32>, vector<16x256xf32>, vector<16x256xf32>, vector<16x256xf32>, vector<16x256xf32>, vector<16x256xf32>, vector<16x256xf32> -> vector<144x256xf32>
    %cst_280 = arith.constant dense<0.000000e+00> : vector<4x256xf32>
    %1096 = tpu.matmul %7, %1095, %cst_280 {dimension_numbers = #tpu.dot_dimension_numbers<[1], [0], [0], [1], [0, 0, 1, 1], [], []>} : vector<4x144xf32>, vector<144x256xf32>, vector<4x256xf32> -> vector<4x256xf32>
    %1097 = arith.negf %1096 : vector<4x256xf32>
    %1098 = math.exp %1097 : vector<4x256xf32>
    %cst_281 = arith.constant 1.000000e+00 : f32
    %1099 = vector.broadcast %cst_281 : f32 to vector<4x256xf32>
    %1100 = arith.addf %1099, %1098 : vector<4x256xf32>
    %1101 = arith.divf %1099, %1100 : vector<4x256xf32>
    %1102 = arith.mulf %1101, %179 : vector<4x256xf32>
    %1103 = vector.extract_strided_slice %1102 {offsets = [0, 239], sizes = [4, 17], strides = [1, 1]} : vector<4x256xf32> to vector<4x17xf32>
    %1104 = vector.extract_strided_slice %1102 {offsets = [0, 0], sizes = [4, 239], strides = [1, 1]} : vector<4x256xf32> to vector<4x239xf32>
    %1105 = tpu.concatenate %1103, %1104 in 1 : vector<4x17xf32>, vector<4x239xf32> -> vector<4x256xf32>
    %cst_282 = arith.constant 0.000000e+00 : f32
    %1106 = vector.shape_cast %101 : vector<1x256xi1> to vector<1x256xi1>
    %1107 = vector.broadcast %1106 : vector<1x256xi1> to vector<4x256xi1>
    %1108 = vector.broadcast %cst_282 : f32 to vector<4x256xf32>
    %1109 = arith.select %1107, %1105, %1108 : vector<4x256xi1>, vector<4x256xf32>
    %1110 = vector.extract_strided_slice %1102 {offsets = [0, 240], sizes = [4, 16], strides = [1, 1]} : vector<4x256xf32> to vector<4x16xf32>
    %1111 = vector.extract_strided_slice %1102 {offsets = [0, 0], sizes = [4, 240], strides = [1, 1]} : vector<4x256xf32> to vector<4x240xf32>
    %1112 = tpu.concatenate %1110, %1111 in 1 : vector<4x16xf32>, vector<4x240xf32> -> vector<4x256xf32>
    %cst_283 = arith.constant 0.000000e+00 : f32
    %1113 = vector.shape_cast %110 : vector<1x256xi1> to vector<1x256xi1>
    %1114 = vector.broadcast %1113 : vector<1x256xi1> to vector<4x256xi1>
    %1115 = vector.broadcast %cst_283 : f32 to vector<4x256xf32>
    %1116 = arith.select %1114, %1112, %1115 : vector<4x256xi1>, vector<4x256xf32>
    %1117 = vector.extract_strided_slice %1102 {offsets = [0, 241], sizes = [4, 15], strides = [1, 1]} : vector<4x256xf32> to vector<4x15xf32>
    %1118 = vector.extract_strided_slice %1102 {offsets = [0, 0], sizes = [4, 241], strides = [1, 1]} : vector<4x256xf32> to vector<4x241xf32>
    %1119 = tpu.concatenate %1117, %1118 in 1 : vector<4x15xf32>, vector<4x241xf32> -> vector<4x256xf32>
    %cst_284 = arith.constant 0.000000e+00 : f32
    %1120 = vector.shape_cast %122 : vector<1x256xi1> to vector<1x256xi1>
    %1121 = vector.broadcast %1120 : vector<1x256xi1> to vector<4x256xi1>
    %1122 = vector.broadcast %cst_284 : f32 to vector<4x256xf32>
    %1123 = arith.select %1121, %1119, %1122 : vector<4x256xi1>, vector<4x256xf32>
    %1124 = vector.extract_strided_slice %1102 {offsets = [0, 255], sizes = [4, 1], strides = [1, 1]} : vector<4x256xf32> to vector<4x1xf32>
    %1125 = vector.extract_strided_slice %1102 {offsets = [0, 0], sizes = [4, 255], strides = [1, 1]} : vector<4x256xf32> to vector<4x255xf32>
    %1126 = tpu.concatenate %1124, %1125 in 1 : vector<4x1xf32>, vector<4x255xf32> -> vector<4x256xf32>
    %cst_285 = arith.constant 0.000000e+00 : f32
    %1127 = vector.shape_cast %131 : vector<1x256xi1> to vector<1x256xi1>
    %1128 = vector.broadcast %1127 : vector<1x256xi1> to vector<4x256xi1>
    %1129 = vector.broadcast %cst_285 : f32 to vector<4x256xf32>
    %1130 = arith.select %1128, %1126, %1129 : vector<4x256xi1>, vector<4x256xf32>
    %1131 = vector.extract_strided_slice %1102 {offsets = [0, 1], sizes = [4, 255], strides = [1, 1]} : vector<4x256xf32> to vector<4x255xf32>
    %1132 = vector.extract_strided_slice %1102 {offsets = [0, 0], sizes = [4, 1], strides = [1, 1]} : vector<4x256xf32> to vector<4x1xf32>
    %1133 = tpu.concatenate %1131, %1132 in 1 : vector<4x255xf32>, vector<4x1xf32> -> vector<4x256xf32>
    %cst_286 = arith.constant 0.000000e+00 : f32
    %1134 = vector.shape_cast %140 : vector<1x256xi1> to vector<1x256xi1>
    %1135 = vector.broadcast %1134 : vector<1x256xi1> to vector<4x256xi1>
    %1136 = vector.broadcast %cst_286 : f32 to vector<4x256xf32>
    %1137 = arith.select %1135, %1133, %1136 : vector<4x256xi1>, vector<4x256xf32>
    %1138 = vector.extract_strided_slice %1102 {offsets = [0, 15], sizes = [4, 241], strides = [1, 1]} : vector<4x256xf32> to vector<4x241xf32>
    %1139 = vector.extract_strided_slice %1102 {offsets = [0, 0], sizes = [4, 15], strides = [1, 1]} : vector<4x256xf32> to vector<4x15xf32>
    %1140 = tpu.concatenate %1138, %1139 in 1 : vector<4x241xf32>, vector<4x15xf32> -> vector<4x256xf32>
    %cst_287 = arith.constant 0.000000e+00 : f32
    %1141 = vector.shape_cast %152 : vector<1x256xi1> to vector<1x256xi1>
    %1142 = vector.broadcast %1141 : vector<1x256xi1> to vector<4x256xi1>
    %1143 = vector.broadcast %cst_287 : f32 to vector<4x256xf32>
    %1144 = arith.select %1142, %1140, %1143 : vector<4x256xi1>, vector<4x256xf32>
    %1145 = vector.extract_strided_slice %1102 {offsets = [0, 16], sizes = [4, 240], strides = [1, 1]} : vector<4x256xf32> to vector<4x240xf32>
    %1146 = vector.extract_strided_slice %1102 {offsets = [0, 0], sizes = [4, 16], strides = [1, 1]} : vector<4x256xf32> to vector<4x16xf32>
    %1147 = tpu.concatenate %1145, %1146 in 1 : vector<4x240xf32>, vector<4x16xf32> -> vector<4x256xf32>
    %cst_288 = arith.constant 0.000000e+00 : f32
    %1148 = vector.shape_cast %161 : vector<1x256xi1> to vector<1x256xi1>
    %1149 = vector.broadcast %1148 : vector<1x256xi1> to vector<4x256xi1>
    %1150 = vector.broadcast %cst_288 : f32 to vector<4x256xf32>
    %1151 = arith.select %1149, %1147, %1150 : vector<4x256xi1>, vector<4x256xf32>
    %1152 = vector.extract_strided_slice %1102 {offsets = [0, 17], sizes = [4, 239], strides = [1, 1]} : vector<4x256xf32> to vector<4x239xf32>
    %1153 = vector.extract_strided_slice %1102 {offsets = [0, 0], sizes = [4, 17], strides = [1, 1]} : vector<4x256xf32> to vector<4x17xf32>
    %1154 = tpu.concatenate %1152, %1153 in 1 : vector<4x239xf32>, vector<4x17xf32> -> vector<4x256xf32>
    %cst_289 = arith.constant 0.000000e+00 : f32
    %1155 = vector.shape_cast %173 : vector<1x256xi1> to vector<1x256xi1>
    %1156 = vector.broadcast %1155 : vector<1x256xi1> to vector<4x256xi1>
    %1157 = vector.broadcast %cst_289 : f32 to vector<4x256xf32>
    %1158 = arith.select %1156, %1154, %1157 : vector<4x256xi1>, vector<4x256xf32>
    %1159 = tpu.concatenate %1109, %1116, %1123, %1130, %1102, %1137, %1144, %1151, %1158 in 0 : vector<4x256xf32>, vector<4x256xf32>, vector<4x256xf32>, vector<4x256xf32>, vector<4x256xf32>, vector<4x256xf32>, vector<4x256xf32>, vector<4x256xf32>, vector<4x256xf32> -> vector<36x256xf32>
    %cst_290 = arith.constant dense<0.000000e+00> : vector<4x256xf32>
    %1160 = tpu.matmul %8, %1159, %cst_290 {dimension_numbers = #tpu.dot_dimension_numbers<[1], [0], [0], [1], [0, 0, 1, 1], [], []>} : vector<4x36xf32>, vector<36x256xf32>, vector<4x256xf32> -> vector<4x256xf32>
    %cst_291 = arith.constant 0.000000e+00 : f32
    %1161 = vector.broadcast %cst_291 : f32 to vector<4x256xf32>
    %1162 = arith.maximumf %1160, %1161 : vector<4x256xf32>
    %1163 = vector.extract_strided_slice %1162 {offsets = [0, 239], sizes = [4, 17], strides = [1, 1]} : vector<4x256xf32> to vector<4x17xf32>
    %1164 = vector.extract_strided_slice %1162 {offsets = [0, 0], sizes = [4, 239], strides = [1, 1]} : vector<4x256xf32> to vector<4x239xf32>
    %1165 = tpu.concatenate %1163, %1164 in 1 : vector<4x17xf32>, vector<4x239xf32> -> vector<4x256xf32>
    %cst_292 = arith.constant 0.000000e+00 : f32
    %1166 = vector.shape_cast %101 : vector<1x256xi1> to vector<1x256xi1>
    %1167 = vector.broadcast %1166 : vector<1x256xi1> to vector<4x256xi1>
    %1168 = vector.broadcast %cst_292 : f32 to vector<4x256xf32>
    %1169 = arith.select %1167, %1165, %1168 : vector<4x256xi1>, vector<4x256xf32>
    %1170 = vector.extract_strided_slice %1162 {offsets = [0, 240], sizes = [4, 16], strides = [1, 1]} : vector<4x256xf32> to vector<4x16xf32>
    %1171 = vector.extract_strided_slice %1162 {offsets = [0, 0], sizes = [4, 240], strides = [1, 1]} : vector<4x256xf32> to vector<4x240xf32>
    %1172 = tpu.concatenate %1170, %1171 in 1 : vector<4x16xf32>, vector<4x240xf32> -> vector<4x256xf32>
    %cst_293 = arith.constant 0.000000e+00 : f32
    %1173 = vector.shape_cast %110 : vector<1x256xi1> to vector<1x256xi1>
    %1174 = vector.broadcast %1173 : vector<1x256xi1> to vector<4x256xi1>
    %1175 = vector.broadcast %cst_293 : f32 to vector<4x256xf32>
    %1176 = arith.select %1174, %1172, %1175 : vector<4x256xi1>, vector<4x256xf32>
    %1177 = vector.extract_strided_slice %1162 {offsets = [0, 241], sizes = [4, 15], strides = [1, 1]} : vector<4x256xf32> to vector<4x15xf32>
    %1178 = vector.extract_strided_slice %1162 {offsets = [0, 0], sizes = [4, 241], strides = [1, 1]} : vector<4x256xf32> to vector<4x241xf32>
    %1179 = tpu.concatenate %1177, %1178 in 1 : vector<4x15xf32>, vector<4x241xf32> -> vector<4x256xf32>
    %cst_294 = arith.constant 0.000000e+00 : f32
    %1180 = vector.shape_cast %122 : vector<1x256xi1> to vector<1x256xi1>
    %1181 = vector.broadcast %1180 : vector<1x256xi1> to vector<4x256xi1>
    %1182 = vector.broadcast %cst_294 : f32 to vector<4x256xf32>
    %1183 = arith.select %1181, %1179, %1182 : vector<4x256xi1>, vector<4x256xf32>
    %1184 = vector.extract_strided_slice %1162 {offsets = [0, 255], sizes = [4, 1], strides = [1, 1]} : vector<4x256xf32> to vector<4x1xf32>
    %1185 = vector.extract_strided_slice %1162 {offsets = [0, 0], sizes = [4, 255], strides = [1, 1]} : vector<4x256xf32> to vector<4x255xf32>
    %1186 = tpu.concatenate %1184, %1185 in 1 : vector<4x1xf32>, vector<4x255xf32> -> vector<4x256xf32>
    %cst_295 = arith.constant 0.000000e+00 : f32
    %1187 = vector.shape_cast %131 : vector<1x256xi1> to vector<1x256xi1>
    %1188 = vector.broadcast %1187 : vector<1x256xi1> to vector<4x256xi1>
    %1189 = vector.broadcast %cst_295 : f32 to vector<4x256xf32>
    %1190 = arith.select %1188, %1186, %1189 : vector<4x256xi1>, vector<4x256xf32>
    %1191 = vector.extract_strided_slice %1162 {offsets = [0, 1], sizes = [4, 255], strides = [1, 1]} : vector<4x256xf32> to vector<4x255xf32>
    %1192 = vector.extract_strided_slice %1162 {offsets = [0, 0], sizes = [4, 1], strides = [1, 1]} : vector<4x256xf32> to vector<4x1xf32>
    %1193 = tpu.concatenate %1191, %1192 in 1 : vector<4x255xf32>, vector<4x1xf32> -> vector<4x256xf32>
    %cst_296 = arith.constant 0.000000e+00 : f32
    %1194 = vector.shape_cast %140 : vector<1x256xi1> to vector<1x256xi1>
    %1195 = vector.broadcast %1194 : vector<1x256xi1> to vector<4x256xi1>
    %1196 = vector.broadcast %cst_296 : f32 to vector<4x256xf32>
    %1197 = arith.select %1195, %1193, %1196 : vector<4x256xi1>, vector<4x256xf32>
    %1198 = vector.extract_strided_slice %1162 {offsets = [0, 15], sizes = [4, 241], strides = [1, 1]} : vector<4x256xf32> to vector<4x241xf32>
    %1199 = vector.extract_strided_slice %1162 {offsets = [0, 0], sizes = [4, 15], strides = [1, 1]} : vector<4x256xf32> to vector<4x15xf32>
    %1200 = tpu.concatenate %1198, %1199 in 1 : vector<4x241xf32>, vector<4x15xf32> -> vector<4x256xf32>
    %cst_297 = arith.constant 0.000000e+00 : f32
    %1201 = vector.shape_cast %152 : vector<1x256xi1> to vector<1x256xi1>
    %1202 = vector.broadcast %1201 : vector<1x256xi1> to vector<4x256xi1>
    %1203 = vector.broadcast %cst_297 : f32 to vector<4x256xf32>
    %1204 = arith.select %1202, %1200, %1203 : vector<4x256xi1>, vector<4x256xf32>
    %1205 = vector.extract_strided_slice %1162 {offsets = [0, 16], sizes = [4, 240], strides = [1, 1]} : vector<4x256xf32> to vector<4x240xf32>
    %1206 = vector.extract_strided_slice %1162 {offsets = [0, 0], sizes = [4, 16], strides = [1, 1]} : vector<4x256xf32> to vector<4x16xf32>
    %1207 = tpu.concatenate %1205, %1206 in 1 : vector<4x240xf32>, vector<4x16xf32> -> vector<4x256xf32>
    %cst_298 = arith.constant 0.000000e+00 : f32
    %1208 = vector.shape_cast %161 : vector<1x256xi1> to vector<1x256xi1>
    %1209 = vector.broadcast %1208 : vector<1x256xi1> to vector<4x256xi1>
    %1210 = vector.broadcast %cst_298 : f32 to vector<4x256xf32>
    %1211 = arith.select %1209, %1207, %1210 : vector<4x256xi1>, vector<4x256xf32>
    %1212 = vector.extract_strided_slice %1162 {offsets = [0, 17], sizes = [4, 239], strides = [1, 1]} : vector<4x256xf32> to vector<4x239xf32>
    %1213 = vector.extract_strided_slice %1162 {offsets = [0, 0], sizes = [4, 17], strides = [1, 1]} : vector<4x256xf32> to vector<4x17xf32>
    %1214 = tpu.concatenate %1212, %1213 in 1 : vector<4x239xf32>, vector<4x17xf32> -> vector<4x256xf32>
    %cst_299 = arith.constant 0.000000e+00 : f32
    %1215 = vector.shape_cast %173 : vector<1x256xi1> to vector<1x256xi1>
    %1216 = vector.broadcast %1215 : vector<1x256xi1> to vector<4x256xi1>
    %1217 = vector.broadcast %cst_299 : f32 to vector<4x256xf32>
    %1218 = arith.select %1216, %1214, %1217 : vector<4x256xi1>, vector<4x256xf32>
    %1219 = tpu.concatenate %1169, %1176, %1183, %1190, %1162, %1197, %1204, %1211, %1218 in 0 : vector<4x256xf32>, vector<4x256xf32>, vector<4x256xf32>, vector<4x256xf32>, vector<4x256xf32>, vector<4x256xf32>, vector<4x256xf32>, vector<4x256xf32>, vector<4x256xf32> -> vector<36x256xf32>
    %cst_300 = arith.constant dense<0.000000e+00> : vector<4x256xf32>
    %1220 = tpu.matmul %9, %1219, %cst_300 {dimension_numbers = #tpu.dot_dimension_numbers<[1], [0], [0], [1], [0, 0, 1, 1], [], []>} : vector<4x36xf32>, vector<36x256xf32>, vector<4x256xf32> -> vector<4x256xf32>
    %1221 = arith.negf %1220 : vector<4x256xf32>
    %1222 = math.exp %1221 : vector<4x256xf32>
    %cst_301 = arith.constant 1.000000e+00 : f32
    %1223 = vector.broadcast %cst_301 : f32 to vector<4x256xf32>
    %1224 = arith.addf %1223, %1222 : vector<4x256xf32>
    %1225 = arith.divf %1223, %1224 : vector<4x256xf32>
    %1226 = arith.mulf %1225, %1102 : vector<4x256xf32>
    %cst_302 = arith.constant dense<0.000000e+00> : vector<4x256xf32>
    %1227 = tpu.matmul %10, %1226, %cst_302 {dimension_numbers = #tpu.dot_dimension_numbers<[1], [0], [0], [1], [0, 0, 1, 1], [], []>} : vector<4x4xf32>, vector<4x256xf32>, vector<4x256xf32> -> vector<4x256xf32>
    %1228 = vector.extract_strided_slice %1226 {offsets = [0, 239], sizes = [4, 17], strides = [1, 1]} : vector<4x256xf32> to vector<4x17xf32>
    %1229 = vector.extract_strided_slice %1226 {offsets = [0, 0], sizes = [4, 239], strides = [1, 1]} : vector<4x256xf32> to vector<4x239xf32>
    %1230 = tpu.concatenate %1228, %1229 in 1 : vector<4x17xf32>, vector<4x239xf32> -> vector<4x256xf32>
    %cst_303 = arith.constant 0.000000e+00 : f32
    %1231 = vector.shape_cast %101 : vector<1x256xi1> to vector<1x256xi1>
    %1232 = vector.broadcast %1231 : vector<1x256xi1> to vector<4x256xi1>
    %1233 = vector.broadcast %cst_303 : f32 to vector<4x256xf32>
    %1234 = arith.select %1232, %1230, %1233 : vector<4x256xi1>, vector<4x256xf32>
    %1235 = vector.extract_strided_slice %1226 {offsets = [0, 240], sizes = [4, 16], strides = [1, 1]} : vector<4x256xf32> to vector<4x16xf32>
    %1236 = vector.extract_strided_slice %1226 {offsets = [0, 0], sizes = [4, 240], strides = [1, 1]} : vector<4x256xf32> to vector<4x240xf32>
    %1237 = tpu.concatenate %1235, %1236 in 1 : vector<4x16xf32>, vector<4x240xf32> -> vector<4x256xf32>
    %cst_304 = arith.constant 0.000000e+00 : f32
    %1238 = vector.shape_cast %110 : vector<1x256xi1> to vector<1x256xi1>
    %1239 = vector.broadcast %1238 : vector<1x256xi1> to vector<4x256xi1>
    %1240 = vector.broadcast %cst_304 : f32 to vector<4x256xf32>
    %1241 = arith.select %1239, %1237, %1240 : vector<4x256xi1>, vector<4x256xf32>
    %1242 = vector.extract_strided_slice %1226 {offsets = [0, 241], sizes = [4, 15], strides = [1, 1]} : vector<4x256xf32> to vector<4x15xf32>
    %1243 = vector.extract_strided_slice %1226 {offsets = [0, 0], sizes = [4, 241], strides = [1, 1]} : vector<4x256xf32> to vector<4x241xf32>
    %1244 = tpu.concatenate %1242, %1243 in 1 : vector<4x15xf32>, vector<4x241xf32> -> vector<4x256xf32>
    %cst_305 = arith.constant 0.000000e+00 : f32
    %1245 = vector.shape_cast %122 : vector<1x256xi1> to vector<1x256xi1>
    %1246 = vector.broadcast %1245 : vector<1x256xi1> to vector<4x256xi1>
    %1247 = vector.broadcast %cst_305 : f32 to vector<4x256xf32>
    %1248 = arith.select %1246, %1244, %1247 : vector<4x256xi1>, vector<4x256xf32>
    %1249 = vector.extract_strided_slice %1226 {offsets = [0, 255], sizes = [4, 1], strides = [1, 1]} : vector<4x256xf32> to vector<4x1xf32>
    %1250 = vector.extract_strided_slice %1226 {offsets = [0, 0], sizes = [4, 255], strides = [1, 1]} : vector<4x256xf32> to vector<4x255xf32>
    %1251 = tpu.concatenate %1249, %1250 in 1 : vector<4x1xf32>, vector<4x255xf32> -> vector<4x256xf32>
    %cst_306 = arith.constant 0.000000e+00 : f32
    %1252 = vector.shape_cast %131 : vector<1x256xi1> to vector<1x256xi1>
    %1253 = vector.broadcast %1252 : vector<1x256xi1> to vector<4x256xi1>
    %1254 = vector.broadcast %cst_306 : f32 to vector<4x256xf32>
    %1255 = arith.select %1253, %1251, %1254 : vector<4x256xi1>, vector<4x256xf32>
    %1256 = vector.extract_strided_slice %1226 {offsets = [0, 1], sizes = [4, 255], strides = [1, 1]} : vector<4x256xf32> to vector<4x255xf32>
    %1257 = vector.extract_strided_slice %1226 {offsets = [0, 0], sizes = [4, 1], strides = [1, 1]} : vector<4x256xf32> to vector<4x1xf32>
    %1258 = tpu.concatenate %1256, %1257 in 1 : vector<4x255xf32>, vector<4x1xf32> -> vector<4x256xf32>
    %cst_307 = arith.constant 0.000000e+00 : f32
    %1259 = vector.shape_cast %140 : vector<1x256xi1> to vector<1x256xi1>
    %1260 = vector.broadcast %1259 : vector<1x256xi1> to vector<4x256xi1>
    %1261 = vector.broadcast %cst_307 : f32 to vector<4x256xf32>
    %1262 = arith.select %1260, %1258, %1261 : vector<4x256xi1>, vector<4x256xf32>
    %1263 = vector.extract_strided_slice %1226 {offsets = [0, 15], sizes = [4, 241], strides = [1, 1]} : vector<4x256xf32> to vector<4x241xf32>
    %1264 = vector.extract_strided_slice %1226 {offsets = [0, 0], sizes = [4, 15], strides = [1, 1]} : vector<4x256xf32> to vector<4x15xf32>
    %1265 = tpu.concatenate %1263, %1264 in 1 : vector<4x241xf32>, vector<4x15xf32> -> vector<4x256xf32>
    %cst_308 = arith.constant 0.000000e+00 : f32
    %1266 = vector.shape_cast %152 : vector<1x256xi1> to vector<1x256xi1>
    %1267 = vector.broadcast %1266 : vector<1x256xi1> to vector<4x256xi1>
    %1268 = vector.broadcast %cst_308 : f32 to vector<4x256xf32>
    %1269 = arith.select %1267, %1265, %1268 : vector<4x256xi1>, vector<4x256xf32>
    %1270 = vector.extract_strided_slice %1226 {offsets = [0, 16], sizes = [4, 240], strides = [1, 1]} : vector<4x256xf32> to vector<4x240xf32>
    %1271 = vector.extract_strided_slice %1226 {offsets = [0, 0], sizes = [4, 16], strides = [1, 1]} : vector<4x256xf32> to vector<4x16xf32>
    %1272 = tpu.concatenate %1270, %1271 in 1 : vector<4x240xf32>, vector<4x16xf32> -> vector<4x256xf32>
    %cst_309 = arith.constant 0.000000e+00 : f32
    %1273 = vector.shape_cast %161 : vector<1x256xi1> to vector<1x256xi1>
    %1274 = vector.broadcast %1273 : vector<1x256xi1> to vector<4x256xi1>
    %1275 = vector.broadcast %cst_309 : f32 to vector<4x256xf32>
    %1276 = arith.select %1274, %1272, %1275 : vector<4x256xi1>, vector<4x256xf32>
    %1277 = vector.extract_strided_slice %1226 {offsets = [0, 17], sizes = [4, 239], strides = [1, 1]} : vector<4x256xf32> to vector<4x239xf32>
    %1278 = vector.extract_strided_slice %1226 {offsets = [0, 0], sizes = [4, 17], strides = [1, 1]} : vector<4x256xf32> to vector<4x17xf32>
    %1279 = tpu.concatenate %1277, %1278 in 1 : vector<4x239xf32>, vector<4x17xf32> -> vector<4x256xf32>
    %cst_310 = arith.constant 0.000000e+00 : f32
    %1280 = vector.shape_cast %173 : vector<1x256xi1> to vector<1x256xi1>
    %1281 = vector.broadcast %1280 : vector<1x256xi1> to vector<4x256xi1>
    %1282 = vector.broadcast %cst_310 : f32 to vector<4x256xf32>
    %1283 = arith.select %1281, %1279, %1282 : vector<4x256xi1>, vector<4x256xf32>
    %1284 = tpu.concatenate %1234, %1241, %1248, %1255, %1226, %1262, %1269, %1276, %1283 in 0 : vector<4x256xf32>, vector<4x256xf32>, vector<4x256xf32>, vector<4x256xf32>, vector<4x256xf32>, vector<4x256xf32>, vector<4x256xf32>, vector<4x256xf32>, vector<4x256xf32> -> vector<36x256xf32>
    %cst_311 = arith.constant dense<0.000000e+00> : vector<4x256xf32>
    %1285 = tpu.matmul %11, %1284, %cst_311 {dimension_numbers = #tpu.dot_dimension_numbers<[1], [0], [0], [1], [0, 0, 1, 1], [], []>} : vector<4x36xf32>, vector<36x256xf32>, vector<4x256xf32> -> vector<4x256xf32>
    %1286 = vector.extract_strided_slice %1226 {offsets = [0, 222], sizes = [4, 34], strides = [1, 1]} : vector<4x256xf32> to vector<4x34xf32>
    %1287 = vector.extract_strided_slice %1226 {offsets = [0, 0], sizes = [4, 222], strides = [1, 1]} : vector<4x256xf32> to vector<4x222xf32>
    %1288 = tpu.concatenate %1286, %1287 in 1 : vector<4x34xf32>, vector<4x222xf32> -> vector<4x256xf32>
    %c2_i32_312 = arith.constant 2 : i32
    %1289 = vector.broadcast %c2_i32_312 : i32 to vector<1x256xi32>
    %1290 = arith.cmpi sge, %82, %1289 : vector<1x256xi32>
    %c2_i32_313 = arith.constant 2 : i32
    %1291 = vector.broadcast %c2_i32_313 : i32 to vector<1x256xi32>
    %1292 = arith.cmpi sge, %79, %1291 : vector<1x256xi32>
    %1293 = arith.andi %1290, %1292 : vector<1x256xi1>
    %cst_314 = arith.constant 0.000000e+00 : f32
    %1294 = vector.shape_cast %1293 : vector<1x256xi1> to vector<1x256xi1>
    %1295 = vector.broadcast %1294 : vector<1x256xi1> to vector<4x256xi1>
    %1296 = vector.broadcast %cst_314 : f32 to vector<4x256xf32>
    %1297 = arith.select %1295, %1288, %1296 : vector<4x256xi1>, vector<4x256xf32>
    %1298 = vector.extract_strided_slice %1226 {offsets = [0, 223], sizes = [4, 33], strides = [1, 1]} : vector<4x256xf32> to vector<4x33xf32>
    %1299 = vector.extract_strided_slice %1226 {offsets = [0, 0], sizes = [4, 223], strides = [1, 1]} : vector<4x256xf32> to vector<4x223xf32>
    %1300 = tpu.concatenate %1298, %1299 in 1 : vector<4x33xf32>, vector<4x223xf32> -> vector<4x256xf32>
    %c1_i32_315 = arith.constant 1 : i32
    %1301 = vector.broadcast %c1_i32_315 : i32 to vector<1x256xi32>
    %1302 = arith.cmpi sge, %82, %1301 : vector<1x256xi32>
    %c2_i32_316 = arith.constant 2 : i32
    %1303 = vector.broadcast %c2_i32_316 : i32 to vector<1x256xi32>
    %1304 = arith.cmpi sge, %79, %1303 : vector<1x256xi32>
    %1305 = arith.andi %1302, %1304 : vector<1x256xi1>
    %cst_317 = arith.constant 0.000000e+00 : f32
    %1306 = vector.shape_cast %1305 : vector<1x256xi1> to vector<1x256xi1>
    %1307 = vector.broadcast %1306 : vector<1x256xi1> to vector<4x256xi1>
    %1308 = vector.broadcast %cst_317 : f32 to vector<4x256xf32>
    %1309 = arith.select %1307, %1300, %1308 : vector<4x256xi1>, vector<4x256xf32>
    %1310 = vector.extract_strided_slice %1226 {offsets = [0, 224], sizes = [4, 32], strides = [1, 1]} : vector<4x256xf32> to vector<4x32xf32>
    %1311 = vector.extract_strided_slice %1226 {offsets = [0, 0], sizes = [4, 224], strides = [1, 1]} : vector<4x256xf32> to vector<4x224xf32>
    %1312 = tpu.concatenate %1310, %1311 in 1 : vector<4x32xf32>, vector<4x224xf32> -> vector<4x256xf32>
    %c2_i32_318 = arith.constant 2 : i32
    %1313 = vector.broadcast %c2_i32_318 : i32 to vector<1x256xi32>
    %1314 = arith.cmpi sge, %79, %1313 : vector<1x256xi32>
    %cst_319 = arith.constant 0.000000e+00 : f32
    %1315 = vector.shape_cast %1314 : vector<1x256xi1> to vector<1x256xi1>
    %1316 = vector.broadcast %1315 : vector<1x256xi1> to vector<4x256xi1>
    %1317 = vector.broadcast %cst_319 : f32 to vector<4x256xf32>
    %1318 = arith.select %1316, %1312, %1317 : vector<4x256xi1>, vector<4x256xf32>
    %1319 = vector.extract_strided_slice %1226 {offsets = [0, 225], sizes = [4, 31], strides = [1, 1]} : vector<4x256xf32> to vector<4x31xf32>
    %1320 = vector.extract_strided_slice %1226 {offsets = [0, 0], sizes = [4, 225], strides = [1, 1]} : vector<4x256xf32> to vector<4x225xf32>
    %1321 = tpu.concatenate %1319, %1320 in 1 : vector<4x31xf32>, vector<4x225xf32> -> vector<4x256xf32>
    %c14_i32_320 = arith.constant 14 : i32
    %1322 = vector.broadcast %c14_i32_320 : i32 to vector<1x256xi32>
    %1323 = arith.cmpi sle, %82, %1322 : vector<1x256xi32>
    %c2_i32_321 = arith.constant 2 : i32
    %1324 = vector.broadcast %c2_i32_321 : i32 to vector<1x256xi32>
    %1325 = arith.cmpi sge, %79, %1324 : vector<1x256xi32>
    %1326 = arith.andi %1323, %1325 : vector<1x256xi1>
    %cst_322 = arith.constant 0.000000e+00 : f32
    %1327 = vector.shape_cast %1326 : vector<1x256xi1> to vector<1x256xi1>
    %1328 = vector.broadcast %1327 : vector<1x256xi1> to vector<4x256xi1>
    %1329 = vector.broadcast %cst_322 : f32 to vector<4x256xf32>
    %1330 = arith.select %1328, %1321, %1329 : vector<4x256xi1>, vector<4x256xf32>
    %1331 = vector.extract_strided_slice %1226 {offsets = [0, 226], sizes = [4, 30], strides = [1, 1]} : vector<4x256xf32> to vector<4x30xf32>
    %1332 = vector.extract_strided_slice %1226 {offsets = [0, 0], sizes = [4, 226], strides = [1, 1]} : vector<4x256xf32> to vector<4x226xf32>
    %1333 = tpu.concatenate %1331, %1332 in 1 : vector<4x30xf32>, vector<4x226xf32> -> vector<4x256xf32>
    %c13_i32_323 = arith.constant 13 : i32
    %1334 = vector.broadcast %c13_i32_323 : i32 to vector<1x256xi32>
    %1335 = arith.cmpi sle, %82, %1334 : vector<1x256xi32>
    %c2_i32_324 = arith.constant 2 : i32
    %1336 = vector.broadcast %c2_i32_324 : i32 to vector<1x256xi32>
    %1337 = arith.cmpi sge, %79, %1336 : vector<1x256xi32>
    %1338 = arith.andi %1335, %1337 : vector<1x256xi1>
    %cst_325 = arith.constant 0.000000e+00 : f32
    %1339 = vector.shape_cast %1338 : vector<1x256xi1> to vector<1x256xi1>
    %1340 = vector.broadcast %1339 : vector<1x256xi1> to vector<4x256xi1>
    %1341 = vector.broadcast %cst_325 : f32 to vector<4x256xf32>
    %1342 = arith.select %1340, %1333, %1341 : vector<4x256xi1>, vector<4x256xf32>
    %1343 = vector.extract_strided_slice %1226 {offsets = [0, 238], sizes = [4, 18], strides = [1, 1]} : vector<4x256xf32> to vector<4x18xf32>
    %1344 = vector.extract_strided_slice %1226 {offsets = [0, 0], sizes = [4, 238], strides = [1, 1]} : vector<4x256xf32> to vector<4x238xf32>
    %1345 = tpu.concatenate %1343, %1344 in 1 : vector<4x18xf32>, vector<4x238xf32> -> vector<4x256xf32>
    %c2_i32_326 = arith.constant 2 : i32
    %1346 = vector.broadcast %c2_i32_326 : i32 to vector<1x256xi32>
    %1347 = arith.cmpi sge, %82, %1346 : vector<1x256xi32>
    %c1_i32_327 = arith.constant 1 : i32
    %1348 = vector.broadcast %c1_i32_327 : i32 to vector<1x256xi32>
    %1349 = arith.cmpi sge, %79, %1348 : vector<1x256xi32>
    %1350 = arith.andi %1347, %1349 : vector<1x256xi1>
    %cst_328 = arith.constant 0.000000e+00 : f32
    %1351 = vector.shape_cast %1350 : vector<1x256xi1> to vector<1x256xi1>
    %1352 = vector.broadcast %1351 : vector<1x256xi1> to vector<4x256xi1>
    %1353 = vector.broadcast %cst_328 : f32 to vector<4x256xf32>
    %1354 = arith.select %1352, %1345, %1353 : vector<4x256xi1>, vector<4x256xf32>
    %1355 = vector.extract_strided_slice %1226 {offsets = [0, 239], sizes = [4, 17], strides = [1, 1]} : vector<4x256xf32> to vector<4x17xf32>
    %1356 = vector.extract_strided_slice %1226 {offsets = [0, 0], sizes = [4, 239], strides = [1, 1]} : vector<4x256xf32> to vector<4x239xf32>
    %1357 = tpu.concatenate %1355, %1356 in 1 : vector<4x17xf32>, vector<4x239xf32> -> vector<4x256xf32>
    %cst_329 = arith.constant 0.000000e+00 : f32
    %1358 = vector.shape_cast %101 : vector<1x256xi1> to vector<1x256xi1>
    %1359 = vector.broadcast %1358 : vector<1x256xi1> to vector<4x256xi1>
    %1360 = vector.broadcast %cst_329 : f32 to vector<4x256xf32>
    %1361 = arith.select %1359, %1357, %1360 : vector<4x256xi1>, vector<4x256xf32>
    %1362 = vector.extract_strided_slice %1226 {offsets = [0, 240], sizes = [4, 16], strides = [1, 1]} : vector<4x256xf32> to vector<4x16xf32>
    %1363 = vector.extract_strided_slice %1226 {offsets = [0, 0], sizes = [4, 240], strides = [1, 1]} : vector<4x256xf32> to vector<4x240xf32>
    %1364 = tpu.concatenate %1362, %1363 in 1 : vector<4x16xf32>, vector<4x240xf32> -> vector<4x256xf32>
    %cst_330 = arith.constant 0.000000e+00 : f32
    %1365 = vector.shape_cast %110 : vector<1x256xi1> to vector<1x256xi1>
    %1366 = vector.broadcast %1365 : vector<1x256xi1> to vector<4x256xi1>
    %1367 = vector.broadcast %cst_330 : f32 to vector<4x256xf32>
    %1368 = arith.select %1366, %1364, %1367 : vector<4x256xi1>, vector<4x256xf32>
    %1369 = vector.extract_strided_slice %1226 {offsets = [0, 241], sizes = [4, 15], strides = [1, 1]} : vector<4x256xf32> to vector<4x15xf32>
    %1370 = vector.extract_strided_slice %1226 {offsets = [0, 0], sizes = [4, 241], strides = [1, 1]} : vector<4x256xf32> to vector<4x241xf32>
    %1371 = tpu.concatenate %1369, %1370 in 1 : vector<4x15xf32>, vector<4x241xf32> -> vector<4x256xf32>
    %cst_331 = arith.constant 0.000000e+00 : f32
    %1372 = vector.shape_cast %122 : vector<1x256xi1> to vector<1x256xi1>
    %1373 = vector.broadcast %1372 : vector<1x256xi1> to vector<4x256xi1>
    %1374 = vector.broadcast %cst_331 : f32 to vector<4x256xf32>
    %1375 = arith.select %1373, %1371, %1374 : vector<4x256xi1>, vector<4x256xf32>
    %1376 = vector.extract_strided_slice %1226 {offsets = [0, 242], sizes = [4, 14], strides = [1, 1]} : vector<4x256xf32> to vector<4x14xf32>
    %1377 = vector.extract_strided_slice %1226 {offsets = [0, 0], sizes = [4, 242], strides = [1, 1]} : vector<4x256xf32> to vector<4x242xf32>
    %1378 = tpu.concatenate %1376, %1377 in 1 : vector<4x14xf32>, vector<4x242xf32> -> vector<4x256xf32>
    %c13_i32_332 = arith.constant 13 : i32
    %1379 = vector.broadcast %c13_i32_332 : i32 to vector<1x256xi32>
    %1380 = arith.cmpi sle, %82, %1379 : vector<1x256xi32>
    %c1_i32_333 = arith.constant 1 : i32
    %1381 = vector.broadcast %c1_i32_333 : i32 to vector<1x256xi32>
    %1382 = arith.cmpi sge, %79, %1381 : vector<1x256xi32>
    %1383 = arith.andi %1380, %1382 : vector<1x256xi1>
    %cst_334 = arith.constant 0.000000e+00 : f32
    %1384 = vector.shape_cast %1383 : vector<1x256xi1> to vector<1x256xi1>
    %1385 = vector.broadcast %1384 : vector<1x256xi1> to vector<4x256xi1>
    %1386 = vector.broadcast %cst_334 : f32 to vector<4x256xf32>
    %1387 = arith.select %1385, %1378, %1386 : vector<4x256xi1>, vector<4x256xf32>
    %1388 = vector.extract_strided_slice %1226 {offsets = [0, 254], sizes = [4, 2], strides = [1, 1]} : vector<4x256xf32> to vector<4x2xf32>
    %1389 = vector.extract_strided_slice %1226 {offsets = [0, 0], sizes = [4, 254], strides = [1, 1]} : vector<4x256xf32> to vector<4x254xf32>
    %1390 = tpu.concatenate %1388, %1389 in 1 : vector<4x2xf32>, vector<4x254xf32> -> vector<4x256xf32>
    %c2_i32_335 = arith.constant 2 : i32
    %1391 = vector.broadcast %c2_i32_335 : i32 to vector<1x256xi32>
    %1392 = arith.cmpi sge, %82, %1391 : vector<1x256xi32>
    %cst_336 = arith.constant 0.000000e+00 : f32
    %1393 = vector.shape_cast %1392 : vector<1x256xi1> to vector<1x256xi1>
    %1394 = vector.broadcast %1393 : vector<1x256xi1> to vector<4x256xi1>
    %1395 = vector.broadcast %cst_336 : f32 to vector<4x256xf32>
    %1396 = arith.select %1394, %1390, %1395 : vector<4x256xi1>, vector<4x256xf32>
    %1397 = vector.extract_strided_slice %1226 {offsets = [0, 255], sizes = [4, 1], strides = [1, 1]} : vector<4x256xf32> to vector<4x1xf32>
    %1398 = vector.extract_strided_slice %1226 {offsets = [0, 0], sizes = [4, 255], strides = [1, 1]} : vector<4x256xf32> to vector<4x255xf32>
    %1399 = tpu.concatenate %1397, %1398 in 1 : vector<4x1xf32>, vector<4x255xf32> -> vector<4x256xf32>
    %cst_337 = arith.constant 0.000000e+00 : f32
    %1400 = vector.shape_cast %131 : vector<1x256xi1> to vector<1x256xi1>
    %1401 = vector.broadcast %1400 : vector<1x256xi1> to vector<4x256xi1>
    %1402 = vector.broadcast %cst_337 : f32 to vector<4x256xf32>
    %1403 = arith.select %1401, %1399, %1402 : vector<4x256xi1>, vector<4x256xf32>
    %1404 = vector.extract_strided_slice %1226 {offsets = [0, 1], sizes = [4, 255], strides = [1, 1]} : vector<4x256xf32> to vector<4x255xf32>
    %1405 = vector.extract_strided_slice %1226 {offsets = [0, 0], sizes = [4, 1], strides = [1, 1]} : vector<4x256xf32> to vector<4x1xf32>
    %1406 = tpu.concatenate %1404, %1405 in 1 : vector<4x255xf32>, vector<4x1xf32> -> vector<4x256xf32>
    %cst_338 = arith.constant 0.000000e+00 : f32
    %1407 = vector.shape_cast %140 : vector<1x256xi1> to vector<1x256xi1>
    %1408 = vector.broadcast %1407 : vector<1x256xi1> to vector<4x256xi1>
    %1409 = vector.broadcast %cst_338 : f32 to vector<4x256xf32>
    %1410 = arith.select %1408, %1406, %1409 : vector<4x256xi1>, vector<4x256xf32>
    %1411 = vector.extract_strided_slice %1226 {offsets = [0, 2], sizes = [4, 254], strides = [1, 1]} : vector<4x256xf32> to vector<4x254xf32>
    %1412 = vector.extract_strided_slice %1226 {offsets = [0, 0], sizes = [4, 2], strides = [1, 1]} : vector<4x256xf32> to vector<4x2xf32>
    %1413 = tpu.concatenate %1411, %1412 in 1 : vector<4x254xf32>, vector<4x2xf32> -> vector<4x256xf32>
    %c13_i32_339 = arith.constant 13 : i32
    %1414 = vector.broadcast %c13_i32_339 : i32 to vector<1x256xi32>
    %1415 = arith.cmpi sle, %82, %1414 : vector<1x256xi32>
    %cst_340 = arith.constant 0.000000e+00 : f32
    %1416 = vector.shape_cast %1415 : vector<1x256xi1> to vector<1x256xi1>
    %1417 = vector.broadcast %1416 : vector<1x256xi1> to vector<4x256xi1>
    %1418 = vector.broadcast %cst_340 : f32 to vector<4x256xf32>
    %1419 = arith.select %1417, %1413, %1418 : vector<4x256xi1>, vector<4x256xf32>
    %1420 = vector.extract_strided_slice %1226 {offsets = [0, 14], sizes = [4, 242], strides = [1, 1]} : vector<4x256xf32> to vector<4x242xf32>
    %1421 = vector.extract_strided_slice %1226 {offsets = [0, 0], sizes = [4, 14], strides = [1, 1]} : vector<4x256xf32> to vector<4x14xf32>
    %1422 = tpu.concatenate %1420, %1421 in 1 : vector<4x242xf32>, vector<4x14xf32> -> vector<4x256xf32>
    %c2_i32_341 = arith.constant 2 : i32
    %1423 = vector.broadcast %c2_i32_341 : i32 to vector<1x256xi32>
    %1424 = arith.cmpi sge, %82, %1423 : vector<1x256xi32>
    %c14_i32_342 = arith.constant 14 : i32
    %1425 = vector.broadcast %c14_i32_342 : i32 to vector<1x256xi32>
    %1426 = arith.cmpi sle, %79, %1425 : vector<1x256xi32>
    %1427 = arith.andi %1424, %1426 : vector<1x256xi1>
    %cst_343 = arith.constant 0.000000e+00 : f32
    %1428 = vector.shape_cast %1427 : vector<1x256xi1> to vector<1x256xi1>
    %1429 = vector.broadcast %1428 : vector<1x256xi1> to vector<4x256xi1>
    %1430 = vector.broadcast %cst_343 : f32 to vector<4x256xf32>
    %1431 = arith.select %1429, %1422, %1430 : vector<4x256xi1>, vector<4x256xf32>
    %1432 = vector.extract_strided_slice %1226 {offsets = [0, 15], sizes = [4, 241], strides = [1, 1]} : vector<4x256xf32> to vector<4x241xf32>
    %1433 = vector.extract_strided_slice %1226 {offsets = [0, 0], sizes = [4, 15], strides = [1, 1]} : vector<4x256xf32> to vector<4x15xf32>
    %1434 = tpu.concatenate %1432, %1433 in 1 : vector<4x241xf32>, vector<4x15xf32> -> vector<4x256xf32>
    %cst_344 = arith.constant 0.000000e+00 : f32
    %1435 = vector.shape_cast %152 : vector<1x256xi1> to vector<1x256xi1>
    %1436 = vector.broadcast %1435 : vector<1x256xi1> to vector<4x256xi1>
    %1437 = vector.broadcast %cst_344 : f32 to vector<4x256xf32>
    %1438 = arith.select %1436, %1434, %1437 : vector<4x256xi1>, vector<4x256xf32>
    %1439 = vector.extract_strided_slice %1226 {offsets = [0, 16], sizes = [4, 240], strides = [1, 1]} : vector<4x256xf32> to vector<4x240xf32>
    %1440 = vector.extract_strided_slice %1226 {offsets = [0, 0], sizes = [4, 16], strides = [1, 1]} : vector<4x256xf32> to vector<4x16xf32>
    %1441 = tpu.concatenate %1439, %1440 in 1 : vector<4x240xf32>, vector<4x16xf32> -> vector<4x256xf32>
    %cst_345 = arith.constant 0.000000e+00 : f32
    %1442 = vector.shape_cast %161 : vector<1x256xi1> to vector<1x256xi1>
    %1443 = vector.broadcast %1442 : vector<1x256xi1> to vector<4x256xi1>
    %1444 = vector.broadcast %cst_345 : f32 to vector<4x256xf32>
    %1445 = arith.select %1443, %1441, %1444 : vector<4x256xi1>, vector<4x256xf32>
    %1446 = vector.extract_strided_slice %1226 {offsets = [0, 17], sizes = [4, 239], strides = [1, 1]} : vector<4x256xf32> to vector<4x239xf32>
    %1447 = vector.extract_strided_slice %1226 {offsets = [0, 0], sizes = [4, 17], strides = [1, 1]} : vector<4x256xf32> to vector<4x17xf32>
    %1448 = tpu.concatenate %1446, %1447 in 1 : vector<4x239xf32>, vector<4x17xf32> -> vector<4x256xf32>
    %cst_346 = arith.constant 0.000000e+00 : f32
    %1449 = vector.shape_cast %173 : vector<1x256xi1> to vector<1x256xi1>
    %1450 = vector.broadcast %1449 : vector<1x256xi1> to vector<4x256xi1>
    %1451 = vector.broadcast %cst_346 : f32 to vector<4x256xf32>
    %1452 = arith.select %1450, %1448, %1451 : vector<4x256xi1>, vector<4x256xf32>
    %1453 = vector.extract_strided_slice %1226 {offsets = [0, 18], sizes = [4, 238], strides = [1, 1]} : vector<4x256xf32> to vector<4x238xf32>
    %1454 = vector.extract_strided_slice %1226 {offsets = [0, 0], sizes = [4, 18], strides = [1, 1]} : vector<4x256xf32> to vector<4x18xf32>
    %1455 = tpu.concatenate %1453, %1454 in 1 : vector<4x238xf32>, vector<4x18xf32> -> vector<4x256xf32>
    %c13_i32_347 = arith.constant 13 : i32
    %1456 = vector.broadcast %c13_i32_347 : i32 to vector<1x256xi32>
    %1457 = arith.cmpi sle, %82, %1456 : vector<1x256xi32>
    %c14_i32_348 = arith.constant 14 : i32
    %1458 = vector.broadcast %c14_i32_348 : i32 to vector<1x256xi32>
    %1459 = arith.cmpi sle, %79, %1458 : vector<1x256xi32>
    %1460 = arith.andi %1457, %1459 : vector<1x256xi1>
    %cst_349 = arith.constant 0.000000e+00 : f32
    %1461 = vector.shape_cast %1460 : vector<1x256xi1> to vector<1x256xi1>
    %1462 = vector.broadcast %1461 : vector<1x256xi1> to vector<4x256xi1>
    %1463 = vector.broadcast %cst_349 : f32 to vector<4x256xf32>
    %1464 = arith.select %1462, %1455, %1463 : vector<4x256xi1>, vector<4x256xf32>
    %1465 = vector.extract_strided_slice %1226 {offsets = [0, 30], sizes = [4, 226], strides = [1, 1]} : vector<4x256xf32> to vector<4x226xf32>
    %1466 = vector.extract_strided_slice %1226 {offsets = [0, 0], sizes = [4, 30], strides = [1, 1]} : vector<4x256xf32> to vector<4x30xf32>
    %1467 = tpu.concatenate %1465, %1466 in 1 : vector<4x226xf32>, vector<4x30xf32> -> vector<4x256xf32>
    %c2_i32_350 = arith.constant 2 : i32
    %1468 = vector.broadcast %c2_i32_350 : i32 to vector<1x256xi32>
    %1469 = arith.cmpi sge, %82, %1468 : vector<1x256xi32>
    %c13_i32_351 = arith.constant 13 : i32
    %1470 = vector.broadcast %c13_i32_351 : i32 to vector<1x256xi32>
    %1471 = arith.cmpi sle, %79, %1470 : vector<1x256xi32>
    %1472 = arith.andi %1469, %1471 : vector<1x256xi1>
    %cst_352 = arith.constant 0.000000e+00 : f32
    %1473 = vector.shape_cast %1472 : vector<1x256xi1> to vector<1x256xi1>
    %1474 = vector.broadcast %1473 : vector<1x256xi1> to vector<4x256xi1>
    %1475 = vector.broadcast %cst_352 : f32 to vector<4x256xf32>
    %1476 = arith.select %1474, %1467, %1475 : vector<4x256xi1>, vector<4x256xf32>
    %1477 = vector.extract_strided_slice %1226 {offsets = [0, 31], sizes = [4, 225], strides = [1, 1]} : vector<4x256xf32> to vector<4x225xf32>
    %1478 = vector.extract_strided_slice %1226 {offsets = [0, 0], sizes = [4, 31], strides = [1, 1]} : vector<4x256xf32> to vector<4x31xf32>
    %1479 = tpu.concatenate %1477, %1478 in 1 : vector<4x225xf32>, vector<4x31xf32> -> vector<4x256xf32>
    %c1_i32_353 = arith.constant 1 : i32
    %1480 = vector.broadcast %c1_i32_353 : i32 to vector<1x256xi32>
    %1481 = arith.cmpi sge, %82, %1480 : vector<1x256xi32>
    %c13_i32_354 = arith.constant 13 : i32
    %1482 = vector.broadcast %c13_i32_354 : i32 to vector<1x256xi32>
    %1483 = arith.cmpi sle, %79, %1482 : vector<1x256xi32>
    %1484 = arith.andi %1481, %1483 : vector<1x256xi1>
    %cst_355 = arith.constant 0.000000e+00 : f32
    %1485 = vector.shape_cast %1484 : vector<1x256xi1> to vector<1x256xi1>
    %1486 = vector.broadcast %1485 : vector<1x256xi1> to vector<4x256xi1>
    %1487 = vector.broadcast %cst_355 : f32 to vector<4x256xf32>
    %1488 = arith.select %1486, %1479, %1487 : vector<4x256xi1>, vector<4x256xf32>
    %1489 = vector.extract_strided_slice %1226 {offsets = [0, 32], sizes = [4, 224], strides = [1, 1]} : vector<4x256xf32> to vector<4x224xf32>
    %1490 = vector.extract_strided_slice %1226 {offsets = [0, 0], sizes = [4, 32], strides = [1, 1]} : vector<4x256xf32> to vector<4x32xf32>
    %1491 = tpu.concatenate %1489, %1490 in 1 : vector<4x224xf32>, vector<4x32xf32> -> vector<4x256xf32>
    %c13_i32_356 = arith.constant 13 : i32
    %1492 = vector.broadcast %c13_i32_356 : i32 to vector<1x256xi32>
    %1493 = arith.cmpi sle, %79, %1492 : vector<1x256xi32>
    %cst_357 = arith.constant 0.000000e+00 : f32
    %1494 = vector.shape_cast %1493 : vector<1x256xi1> to vector<1x256xi1>
    %1495 = vector.broadcast %1494 : vector<1x256xi1> to vector<4x256xi1>
    %1496 = vector.broadcast %cst_357 : f32 to vector<4x256xf32>
    %1497 = arith.select %1495, %1491, %1496 : vector<4x256xi1>, vector<4x256xf32>
    %1498 = vector.extract_strided_slice %1226 {offsets = [0, 33], sizes = [4, 223], strides = [1, 1]} : vector<4x256xf32> to vector<4x223xf32>
    %1499 = vector.extract_strided_slice %1226 {offsets = [0, 0], sizes = [4, 33], strides = [1, 1]} : vector<4x256xf32> to vector<4x33xf32>
    %1500 = tpu.concatenate %1498, %1499 in 1 : vector<4x223xf32>, vector<4x33xf32> -> vector<4x256xf32>
    %c14_i32_358 = arith.constant 14 : i32
    %1501 = vector.broadcast %c14_i32_358 : i32 to vector<1x256xi32>
    %1502 = arith.cmpi sle, %82, %1501 : vector<1x256xi32>
    %c13_i32_359 = arith.constant 13 : i32
    %1503 = vector.broadcast %c13_i32_359 : i32 to vector<1x256xi32>
    %1504 = arith.cmpi sle, %79, %1503 : vector<1x256xi32>
    %1505 = arith.andi %1502, %1504 : vector<1x256xi1>
    %cst_360 = arith.constant 0.000000e+00 : f32
    %1506 = vector.shape_cast %1505 : vector<1x256xi1> to vector<1x256xi1>
    %1507 = vector.broadcast %1506 : vector<1x256xi1> to vector<4x256xi1>
    %1508 = vector.broadcast %cst_360 : f32 to vector<4x256xf32>
    %1509 = arith.select %1507, %1500, %1508 : vector<4x256xi1>, vector<4x256xf32>
    %1510 = vector.extract_strided_slice %1226 {offsets = [0, 34], sizes = [4, 222], strides = [1, 1]} : vector<4x256xf32> to vector<4x222xf32>
    %1511 = vector.extract_strided_slice %1226 {offsets = [0, 0], sizes = [4, 34], strides = [1, 1]} : vector<4x256xf32> to vector<4x34xf32>
    %1512 = tpu.concatenate %1510, %1511 in 1 : vector<4x222xf32>, vector<4x34xf32> -> vector<4x256xf32>
    %c13_i32_361 = arith.constant 13 : i32
    %1513 = vector.broadcast %c13_i32_361 : i32 to vector<1x256xi32>
    %1514 = arith.cmpi sle, %82, %1513 : vector<1x256xi32>
    %c13_i32_362 = arith.constant 13 : i32
    %1515 = vector.broadcast %c13_i32_362 : i32 to vector<1x256xi32>
    %1516 = arith.cmpi sle, %79, %1515 : vector<1x256xi32>
    %1517 = arith.andi %1514, %1516 : vector<1x256xi1>
    %cst_363 = arith.constant 0.000000e+00 : f32
    %1518 = vector.shape_cast %1517 : vector<1x256xi1> to vector<1x256xi1>
    %1519 = vector.broadcast %1518 : vector<1x256xi1> to vector<4x256xi1>
    %1520 = vector.broadcast %cst_363 : f32 to vector<4x256xf32>
    %1521 = arith.select %1519, %1512, %1520 : vector<4x256xi1>, vector<4x256xf32>
    %1522 = tpu.concatenate %1297, %1309, %1318, %1330, %1342, %1354, %1361, %1368, %1375, %1387, %1396, %1403, %1226, %1410, %1419, %1431 in 0 : vector<4x256xf32>, vector<4x256xf32>, vector<4x256xf32>, vector<4x256xf32>, vector<4x256xf32>, vector<4x256xf32>, vector<4x256xf32>, vector<4x256xf32>, vector<4x256xf32>, vector<4x256xf32>, vector<4x256xf32>, vector<4x256xf32>, vector<4x256xf32>, vector<4x256xf32>, vector<4x256xf32>, vector<4x256xf32> -> vector<64x256xf32>
    %1523 = tpu.concatenate %1438, %1445, %1452, %1464, %1476, %1488, %1497, %1509, %1521 in 0 : vector<4x256xf32>, vector<4x256xf32>, vector<4x256xf32>, vector<4x256xf32>, vector<4x256xf32>, vector<4x256xf32>, vector<4x256xf32>, vector<4x256xf32>, vector<4x256xf32> -> vector<36x256xf32>
    %1524 = tpu.concatenate %1522, %1523 in 0 : vector<64x256xf32>, vector<36x256xf32> -> vector<100x256xf32>
    %cst_364 = arith.constant dense<0.000000e+00> : vector<4x256xf32>
    %1525 = tpu.matmul %12, %1524, %cst_364 {dimension_numbers = #tpu.dot_dimension_numbers<[1], [0], [0], [1], [0, 0, 1, 1], [], []>} : vector<4x100xf32>, vector<100x256xf32>, vector<4x256xf32> -> vector<4x256xf32>
    %1526 = tpu.concatenate %1227, %1285, %1525 in 0 : vector<4x256xf32>, vector<4x256xf32>, vector<4x256xf32> -> vector<12x256xf32>
    %1527 = vector.extract_strided_slice %1526 {offsets = [0, 239], sizes = [12, 17], strides = [1, 1]} : vector<12x256xf32> to vector<12x17xf32>
    %1528 = vector.extract_strided_slice %1526 {offsets = [0, 0], sizes = [12, 239], strides = [1, 1]} : vector<12x256xf32> to vector<12x239xf32>
    %1529 = tpu.concatenate %1527, %1528 in 1 : vector<12x17xf32>, vector<12x239xf32> -> vector<12x256xf32>
    %cst_365 = arith.constant 0.000000e+00 : f32
    %1530 = vector.shape_cast %101 : vector<1x256xi1> to vector<1x256xi1>
    %1531 = vector.broadcast %1530 : vector<1x256xi1> to vector<12x256xi1>
    %1532 = vector.broadcast %cst_365 : f32 to vector<12x256xf32>
    %1533 = arith.select %1531, %1529, %1532 : vector<12x256xi1>, vector<12x256xf32>
    %1534 = vector.extract_strided_slice %1526 {offsets = [0, 240], sizes = [12, 16], strides = [1, 1]} : vector<12x256xf32> to vector<12x16xf32>
    %1535 = vector.extract_strided_slice %1526 {offsets = [0, 0], sizes = [12, 240], strides = [1, 1]} : vector<12x256xf32> to vector<12x240xf32>
    %1536 = tpu.concatenate %1534, %1535 in 1 : vector<12x16xf32>, vector<12x240xf32> -> vector<12x256xf32>
    %cst_366 = arith.constant 0.000000e+00 : f32
    %1537 = vector.shape_cast %110 : vector<1x256xi1> to vector<1x256xi1>
    %1538 = vector.broadcast %1537 : vector<1x256xi1> to vector<12x256xi1>
    %1539 = vector.broadcast %cst_366 : f32 to vector<12x256xf32>
    %1540 = arith.select %1538, %1536, %1539 : vector<12x256xi1>, vector<12x256xf32>
    %1541 = vector.extract_strided_slice %1526 {offsets = [0, 241], sizes = [12, 15], strides = [1, 1]} : vector<12x256xf32> to vector<12x15xf32>
    %1542 = vector.extract_strided_slice %1526 {offsets = [0, 0], sizes = [12, 241], strides = [1, 1]} : vector<12x256xf32> to vector<12x241xf32>
    %1543 = tpu.concatenate %1541, %1542 in 1 : vector<12x15xf32>, vector<12x241xf32> -> vector<12x256xf32>
    %cst_367 = arith.constant 0.000000e+00 : f32
    %1544 = vector.shape_cast %122 : vector<1x256xi1> to vector<1x256xi1>
    %1545 = vector.broadcast %1544 : vector<1x256xi1> to vector<12x256xi1>
    %1546 = vector.broadcast %cst_367 : f32 to vector<12x256xf32>
    %1547 = arith.select %1545, %1543, %1546 : vector<12x256xi1>, vector<12x256xf32>
    %1548 = vector.extract_strided_slice %1526 {offsets = [0, 255], sizes = [12, 1], strides = [1, 1]} : vector<12x256xf32> to vector<12x1xf32>
    %1549 = vector.extract_strided_slice %1526 {offsets = [0, 0], sizes = [12, 255], strides = [1, 1]} : vector<12x256xf32> to vector<12x255xf32>
    %1550 = tpu.concatenate %1548, %1549 in 1 : vector<12x1xf32>, vector<12x255xf32> -> vector<12x256xf32>
    %cst_368 = arith.constant 0.000000e+00 : f32
    %1551 = vector.shape_cast %131 : vector<1x256xi1> to vector<1x256xi1>
    %1552 = vector.broadcast %1551 : vector<1x256xi1> to vector<12x256xi1>
    %1553 = vector.broadcast %cst_368 : f32 to vector<12x256xf32>
    %1554 = arith.select %1552, %1550, %1553 : vector<12x256xi1>, vector<12x256xf32>
    %1555 = vector.extract_strided_slice %1526 {offsets = [0, 1], sizes = [12, 255], strides = [1, 1]} : vector<12x256xf32> to vector<12x255xf32>
    %1556 = vector.extract_strided_slice %1526 {offsets = [0, 0], sizes = [12, 1], strides = [1, 1]} : vector<12x256xf32> to vector<12x1xf32>
    %1557 = tpu.concatenate %1555, %1556 in 1 : vector<12x255xf32>, vector<12x1xf32> -> vector<12x256xf32>
    %cst_369 = arith.constant 0.000000e+00 : f32
    %1558 = vector.shape_cast %140 : vector<1x256xi1> to vector<1x256xi1>
    %1559 = vector.broadcast %1558 : vector<1x256xi1> to vector<12x256xi1>
    %1560 = vector.broadcast %cst_369 : f32 to vector<12x256xf32>
    %1561 = arith.select %1559, %1557, %1560 : vector<12x256xi1>, vector<12x256xf32>
    %1562 = vector.extract_strided_slice %1526 {offsets = [0, 15], sizes = [12, 241], strides = [1, 1]} : vector<12x256xf32> to vector<12x241xf32>
    %1563 = vector.extract_strided_slice %1526 {offsets = [0, 0], sizes = [12, 15], strides = [1, 1]} : vector<12x256xf32> to vector<12x15xf32>
    %1564 = tpu.concatenate %1562, %1563 in 1 : vector<12x241xf32>, vector<12x15xf32> -> vector<12x256xf32>
    %cst_370 = arith.constant 0.000000e+00 : f32
    %1565 = vector.shape_cast %152 : vector<1x256xi1> to vector<1x256xi1>
    %1566 = vector.broadcast %1565 : vector<1x256xi1> to vector<12x256xi1>
    %1567 = vector.broadcast %cst_370 : f32 to vector<12x256xf32>
    %1568 = arith.select %1566, %1564, %1567 : vector<12x256xi1>, vector<12x256xf32>
    %1569 = vector.extract_strided_slice %1526 {offsets = [0, 16], sizes = [12, 240], strides = [1, 1]} : vector<12x256xf32> to vector<12x240xf32>
    %1570 = vector.extract_strided_slice %1526 {offsets = [0, 0], sizes = [12, 16], strides = [1, 1]} : vector<12x256xf32> to vector<12x16xf32>
    %1571 = tpu.concatenate %1569, %1570 in 1 : vector<12x240xf32>, vector<12x16xf32> -> vector<12x256xf32>
    %cst_371 = arith.constant 0.000000e+00 : f32
    %1572 = vector.shape_cast %161 : vector<1x256xi1> to vector<1x256xi1>
    %1573 = vector.broadcast %1572 : vector<1x256xi1> to vector<12x256xi1>
    %1574 = vector.broadcast %cst_371 : f32 to vector<12x256xf32>
    %1575 = arith.select %1573, %1571, %1574 : vector<12x256xi1>, vector<12x256xf32>
    %1576 = vector.extract_strided_slice %1526 {offsets = [0, 17], sizes = [12, 239], strides = [1, 1]} : vector<12x256xf32> to vector<12x239xf32>
    %1577 = vector.extract_strided_slice %1526 {offsets = [0, 0], sizes = [12, 17], strides = [1, 1]} : vector<12x256xf32> to vector<12x17xf32>
    %1578 = tpu.concatenate %1576, %1577 in 1 : vector<12x239xf32>, vector<12x17xf32> -> vector<12x256xf32>
    %cst_372 = arith.constant 0.000000e+00 : f32
    %1579 = vector.shape_cast %173 : vector<1x256xi1> to vector<1x256xi1>
    %1580 = vector.broadcast %1579 : vector<1x256xi1> to vector<12x256xi1>
    %1581 = vector.broadcast %cst_372 : f32 to vector<12x256xf32>
    %1582 = arith.select %1580, %1578, %1581 : vector<12x256xi1>, vector<12x256xf32>
    %1583 = tpu.concatenate %1533, %1540, %1547, %1554, %1526, %1561, %1568, %1575, %1582 in 0 : vector<12x256xf32>, vector<12x256xf32>, vector<12x256xf32>, vector<12x256xf32>, vector<12x256xf32>, vector<12x256xf32>, vector<12x256xf32>, vector<12x256xf32>, vector<12x256xf32> -> vector<108x256xf32>
    %cst_373 = arith.constant dense<0.000000e+00> : vector<4x256xf32>
    %1584 = tpu.matmul %13, %1583, %cst_373 {dimension_numbers = #tpu.dot_dimension_numbers<[1], [0], [0], [1], [0, 0, 1, 1], [], []>} : vector<4x108xf32>, vector<108x256xf32>, vector<4x256xf32> -> vector<4x256xf32>
    %1585 = tpu.concatenate %1226, %1584 in 0 : vector<4x256xf32>, vector<4x256xf32> -> vector<8x256xf32>
    %1586 = vector.extract_strided_slice %1585 {offsets = [0, 239], sizes = [8, 17], strides = [1, 1]} : vector<8x256xf32> to vector<8x17xf32>
    %1587 = vector.extract_strided_slice %1585 {offsets = [0, 0], sizes = [8, 239], strides = [1, 1]} : vector<8x256xf32> to vector<8x239xf32>
    %1588 = tpu.concatenate %1586, %1587 in 1 : vector<8x17xf32>, vector<8x239xf32> -> vector<8x256xf32>
    %cst_374 = arith.constant 0.000000e+00 : f32
    %1589 = vector.shape_cast %101 : vector<1x256xi1> to vector<1x256xi1>
    %1590 = vector.broadcast %1589 : vector<1x256xi1> to vector<8x256xi1>
    %1591 = vector.broadcast %cst_374 : f32 to vector<8x256xf32>
    %1592 = arith.select %1590, %1588, %1591 : vector<8x256xi1>, vector<8x256xf32>
    %1593 = vector.extract_strided_slice %1585 {offsets = [0, 240], sizes = [8, 16], strides = [1, 1]} : vector<8x256xf32> to vector<8x16xf32>
    %1594 = vector.extract_strided_slice %1585 {offsets = [0, 0], sizes = [8, 240], strides = [1, 1]} : vector<8x256xf32> to vector<8x240xf32>
    %1595 = tpu.concatenate %1593, %1594 in 1 : vector<8x16xf32>, vector<8x240xf32> -> vector<8x256xf32>
    %cst_375 = arith.constant 0.000000e+00 : f32
    %1596 = vector.shape_cast %110 : vector<1x256xi1> to vector<1x256xi1>
    %1597 = vector.broadcast %1596 : vector<1x256xi1> to vector<8x256xi1>
    %1598 = vector.broadcast %cst_375 : f32 to vector<8x256xf32>
    %1599 = arith.select %1597, %1595, %1598 : vector<8x256xi1>, vector<8x256xf32>
    %1600 = vector.extract_strided_slice %1585 {offsets = [0, 241], sizes = [8, 15], strides = [1, 1]} : vector<8x256xf32> to vector<8x15xf32>
    %1601 = vector.extract_strided_slice %1585 {offsets = [0, 0], sizes = [8, 241], strides = [1, 1]} : vector<8x256xf32> to vector<8x241xf32>
    %1602 = tpu.concatenate %1600, %1601 in 1 : vector<8x15xf32>, vector<8x241xf32> -> vector<8x256xf32>
    %cst_376 = arith.constant 0.000000e+00 : f32
    %1603 = vector.shape_cast %122 : vector<1x256xi1> to vector<1x256xi1>
    %1604 = vector.broadcast %1603 : vector<1x256xi1> to vector<8x256xi1>
    %1605 = vector.broadcast %cst_376 : f32 to vector<8x256xf32>
    %1606 = arith.select %1604, %1602, %1605 : vector<8x256xi1>, vector<8x256xf32>
    %1607 = vector.extract_strided_slice %1585 {offsets = [0, 255], sizes = [8, 1], strides = [1, 1]} : vector<8x256xf32> to vector<8x1xf32>
    %1608 = vector.extract_strided_slice %1585 {offsets = [0, 0], sizes = [8, 255], strides = [1, 1]} : vector<8x256xf32> to vector<8x255xf32>
    %1609 = tpu.concatenate %1607, %1608 in 1 : vector<8x1xf32>, vector<8x255xf32> -> vector<8x256xf32>
    %cst_377 = arith.constant 0.000000e+00 : f32
    %1610 = vector.shape_cast %131 : vector<1x256xi1> to vector<1x256xi1>
    %1611 = vector.broadcast %1610 : vector<1x256xi1> to vector<8x256xi1>
    %1612 = vector.broadcast %cst_377 : f32 to vector<8x256xf32>
    %1613 = arith.select %1611, %1609, %1612 : vector<8x256xi1>, vector<8x256xf32>
    %1614 = vector.extract_strided_slice %1585 {offsets = [0, 1], sizes = [8, 255], strides = [1, 1]} : vector<8x256xf32> to vector<8x255xf32>
    %1615 = vector.extract_strided_slice %1585 {offsets = [0, 0], sizes = [8, 1], strides = [1, 1]} : vector<8x256xf32> to vector<8x1xf32>
    %1616 = tpu.concatenate %1614, %1615 in 1 : vector<8x255xf32>, vector<8x1xf32> -> vector<8x256xf32>
    %cst_378 = arith.constant 0.000000e+00 : f32
    %1617 = vector.shape_cast %140 : vector<1x256xi1> to vector<1x256xi1>
    %1618 = vector.broadcast %1617 : vector<1x256xi1> to vector<8x256xi1>
    %1619 = vector.broadcast %cst_378 : f32 to vector<8x256xf32>
    %1620 = arith.select %1618, %1616, %1619 : vector<8x256xi1>, vector<8x256xf32>
    %1621 = vector.extract_strided_slice %1585 {offsets = [0, 15], sizes = [8, 241], strides = [1, 1]} : vector<8x256xf32> to vector<8x241xf32>
    %1622 = vector.extract_strided_slice %1585 {offsets = [0, 0], sizes = [8, 15], strides = [1, 1]} : vector<8x256xf32> to vector<8x15xf32>
    %1623 = tpu.concatenate %1621, %1622 in 1 : vector<8x241xf32>, vector<8x15xf32> -> vector<8x256xf32>
    %cst_379 = arith.constant 0.000000e+00 : f32
    %1624 = vector.shape_cast %152 : vector<1x256xi1> to vector<1x256xi1>
    %1625 = vector.broadcast %1624 : vector<1x256xi1> to vector<8x256xi1>
    %1626 = vector.broadcast %cst_379 : f32 to vector<8x256xf32>
    %1627 = arith.select %1625, %1623, %1626 : vector<8x256xi1>, vector<8x256xf32>
    %1628 = vector.extract_strided_slice %1585 {offsets = [0, 16], sizes = [8, 240], strides = [1, 1]} : vector<8x256xf32> to vector<8x240xf32>
    %1629 = vector.extract_strided_slice %1585 {offsets = [0, 0], sizes = [8, 16], strides = [1, 1]} : vector<8x256xf32> to vector<8x16xf32>
    %1630 = tpu.concatenate %1628, %1629 in 1 : vector<8x240xf32>, vector<8x16xf32> -> vector<8x256xf32>
    %cst_380 = arith.constant 0.000000e+00 : f32
    %1631 = vector.shape_cast %161 : vector<1x256xi1> to vector<1x256xi1>
    %1632 = vector.broadcast %1631 : vector<1x256xi1> to vector<8x256xi1>
    %1633 = vector.broadcast %cst_380 : f32 to vector<8x256xf32>
    %1634 = arith.select %1632, %1630, %1633 : vector<8x256xi1>, vector<8x256xf32>
    %1635 = vector.extract_strided_slice %1585 {offsets = [0, 17], sizes = [8, 239], strides = [1, 1]} : vector<8x256xf32> to vector<8x239xf32>
    %1636 = vector.extract_strided_slice %1585 {offsets = [0, 0], sizes = [8, 17], strides = [1, 1]} : vector<8x256xf32> to vector<8x17xf32>
    %1637 = tpu.concatenate %1635, %1636 in 1 : vector<8x239xf32>, vector<8x17xf32> -> vector<8x256xf32>
    %cst_381 = arith.constant 0.000000e+00 : f32
    %1638 = vector.shape_cast %173 : vector<1x256xi1> to vector<1x256xi1>
    %1639 = vector.broadcast %1638 : vector<1x256xi1> to vector<8x256xi1>
    %1640 = vector.broadcast %cst_381 : f32 to vector<8x256xf32>
    %1641 = arith.select %1639, %1637, %1640 : vector<8x256xi1>, vector<8x256xf32>
    %1642 = tpu.concatenate %1592, %1599, %1606, %1613, %1585, %1620, %1627, %1634, %1641 in 0 : vector<8x256xf32>, vector<8x256xf32>, vector<8x256xf32>, vector<8x256xf32>, vector<8x256xf32>, vector<8x256xf32>, vector<8x256xf32>, vector<8x256xf32>, vector<8x256xf32> -> vector<72x256xf32>
    %cst_382 = arith.constant dense<0.000000e+00> : vector<8x256xf32>
    %1643 = tpu.matmul %14, %1642, %cst_382 {dimension_numbers = #tpu.dot_dimension_numbers<[1], [0], [0], [1], [0, 0, 1, 1], [], []>} : vector<8x72xf32>, vector<72x256xf32>, vector<8x256xf32> -> vector<8x256xf32>
    %1644 = vector.extract_strided_slice %1643 {offsets = [0, 239], sizes = [8, 17], strides = [1, 1]} : vector<8x256xf32> to vector<8x17xf32>
    %1645 = vector.extract_strided_slice %1643 {offsets = [0, 0], sizes = [8, 239], strides = [1, 1]} : vector<8x256xf32> to vector<8x239xf32>
    %1646 = tpu.concatenate %1644, %1645 in 1 : vector<8x17xf32>, vector<8x239xf32> -> vector<8x256xf32>
    %cst_383 = arith.constant 0.000000e+00 : f32
    %1647 = vector.shape_cast %101 : vector<1x256xi1> to vector<1x256xi1>
    %1648 = vector.broadcast %1647 : vector<1x256xi1> to vector<8x256xi1>
    %1649 = vector.broadcast %cst_383 : f32 to vector<8x256xf32>
    %1650 = arith.select %1648, %1646, %1649 : vector<8x256xi1>, vector<8x256xf32>
    %1651 = vector.extract_strided_slice %1643 {offsets = [0, 240], sizes = [8, 16], strides = [1, 1]} : vector<8x256xf32> to vector<8x16xf32>
    %1652 = vector.extract_strided_slice %1643 {offsets = [0, 0], sizes = [8, 240], strides = [1, 1]} : vector<8x256xf32> to vector<8x240xf32>
    %1653 = tpu.concatenate %1651, %1652 in 1 : vector<8x16xf32>, vector<8x240xf32> -> vector<8x256xf32>
    %cst_384 = arith.constant 0.000000e+00 : f32
    %1654 = vector.shape_cast %110 : vector<1x256xi1> to vector<1x256xi1>
    %1655 = vector.broadcast %1654 : vector<1x256xi1> to vector<8x256xi1>
    %1656 = vector.broadcast %cst_384 : f32 to vector<8x256xf32>
    %1657 = arith.select %1655, %1653, %1656 : vector<8x256xi1>, vector<8x256xf32>
    %1658 = vector.extract_strided_slice %1643 {offsets = [0, 241], sizes = [8, 15], strides = [1, 1]} : vector<8x256xf32> to vector<8x15xf32>
    %1659 = vector.extract_strided_slice %1643 {offsets = [0, 0], sizes = [8, 241], strides = [1, 1]} : vector<8x256xf32> to vector<8x241xf32>
    %1660 = tpu.concatenate %1658, %1659 in 1 : vector<8x15xf32>, vector<8x241xf32> -> vector<8x256xf32>
    %cst_385 = arith.constant 0.000000e+00 : f32
    %1661 = vector.shape_cast %122 : vector<1x256xi1> to vector<1x256xi1>
    %1662 = vector.broadcast %1661 : vector<1x256xi1> to vector<8x256xi1>
    %1663 = vector.broadcast %cst_385 : f32 to vector<8x256xf32>
    %1664 = arith.select %1662, %1660, %1663 : vector<8x256xi1>, vector<8x256xf32>
    %1665 = vector.extract_strided_slice %1643 {offsets = [0, 255], sizes = [8, 1], strides = [1, 1]} : vector<8x256xf32> to vector<8x1xf32>
    %1666 = vector.extract_strided_slice %1643 {offsets = [0, 0], sizes = [8, 255], strides = [1, 1]} : vector<8x256xf32> to vector<8x255xf32>
    %1667 = tpu.concatenate %1665, %1666 in 1 : vector<8x1xf32>, vector<8x255xf32> -> vector<8x256xf32>
    %cst_386 = arith.constant 0.000000e+00 : f32
    %1668 = vector.shape_cast %131 : vector<1x256xi1> to vector<1x256xi1>
    %1669 = vector.broadcast %1668 : vector<1x256xi1> to vector<8x256xi1>
    %1670 = vector.broadcast %cst_386 : f32 to vector<8x256xf32>
    %1671 = arith.select %1669, %1667, %1670 : vector<8x256xi1>, vector<8x256xf32>
    %1672 = vector.extract_strided_slice %1643 {offsets = [0, 1], sizes = [8, 255], strides = [1, 1]} : vector<8x256xf32> to vector<8x255xf32>
    %1673 = vector.extract_strided_slice %1643 {offsets = [0, 0], sizes = [8, 1], strides = [1, 1]} : vector<8x256xf32> to vector<8x1xf32>
    %1674 = tpu.concatenate %1672, %1673 in 1 : vector<8x255xf32>, vector<8x1xf32> -> vector<8x256xf32>
    %cst_387 = arith.constant 0.000000e+00 : f32
    %1675 = vector.shape_cast %140 : vector<1x256xi1> to vector<1x256xi1>
    %1676 = vector.broadcast %1675 : vector<1x256xi1> to vector<8x256xi1>
    %1677 = vector.broadcast %cst_387 : f32 to vector<8x256xf32>
    %1678 = arith.select %1676, %1674, %1677 : vector<8x256xi1>, vector<8x256xf32>
    %1679 = vector.extract_strided_slice %1643 {offsets = [0, 15], sizes = [8, 241], strides = [1, 1]} : vector<8x256xf32> to vector<8x241xf32>
    %1680 = vector.extract_strided_slice %1643 {offsets = [0, 0], sizes = [8, 15], strides = [1, 1]} : vector<8x256xf32> to vector<8x15xf32>
    %1681 = tpu.concatenate %1679, %1680 in 1 : vector<8x241xf32>, vector<8x15xf32> -> vector<8x256xf32>
    %cst_388 = arith.constant 0.000000e+00 : f32
    %1682 = vector.shape_cast %152 : vector<1x256xi1> to vector<1x256xi1>
    %1683 = vector.broadcast %1682 : vector<1x256xi1> to vector<8x256xi1>
    %1684 = vector.broadcast %cst_388 : f32 to vector<8x256xf32>
    %1685 = arith.select %1683, %1681, %1684 : vector<8x256xi1>, vector<8x256xf32>
    %1686 = vector.extract_strided_slice %1643 {offsets = [0, 16], sizes = [8, 240], strides = [1, 1]} : vector<8x256xf32> to vector<8x240xf32>
    %1687 = vector.extract_strided_slice %1643 {offsets = [0, 0], sizes = [8, 16], strides = [1, 1]} : vector<8x256xf32> to vector<8x16xf32>
    %1688 = tpu.concatenate %1686, %1687 in 1 : vector<8x240xf32>, vector<8x16xf32> -> vector<8x256xf32>
    %cst_389 = arith.constant 0.000000e+00 : f32
    %1689 = vector.shape_cast %161 : vector<1x256xi1> to vector<1x256xi1>
    %1690 = vector.broadcast %1689 : vector<1x256xi1> to vector<8x256xi1>
    %1691 = vector.broadcast %cst_389 : f32 to vector<8x256xf32>
    %1692 = arith.select %1690, %1688, %1691 : vector<8x256xi1>, vector<8x256xf32>
    %1693 = vector.extract_strided_slice %1643 {offsets = [0, 17], sizes = [8, 239], strides = [1, 1]} : vector<8x256xf32> to vector<8x239xf32>
    %1694 = vector.extract_strided_slice %1643 {offsets = [0, 0], sizes = [8, 17], strides = [1, 1]} : vector<8x256xf32> to vector<8x17xf32>
    %1695 = tpu.concatenate %1693, %1694 in 1 : vector<8x239xf32>, vector<8x17xf32> -> vector<8x256xf32>
    %cst_390 = arith.constant 0.000000e+00 : f32
    %1696 = vector.shape_cast %173 : vector<1x256xi1> to vector<1x256xi1>
    %1697 = vector.broadcast %1696 : vector<1x256xi1> to vector<8x256xi1>
    %1698 = vector.broadcast %cst_390 : f32 to vector<8x256xf32>
    %1699 = arith.select %1697, %1695, %1698 : vector<8x256xi1>, vector<8x256xf32>
    %1700 = tpu.concatenate %1650, %1657, %1664, %1671, %1643, %1678, %1685, %1692, %1699 in 0 : vector<8x256xf32>, vector<8x256xf32>, vector<8x256xf32>, vector<8x256xf32>, vector<8x256xf32>, vector<8x256xf32>, vector<8x256xf32>, vector<8x256xf32>, vector<8x256xf32> -> vector<72x256xf32>
    %cst_391 = arith.constant dense<0.000000e+00> : vector<4x256xf32>
    %1701 = tpu.matmul %15, %1700, %cst_391 {dimension_numbers = #tpu.dot_dimension_numbers<[1], [0], [0], [1], [0, 0, 1, 1], [], []>} : vector<4x72xf32>, vector<72x256xf32>, vector<4x256xf32> -> vector<4x256xf32>
    %1702 = arith.addf %1701, %17 : vector<4x256xf32>
    %c0_392 = arith.constant 0 : index
    %c0_393 = arith.constant 0 : index
    %c0_394 = arith.constant 0 : index
    %1703 = vector.load %arg18[%c0_392, %c0_393, %c0_394] : memref<1x4x256xf32, #tpu.memory_space<vmem>>, vector<1x4x256xf32>
    %1704 = vector.shape_cast %1703 : vector<1x4x256xf32> to vector<4x256xf32>
    %1705 = vector.shape_cast %1702 : vector<4x256xf32> to vector<1x4x256xf32>
    tpu.vector_store %arg18[%c0_392, %c0_393, %c0_394], %1705 {strides = array<i32>} : memref<1x4x256xf32, #tpu.memory_space<vmem>>, vector<1x4x256xf32>,
    return
  }
  func.func @transform_0(%arg0: i32) -> (i32, i32, i32) {
    %c0_i32 = arith.constant 0 : i32
    %c0_i32_0 = arith.constant 0 : i32
    %c0_i32_1 = arith.constant 0 : i32
    return %arg0, %c0_i32, %c0_i32_0 : i32, i32, i32
  }
  func.func @transform_1(%arg0: i32) -> (i32, i32) {
    %c0_i32 = arith.constant 0 : i32
    %c0_i32_0 = arith.constant 0 : i32
    %c0_i32_1 = arith.constant 0 : i32
    return %c0_i32, %c0_i32_0 : i32, i32
  }
  func.func @transform_2(%arg0: i32) -> (i32, i32) {
    %c0_i32 = arith.constant 0 : i32
    %c0_i32_0 = arith.constant 0 : i32
    %c0_i32_1 = arith.constant 0 : i32
    return %c0_i32, %c0_i32_0 : i32, i32
  }
  func.func @transform_3(%arg0: i32) -> (i32, i32) {
    %c0_i32 = arith.constant 0 : i32
    %c0_i32_0 = arith.constant 0 : i32
    %c0_i32_1 = arith.constant 0 : i32
    return %c0_i32, %c0_i32_0 : i32, i32
  }
  func.func @transform_4(%arg0: i32) -> (i32, i32) {
    %c0_i32 = arith.constant 0 : i32
    %c0_i32_0 = arith.constant 0 : i32
    %c0_i32_1 = arith.constant 0 : i32
    return %c0_i32, %c0_i32_0 : i32, i32
  }
  func.func @transform_5(%arg0: i32) -> (i32, i32) {
    %c0_i32 = arith.constant 0 : i32
    %c0_i32_0 = arith.constant 0 : i32
    %c0_i32_1 = arith.constant 0 : i32
    return %c0_i32, %c0_i32_0 : i32, i32
  }
  func.func @transform_6(%arg0: i32) -> (i32, i32) {
    %c0_i32 = arith.constant 0 : i32
    %c0_i32_0 = arith.constant 0 : i32
    %c0_i32_1 = arith.constant 0 : i32
    return %c0_i32, %c0_i32_0 : i32, i32
  }
  func.func @transform_7(%arg0: i32) -> (i32, i32) {
    %c0_i32 = arith.constant 0 : i32
    %c0_i32_0 = arith.constant 0 : i32
    %c0_i32_1 = arith.constant 0 : i32
    return %c0_i32, %c0_i32_0 : i32, i32
  }
  func.func @transform_8(%arg0: i32) -> (i32, i32) {
    %c0_i32 = arith.constant 0 : i32
    %c0_i32_0 = arith.constant 0 : i32
    %c0_i32_1 = arith.constant 0 : i32
    return %c0_i32, %c0_i32_0 : i32, i32
  }
  func.func @transform_9(%arg0: i32) -> (i32, i32) {
    %c0_i32 = arith.constant 0 : i32
    %c0_i32_0 = arith.constant 0 : i32
    %c0_i32_1 = arith.constant 0 : i32
    return %c0_i32, %c0_i32_0 : i32, i32
  }
  func.func @transform_10(%arg0: i32) -> (i32, i32) {
    %c0_i32 = arith.constant 0 : i32
    %c0_i32_0 = arith.constant 0 : i32
    %c0_i32_1 = arith.constant 0 : i32
    return %c0_i32, %c0_i32_0 : i32, i32
  }
  func.func @transform_11(%arg0: i32) -> (i32, i32) {
    %c0_i32 = arith.constant 0 : i32
    %c0_i32_0 = arith.constant 0 : i32
    %c0_i32_1 = arith.constant 0 : i32
    return %c0_i32, %c0_i32_0 : i32, i32
  }
  func.func @transform_12(%arg0: i32) -> (i32, i32) {
    %c0_i32 = arith.constant 0 : i32
    %c0_i32_0 = arith.constant 0 : i32
    %c0_i32_1 = arith.constant 0 : i32
    return %c0_i32, %c0_i32_0 : i32, i32
  }
  func.func @transform_13(%arg0: i32) -> (i32, i32) {
    %c0_i32 = arith.constant 0 : i32
    %c0_i32_0 = arith.constant 0 : i32
    %c0_i32_1 = arith.constant 0 : i32
    return %c0_i32, %c0_i32_0 : i32, i32
  }
  func.func @transform_14(%arg0: i32) -> (i32, i32) {
    %c0_i32 = arith.constant 0 : i32
    %c0_i32_0 = arith.constant 0 : i32
    %c0_i32_1 = arith.constant 0 : i32
    return %c0_i32, %c0_i32_0 : i32, i32
  }
  func.func @transform_15(%arg0: i32) -> (i32, i32) {
    %c0_i32 = arith.constant 0 : i32
    %c0_i32_0 = arith.constant 0 : i32
    %c0_i32_1 = arith.constant 0 : i32
    return %c0_i32, %c0_i32_0 : i32, i32
  }
  func.func @transform_16(%arg0: i32) -> (i32, i32) {
    %c0_i32 = arith.constant 0 : i32
    %c0_i32_0 = arith.constant 0 : i32
    %c0_i32_1 = arith.constant 0 : i32
    return %c0_i32, %c0_i32_0 : i32, i32
  }
  func.func @transform_17(%arg0: i32) -> (i32, i32, i32) {
    %c0_i32 = arith.constant 0 : i32
    %c0_i32_0 = arith.constant 0 : i32
    %c0_i32_1 = arith.constant 0 : i32
    return %arg0, %c0_i32, %c0_i32_0 : i32, i32, i32
  }
}

</mosaic_0001>

<bundles_post_ra>
// kernel: attention_block_forward.1
= control target key start
LH: loop header
LB: loop body
LE: loop exit
PB: predicated region body
PF: predicated region fallthrough
CT: control target
= control target key end

     0   :  { %s9025_s24 = smov 0   ;;  %s12040_s0 = inlined_call_operand.vmem [shape: f32[2,4,256], index: 0, kind: input, shape index: {}]   ;;  %s12041_s1 = inlined_call_operand.vmem [shape: f32[4,36], index: 1, kind: input, shape index: {}]   ;;  %s12042_s2 = inlined_call_operand.vmem [shape: f32[4,12], index: 2, kind: input, shape index: {}]   ;;  %s12043_s3 = inlined_call_operand.vmem [shape: f32[4,12], index: 3, kind: input, shape index: {}]   ;;  %s12044_s4 = inlined_call_operand.vmem [shape: f32[4,36], index: 4, kind: input, shape index: {}]   ;;  %s12045_s5 = inlined_call_operand.vmem [shape: f32[4,36], index: 5, kind: input, shape index: {}]   ;;  %s12046_s6 = inlined_call_operand.vmem [shape: f32[4,36], index: 6, kind: input, shape index: {}]   ;;  %s12047_s7 = inlined_call_operand.vmem [shape: f32[4,36], index: 7, kind: input, shape index: {}]   ;;  %s12048_s8 = inlined_call_operand.vmem [shape: f32[4,144], index: 8, kind: input, shape index: {}]   ;;  %s12049_s9 = inlined_call_operand.vmem [shape: f32[4,36], index: 9, kind: input, shape index: {}]   ;;  %s12050_s10 = inlined_call_operand.vmem [shape: f32[4,36], index: 10, kind: input, shape index: {}]   ;;  %s12051_s11 = inlined_call_operand.vmem [shape: f32[4,4], index: 11, kind: input, shape index: {}]   ;;  %s12052_s12 = inlined_call_operand.vmem [shape: f32[4,36], index: 12, kind: input, shape index: {}]   ;;  %s12053_s13 = inlined_call_operand.vmem [shape: f32[4,100], index: 13, kind: input, shape index: {}]   ;;  %s12054_s14 = inlined_call_operand.vmem [shape: f32[4,108], index: 14, kind: input, shape index: {}]   ;;  %s12055_s15 = inlined_call_operand.vmem [shape: f32[8,72], index: 15, kind: input, shape index: {}]   ;;  %s12056_s16 = inlined_call_operand.vmem [shape: f32[4,72], index: 16, kind: input, shape index: {}]   ;;  %s12057_s17 = inlined_call_operand.vmem [shape: f32[2,4,256], index: 17, kind: output, shape index: {}]  }
   0x1   :  { %12149 = sst [smem:[#allocation3_spill]] %s12040_s0 }
   0x2   :  { %12150 = sst [smem:[#allocation4_spill]] %s12041_s1 }
   0x3   :  { %12151 = sst [smem:[#allocation5_spill]] %s12042_s2 }
   0x4   :  { %12152 = sst [smem:[#allocation6_spill]] %s12043_s3 }
   0x5   :  { %12153 = sst [smem:[#allocation7_spill]] %s12044_s4 }
   0x6 LB: > { %s8133_s25 = sadd.s32 4294967295, %s8899_s24   ;;  %p8137_p0 = scmp.ge.s32.totalorder %s8899_s24, 1  ;;  %s8899_s24 = sphi %s9025_s24, %s27_s24  }
   0x7   : > { %p487_p1 = scmp.lt.s32.totalorder %s8899_s24, 3 }
   0x9   : > { %p488_p2 = pnand %p8137_p0, %p487_p1 }
   0xb   : > { %491 = sbr.rel (%p488_p2) target bundleno = 6584 (0x19b8), region = 88 }
  0x10   : > { %p539_p3 = scmp.lt.s32.totalorder %s8133_s25, 1  ;;  %s12154_s29 = sld [smem:[#allocation3_spill]]  ;;  %v8906_v2 = vmov 0.0   ;;  %v566_v3 = vlaneseq  ;;  %v8910_v6 = vmov 0   ;;  %v12156_v40 = vmov 0 }
  0x11   : > { %s12069_s30 = smov 111   ;;  %s12139_s18 = smov 112   ;;  %934 = vmatprep.mubr.f32.mxu0 %v8906_v2  ;;  %8584 = vmatprep.subr.mxu1 %v8906_v2  ;;  %v12158_v41 = vmov 0  ;;  %v12160_v57 = vmov 0  ;;  %v12162_v59 = vmov 0 }
  0x12   : > { %s12792_s25 = smov (!%p539_p3, %s8133_s25), 1  ;;  %s12127_s19 = smov 127   ;;  %v567_v4 = vand.u32 127, %v566_v3 }
  0x13   : > { %s12068_s26 = sshll.u32 %s12792_s25, 3  ;;  %s12132_s1 = smov 113  }
  0x14   : > { %s12129_s20 = smov 1   ;;  %s12081_s21 = smov 16   ;;  %v568_v5 = vadd.s32 128, %v567_v4  ;;  %vm569_vm1 = vcmp.ge.s32.totalorder %v567_v4, 16  ;;  %vm573_vm2 = vcmp.ge.s32.totalorder %v567_v4, 32  ;;  %vm579_vm4 = vcmp.ge.s32.totalorder %v567_v4, 48 }
  0x15   : > { %s12136_s22 = smov 15   ;;  %s12077_s23 = smov 17   ;;  %v571_v9 = vsel %vm569_vm1, 1, %v8910_v6  ;;  %v575_v10 = vsel %vm573_vm2, 1, %v8910_v6  ;;  %v581_v14 = vsel %vm579_vm4, 1, %v8910_v6  ;;  %vm585_vm6 = vcmp.ge.s32.totalorder %v567_v4, 64 }
  0x16   : > { %s9041_s0 = scalar_lea.vmem %s12154_s29, %s12068_s26  ;;  %vm616_vm0 = vcmp.ge.s32.totalorder %v568_v5, 144  ;;  %vm622_vm3 = vcmp.ge.s32.totalorder %v568_v5, 160  ;;  %vm628_vm5 = vcmp.ge.s32.totalorder %v568_v5, 176  ;;  %v577_v12 = vadd.s32 %v575_v10, %v571_v9  ;;  %s12172_s29 = sld [smem:[#allocation4_spill]] }
  0x17   : > { %v9044_v0 = vld [vmem:[%s9041_s0] sm:$0xff]  ;;  %v618_v7 = vsel %vm616_vm0, 1, %v8910_v6  ;;  %v624_v11 = vsel %vm622_vm3, 1, %v8910_v6  ;;  %v630_v15 = vsel %vm628_vm5, 1, %v8910_v6  ;;  %vm634_vm7 = vcmp.ge.s32.totalorder %v568_v5, 192  ;;  %s12075_s26 = smov 96  }
  0x18   : > { %808 = vrot.lane.b32.xlu1 %v9044_v0, %s12069_s30  ;;  %792 = vrot.lane.b32.xlu0 %v9044_v0, %s12139_s18  ;;  %v9052_v1 = vcombine.high %v9044_v0, %v9044_v0  ;;  %v620_v8 = vadd.s32 8, %v618_v7  ;;  %v583_v16 = vadd.s32 %v581_v14, %v577_v12  ;;  %v587_v18 = vsel %vm585_vm6, 1, %v8910_v6  ;;  %s8913_s27 = smov 80   ;;  %s12073_s28 = smov 32  }
  0x19   : > { %v636_v19 = vsel %vm634_vm7, 1, %v8910_v6  ;;  %vm591_vm8 = vcmp.ge.s32.totalorder %v567_v4, 80  ;;  %vm640_vm9 = vcmp.ge.s32.totalorder %v568_v5, 208  ;;  %vm597_vm10 = vcmp.ge.s32.totalorder %v567_v4, 96  ;;  %s12174_s2 = sld [smem:[#allocation5_spill]] }
  0x1a   : > { %12155 = vst [vmem:[#allocation2_spill] sm:$0xff] %v9052_v1  ;;  %v626_v13 = vadd.s32 %v624_v11, %v620_v8  ;;  %v589_v20 = vadd.s32 %v587_v18, %v583_v16  ;;  %v593_v22 = vsel %vm591_vm8, 1, %v8910_v6  ;;  %v642_v23 = vsel %vm640_vm9, 1, %v8910_v6  ;;  %s12199_s4 = sld [smem:[#allocation7_spill]] }
  0x1b   : > { %vm646_vm11 = vcmp.ge.s32.totalorder %v568_v5, 224  ;;  %v599_v26 = vsel %vm597_vm10, 1, %v8910_v6  ;;  %vm603_vm12 = vcmp.ge.s32.totalorder %v567_v4, 112  ;;  %vm652_vm13 = vcmp.ge.s32.totalorder %v568_v5, 240  ;;  %s12253_s3 = sld [smem:[#allocation6_spill]] }
  0x1c   : > { %756 = vrot.lane.b32.xlu0 %v9044_v0, %s12127_s19  ;;  %810 = vrot.lane.b32.xlu1 %v9052_v1, %s12069_s30  ;;  %v632_v17 = vadd.s32 %v630_v15, %v626_v13  ;;  %v595_v24 = vadd.s32 %v593_v22, %v589_v20  ;;  %v648_v27 = vsel %vm646_vm11, 1, %v8910_v6  ;;  %v605_v30 = vsel %vm603_vm12, 1, %v8910_v6  ;;  %s8912_s30 = smov 64  }
  0x1d   : > { %v654_v31 = vsel %vm652_vm13, 1, %v8910_v6  ;;  %vm12058_vm2 = vcmask 908288   ;;  %vm12090_vm5 = vcmask 1043456   ;;  %vm12059_vm6 = vcmask 1039360  }
  0x1e   : > { %v638_v21 = vadd.s32 %v636_v19, %v632_v17  ;;  %v601_v28 = vadd.s32 %v599_v26, %v595_v24  ;;  %vm12063_vm7 = vcmask 916480   ;;  %vm12060_vm10 = vcmask 924672  }
  0x1f   : > { %vm12064_vm13 = vcmask 7168   ;;  %v12166_v24 = vmov 0 }
  0x20   : > { %758 = vrot.lane.b32.xlu1 %v9052_v1, %s12127_s19  ;;  %794 = vrot.lane.b32.xlu0 %v9052_v1, %s12139_s18  ;;  %v644_v25 = vadd.s32 %v642_v23, %v638_v21  ;;  %v9085_v32 = vadd.s32 %v605_v30, %v601_v28 }
  0x22   : > { %v650_v29 = vadd.s32 %v648_v27, %v644_v25  ;;  %v657_v34 = vmul.u32 16, %v9085_v32  ;;  %vm12061_vm15 = vcmp.le.s32.totalorder %v9085_v32, 14 }
  0x24   : > { %774 = vrot.lane.b32.xlu1 %v9052_v1, %s12132_s1  ;;  %772 = vrot.lane.b32.xlu0 %v9044_v0, %s12132_s1  ;;  %v9087_v33 = vadd.s32 %v654_v31, %v650_v29  ;;  %v9091_v36 = vsub.s32 %v567_v4, %v657_v34 }
  0x26   : > { %v658_v35 = vmul.u32 16, %v9087_v33  ;;  %vm12065_vm14 = vcmp.le.s32.totalorder %v9091_v36, 14  ;;  %vm12062_vm1 = vcmp.le.s32.totalorder %v9087_v33, 14  ;;  %vm12072_vm9 = vcmp.ge.s32.totalorder %v9091_v36, 1 }
  0x27   : > { %vm9103_vm3 = vmand %vm12065_vm14, %vm12061_vm15 }
  0x28   : > { %743 = vrot.lane.b32.xlu1 %v9044_v0, %s12129_s20  ;;  %740 = vrot.lane.b32.xlu0 %v9052_v1, %s12129_s20  ;;  %v9093_v37 = vsub.s32 %v568_v5, %v658_v35  ;;  %v12157_v40 = vsel %vm9103_vm3, 4294967295, %v12156_v40  ;;  %vm9149_vm12 = vmand %vm12072_vm9, %vm12061_vm15 }
  0x29   : > { %v12163_v59 = vsel %vm9149_vm12, 4294967295, %v12162_v59 }
  0x2a   : > { %vm12084_vm0 = vcmp.le.s32.totalorder %v9093_v37, 14  ;;  %vm12083_vm8 = vcmp.ge.s32.totalorder %v9093_v37, 1 }
  0x2b   : > { %vm9111_vm4 = vmand %vm12084_vm0, %vm12062_vm1 }
  0x2c   : > { %707 = vrot.lane.b32.xlu1 %v9044_v0, %s12081_s21  ;;  %704 = vrot.lane.b32.xlu0 %v9052_v1, %s12081_s21  ;;  %v12159_v41 = vsel %vm9111_vm4, 4294967295, %v12158_v41  ;;  %vm9139_vm11 = vmand %vm12083_vm8, %vm12062_vm1 }
  0x2d   : > { %v12161_v57 = vsel %vm9139_vm11, 4294967295, %v12160_v57 }
  0x30   : > { %723 = vrot.lane.b32.xlu1 %v9044_v0, %s12136_s22  ;;  %720 = vrot.lane.b32.xlu0 %v9052_v1, %s12136_s22 }
  0x34   : > { %685 = vrot.lane.b32.xlu1 %v9044_v0, %s12077_s23  ;;  %682 = vrot.lane.b32.xlu0 %v9052_v1, %s12077_s23  ;;  %s8922_s23 = smov 65  }
  0x8a   : > { %v809_v38 = vpop.permute.xlu1 %808  ;;  %v793_v39 = vpop.permute.xlu0 %792 }
  0x8e   : > { %v757_v42 = vpop.permute.xlu0 %756  ;;  %v811_v43 = vpop.permute.xlu1 %810 }
  0x8f   : > { %v817_v44 = vsel %vm12058_vm2, %v811_v43, %v809_v38  ;;  %v813_v45 = vsel %vm12058_vm2, %v809_v38, %v811_v43  ;;  %vm12086_vm2 = vcmask 130048  }
  0x90   : > { %v825_v46 = vsel %vm9111_vm4, %v817_v44, 0.0  ;;  %v824_v47 = vsel %vm9103_vm3, %v813_v45, 0.0  ;;  %v12170_v44 = vmov 0 }
  0x91   : > { %8142 = vmatprep.subr.msk.mxu0 %vm12090_vm5, %v825_v46 }
  0x92   : > { %8143 = vmatpush1.msk.msra.mxu0 %vm12090_vm5, %v824_v47  ;;  %v759_v48 = vpop.permute.xlu1 %758  ;;  %v795_v49 = vpop.permute.xlu0 %794 }
  0x93   : > { %v761_v50 = vsel %vm12059_vm6, %v757_v42, %v759_v48  ;;  %v765_v51 = vsel %vm12059_vm6, %v759_v48, %v757_v42  ;;  %v797_v52 = vsel %vm12063_vm7, %v793_v39, %v795_v49  ;;  %v801_v53 = vsel %vm12063_vm7, %v795_v49, %v793_v39 }
  0x94   : > { %v771_v54 = vsel %vm12084_vm0, %v765_v51, 0.0  ;;  %v806_v55 = vsel %vm12061_vm15, %v797_v52, 0.0  ;;  %v807_v56 = vsel %vm12062_vm1, %v801_v53, 0.0  ;;  %v770_v58 = vsel %vm12065_vm14, %v761_v50, 0.0 }
  0x95   : > { %v842_v60 = vrot.slane %v771_v54, 4  ;;  %v847_v63 = vrot.slane %v806_v55, 4  ;;  %v848_v4 = vrot.slane %v807_v56, 4  ;;  %v841_v7 = vrot.slane %v770_v58, 4  ;;  %v549_v55 = vld [vmem:[%s12172_s29] sm:$0xf] }
  0x96   : > { %v775_v61 = vpop.permute.xlu1 %774  ;;  %v773_v62 = vpop.permute.xlu0 %772  ;;  %vm12071_vm6 = vcmp.ge.s32.totalorder %v9087_v33, 1  ;;  %vm12066_vm15 = vcmask 121856   ;;  %v12168_v39 = vmov 0  ;;  %s8915_s29 = smov 48  }
  0x97   : > { %v777_v5 = vsel %vm12060_vm10, %v773_v62, %v775_v61  ;;  %v781_v6 = vsel %vm12060_vm10, %v775_v61, %v773_v62  ;;  %v857_v14 = vsel %vm12090_vm5, %v9052_v1, %v842_v60  ;;  %v856_v15 = vsel %vm12090_vm5, %v9044_v0, %v841_v7  ;;  %vm9177_vm1 = vmand %vm12084_vm0, %vm12071_vm6 }
  0x98   : > { %v791_v8 = vsel %vm9139_vm11, %v781_v6, 0.0  ;;  %v790_v9 = vsel %vm9149_vm12, %v777_v5, 0.0  ;;  %vm12067_vm10 = vcmp.ge.s32.totalorder %v9085_v32, 1  ;;  %v12164_v0 = vmov 0 }
  0x99   : > { %v859_v10 = vsel %vm12090_vm5, %v791_v8, %v848_v4  ;;  %v858_v11 = vsel %vm12090_vm5, %v790_v9, %v847_v63  ;;  %v12165_v0 = vsel %vm9177_vm1, 4294967295, %v12164_v0  ;;  %vm9187_vm7 = vmand %vm12065_vm14, %vm12067_vm10 }
  0x9a   : > { %v744_v12 = vpop.permute.xlu1 %743  ;;  %894 = vmatprep.subr.mxu0 %v859_v10  ;;  %v741_v13 = vpop.permute.xlu0 %740  ;;  %v12167_v24 = vsel %vm9187_vm7, 4294967295, %v12166_v24  ;;  %vm9205_vm14 = vmand %vm12083_vm8, %vm12071_vm6 }
  0x9b   : > { %895 = vmatpush1.msra.mxu0 %v858_v11  ;;  %v746_v16 = vsel %vm12064_vm13, %v744_v12, %v741_v13  ;;  %v749_v17 = vsel %vm12064_vm13, %v741_v13, %v744_v12  ;;  %vm12095_vm13 = vcmask 138240   ;;  %v12169_v39 = vsel %vm9205_vm14, 4294967295, %v12168_v39 }
  0x9c   : > { %896 = vmatprep.subr.mxu0 %v857_v14  ;;  %v754_v20 = vsel %vm12072_vm9, %v749_v17, 0.0  ;;  %v755_v21 = vsel %vm12083_vm8, %v746_v16, 0.0  ;;  %vm12175_vm8 = vcmask 7168  }
  0x9d   : > { %897 = vmatpush1.msra.mxu0 %v856_v15  ;;  %v834_v27 = vrot.slane %v754_v20, 4  ;;  %v835_v28 = vrot.slane %v755_v21, 4  ;;  %vm12176_vm0 = vmmov %vm12175_vm8 }
  0x9e   : > { %v708_v18 = vpop.permute.xlu1 %707  ;;  %v705_v19 = vpop.permute.xlu0 %704 }
  0x9f   : > { %v710_v22 = vsel %vm12086_vm2, %v708_v18, %v705_v19  ;;  %v713_v23 = vsel %vm12086_vm2, %v705_v19, %v708_v18 }
  0xa0   : > { %v718_v31 = vsel %vm12067_vm10, %v713_v23, 0.0  ;;  %v719_v34 = vsel %vm12071_vm6, %v710_v22, 0.0  ;;  %vm12087_vm6 = vmmov 0  }
  0xa1   : > { %v828_v47 = vrot.slane %v718_v31, 4  ;;  %v829_v48 = vrot.slane %v719_v34, 4  ;;  %8588 = vmatprep.mubr.msk.f32.mxu1 %vm12087_vm6, %v8906_v2 }
  0xa2   : > { %v724_v25 = vpop.permute.xlu1 %723  ;;  %v721_v26 = vpop.permute.xlu0 %720 }
  0xa3   : > { %v726_v29 = vsel %vm12066_vm15, %v724_v25, %v721_v26  ;;  %v729_v30 = vsel %vm12066_vm15, %v721_v26, %v724_v25  ;;  %vm9215_vm15 = vmand %vm12072_vm9, %vm12067_vm10  ;;  %vm12089_vm10 = vcmask 293888   ;;  %vm12173_vm9 = vcmask 7168  }
  0xa4   : > { %v739_v35 = vsel %vm9177_vm1, %v726_v29, 0.0  ;;  %v738_v38 = vsel %vm9187_vm7, %v729_v30, 0.0  ;;  %v12171_v44 = vsel %vm9215_vm15, 4294967295, %v12170_v44  ;;  %vm12245_vm7 = vcmp.ge.s32.totalorder %v9091_v36, 0 }
  0xa5   : > { %v855_v42 = vsel %vm12090_vm5, %v739_v35, %v835_v28  ;;  %v854_v43 = vsel %vm12090_vm5, %v738_v38, %v834_v27 }
  0xa6   : > { %v686_v45 = vpop.permute.xlu1 %685  ;;  %898 = vmatprep.subr.mxu0 %v855_v42  ;;  %v683_v46 = vpop.permute.xlu0 %682 }
  0xa7   : > { %v688_v49 = vsel %vm12095_vm13, %v686_v45, %v683_v46  ;;  %v691_v50 = vsel %vm12095_vm13, %v683_v46, %v686_v45  ;;  %899 = vmatpush1.msra.mxu0 %v854_v43 }
  0xa8   : > { %v703_v51 = vsel %vm9205_vm14, %v688_v49, 0.0  ;;  %v702_v52 = vsel %vm9215_vm15, %v691_v50, 0.0  ;;  %vm3056_vm15 = vcmp.ge.s32.totalorder %v9093_v37, 5 }
  0xa9   : > { %v853_v53 = vsel %vm12090_vm5, %v703_v51, %v829_v48  ;;  %v852_v54 = vsel %vm12090_vm5, %v702_v52, %v828_v47 }
  0xaa   : > { %900 = vmatprep.subr.mxu0 %v853_v53 }
  0xab   : > { %901 = vmatpush1.msra.mxu0 %v852_v54 }
  0xac   : > { %8144 = vmatmul.mubr.msk.f32.vlgmr.msra.gmra.mxu0 %vm12089_vm10, %v549_v55  ;;  %8604 = vmatprep.subr.mxu0 %v8906_v2 }
  0xad   : > { %8614 = vmatprep.mubr.msk.f32.mxu0 %vm12087_vm6, %v8906_v2 }
 0x16c   : > { %v9232_v56 = vpop.f32.mrf.mxu0 }
 0x16d   : > { %946 = vrot.lane.b32.xlu1 %v9232_v56, %s12075_s26  ;;  %942 = vrot.lane.b32.xlu0 %v9232_v56, %s12139_s18 }
 0x16e   : > { %v9243_v58 = vpop.f32.mrf.mxu0 }
 0x171   : > { %954 = vrot.lane.b32.xlu1 %v9232_v56, %s8912_s30  ;;  %950 = vrot.lane.b32.xlu0 %v9232_v56, %s8913_s27 }
 0x175   : > { %962 = vrot.lane.b32.xlu1 %v9232_v56, %s12073_s28  ;;  %958 = vrot.lane.b32.xlu0 %v9232_v56, %s8915_s29 }
 0x179   : > { %966 = vrot.lane.b32.xlu0 %v9232_v56, %s12081_s21  ;;  %972 = vrot.lane.b32.xlu1 %v9243_v58, %s12139_s18 }
 0x17d   : > { %976 = vrot.lane.b32.xlu0 %v9243_v58, %s12075_s26  ;;  %980 = vrot.lane.b32.xlu1 %v9243_v58, %s8913_s27  ;;  %s12135_s27 = smov 97   ;;  %s8921_s26 = smov 81  }
 0x181   : > { %984 = vrot.lane.b32.xlu0 %v9243_v58, %s8912_s30  ;;  %988 = vrot.lane.b32.xlu1 %v9243_v58, %s8915_s29  ;;  %s12125_s30 = smov 126   ;;  %s8919_s29 = smov 49  }
 0x185   : > { %992 = vrot.lane.b32.xlu0 %v9243_v58, %s12073_s28  ;;  %996 = vrot.lane.b32.xlu1 %v9243_v58, %s12081_s21  ;;  %s12079_s28 = smov 33   ;;  %s12378_s21 = smov 17  }
 0x1df   : > { %v947_v60 = vpop.permute.xlu1 %946  ;;  %v943_v61 = vpop.permute.xlu0 %942 }
 0x1e0   : > { %v945_v62 = vadd.f32 %v943_v61, %v9232_v56 }
 0x1e2   : > { %v9259_v63 = vadd.f32 %v947_v60, %v945_v62 }
 0x1e3   : > { %v955_v4 = vpop.permute.xlu1 %954  ;;  %v951_v5 = vpop.permute.xlu0 %950 }
 0x1e4   : > { %v953_v6 = vadd.f32 %v951_v5, %v9259_v63 }
 0x1e6   : > { %v957_v7 = vadd.f32 %v955_v4, %v953_v6  ;;  %v1301_v61 = vmul.f32 0.25, %v953_v6  ;;  %v550_v6 = vld [vmem:[%s12174_s2] sm:$0xf]  ;;  %s8932_s2 = smov 114  }
 0x1e7   : > { %v963_v8 = vpop.permute.xlu1 %962  ;;  %v959_v9 = vpop.permute.xlu0 %958 }
 0x1e8   : > { %v961_v10 = vadd.f32 %v959_v9, %v957_v7 }
 0x1ea   : > { %v965_v11 = vadd.f32 %v963_v8, %v961_v10  ;;  %v1169_v60 = vmul.f32 0.16666667, %v961_v10 }
 0x1eb   : > { %v967_v12 = vpop.permute.xlu0 %966  ;;  %v973_v13 = vpop.permute.xlu1 %972 }
 0x1ec   : > { %v969_v14 = vadd.f32 %v967_v12, %v965_v11  ;;  %v1174_v31 = vadd.f32 %v973_v13, %v9243_v58 }
 0x1ee   : > { %v970_v15 = vadd.f32 %v969_v14, %v9243_v58 }
 0x1ef   : > { %v977_v16 = vpop.permute.xlu0 %976  ;;  %v981_v17 = vpop.permute.xlu1 %980 }
 0x1f0   : > { %v975_v18 = vadd.f32 %v973_v13, %v970_v15  ;;  %v9265_v34 = vadd.f32 %v1174_v31, %v977_v16  ;;  %v1170_v38 = vadd.f32 %v981_v17, %v9259_v63  ;;  %v1302_v46 = vadd.f32 %v977_v16, %v945_v62 }
 0x1f2   : > { %v979_v19 = vadd.f32 %v977_v16, %v975_v18  ;;  %v1176_v35 = vadd.f32 %v9265_v34, %v981_v17  ;;  %v1303_v53 = vadd.f32 %v1302_v46, %v981_v17 }
 0x1f3   : > { %v985_v20 = vpop.permute.xlu0 %984  ;;  %v989_v22 = vpop.permute.xlu1 %988 }
 0x1f4   : > { %v983_v21 = vadd.f32 %v981_v17, %v979_v19  ;;  %v1177_v42 = vadd.f32 %v1176_v35, %v985_v20  ;;  %v1171_v43 = vadd.f32 %v1170_v38, %v985_v20  ;;  %v1304_v55 = vmul.f32 0.25, %v1303_v53 }
 0x1f5   : > { %v1305_v62 = vmul.f32 0.25, %v1176_v35 }
 0x1f6   : > { %v987_v23 = vadd.f32 %v985_v20, %v983_v21  ;;  %v1178_v48 = vadd.f32 %v1177_v42, %v989_v22  ;;  %v1172_v51 = vadd.f32 %v1171_v43, %v989_v22 }
 0x1f7   : > { %v993_v26 = vpop.permute.xlu0 %992  ;;  %v997_v28 = vpop.permute.xlu1 %996 }
 0x1f8   : > { %v991_v25 = vadd.f32 %v989_v22, %v987_v23  ;;  %v1179_v52 = vmul.f32 0.16666667, %v1178_v48  ;;  %v1173_v54 = vmul.f32 0.16666667, %v1172_v51  ;;  %v9380_v51 = vmul.f32 0.33333334, %v9265_v34 }
 0x1fa   : > { %v995_v27 = vadd.f32 %v993_v26, %v991_v25 }
 0x1fc   : > { %v999_v29 = vadd.f32 %v997_v28, %v995_v27 }
 0x1fe   : > { %v1000_v30 = vmul.f32 0.0625, %v999_v29 }
 0x200   : > { %1002 = vrot.lane.b32.xlu0 %v1000_v30, %s12129_s20 }
 0x272   : > { %v1003_v45 = vpop.permute.xlu0 %1002 }
 0x273   : > { %v1005_v47 = vsel %vm12173_vm9, 0.0, %v1003_v45  ;;  %vm12085_vm9 = vcmask 97280  }
 0x274   : > { %v1006_v49 = vsel %vm12095_vm13, %v1005_v47, 0.0 }
 0x275   : > { %1012 = vrot.lane.b32.xlu1 %v1006_v49, %s12125_s30  ;;  %v1008_v50 = vrot.slane %v1006_v49, 4 }
 0x277   : > { %1009 = vrot.lane.b32.xlu0 %v1008_v50, %s12127_s19  ;;  %v1883_v50 = vmul.f32 0.33333334, %v9259_v63 }
 0x279   : > { %1193 = vrot.lane.b32.xlu1 %v1179_v52, %s12135_s27  ;;  %v9388_v52 = vshrl.u32 %v566_v3, 7  ;;  %v12184_v3 = vmov 0 }
 0x27b   : > { %1187 = vrot.lane.b32.xlu0 %v1173_v54, %s8919_s29  ;;  %v9391_v63 = vadd.s32 8, %v9388_v52  ;;  %v12091_v54 = vmov 1.0   ;;  %vm9416_vm2 = vcmp.eq.s32.totalorder %v9388_v52, %v9091_v36  ;;  %vm9886_vm14 = vcmp.eq.s32.totalorder %v9388_v52, %v9087_v33 }
 0x27c   : > { %vm9900_vm11 = vcmp.eq.s32.totalorder %v9388_v52, %v9085_v32 }
 0x27d   : > { %1318 = vrot.lane.b32.xlu1 %v1304_v55, %s12079_s28  ;;  %v12186_v55 = vmov 0  ;;  %vm9857_vm4 = vcmp.eq.s32.totalorder %v9391_v63, %v9087_v33  ;;  %s8924_s28 = smov 95  }
 0x27e   : > { %v12187_v55 = vsel %vm9416_vm2, 4294967295, %v12186_v55 }
 0x27f   : > { %1181 = vrot.lane.b32.xlu0 %v1169_v60, %s12129_s20 }
 0x281   : > { %1312 = vrot.lane.b32.xlu1 %v1301_v61, %s8921_s26 }
 0x283   : > { %1307 = vrot.lane.b32.xlu0 %v1301_v61, %s12129_s20 }
 0x285   : > { %1324 = vrot.lane.b32.xlu1 %v1305_v62, %s12132_s1 }
 0x287   : > { %1329 = vrot.lane.b32.xlu0 %v1305_v62, %s8922_s23 }
 0x2e7   : > { %v1013_v4 = vpop.permute.xlu1 %1012 }
 0x2e8   : > { %8585 = vmatpush3.msk.msra.mxu1 %vm12090_vm5, %v1013_v4 }
 0x2e9   : > { %v1010_v5 = vpop.permute.xlu0 %1009  ;;  %8586 = vmatprep.subr.mxu1 %v8906_v2 }
 0x2ea   : > { %v1014_v7 = vsel %vm12090_vm5, %v1006_v49, %v1010_v5 }
 0x2eb   : > { %v1194_v8 = vpop.permute.xlu1 %1193  ;;  %8587 = vmatpush3.msra.mxu1 %v1014_v7 }
 0x2ec   : > { %v1196_v9 = vsel %vm12175_vm8, 0.0, %v1194_v8  ;;  %8589 = vmatmul.mubr.msk.f32.vlgmr.msra.gmra.mxu1 %vm12085_vm9, %v550_v6  ;;  %vm12177_vm8 = vmmov %vm12176_vm0  ;;  %vm9410_vm9 = vcmp.eq.s32.totalorder %v9388_v52, %v9093_v37 }
 0x2ed   : > { %v1188_v10 = vpop.permute.xlu0 %1187  ;;  %v9294_v11 = vsel %vm12095_vm13, %v1196_v9, 0.0  ;;  %1162 = vmatprep.mubr.f32.mxu1 %v8906_v2  ;;  %v12185_v3 = vsel %vm9410_vm9, 4294967295, %v12184_v3 }
 0x2ee   : > { %v1190_v12 = vsel %vm12176_vm0, 0.0, %v1188_v10  ;;  %1220 = vrot.lane.b32.xlu1 %v9294_v11, %s12125_s30  ;;  %v1216_v13 = vrot.slane %v9294_v11, 4 }
 0x2ef   : > { %v1319_v14 = vpop.permute.xlu1 %1318  ;;  %v9302_v15 = vsel %vm12095_vm13, %v1190_v12, 0.0 }
 0x2f0   : > { %1217 = vrot.lane.b32.xlu0 %v1216_v13, %s12127_s19  ;;  %v1321_v17 = vsel %vm12177_vm8, 0.0, %v1319_v14  ;;  %v1207_v18 = vrot.slane %v9302_v15, 4  ;;  %vm12178_vm8 = vmmov %vm12176_vm0 }
 0x2f1   : > { %v1182_v16 = vpop.permute.xlu0 %1181  ;;  %v9314_v20 = vsel %vm12095_vm13, %v1321_v17, 0.0 }
 0x2f2   : > { %1209 = vrot.lane.b32.xlu1 %v9302_v15, %s12127_s19  ;;  %v1184_v19 = vsel %vm12176_vm0, 0.0, %v1182_v16  ;;  %v9322_v23 = vrot.slane %v9314_v20, 4 }
 0x2f3   : > { %v1313_v21 = vpop.permute.xlu1 %1312  ;;  %v9319_v22 = vsel %vm12095_vm13, %v1184_v19, 0.0 }
 0x2f4   : > { %1212 = vrot.lane.b32.xlu0 %v1207_v18, %s12125_s30  ;;  %v1315_v25 = vsel %vm12178_vm8, 0.0, %v1313_v21  ;;  %v1199_v26 = vrot.slane %v9319_v22, 4  ;;  %vm12179_vm8 = vmmov %vm12176_vm0 }
 0x2f5   : > { %v9331_v27 = vsel %vm12095_vm13, %v1315_v25, 0.0  ;;  %v1308_v28 = vpop.permute.xlu0 %1307 }
 0x2f6   : > { %1356 = vrot.lane.b32.xlu1 %v9314_v20, %s12125_s30  ;;  %v1310_v30 = vsel %vm12176_vm0, 0.0, %v1308_v28  ;;  %v1343_v31 = vrot.slane %v9331_v27, 4 }
 0x2f7   : > { %v1325_v29 = vpop.permute.xlu1 %1324  ;;  %v9341_v38 = vsel %vm12095_vm13, %v1310_v30, 0.0 }
 0x2f8   : > { %1203 = vrot.lane.b32.xlu0 %v9319_v22, %s12125_s30  ;;  %v1327_v35 = vsel %vm12179_vm8, 0.0, %v1325_v29  ;;  %v1335_v43 = vrot.slane %v9341_v38, 4  ;;  %vm9395_vm8 = vcmp.eq.s32.totalorder %v9391_v63, %v9093_v37 }
 0x2f9   : > { %v9346_v42 = vsel %vm12095_vm13, %v1327_v35, 0.0  ;;  %v1330_v46 = vpop.permute.xlu0 %1329  ;;  %8147 = vmatprep.subr.msk.mxu1 %vm9395_vm8, %v12091_v54 }
 0x2fa   : > { %1353 = vrot.lane.b32.xlu1 %v9322_v23, %s12127_s19  ;;  %v9353_v45 = vrot.slane %v9346_v42, 4  ;;  %v1332_v47 = vsel %vm12176_vm0, 0.0, %v1330_v46  ;;  %vm9401_vm0 = vcmp.eq.s32.totalorder %v9391_v63, %v9091_v36 }
 0x2fb   : > { %v9363_v48 = vsel %vm12095_vm13, %v1332_v47, 0.0  ;;  %8148 = vmatpush1.msk.msra.mxu1 %vm9401_vm0, %v12091_v54 }
 0x2fc   : > { %1200 = vrot.lane.b32.xlu0 %v1199_v26, %s12127_s19  ;;  %v1542_v49 = vrot.slane %v9363_v48, 4  ;;  %8149 = vmatprep.subr.msk.mxu1 %vm9410_vm9, %v12091_v54 }
 0x2fd   : > { %8150 = vmatpush1.msk.msra.mxu1 %vm9416_vm2, %v12091_v54 }
 0x2fe   : > { %1345 = vrot.lane.b32.xlu1 %v9331_v27, %s12127_s19  ;;  %8591 = vmatprep.subr.mxu1 %v8906_v2 }
 0x300   : > { %1348 = vrot.lane.b32.xlu0 %v1343_v31, %s12125_s30 }
 0x302   : > { %1339 = vrot.lane.b32.xlu1 %v9341_v38, %s12125_s30 }
 0x304   : > { %1455 = vrot.lane.b32.xlu0 %v9346_v42, %s12125_s30 }
 0x306   : > { %1336 = vrot.lane.b32.xlu1 %v1335_v43, %s12127_s19 }
 0x308   : > { %1452 = vrot.lane.b32.xlu0 %v9353_v45, %s12127_s19 }
 0x30a   : > { %1444 = vrot.lane.b32.xlu1 %v9314_v20, %s12127_s19 }
 0x30c   : > { %1447 = vrot.lane.b32.xlu0 %v9322_v23, %s12125_s30 }
 0x30e   : > { %1546 = vrot.lane.b32.xlu1 %v9363_v48, %s12125_s30 }
 0x310   : > { %1440 = vrot.lane.b32.xlu0 %v9331_v27, %s12125_s30 }
 0x312   : > { %1543 = vrot.lane.b32.xlu1 %v1542_v49, %s12127_s19 }
 0x314   : > { %1437 = vrot.lane.b32.xlu0 %v1343_v31, %s12127_s19 }
 0x316   : > { %1535 = vrot.lane.b32.xlu1 %v9346_v42, %s12127_s19 }
 0x318   : > { %1538 = vrot.lane.b32.xlu0 %v9353_v45, %s12125_s30 }
 0x31a   : > { %1896 = vrot.lane.b32.xlu1 %v1883_v50, %s8922_s23  ;;  %s12379_s23 = smov 111  }
 0x31c   : > { %1891 = vrot.lane.b32.xlu0 %v1883_v50, %s12135_s27 }
 0x31e   : > { %1907 = vrot.lane.b32.xlu1 %v9380_v51, %s8921_s26  ;;  %s12377_s26 = smov 16  }
 0x320   : > { %1886 = vrot.lane.b32.xlu0 %v1883_v50, %s12129_s20 }
 0x322   : > { %1902 = vrot.lane.b32.xlu1 %v9380_v51, %s12132_s1 }
 0x360   : > { %v9430_v60 = vpop.permute.xlu1 %1220 }
 0x362   : > { %v9432_v61 = vpop.permute.xlu0 %1217 }
 0x364   : > { %v9434_v62 = vpop.permute.xlu1 %1209 }
 0x366   : > { %v9436_v4 = vpop.permute.xlu0 %1212 }
 0x368   : > { %v9438_v5 = vpop.permute.xlu1 %1356 }
 0x369   : > { %8605 = vmatpush3.msk.msra.mxu0 %vm12090_vm5, %v9438_v5 }
 0x36a   : > { %v9442_v6 = vpop.permute.xlu0 %1203  ;;  %8606 = vmatprep.subr.mxu0 %v8906_v2 }
 0x36c   : > { %v1354_v7 = vpop.permute.xlu1 %1353 }
 0x36d   : > { %v9447_v8 = vsel %vm12090_vm5, %v9314_v20, %v1354_v7  ;;  %v9462_v20 = vld [vmem:[%s12046_s6] sm:$0xf]  ;;  %v1548_v7 = vsel %vm12090_vm5, %v9438_v5, %v9353_v45 }
 0x36e   : > { %8607 = vmatpush3.msra.mxu0 %v9447_v8  ;;  %v9450_v9 = vpop.permute.xlu0 %1200 }
 0x36f   : > { %8608 = vmatprep.subr.mxu0 %v8906_v2 }
 0x370   : > { %v1346_v10 = vpop.permute.xlu1 %1345 }
 0x372   : > { %v1349_v12 = vpop.permute.xlu0 %1348 }
 0x373   : > { %v1360_v13 = vsel %vm12090_vm5, %v1346_v10, %v1349_v12 }
 0x374   : > { %v1340_v14 = vpop.permute.xlu1 %1339  ;;  %8609 = vmatpush3.msra.mxu0 %v1360_v13 }
 0x375   : > { %v1359_v16 = vsel %vm12090_vm5, %v1340_v14, %v1343_v31  ;;  %8610 = vmatprep.subr.mxu0 %v8906_v2 }
 0x376   : > { %8611 = vmatpush3.msra.mxu0 %v1359_v16  ;;  %v9456_v17 = vpop.permute.xlu0 %1455 }
 0x377   : > { %8612 = vmatprep.subr.mxu0 %v8906_v2 }
 0x378   : > { %v1337_v19 = vpop.permute.xlu1 %1336 }
 0x379   : > { %v1358_v21 = vsel %vm12090_vm5, %v9341_v38, %v1337_v19 }
 0x37a   : > { %8613 = vmatpush3.msra.mxu0 %v1358_v21  ;;  %v9466_v25 = vpop.permute.xlu0 %1452 }
 0x37b   : > { %8615 = vmatmul.mubr.msk.f32.vlgmr.msra.gmra.mxu0 %vm12089_vm10, %v9462_v20  ;;  %8630 = vmatprep.subr.mxu0 %v8906_v2 }
 0x37c   : > { %v9471_v26 = vpop.permute.xlu1 %1444  ;;  %8640 = vmatprep.mubr.msk.f32.mxu0 %vm12087_vm6, %v8906_v2  ;;  %vm12188_vm6 = vcmask 7168  }
 0x37d   : > { %vm12189_vm10 = vmmov %vm12188_vm6 }
 0x37e   : > { %v9475_v28 = vpop.permute.xlu0 %1447 }
 0x380   : > { %v1547_v29 = vpop.permute.xlu1 %1546 }
 0x381   : > { %8631 = vmatpush3.msk.msra.mxu0 %vm12090_vm5, %v1547_v29 }
 0x382   : > { %v9478_v30 = vpop.permute.xlu0 %1440  ;;  %8632 = vmatprep.subr.mxu0 %v8906_v2 }
 0x384   : > { %v1544_v31 = vpop.permute.xlu1 %1543 }
 0x385   : > { %v1550_v35 = vsel %vm12090_vm5, %v9363_v48, %v1544_v31 }
 0x386   : > { %8633 = vmatpush3.msra.mxu0 %v1550_v35  ;;  %v9483_v38 = vpop.permute.xlu0 %1437 }
 0x387   : > { %8634 = vmatprep.subr.mxu0 %v8906_v2 }
 0x388   : > { %v1536_v43 = vpop.permute.xlu1 %1535 }
 0x38a   : > { %v1539_v46 = vpop.permute.xlu0 %1538 }
 0x38b   : > { %v1549_v47 = vsel %vm12090_vm5, %v1536_v43, %v1539_v46 }
 0x38c   : > { %v1897_v49 = vpop.permute.xlu1 %1896  ;;  %8635 = vmatpush3.msra.mxu0 %v1549_v47 }
 0x38d   : > { %v1899_v50 = vsel %vm12188_vm6, 0.0, %v1897_v49  ;;  %8636 = vmatprep.subr.mxu0 %v8906_v2  ;;  %vm12190_vm6 = vcmask 293888  }
 0x38e   : > { %v9493_v48 = vsel %vm12095_vm13, %v1899_v50, 0.0  ;;  %8637 = vmatpush3.msra.mxu0 %v1548_v7  ;;  %v1892_v10 = vpop.permute.xlu0 %1891  ;;  %v12094_v7 = vcvt.s32.f32 %v9087_v33 }
 0x38f   : > { %v1894_v12 = vsel %vm12189_vm10, 0.0, %v1892_v10  ;;  %2024 = vrot.lane.b32.xlu0 %v9493_v48, %s12127_s19  ;;  %8638 = vmatprep.subr.mxu0 %v8906_v2  ;;  %v9500_v13 = vrot.slane %v9493_v48, 4  ;;  %v12093_v10 = vcvt.s32.f32 %v9085_v32 }
 0x390   : > { %8639 = vmatpush3.msra.mxu0 %v9447_v8  ;;  %v9508_v45 = vsel %vm12095_vm13, %v1894_v12, 0.0  ;;  %v1908_v16 = vpop.permute.xlu1 %1907 }
 0x391   : > { %2027 = vrot.lane.b32.xlu1 %v9500_v13, %s12125_s30  ;;  %8641 = vmatmul.mubr.msk.f32.vlgmr.msra.gmra.mxu0 %vm12190_vm6, %v9462_v20  ;;  %v9518_v14 = vrot.slane %v9508_v45, 4  ;;  %v1910_v21 = vsel %vm12189_vm10, 0.0, %v1908_v16  ;;  %vm12191_vm6 = vmmov %vm12189_vm10  ;;  %v1624_v16 = vmul.f32 0.13333334, %v12094_v7  ;;  %vm12194_vm10 = vcmask 1043456  }
 0x392   : > { %1788 = vmatprep.mubr.f32.mxu0 %v8906_v2  ;;  %v1887_v19 = vpop.permute.xlu0 %1886  ;;  %v9529_v31 = vsel %vm12095_vm13, %v1910_v21, 0.0  ;;  %vm12192_vm5 = vmmov %vm12191_vm6 }
 0x393   : > { %2020 = vrot.lane.b32.xlu0 %v9508_v45, %s12125_s30  ;;  %v1889_v29 = vsel %vm12191_vm6, 0.0, %v1887_v19  ;;  %v9540_v47 = vrot.slane %v9529_v31, 4  ;;  %v9560_v19 = vmul.f32 0.13333334, %v12093_v10  ;;  %v1626_v21 = vand.u32 2147483647, %v1624_v16 }
 0x394   : > { %v1903_v35 = vpop.permute.xlu1 %1902  ;;  %v9534_v43 = vsel %vm12095_vm13, %v1889_v29, 0.0  ;;  %vm12195_vm6 = vmmov 0  }
 0x395   : > { %1939 = vrot.lane.b32.xlu1 %v9493_v48, %s12125_s30  ;;  %v1905_v46 = vsel %vm12192_vm5, 0.0, %v1903_v35  ;;  %v1918_v49 = vrot.slane %v9534_v43, 4  ;;  %v1625_v29 = vand.u32 2147483647, %v9560_v19  ;;  %vm12193_vm5 = vcmask 130048  }
 0x396   : > { %v9546_v50 = vsel %vm12095_vm13, %v1905_v46, 0.0  ;;  %v1628_v46 = vsub.f32 1.0, %v1626_v21  ;;  %vm12196_vm13 = vmmov %vm12194_vm10 }
 0x397   : > { %1936 = vrot.lane.b32.xlu0 %v9500_v13, %s12127_s19  ;;  %v9554_v12 = vrot.slane %v9546_v50, 4 }
 0x398   : > { %v1630_v10 = vmax.f32 %v1628_v46, 0.0 }
 0x399   : > { %2017 = vrot.lane.b32.xlu1 %v9518_v14, %s12127_s19 }
 0x39a   : > { %8167 = vmatprep.subr.msk.mxu0 %vm9395_vm8, %v1630_v10 }
 0x39b   : > { %1928 = vrot.lane.b32.xlu0 %v9508_v45, %s12127_s19 }
 0x39d   : > { %1931 = vrot.lane.b32.xlu1 %v9518_v14, %s12125_s30 }
 0x39f   : > { %2197 = vrot.lane.b32.xlu0 %v9529_v31, %s12125_s30 }
 0x3a1   : > { %1922 = vrot.lane.b32.xlu1 %v9534_v43, %s12125_s30 }
 0x3a3   : > { %2194 = vrot.lane.b32.xlu0 %v9540_v47, %s12127_s19 }
 0x3a5   : > { %1919 = vrot.lane.b32.xlu1 %v1918_v49, %s12127_s19  ;;  %v1627_v49 = vsub.f32 1.0, %v1625_v29 }
 0x3a7   : > { %2186 = vrot.lane.b32.xlu0 %v9546_v50, %s12127_s19  ;;  %v1629_v7 = vmax.f32 %v1627_v49, 0.0 }
 0x3a9   : > { %2189 = vrot.lane.b32.xlu1 %v9554_v12, %s12125_s30  ;;  %8168 = vmatpush1.msk.msra.mxu0 %vm9401_vm0, %v1629_v7 }
 0x3aa   : > { %8169 = vmatprep.subr.msk.mxu0 %vm9410_vm9, %v1630_v10 }
 0x3ab   : > { %1912 = vrot.lane.b32.xlu0 %v9380_v51, %s8919_s29  ;;  %v1225_v51 = vsel %vm12196_vm13, %v9294_v11, %v9432_v61  ;;  %8170 = vmatpush1.msk.msra.mxu0 %vm9416_vm2, %v1629_v7  ;;  %s12131_s29 = smov 14  }
 0x3ac   : > { %v1087_v35 = vpop.f32.mrf.mxu1  ;;  %8643 = vmatprep.subr.mxu0 %v8906_v2 }
 0x3ad   : > { %8151 = vmatmul.mubr.msk.f32.vlgmr.msra.gmra.mxu1 %vm12193_vm5, %v1087_v35  ;;  %2109 = vrot.lane.b32.xlu1 %v9546_v50, %s12125_s30  ;;  %vm12197_vm5 = vmmov %vm12194_vm10 }
 0x3ae   : > { %8592 = vmatpush3.msk.msra.mxu1 %vm12194_vm10, %v9430_v60  ;;  %v8590_v54 = vpop.f32.mrf.mxu1  ;;  %8601 = vmatprep.mubr.msk.f32.mxu1 %vm12195_vm6, %v8906_v2  ;;  %vm12198_vm13 = vmmov %vm12197_vm5  ;;  %v552_v60 = vld [vmem:[%s12199_s4] sm:$0xf]  ;;  %s12516_s4 = smov 18  }
 0x3af   : > { %8593 = vmatprep.subr.mxu1 %v8906_v2  ;;  %2106 = vrot.lane.b32.xlu0 %v9554_v12, %s12127_s19  ;;  %v1224_v54 = vsel %vm12197_vm5, %v9434_v62, %v9436_v4  ;;  %v1223_v11 = vsel %vm12198_vm13, %v9442_v6, %v1207_v18  ;;  %vm12200_vm10 = vmmov %vm12197_vm5  ;;  %vm12201_vm5 = vcmask 293888   ;;  %v8161_v62 = vadd.f32 -1.0, %v1624_v16 }
 0x3b0   : > { %8594 = vmatpush3.msra.mxu1 %v1225_v51  ;;  %v1222_v61 = vsel %vm12200_vm10, %v9319_v22, %v9450_v9  ;;  %vm12202_vm13 = vmmov %vm12200_vm10  ;;  %v8160_v4 = vadd.f32 -1.0, %v9560_v19 }
 0x3b1   : > { %8595 = vmatprep.subr.mxu1 %v8906_v2  ;;  %vm12203_vm3 = vmmov %vm12200_vm10  ;;  %v1638_v6 = vand.u32 2147483647, %v8161_v62 }
 0x3b2   : > { %8596 = vmatpush3.msra.mxu1 %v1224_v54  ;;  %v1460_v15 = vsel %vm12203_vm3, %v9346_v42, %v9466_v25  ;;  %vm12204_vm10 = vmmov %vm12203_vm3  ;;  %v1457_v42 = vsel %vm12203_vm3, %v9331_v27, %v9483_v38  ;;  %v1637_v9 = vand.u32 2147483647, %v8160_v4  ;;  %v8173_v25 = vadd.f32 -2.0, %v1624_v16 }
 0x3b3   : > { %8597 = vmatprep.subr.mxu1 %v8906_v2  ;;  %v9618_v18 = vsel %vm12204_vm10, %v9471_v26, %v9475_v28  ;;  %vm12207_vm10 = vcmask 7168  }
 0x3b4   : > { %8598 = vmatpush3.msra.mxu1 %v1223_v11  ;;  %v1639_v26 = vsub.f32 1.0, %v1637_v9 }
 0x3b5   : > { %8599 = vmatprep.subr.mxu1 %v8906_v2 }
 0x3b6   : > { %8600 = vmatpush3.msra.mxu1 %v1222_v61  ;;  %v1641_v7 = vmax.f32 %v1639_v26, 0.0 }
 0x3b7   : > { %8602 = vmatmul.mubr.msk.f32.vlgmr.msra.gmra.mxu1 %vm12201_vm5, %v552_v60  ;;  %8617 = vmatprep.subr.mxu1 %v8906_v2  ;;  %vm12205_vm5 = vmmov %vm12203_vm3  ;;  %vm12209_vm3 = vcmask 130048  }
 0x3b8   : > { %8618 = vmatpush3.msk.msra.mxu1 %vm12202_vm13, %v9456_v17  ;;  %8627 = vmatprep.mubr.msk.f32.mxu1 %vm12195_vm6, %v8906_v2  ;;  %v1458_v22 = vsel %vm12205_vm5, %v9478_v30, %v9322_v23  ;;  %vm12206_vm13 = vcmask 293888   ;;  %v1640_v17 = vsub.f32 1.0, %v1638_v6  ;;  %v1798_v30 = vand.u32 2147483647, %v8173_v25 }
 0x3b9   : > { %8619 = vmatprep.subr.mxu1 %v8906_v2  ;;  %vm12208_vm5 = vcmask 138240  }
 0x3ba   : > { %8620 = vmatpush3.msra.mxu1 %v1460_v15  ;;  %v1642_v28 = vmax.f32 %v1640_v17, 0.0  ;;  %v9636_v27 = vsub.f32 1.0, %v1798_v30 }
 0x3bb   : > { %8621 = vmatprep.subr.mxu1 %v8906_v2 }
 0x3bc   : > { %8622 = vmatpush3.msra.mxu1 %v9618_v18  ;;  %v1802_v38 = vmax.f32 %v9636_v27, 0.0 }
 0x3bd   : > { %8623 = vmatprep.subr.mxu1 %v8906_v2 }
 0x3be   : > { %8624 = vmatpush3.msra.mxu1 %v1458_v22 }
 0x3bf   : > { %8625 = vmatprep.subr.mxu1 %v8906_v2 }
 0x3c0   : > { %8626 = vmatpush3.msra.mxu1 %v1457_v42 }
 0x3c1   : > { %8628 = vmatmul.mubr.msk.f32.vlgmr.msra.gmra.mxu1 %vm12206_vm13, %v9462_v20  ;;  %8162 = vmatprep.subr.msk.mxu1 %vm9395_vm8, %v1642_v28  ;;  %vm12210_vm13 = vcmask 1043456  }
 0x3c2   : > { %1714 = vmatprep.mubr.f32.mxu1 %v8906_v2  ;;  %8163 = vmatpush1.msk.msra.mxu1 %vm9401_vm0, %v1641_v7 }
 0x3c3   : > { %8164 = vmatprep.subr.msk.mxu1 %vm9410_vm9, %v1642_v28 }
 0x3c4   : > { %8165 = vmatpush1.msk.msra.mxu1 %vm9416_vm2, %v1641_v7 }
 0x3c5   : > { %8174 = vmatprep.subr.msk.mxu1 %vm9395_vm8, %v1802_v38 }
 0x401   : > { %v9645_v10 = vpop.permute.xlu0 %2024 }
 0x403   : > { %v9659_v51 = vpop.permute.xlu1 %2027 }
 0x405   : > { %v9651_v16 = vpop.permute.xlu0 %2020 }
 0x407   : > { %v1940_v15 = vpop.permute.xlu1 %1939 }
 0x409   : > { %v1937_v21 = vpop.permute.xlu0 %1936 }
 0x40b   : > { %v9673_v22 = vpop.permute.xlu1 %2017 }
 0x40d   : > { %v1929_v29 = vpop.permute.xlu0 %1928 }
 0x40f   : > { %v1932_v42 = vpop.permute.xlu1 %1931 }
 0x411   : > { %v9653_v35 = vpop.permute.xlu0 %2197 }
 0x413   : > { %v1923_v62 = vpop.permute.xlu1 %1922 }
 0x415   : > { %v9655_v46 = vpop.permute.xlu0 %2194 }
 0x417   : > { %v1920_v4 = vpop.permute.xlu1 %1919 }
 0x419   : > { %v9657_v49 = vpop.permute.xlu0 %2186 }
 0x41b   : > { %v9683_v26 = vpop.permute.xlu1 %2189 }
 0x41d   : > { %v1913_v54 = vpop.permute.xlu0 %1912 }
 0x41e   : > { %v1915_v11 = vsel %vm12207_vm10, 0.0, %v1913_v54  ;;  %vm12211_vm10 = vmmov %vm12210_vm13 }
 0x41f   : > { %v9663_v60 = vsel %vm12208_vm5, %v1915_v11, 0.0  ;;  %v1944_v17 = vsel %vm12211_vm10, %v9493_v48, %v1937_v21  ;;  %vm12212_vm5 = vmmov %vm12211_vm10  ;;  %v9692_v7 = vpop.permute.xlu1 %2109  ;;  %vm12215_vm10 = vcmask 293888  }
 0x420   : > { %2287 = vrot.lane.b32.xlu1 %v9663_v60, %s12125_s30  ;;  %v2283_v61 = vrot.slane %v9663_v60, 4  ;;  %v1943_v25 = vsel %vm12212_vm5, %v1929_v29, %v1932_v42  ;;  %v8172_v29 = vadd.f32 -2.0, %v9560_v19 }
 0x421   : > { %v2107_v48 = vpop.permute.xlu0 %2106 }
 0x422   : > { %2284 = vrot.lane.b32.xlu0 %v2283_v61, %s12127_s19  ;;  %v1797_v11 = vand.u32 2147483647, %v8172_v29 }
 0x424   : > { %2276 = vrot.lane.b32.xlu1 %v9529_v31, %s12127_s19 }
 0x426   : > { %2279 = vrot.lane.b32.xlu0 %v9540_v47, %s12125_s30 }
 0x43b   : > { %v1433_v6 = vpop.f32.mrf.mxu0 }
 0x43c   : > { %8171 = vmatmul.mubr.msk.f32.vlgmr.msra.gmra.mxu0 %vm12209_vm3, %v1433_v6  ;;  %vm12213_vm3 = vmmov %vm12212_vm5 }
 0x43d   : > { %8644 = vmatpush3.msk.msra.mxu0 %vm12210_vm13, %v1940_v15  ;;  %8653 = vmatprep.mubr.msk.f32.mxu0 %vm12195_vm6, %v8906_v2  ;;  %v8616_v9 = vpop.f32.mrf.mxu0  ;;  %v1942_v28 = vsel %vm12213_vm3, %v1923_v62, %v9518_v14  ;;  %vm12214_vm13 = vmmov %vm12213_vm3  ;;  %v9703_v14 = vsel %vm12213_vm3, %v9546_v50, %v2107_v48 }
 0x43e   : > { %8645 = vmatprep.subr.mxu0 %v8906_v2  ;;  %v1941_v30 = vsel %vm12214_vm13, %v9534_v43, %v1920_v4  ;;  %vm12216_vm5 = vmmov %vm12213_vm3 }
 0x43f   : > { %8646 = vmatpush3.msra.mxu0 %v1944_v17  ;;  %vm12217_vm13 = vmmov %vm12213_vm3 }
 0x440   : > { %8647 = vmatprep.subr.mxu0 %v8906_v2  ;;  %v2111_v43 = vsel %vm12217_vm13, %v1940_v15, %v9322_v23  ;;  %v1799_v15 = vsub.f32 1.0, %v1797_v11 }
 0x441   : > { %8648 = vmatpush3.msra.mxu0 %v1943_v25 }
 0x442   : > { %8649 = vmatprep.subr.mxu0 %v8906_v2  ;;  %v1801_v42 = vmax.f32 %v1799_v15, 0.0 }
 0x443   : > { %8650 = vmatpush3.msra.mxu0 %v1942_v28 }
 0x444   : > { %8651 = vmatprep.subr.mxu0 %v8906_v2 }
 0x445   : > { %8652 = vmatpush3.msra.mxu0 %v1941_v30 }
 0x446   : > { %8669 = vmatprep.subr.mxu0 %v8906_v2  ;;  %8654 = vmatmul.mubr.msk.f32.vlgmr.msra.gmra.mxu0 %vm12215_vm10, %v9462_v20 }
 0x447   : > { %8670 = vmatpush3.msk.msra.mxu0 %vm12216_vm5, %v9692_v7  ;;  %8679 = vmatprep.mubr.msk.f32.mxu0 %vm12195_vm6, %v8906_v2  ;;  %vm12218_vm5 = vcmask 130048  }
 0x448   : > { %8671 = vmatprep.subr.mxu0 %v8906_v2  ;;  %vm12219_vm3 = vmmov %vm12218_vm5 }
 0x449   : > { %8672 = vmatpush3.msra.mxu0 %v9703_v14 }
 0x44a   : > { %8673 = vmatprep.subr.mxu0 %v8906_v2 }
 0x44b   : > { %8674 = vmatpush3.msra.mxu0 %v9618_v18 }
 0x44c   : > { %8675 = vmatprep.subr.mxu0 %v8906_v2 }
 0x44d   : > { %8676 = vmatpush3.msra.mxu0 %v2111_v43 }
 0x44e   : > { %8677 = vmatprep.subr.mxu0 %v8906_v2 }
 0x44f   : > { %8678 = vmatpush3.msra.mxu0 %v1944_v17 }
 0x450   : > { %8695 = vmatprep.subr.mxu0 %v8906_v2  ;;  %8680 = vmatmul.mubr.msk.f32.vlgmr.msra.gmra.mxu0 %vm12215_vm10, %v9462_v20  ;;  %vm12220_vm10 = vmmov %vm12217_vm13 }
 0x451   : > { %v1619_v50 = vpop.f32.mrf.mxu0  ;;  %8705 = vmatprep.mubr.msk.f32.mxu0 %vm12195_vm6, %v8906_v2  ;;  %v2032_v19 = vsel %vm12220_vm10, %v9645_v10, %v9659_v51 }
 0x453   : > { %v8642_v21 = vpop.f32.mrf.mxu0 }
 0x46d   : > { %v9718_v18 = vpop.f32.mrf.mxu1 }
 0x46f   : > { %v9721_v54 = vpop.f32.mrf.mxu1 }
 0x477   : > { %v9723_v23 = vpop.f32.mrf.mxu1 }
 0x479   : > { %v8603_v61 = vpop.f32.mrf.mxu1 }
 0x481   : > { %v1529_v62 = vpop.f32.mrf.mxu1 }
 0x482   : > { %8166 = vmatmul.mubr.msk.f32.vlgmr.msra.gmra.mxu1 %vm12218_vm5, %v1529_v62  ;;  %vm12221_vm5 = vmmov %vm12220_vm10 }
 0x483   : > { %8175 = vmatpush1.msk.msra.mxu1 %vm9401_vm0, %v1801_v42  ;;  %v8629_v4 = vpop.f32.mrf.mxu1  ;;  %1874 = vmatprep.mubr.f32.mxu1 %v8906_v2  ;;  %v2031_v27 = vsel %vm12221_vm5, %v9651_v16, %v9500_v13 }
 0x484   : > { %8176 = vmatprep.subr.msk.mxu1 %vm9410_vm9, %v1802_v38 }
 0x485   : > { %8177 = vmatpush1.msk.msra.mxu1 %vm9416_vm2, %v1801_v42 }
 0x486   : > { %8656 = vmatprep.subr.mxu1 %v8906_v2  ;;  %8178 = vmatmul.mubr.msk.f32.vlgmr.msra.gmra.mxu1 %vm12219_vm3, %v1619_v50  ;;  %vm12222_vm3 = vmmov %vm12221_vm5 }
 0x487   : > { %8657 = vmatpush3.msk.msra.mxu1 %vm12217_vm13, %v9438_v5  ;;  %8666 = vmatprep.mubr.msk.f32.mxu1 %vm12195_vm6, %v8906_v2  ;;  %v2030_v38 = vsel %vm12222_vm3, %v9508_v45, %v9673_v22  ;;  %vm12223_vm13 = vcmask 293888   ;;  %vm12224_vm10 = vmmov %vm12222_vm3 }
 0x488   : > { %8658 = vmatprep.subr.mxu1 %v8906_v2  ;;  %vm12225_vm5 = vmmov %vm12222_vm3 }
 0x489   : > { %8659 = vmatpush3.msra.mxu1 %v9447_v8  ;;  %v2201_v13 = vsel %vm12225_vm5, %v9529_v31, %v9655_v46  ;;  %vm12228_vm5 = vmmov %vm12222_vm3 }
 0x48a   : > { %8660 = vmatprep.subr.mxu1 %v8906_v2  ;;  %v2199_v31 = vsel %vm12228_vm5, %v9438_v5, %v9554_v12 }
 0x48b   : > { %8661 = vmatpush3.msra.mxu1 %v2032_v19 }
 0x48c   : > { %8662 = vmatprep.subr.mxu1 %v8906_v2 }
 0x48d   : > { %8663 = vmatpush3.msra.mxu1 %v2031_v27 }
 0x48e   : > { %8664 = vmatprep.subr.mxu1 %v8906_v2 }
 0x48f   : > { %8665 = vmatpush3.msra.mxu1 %v2030_v38 }
 0x490   : > { %8667 = vmatmul.mubr.msk.f32.vlgmr.msra.gmra.mxu1 %vm12223_vm13, %v9462_v20  ;;  %8682 = vmatprep.subr.mxu1 %v8906_v2  ;;  %vm12226_vm13 = vmmov %vm12222_vm3 }
 0x491   : > { %8683 = vmatpush3.msk.msra.mxu1 %vm12224_vm10, %v9653_v35  ;;  %8692 = vmatprep.mubr.msk.f32.mxu1 %vm12195_vm6, %v8906_v2  ;;  %v2200_v10 = vsel %vm12226_vm13, %v9657_v49, %v9683_v26  ;;  %vm12227_vm10 = vmmov %vm12222_vm3  ;;  %vm12229_vm13 = vcmask 293888  }
 0x492   : > { %8684 = vmatprep.subr.mxu1 %v8906_v2  ;;  %v2288_v45 = vpop.permute.xlu1 %2287  ;;  %vm12231_vm5 = vmmov %vm12229_vm13 }
 0x493   : > { %8685 = vmatpush3.msra.mxu1 %v2201_v13  ;;  %8696 = vmatpush3.msk.msra.mxu0 %vm12222_vm3, %v2288_v45 }
 0x494   : > { %8686 = vmatprep.subr.mxu1 %v8906_v2  ;;  %v2285_v16 = vpop.permute.xlu0 %2284  ;;  %8697 = vmatprep.subr.mxu0 %v8906_v2 }
 0x495   : > { %8687 = vmatpush3.msra.mxu1 %v2200_v10  ;;  %v2291_v35 = vsel %vm12227_vm10, %v9663_v60, %v2285_v16  ;;  %vm12230_vm10 = vmmov %vm12222_vm3  ;;  %v12233_v60 = vcvt.s32.f32 %v9085_v32 }
 0x496   : > { %8688 = vmatprep.subr.mxu1 %v8906_v2  ;;  %8698 = vmatpush3.msra.mxu0 %v2291_v35  ;;  %v2277_v46 = vpop.permute.xlu1 %2276  ;;  %v2289_v5 = vsel %vm12230_vm10, %v9692_v7, %v9540_v47  ;;  %vm12101_vm10 = vcmp.ge.s32.totalorder %v9093_v37, 0 }
 0x497   : > { %8689 = vmatpush3.msra.mxu1 %v2199_v31  ;;  %8699 = vmatprep.subr.mxu0 %v8906_v2  ;;  %v2364_v22 = vmul.f32 0.26666668, %v12233_v60 }
 0x498   : > { %8690 = vmatprep.subr.mxu1 %v8906_v2  ;;  %v2280_v49 = vpop.permute.xlu0 %2279 }
 0x499   : > { %8691 = vmatpush3.msra.mxu1 %v9447_v8  ;;  %v2290_v51 = vsel %vm12222_vm3, %v2277_v46, %v2280_v49  ;;  %v12232_v8 = vcvt.s32.f32 %v9087_v33  ;;  %v8189_v47 = vadd.f32 -1.0, %v2364_v22  ;;  %v8215_v38 = vadd.f32 -4.0, %v2364_v22 }
 0x49a   : > { %8693 = vmatmul.mubr.msk.f32.vlgmr.msra.gmra.mxu1 %vm12229_vm13, %v9462_v20  ;;  %8700 = vmatpush3.msra.mxu0 %v2290_v51  ;;  %vm12234_vm3 = vcmask 130048  }
 0x49b   : > { %8701 = vmatprep.subr.mxu0 %v8906_v2  ;;  %2455 = vmatprep.mubr.f32.mxu1 %v8906_v2  ;;  %v2365_v12 = vmul.f32 0.26666668, %v12232_v8  ;;  %v2378_v17 = vand.u32 2147483647, %v8189_v47  ;;  %v2714_v10 = vand.u32 2147483647, %v8215_v38  ;;  %vm12235_vm13 = vmmov %vm12234_vm3 }
 0x49c   : > { %8702 = vmatpush3.msra.mxu0 %v2289_v5 }
 0x49d   : > { %8703 = vmatprep.subr.mxu0 %v8906_v2  ;;  %v8190_v6 = vadd.f32 -1.0, %v2365_v12  ;;  %v2380_v26 = vsub.f32 1.0, %v2378_v17  ;;  %v2367_v30 = vand.u32 2147483647, %v2365_v12  ;;  %v8202_v48 = vadd.f32 -2.0, %v2365_v12 }
 0x49e   : > { %8704 = vmatpush3.msra.mxu0 %v9703_v14  ;;  %v8201_v14 = vadd.f32 -2.0, %v2364_v22  ;;  %v8216_v42 = vadd.f32 -4.0, %v2365_v12  ;;  %v2716_v35 = vsub.f32 1.0, %v2714_v10  ;;  %v8208_v17 = vadd.f32 -3.0, %v2364_v22 }
 0x49f   : > { %8706 = vmatmul.mubr.msk.f32.vlgmr.msra.gmra.mxu0 %vm12231_vm5, %v9462_v20  ;;  %v2379_v9 = vand.u32 2147483647, %v8190_v6  ;;  %v2382_v7 = vmax.f32 %v2380_v26, 0.0  ;;  %v9800_v20 = vsub.f32 1.0, %v2367_v30  ;;  %v2539_v43 = vand.u32 2147483647, %v8202_v48 }
 0x4a0   : > { %2615 = vmatprep.mubr.f32.mxu0 %v8906_v2  ;;  %v2538_v50 = vand.u32 2147483647, %v8201_v14  ;;  %v2715_v62 = vand.u32 2147483647, %v8216_v42  ;;  %v2718_v31 = vmax.f32 %v2716_v35, 0.0  ;;  %v8209_v6 = vadd.f32 -3.0, %v2365_v12 }
 0x4a1   : > { %v2381_v25 = vsub.f32 1.0, %v2379_v9  ;;  %v2371_v21 = vmax.f32 %v9800_v20, 0.0  ;;  %v2541_v29 = vsub.f32 1.0, %v2539_v43  ;;  %v2366_v9 = vand.u32 2147483647, %v2364_v22 }
 0x4a2   : > { %v2540_v11 = vsub.f32 1.0, %v2538_v50  ;;  %v2717_v4 = vsub.f32 1.0, %v2715_v62  ;;  %v2627_v30 = vand.u32 2147483647, %v8209_v6  ;;  %vm12100_vm5 = vcmp.lt.s32.totalorder %v9093_v37, 16 }
 0x4a3   : > { %v2383_v28 = vmax.f32 %v2381_v25, 0.0  ;;  %v2543_v61 = vmax.f32 %v2541_v29, 0.0  ;;  %v2368_v48 = vsub.f32 1.0, %v2366_v9  ;;  %v12242_v42 = vmov 1.0  }
 0x4a4   : > { %v2542_v15 = vmax.f32 %v2540_v11, 0.0  ;;  %v2719_v19 = vmax.f32 %v2717_v4, 0.0  ;;  %v2629_v14 = vsub.f32 1.0, %v2627_v30 }
 0x4a5   : > { %8191 = vmatprep.subr.msk.mxu1 %vm9395_vm8, %v2383_v28  ;;  %8203 = vmatprep.subr.msk.mxu0 %vm9395_vm8, %v2543_v61  ;;  %v2370_v20 = vmax.f32 %v2368_v48, 0.0 }
 0x4a6   : > { %8192 = vmatpush1.msk.msra.mxu1 %vm9401_vm0, %v2382_v7  ;;  %8204 = vmatpush1.msk.msra.mxu0 %vm9401_vm0, %v2542_v15  ;;  %v2631_v29 = vmax.f32 %v2629_v14, 0.0 }
 0x4a7   : > { %8193 = vmatprep.subr.msk.mxu1 %vm9410_vm9, %v2383_v28  ;;  %8205 = vmatprep.subr.msk.mxu0 %vm9410_vm9, %v2543_v61 }
 0x4a8   : > { %8194 = vmatpush1.msk.msra.mxu1 %vm9416_vm2, %v2382_v7  ;;  %8206 = vmatpush1.msk.msra.mxu0 %vm9416_vm2, %v2542_v15  ;;  %v2626_v7 = vand.u32 2147483647, %v8208_v17 }
 0x4a9   : > { %8196 = vmatprep.subr.msk.mxu1 %vm9395_vm8, %v2371_v21  ;;  %8217 = vmatprep.subr.msk.mxu0 %vm9395_vm8, %v2719_v19 }
 0x4aa   : > { %v2628_v43 = vsub.f32 1.0, %v2626_v7 }
 0x4ac   : > { %v2630_v22 = vmax.f32 %v2628_v43, 0.0 }
 0x4fc   : > { %v1790_v27 = vpop.f32.mrf.mxu0 }
 0x4fe   : > { %v1792_v13 = vpop.f32.mrf.mxu0 }
 0x506   : > { %v2013_v45 = vpop.f32.mrf.mxu0 }
 0x508   : > { %v8655_v16 = vpop.f32.mrf.mxu0 }
 0x510   : > { %v2181_v46 = vpop.f32.mrf.mxu0 }
 0x511   : > { %8207 = vmatmul.mubr.msk.f32.vlgmr.msra.gmra.mxu0 %vm12234_vm3, %v2181_v46  ;;  %vm9848_vm3 = vmand %vm12101_vm10, %vm12100_vm5  ;;  %vm12114_vm5 = vcmp.lt.s32.totalorder %v9091_v36, 16  ;;  %vm9875_vm10 = vcmp.eq.s32.totalorder %v9391_v63, %v9085_v32 }
 0x512   : > { %v8681_v49 = vpop.f32.mrf.mxu0  ;;  %8218 = vmatpush1.msk.msra.mxu0 %vm9401_vm0, %v2718_v31  ;;  %2791 = vmatprep.mubr.f32.mxu0 %v8906_v2  ;;  %v2811_v61 = vsel %vm9848_vm3, %v9243_v58, 0.0  ;;  %vm3058_vm3 = vcmp.lt.s32.totalorder %v9093_v37, 11  ;;  %vm2804_vm1 = vmand %vm12245_vm7, %vm12114_vm5  ;;  %vm3055_vm7 = vcmp.ge.s32.totalorder %v9091_v36, 5  ;;  %vm3140_vm5 = vcmp.ge.s32.totalorder %v9093_v37, 10 }
 0x513   : > { %8219 = vmatprep.subr.msk.mxu0 %vm9410_vm9, %v2719_v19  ;;  %v2813_v19 = vmul.f32 0.0625, %v2811_v61  ;;  %vm3060_vm12 = vmand %vm3056_vm15, %vm3058_vm3  ;;  %v2810_v38 = vsel %vm2804_vm1, %v9232_v56, 0.0  ;;  %vm12250_vm3 = vcmask 138240  }
 0x514   : > { %8220 = vmatpush1.msk.msra.mxu0 %vm9416_vm2, %v2718_v31  ;;  %vm12248_vm15 = vmmov %vm12235_vm13  ;;  %v2812_v52 = vmul.f32 0.0625, %v2810_v38 }
 0x515   : > { %8708 = vmatprep.subr.mxu0 %v8906_v2 }
 0x542   : > { %v1716_v51 = vpop.f32.mrf.mxu1 }
 0x543   : > { %v1791_v8 = vadd.f32 %v1790_v27, %v1716_v51 }
 0x544   : > { %v1718_v5 = vpop.f32.mrf.mxu1 }
 0x545   : > { %v1793_v60 = vadd.f32 %v1792_v13, %v1718_v5 }
 0x546   : > { %v1876_v47 = vpop.f32.mrf.mxu1 }
 0x547   : > { %v9830_v25 = vadd.f32 %v1876_v47, %v1791_v8 }
 0x548   : > { %v1878_v26 = vpop.f32.mrf.mxu1 }
 0x549   : > { %v9832_v28 = vadd.f32 %v1878_v26, %v1793_v60 }
 0x550   : > { %v2099_v50 = vpop.f32.mrf.mxu1 }
 0x551   : > { %8195 = vmatmul.mubr.msk.f32.vlgmr.msra.gmra.mxu1 %vm12235_vm13, %v2099_v50 }
 0x552   : > { %v8668_v12 = vpop.f32.mrf.mxu1  ;;  %8197 = vmatpush1.msk.msra.mxu1 %vm9401_vm0, %v2370_v20  ;;  %2529 = vmatprep.mubr.f32.mxu1 %v8906_v2 }
 0x553   : > { %8198 = vmatprep.subr.msk.mxu1 %vm9410_vm9, %v2371_v21 }
 0x554   : > { %8199 = vmatpush1.msk.msra.mxu1 %vm9416_vm2, %v2370_v20 }
 0x555   : > { %8200 = vmatmul.mubr.msk.f32.vlgmr.msra.gmra.mxu1 %vm12235_vm13, %v2013_v45  ;;  %8210 = vmatprep.subr.msk.mxu1 %vm9395_vm8, %v2631_v29  ;;  %v3066_v45 = vsel %vm3060_vm12, %v9243_v58, 0.0  ;;  %vm12249_vm12 = vcmask 7168  }
 0x556   : > { %8211 = vmatpush1.msk.msra.mxu1 %vm9401_vm0, %v2630_v22  ;;  %2703 = vmatprep.mubr.f32.mxu1 %v8906_v2  ;;  %v3068_v16 = vmul.f32 0.16666667, %v3066_v45 }
 0x557   : > { %8212 = vmatprep.subr.msk.mxu1 %vm9410_vm9, %v2631_v29 }
 0x558   : > { %8213 = vmatpush1.msk.msra.mxu1 %vm9416_vm2, %v2630_v22  ;;  %vm12275_vm2 = vcmask 130048  }
 0x559   : > { %8222 = vmatprep.subr.msk.mxu1 %vm9857_vm4, %v12242_v42 }
 0x55a   : > { %v2270_v4 = vpop.f32.mrf.mxu1 }
 0x55b   : > { %8214 = vmatmul.mubr.msk.f32.vlgmr.msra.gmra.mxu1 %vm12235_vm13, %v2270_v4  ;;  %vm3057_vm13 = vcmp.lt.s32.totalorder %v9091_v36, 11 }
 0x55c   : > { %8223 = vmatpush1.xpose.msk.msra.mxu1 %vm9875_vm10, %v12242_v42  ;;  %v8694_v63 = vpop.f32.mrf.mxu1  ;;  %2878 = vmatprep.mubr.f32.mxu1 %v2813_v19  ;;  %vm3059_vm1 = vmand %vm3055_vm7, %vm3057_vm13  ;;  %vm12251_vm7 = vcmp.ge.s32.totalorder %v9093_v37, 0 }
 0x55d   : > { %8224 = vmatprep.subr.msk.mxu1 %vm9886_vm14, %v12242_v42  ;;  %v3065_v35 = vsel %vm3059_vm1, %v9232_v56, 0.0  ;;  %vm12252_vm1 = vcmask 1043456  }
 0x55e   : > { %v3067_v31 = vmul.f32 0.16666667, %v3065_v35 }
 0x55f   : > { %v2360_v13 = vpop.f32.mrf.mxu0 }
 0x560   : > { %8225 = vmatpush1.xpose.msk.msra.mxu1 %vm9900_vm11, %v12242_v42  ;;  %8221 = vmatmul.mubr.msk.f32.vlgmr.msra.gmra.mxu0 %vm12248_vm15, %v2360_v13  ;;  %vm2974_vm15 = vcmp.lt.s32.totalorder %v9093_v37, 6  ;;  %v551_v13 = vld [vmem:[%s12253_s3] sm:$0xf]  ;;  %s12511_s3 = smov 1  }
 0x561   : > { %8232 = vmatprep.subr.msk.mxu1 %vm9857_vm4, %v12242_v42  ;;  %v8707_v10 = vpop.f32.mrf.mxu0  ;;  %8712 = vmatprep.mubr.msk.f32.mxu0 %vm12195_vm6, %v8906_v2  ;;  %vm2976_vm13 = vmand %vm12251_vm7, %vm2974_vm15  ;;  %vm12255_vm15 = vcmask 97280   ;;  %vm12256_vm7 = vcmp.ge.s32.totalorder %v9091_v36, 0 }
 0x562   : > { %v2982_v63 = vsel %vm2976_vm13, %v9243_v58, 0.0 }
 0x563   : > { %2879 = vmatmul.mubr.f32.vlgmr.msra.gmra.mxu1 %v2812_v52  ;;  %v2984_v52 = vmul.f32 0.16666667, %v2982_v63 }
 0x564   : > { %8233 = vmatpush1.xpose.msk.msra.mxu1 %vm9875_vm10, %v12242_v42  ;;  %3133 = vmatprep.mubr.f32.mxu1 %v3068_v16 }
 0x565   : > { %8234 = vmatprep.subr.msk.mxu1 %vm9886_vm14, %v12242_v42 }
 0x568   : > { %8235 = vmatpush1.xpose.msk.msra.mxu1 %vm9900_vm11, %v12242_v42 }
 0x569   : > { %8715 = vmatprep.subr.mxu1 %v8906_v2 }
 0x56b   : > { %3134 = vmatmul.mubr.f32.vlgmr.msra.gmra.mxu1 %v3067_v31 }
 0x56c   : > { %8725 = vmatprep.mubr.msk.f32.mxu1 %vm12195_vm6, %v8906_v2 }
 0x5d1   : > { %v2617_v51 = vpop.f32.mrf.mxu0 }
 0x5d3   : > { %v2619_v6 = vpop.f32.mrf.mxu0 }
 0x611   : > { %v2457_v46 = vpop.f32.mrf.mxu1 }
 0x613   : > { %v2459_v49 = vpop.f32.mrf.mxu1 }
 0x615   : > { %v2531_v5 = vpop.f32.mrf.mxu1 }
 0x616   : > { %v2532_v8 = vadd.f32 %v2531_v5, %v2457_v46 }
 0x617   : > { %v2533_v60 = vpop.f32.mrf.mxu1 }
 0x618   : > { %v2534_v47 = vadd.f32 %v2533_v60, %v2459_v49  ;;  %v2622_v9 = vadd.f32 %v2617_v51, %v2532_v8 }
 0x61a   : > { %v2623_v17 = vadd.f32 %v2619_v6, %v2534_v47 }
 0x61b   : > { %v2705_v26 = vpop.f32.mrf.mxu1 }
 0x61c   : > { %v2710_v30 = vadd.f32 %v2705_v26, %v2622_v9 }
 0x61d   : > { %v2707_v48 = vpop.f32.mrf.mxu1 }
 0x61e   : > { %v9933_v7 = vadd.f32 %v2707_v48, %v2623_v17 }
 0x620   : > { %v2793_v14 = vpop.f32.mrf.mxu0 }
 0x621   : > { %v9935_v20 = vadd.f32 %v2793_v14, %v2710_v30 }
 0x622   : > { %v10006_v51 = vpop.f32.mrf.mxu0 }
 0x623   : > { %v2880_v43 = vpop.f32.mrf.mxu1 }
 0x624   : > { %2885 = vrot.lane.b32.xlu1 %v2880_v43, %s12129_s20 }
 0x625   : > { %v2882_v50 = vpop.f32.mrf.mxu1 }
 0x62b   : > { %v3135_v29 = vpop.f32.mrf.mxu1 }
 0x62d   : > { %v3137_v12 = vpop.f32.mrf.mxu1 }
 0x696   : > { %v2886_v22 = vpop.permute.xlu1 %2885 }
 0x697   : > { %v2888_v11 = vsel %vm12249_vm12, 0.0, %v2886_v22  ;;  %vm2973_vm12 = vcmp.lt.s32.totalorder %v9091_v36, 6 }
 0x698   : > { %v2889_v61 = vsel %vm12250_vm3, %v2888_v11, 0.0  ;;  %vm12254_vm3 = vmmov %vm12252_vm1 }
 0x699   : > { %2895 = vrot.lane.b32.xlu0 %v2889_v61, %s12125_s30  ;;  %v2891_v4 = vrot.slane %v2889_v61, 4  ;;  %vm2975_vm13 = vmand %vm12256_vm7, %vm2973_vm12  ;;  %vm3139_vm12 = vcmp.ge.s32.totalorder %v9091_v36, 10  ;;  %vm12259_vm7 = vcmask 7168  }
 0x69a   : > { %v2981_v10 = vsel %vm2975_vm13, %v9232_v56, 0.0  ;;  %vm12260_vm13 = vcmask 138240  }
 0x69b   : > { %2892 = vrot.lane.b32.xlu1 %v2891_v4, %s12127_s19  ;;  %v2983_v35 = vmul.f32 0.16666667, %v2981_v10 }
 0x69d   : > { %3228 = vrot.lane.b32.xlu0 %v3135_v29, %s12129_s20 }
 0x70b   : > { %v2896_v19 = vpop.permute.xlu0 %2895 }
 0x70c   : > { %8709 = vmatpush3.msk.msra.mxu0 %vm12252_vm1, %v2896_v19  ;;  %vm12257_vm1 = vcmp.lt.s32.totalorder %v9093_v37, 16 }
 0x70d   : > { %v2893_v38 = vpop.permute.xlu1 %2892  ;;  %8710 = vmatprep.subr.mxu0 %v8906_v2 }
 0x70e   : > { %v2897_v45 = vsel %vm12254_vm3, %v2889_v61, %v2893_v38  ;;  %vm3142_vm3 = vmand %vm3140_vm5, %vm12257_vm1  ;;  %vm12258_vm5 = vcmp.lt.s32.totalorder %v9091_v36, 16 }
 0x70f   : > { %8711 = vmatpush3.msra.mxu0 %v2897_v45  ;;  %v3148_v16 = vsel %vm3142_vm3, %v9243_v58, 0.0  ;;  %v3229_v60 = vpop.permute.xlu0 %3228  ;;  %vm12261_vm1 = vmmov %vm12259_vm7 }
 0x710   : > { %8713 = vmatmul.mubr.msk.f32.vlgmr.msra.gmra.mxu0 %vm12255_vm15, %v551_v13  ;;  %8228 = vmatprep.subr.msk.mxu0 %vm9857_vm4, %v12242_v42  ;;  %v3150_v31 = vmul.f32 0.16666667, %v3148_v16  ;;  %vm3141_vm15 = vmand %vm3139_vm12, %vm12258_vm5  ;;  %v3231_v47 = vsel %vm12259_vm7, 0.0, %v3229_v60  ;;  %vm3417_vm7 = vcmp.lt.s32.totalorder %v9093_v37, 4 }
 0x711   : > { %8229 = vmatpush1.xpose.msk.msra.mxu0 %vm9875_vm10, %v12242_v42  ;;  %3049 = vmatprep.mubr.f32.mxu0 %v2984_v52  ;;  %v3147_v46 = vsel %vm3141_vm15, %v9232_v56, 0.0  ;;  %v3232_v17 = vsel %vm12260_vm13, %v3231_v47, 0.0  ;;  %vm12262_vm3 = vmmov %vm12260_vm13  ;;  %vm12265_vm15 = vcmask 1043456  }
 0x712   : > { %8230 = vmatprep.subr.msk.mxu0 %vm9886_vm14, %v12242_v42  ;;  %v3149_v49 = vmul.f32 0.16666667, %v3147_v46  ;;  %v3240_v48 = vrot.slane %v3232_v17, 4  ;;  %vm12263_vm12 = vmmov %vm12261_vm1 }
 0x713   : > { %vm12264_vm5 = vmmov %vm12262_vm3 }
 0x714   : > { %vm12266_vm13 = vmmov %vm12265_vm15 }
 0x715   : > { %8231 = vmatpush1.xpose.msk.msra.mxu0 %vm9900_vm11, %v12242_v42 }
 0x716   : > { %8236 = vmatprep.subr.msk.mxu0 %vm9857_vm4, %v12242_v42 }
 0x718   : > { %3050 = vmatmul.mubr.f32.vlgmr.msra.gmra.mxu0 %v2983_v35 }
 0x719   : > { %8237 = vmatpush1.xpose.msk.msra.mxu0 %vm9875_vm10, %v12242_v42  ;;  %3215 = vmatprep.mubr.f32.mxu0 %v3150_v31  ;;  %v553_v31 = vld [vmem:[%s12045_s5] sm:$0xf] }
 0x71a   : > { %8238 = vmatprep.subr.msk.mxu0 %vm9886_vm14, %v12242_v42 }
 0x71d   : > { %8239 = vmatpush1.xpose.msk.msra.mxu0 %vm9900_vm11, %v12242_v42 }
 0x71e   : > { %8242 = vmatprep.subr.msk.mxu0 %vm9857_vm4, %v12242_v42 }
 0x720   : > { %3216 = vmatmul.mubr.f32.vlgmr.msra.gmra.mxu0 %v3149_v49 }
 0x721   : > { %8243 = vmatpush1.msk.msra.mxu0 %vm9875_vm10, %v12242_v42  ;;  %3409 = vmatprep.mubr.f32.mxu0 %v8906_v2 }
 0x722   : > { %8244 = vmatprep.subr.msk.mxu0 %vm9886_vm14, %v12242_v42 }
 0x723   : > { %8245 = vmatpush1.msk.msra.mxu0 %vm9900_vm11, %v12242_v42 }
 0x724   : > { %8251 = vmatprep.subr.msk.mxu0 %vm9857_vm4, %v12242_v42 }
 0x7d0   : > { %v10008_v5 = vpop.f32.mrf.mxu0 }
 0x7d2   : > { %v8714_v8 = vpop.f32.mrf.mxu0 }
 0x7d8   : > { %v3051_v6 = vpop.f32.mrf.mxu0 }
 0x7d9   : > { %3222 = vrot.lane.b32.xlu0 %v3051_v6, %s12129_s20 }
 0x7da   : > { %v3053_v9 = vpop.f32.mrf.mxu0 }
 0x7dd   : > { %3247 = vrot.lane.b32.xlu0 %v3232_v17, %s12127_s19 }
 0x7e0   : > { %v3217_v26 = vpop.f32.mrf.mxu0 }
 0x7e1   : > { %3234 = vrot.lane.b32.xlu1 %v3217_v26, %s12129_s20 }
 0x7e2   : > { %v3219_v30 = vpop.f32.mrf.mxu0 }
 0x7e5   : > { %3258 = vrot.lane.b32.xlu1 %v3240_v48, %s12125_s30 }
 0x84b   : > { %v3223_v14 = vpop.permute.xlu0 %3222 }
 0x84c   : > { %v3225_v43 = vsel %vm12261_vm1, 0.0, %v3223_v14  ;;  %vm12267_vm1 = vcmp.ge.s32.totalorder %v9093_v37, 0 }
 0x84d   : > { %v3226_v50 = vsel %vm12262_vm3, %v3225_v43, 0.0  ;;  %vm3419_vm3 = vmand %vm12267_vm1, %vm3417_vm7  ;;  %vm3583_vm7 = vcmp.ge.s32.totalorder %v9093_v37, 6  ;;  %vm3585_vm1 = vcmp.lt.s32.totalorder %v9093_v37, 10 }
 0x84e   : > { %3255 = vrot.lane.b32.xlu0 %v3226_v50, %s12125_s30  ;;  %v3243_v29 = vrot.slane %v3226_v50, 4  ;;  %v3425_v35 = vsel %vm3419_vm3, %v9243_v58, 0.0  ;;  %vm12272_vm3 = vcmp.ge.s32.totalorder %v9091_v36, 0 }
 0x84f   : > { %v3248_v4 = vpop.permute.xlu0 %3247  ;;  %v3427_v49 = vmul.f32 0.25, %v3425_v35 }
 0x852   : > { %3244 = vrot.lane.b32.xlu0 %v3243_v29, %s12127_s19 }
 0x853   : > { %v3235_v12 = vpop.permute.xlu1 %3234 }
 0x854   : > { %v3237_v22 = vsel %vm12263_vm12, 0.0, %v3235_v12  ;;  %vm12268_vm12 = vmmov %vm12266_vm13 }
 0x855   : > { %v3238_v11 = vsel %vm12264_vm5, %v3237_v22, 0.0  ;;  %vm12269_vm5 = vmmov %vm12268_vm12 }
 0x856   : > { %3261 = vrot.lane.b32.xlu1 %v3238_v11, %s12125_s30  ;;  %v3251_v61 = vrot.slane %v3238_v11, 4 }
 0x857   : > { %v3259_v19 = vpop.permute.xlu1 %3258 }
 0x85a   : > { %3252 = vrot.lane.b32.xlu1 %v3251_v61, %s12127_s19 }
 0x8c0   : > { %v3256_v63 = vpop.permute.xlu0 %3255 }
 0x8c1   : > { %v3266_v13 = vsel %vm12266_vm13, %v3256_v63, %v3259_v19  ;;  %vm12270_vm13 = vmmov %vm12269_vm5 }
 0x8c2   : > { %v3263_v46 = vsel %vm12270_vm13, %v3226_v50, %v3240_v48  ;;  %vm3587_vm13 = vmand %vm3583_vm7, %vm3585_vm1  ;;  %vm3751_vm7 = vcmp.ge.s32.totalorder %v9093_v37, 12 }
 0x8c3   : > { %v3593_v60 = vsel %vm3587_vm13, %v9243_v58, 0.0  ;;  %vm3750_vm13 = vcmp.ge.s32.totalorder %v9091_v36, 12 }
 0x8c4   : > { %v3245_v45 = vpop.permute.xlu0 %3244  ;;  %v3595_v47 = vmul.f32 0.25, %v3593_v60 }
 0x8c5   : > { %v3264_v16 = vsel %vm12269_vm5, %v3238_v11, %v3245_v45 }
 0x8c8   : > { %v3262_v38 = vpop.permute.xlu1 %3261 }
 0x8c9   : > { %8716 = vmatpush3.msk.msra.mxu1 %vm12265_vm15, %v3262_v38  ;;  %vm3416_vm15 = vcmp.lt.s32.totalorder %v9091_v36, 4 }
 0x8ca   : > { %8717 = vmatprep.subr.mxu1 %v8906_v2  ;;  %vm3418_vm5 = vmand %vm12272_vm3, %vm3416_vm15  ;;  %vm3582_vm15 = vcmp.ge.s32.totalorder %v9091_v36, 6  ;;  %vm12273_vm3 = vcmp.lt.s32.totalorder %v9093_v37, 16 }
 0x8cb   : > { %8718 = vmatpush3.msra.mxu1 %v3266_v13  ;;  %v3424_v8 = vsel %vm3418_vm5, %v9232_v56, 0.0  ;;  %vm3753_vm5 = vmand %vm3751_vm7, %vm12273_vm3  ;;  %vm3499_vm7 = vcmp.ge.s32.totalorder %v9093_v37, 3 }
 0x8cc   : > { %v3253_v52 = vpop.permute.xlu1 %3252  ;;  %8719 = vmatprep.subr.mxu1 %v8906_v2  ;;  %v3426_v6 = vmul.f32 0.25, %v3424_v8  ;;  %v3759_v17 = vsel %vm3753_vm5, %v9243_v58, 0.0  ;;  %vm3498_vm5 = vcmp.ge.s32.totalorder %v9091_v36, 3 }
 0x8cd   : > { %v3265_v10 = vsel %vm12268_vm12, %v3248_v4, %v3253_v52  ;;  %vm12271_vm12 = vcmask 293888   ;;  %v3761_v30 = vmul.f32 0.25, %v3759_v17 }
 0x8ce   : > { %8720 = vmatpush3.msra.mxu1 %v3265_v10 }
 0x8cf   : > { %8721 = vmatprep.subr.mxu1 %v8906_v2 }
 0x8d0   : > { %8722 = vmatpush3.msra.mxu1 %v3264_v16 }
 0x8d1   : > { %8723 = vmatprep.subr.mxu1 %v8906_v2 }
 0x8d2   : > { %8724 = vmatpush3.msra.mxu1 %v3263_v46 }
 0x8d3   : > { %8726 = vmatmul.mubr.msk.f32.vlgmr.msra.gmra.mxu1 %vm12271_vm12, %v553_v31  ;;  %8247 = vmatprep.subr.msk.mxu1 %vm9857_vm4, %v12242_v42  ;;  %vm3584_vm12 = vcmp.lt.s32.totalorder %v9091_v36, 10 }
 0x8d4   : > { %8248 = vmatpush1.xpose.msk.msra.mxu1 %vm9875_vm10, %v12242_v42  ;;  %3492 = vmatprep.mubr.f32.mxu1 %v3427_v49  ;;  %vm3586_vm1 = vmand %vm3582_vm15, %vm3584_vm12  ;;  %vm12274_vm15 = vcmp.lt.s32.totalorder %v9091_v36, 16 }
 0x8d5   : > { %8249 = vmatprep.subr.msk.mxu1 %vm9886_vm14, %v12242_v42  ;;  %v3592_v9 = vsel %vm3586_vm1, %v9232_v56, 0.0  ;;  %vm3752_vm12 = vmand %vm3750_vm13, %vm12274_vm15  ;;  %vm3501_vm1 = vcmp.lt.s32.totalorder %v9093_v37, 7  ;;  %vm12119_vm13 = vcmp.lt.s32.totalorder %v9091_v36, 7  ;;  %vm12118_vm15 = vcmp.ge.s32.totalorder %v9093_v37, 9 }
 0x8d6   : > { %v3594_v26 = vmul.f32 0.25, %v3592_v9  ;;  %v3758_v48 = vsel %vm3752_vm12, %v9232_v56, 0.0  ;;  %vm3503_vm3 = vmand %vm3499_vm7, %vm3501_vm1  ;;  %vm3669_vm12 = vcmp.lt.s32.totalorder %v9093_v37, 13 }
 0x8d7   : > { %v3760_v14 = vmul.f32 0.25, %v3758_v48  ;;  %v3509_v43 = vsel %vm3503_vm3, %v9243_v58, 0.0  ;;  %vm3502_vm9 = vmand %vm3498_vm5, %vm12119_vm13  ;;  %vm3668_vm3 = vcmp.lt.s32.totalorder %v9091_v36, 13  ;;  %vm12276_vm5 = vcmask 7168  }
 0x8d8   : > { %8250 = vmatpush1.xpose.msk.msra.mxu1 %vm9900_vm11, %v12242_v42  ;;  %v3511_v29 = vmul.f32 0.25, %v3509_v43  ;;  %vm3671_vm7 = vmand %vm12118_vm15, %vm3669_vm12  ;;  %v3508_v22 = vsel %vm3502_vm9, %v9232_v56, 0.0  ;;  %vm12277_vm12 = vcmask 138240   ;;  %vm12303_vm15 = vcmp.ge.s32.totalorder %v9091_v36, 0 }
 0x8d9   : > { %8255 = vmatprep.subr.msk.mxu1 %vm9857_vm4, %v12242_v42  ;;  %v3677_v11 = vsel %vm3671_vm7, %v9243_v58, 0.0  ;;  %v3510_v61 = vmul.f32 0.25, %v3508_v22  ;;  %vm12278_vm7 = vmmov %vm12276_vm5 }
 0x8da   : > { %v3679_v19 = vmul.f32 0.25, %v3677_v11 }
 0x8db   : > { %3493 = vmatmul.mubr.f32.vlgmr.msra.gmra.mxu1 %v3426_v6 }
 0x8dc   : > { %8256 = vmatpush1.xpose.msk.msra.mxu1 %vm9875_vm10, %v12242_v42  ;;  %3660 = vmatprep.mubr.f32.mxu1 %v3595_v47 }
 0x8dd   : > { %8257 = vmatprep.subr.msk.mxu1 %vm9886_vm14, %v12242_v42 }
 0x8e0   : > { %8258 = vmatpush1.xpose.msk.msra.mxu1 %vm9900_vm11, %v12242_v42 }
 0x8e1   : > { %8263 = vmatprep.subr.msk.mxu1 %vm9857_vm4, %v12242_v42 }
 0x8e3   : > { %3661 = vmatmul.mubr.f32.vlgmr.msra.gmra.mxu1 %v3594_v26 }
 0x8e4   : > { %8264 = vmatpush1.xpose.msk.msra.mxu1 %vm9875_vm10, %v12242_v42  ;;  %3826 = vmatprep.mubr.f32.mxu1 %v3761_v30 }
 0x8e5   : > { %8265 = vmatprep.subr.msk.mxu1 %vm9886_vm14, %v12242_v42 }
 0x8e8   : > { %8266 = vmatpush1.xpose.msk.msra.mxu1 %vm9900_vm11, %v12242_v42 }
 0x8e9   : > { %8741 = vmatprep.subr.mxu1 %v8906_v2 }
 0x8eb   : > { %3827 = vmatmul.mubr.f32.vlgmr.msra.gmra.mxu1 %v3760_v14 }
 0x8ec   : > { %8751 = vmatprep.mubr.msk.f32.mxu1 %vm12195_vm6, %v8906_v2 }
 0x993   : > { %v3338_v50 = vpop.f32.mrf.mxu1 }
 0x994   : > { %8246 = vmatmul.mubr.msk.f32.vlgmr.msra.gmra.mxu0 %vm12275_vm2, %v3338_v50  ;;  %vm12117_vm2 = vcmp.ge.s32.totalorder %v9091_v36, 9 }
 0x995   : > { %8252 = vmatpush1.xpose.msk.msra.mxu0 %vm9875_vm10, %v12242_v42  ;;  %v8727_v12 = vpop.f32.mrf.mxu1  ;;  %3576 = vmatprep.mubr.f32.mxu0 %v3511_v29  ;;  %vm3670_vm9 = vmand %vm12117_vm2, %vm3668_vm3 }
 0x996   : > { %8253 = vmatprep.subr.msk.mxu0 %vm9886_vm14, %v12242_v42  ;;  %v3676_v38 = vsel %vm3670_vm9, %v9232_v56, 0.0  ;;  %vm12279_vm3 = vmmov %vm12277_vm12 }
 0x997   : > { %v3678_v13 = vmul.f32 0.25, %v3676_v38  ;;  %vm12280_vm9 = vmmov %vm12276_vm5 }
 0x998   : > { %vm12283_vm2 = vmmov %vm12278_vm7 }
 0x999   : > { %8254 = vmatpush1.xpose.msk.msra.mxu0 %vm9900_vm11, %v12242_v42 }
 0x99a   : > { %8259 = vmatprep.subr.msk.mxu0 %vm9857_vm4, %v12242_v42 }
 0x99b   : > { %v3494_v4 = vpop.f32.mrf.mxu1 }
 0x99c   : > { %3577 = vmatmul.mubr.f32.vlgmr.msra.gmra.mxu0 %v3510_v61 }
 0x99d   : > { %8260 = vmatpush1.xpose.msk.msra.mxu0 %vm9875_vm10, %v12242_v42  ;;  %3744 = vmatprep.mubr.f32.mxu0 %v3679_v19  ;;  %v3496_v63 = vpop.f32.mrf.mxu1 }
 0x99e   : > { %8261 = vmatprep.subr.msk.mxu0 %vm9886_vm14, %v12242_v42 }
 0x9a1   : > { %8262 = vmatpush1.xpose.msk.msra.mxu0 %vm9900_vm11, %v12242_v42 }
 0x9a2   : > { %8728 = vmatprep.subr.mxu0 %v8906_v2 }
 0x9a3   : > { %v3662_v45 = vpop.f32.mrf.mxu1 }
 0x9a4   : > { %3745 = vmatmul.mubr.f32.vlgmr.msra.gmra.mxu0 %v3678_v13  ;;  %3845 = vrot.lane.b32.xlu0 %v3662_v45, %s12129_s20 }
 0x9a5   : > { %v3664_v52 = vpop.f32.mrf.mxu1  ;;  %8738 = vmatprep.mubr.msk.f32.mxu0 %vm12195_vm6, %v8906_v2 }
 0x9ab   : > { %v3828_v10 = vpop.f32.mrf.mxu1 }
 0x9ad   : > { %v3830_v16 = vpop.f32.mrf.mxu1 }
 0xa16   : > { %v3846_v8 = vpop.permute.xlu0 %3845 }
 0xa17   : > { %v3848_v6 = vsel %vm12276_vm5, 0.0, %v3846_v8  ;;  %vm12281_vm5 = vmmov %vm12279_vm3 }
 0xa18   : > { %v10154_v9 = vsel %vm12277_vm12, %v3848_v6, 0.0  ;;  %vm12282_vm12 = vcmask 1043456  }
 0xa19   : > { %v10159_v17 = vrot.slane %v10154_v9, 4 }
 0xa54   : > { %v10144_v35 = vpop.f32.mrf.mxu0 }
 0xa56   : > { %v10146_v31 = vpop.f32.mrf.mxu0 }
 0xa5c   : > { %v3578_v46 = vpop.f32.mrf.mxu0 }
 0xa5d   : > { %3839 = vrot.lane.b32.xlu1 %v3578_v46, %s12129_s20 }
 0xa5e   : > { %v3580_v49 = vpop.f32.mrf.mxu0 }
 0xa61   : > { %3833 = vrot.lane.b32.xlu1 %v3494_v4, %s12129_s20 }
 0xa64   : > { %v3746_v60 = vpop.f32.mrf.mxu0 }
 0xa65   : > { %3851 = vrot.lane.b32.xlu0 %v3746_v60, %s12129_s20  ;;  %3857 = vrot.lane.b32.xlu1 %v3828_v10, %s12129_s20 }
 0xa66   : > { %v3748_v47 = vpop.f32.mrf.mxu0 }
 0xa69   : > { %3884 = vrot.lane.b32.xlu0 %v10154_v9, %s12125_s30 }
 0xa6d   : > { %3875 = vrot.lane.b32.xlu0 %v10159_v17, %s12127_s19 }
 0xa71   : > { %3980 = vrot.lane.b32.xlu0 %v10159_v17, %s12125_s30 }
 0xacf   : > { %v3840_v26 = vpop.permute.xlu1 %3839 }
 0xad0   : > { %v3842_v30 = vsel %vm12278_vm7, 0.0, %v3840_v26  ;;  %vm12284_vm7 = vmmov %vm12279_vm3 }
 0xad1   : > { %v10167_v48 = vsel %vm12279_vm3, %v3842_v30, 0.0  ;;  %vm12285_vm3 = vmmov %vm12282_vm12 }
 0xad2   : > { %v3863_v14 = vrot.slane %v10167_v48, 4 }
 0xad3   : > { %v3834_v43 = vpop.permute.xlu1 %3833 }
 0xad4   : > { %v3836_v50 = vsel %vm12280_vm9, 0.0, %v3834_v43  ;;  %3881 = vrot.lane.b32.xlu0 %v3863_v14, %s12125_s30  ;;  %vm12286_vm9 = vmmov %vm12283_vm2 }
 0xad5   : > { %v3837_v29 = vsel %vm12281_vm5, %v3836_v50, 0.0  ;;  %v12120_v50 = vcvt.s32.f32 %v9091_v36 }
 0xad6   : > { %3878 = vrot.lane.b32.xlu1 %v3837_v29, %s12125_s30  ;;  %v3886_v12 = vsel %vm12282_vm12, %v3837_v29, %v3863_v14  ;;  %v3866_v11 = vrot.slane %v3837_v29, 4  ;;  %vm12289_vm12 = vmmov %vm12285_vm3 }
 0xad7   : > { %v3852_v22 = vpop.permute.xlu0 %3851  ;;  %v3858_v19 = vpop.permute.xlu1 %3857 }
 0xad8   : > { %v3854_v61 = vsel %vm12283_vm2, 0.0, %v3852_v22  ;;  %3966 = vrot.lane.b32.xlu0 %v3863_v14, %s12127_s19  ;;  %v3860_v13 = vsel %vm12286_vm9, 0.0, %v3858_v19  ;;  %vm12287_vm2 = vmmov %vm12281_vm5  ;;  %v12121_v14 = vcvt.s32.f32 %v9093_v37 }
 0xad9   : > { %v3855_v4 = vsel %vm12284_vm7, %v3854_v61, 0.0  ;;  %v10193_v45 = vsel %vm12287_vm2, %v3860_v13, 0.0  ;;  %vm12288_vm5 = vmmov %vm12285_vm3  ;;  %v10228_v13 = vld [vmem:[%s12047_s7] sm:$0xf] }
 0xada   : > { %3867 = vrot.lane.b32.xlu1 %v3866_v11, %s12127_s19  ;;  %v10185_v38 = vrot.slane %v3855_v4, 4  ;;  %v4066_v52 = vrot.slane %v10193_v45, 4  ;;  %vm12290_vm7 = vmmov %vm12285_vm3  ;;  %v4153_v11 = vmul.f32 0.13333334, %v12121_v14 }
 0xadb   : > { %v10179_v63 = vpop.permute.xlu0 %3884  ;;  %vm12291_vm9 = vmmov %vm12285_vm3 }
 0xadc   : > { %3983 = vrot.lane.b32.xlu0 %v3855_v4, %s12125_s30  ;;  %8729 = vmatpush3.msk.msra.mxu0 %vm12285_vm3, %v10179_v63  ;;  %vm12292_vm2 = vmmov %vm12285_vm3 }
 0xadd   : > { %8730 = vmatprep.subr.mxu0 %v8906_v2 }
 0xade   : > { %3969 = vrot.lane.b32.xlu1 %v10154_v9, %s12127_s19 }
 0xadf   : > { %v10206_v10 = vpop.permute.xlu0 %3875 }
 0xae0   : > { %3974 = vrot.lane.b32.xlu0 %v10185_v38, %s12127_s19 }
 0xae2   : > { %4074 = vrot.lane.b32.xlu1 %v10193_v45, %s12125_s30 }
 0xae3   : > { %v10208_v16 = vpop.permute.xlu0 %3980 }
 0xae4   : > { %4062 = vrot.lane.b32.xlu0 %v3855_v4, %s12127_s19 }
 0xae6   : > { %3870 = vrot.lane.b32.xlu1 %v10167_v48, %s12127_s19 }
 0xaea   : > { %3977 = vrot.lane.b32.xlu1 %v10167_v48, %s12125_s30 }
 0xaee   : > { %4071 = vrot.lane.b32.xlu1 %v10185_v38, %s12125_s30 }
 0xaf2   : > { %4067 = vrot.lane.b32.xlu1 %v4066_v52, %s12127_s19  ;;  %v10232_v52 = vmul.f32 0.13333334, %v12120_v50 }
 0xb46   : > { %v3882_v46 = vpop.permute.xlu0 %3881 }
 0xb48   : > { %v3879_v49 = vpop.permute.xlu1 %3878 }
 0xb49   : > { %v3889_v8 = vsel %vm12288_vm5, %v3879_v49, %v3882_v46  ;;  %vm12293_vm5 = vcmask 293888  }
 0xb4a   : > { %v3967_v60 = vpop.permute.xlu0 %3966  ;;  %8731 = vmatpush3.msra.mxu0 %v3889_v8  ;;  %v4155_v8 = vand.u32 2147483647, %v4153_v11 }
 0xb4b   : > { %8732 = vmatprep.subr.mxu0 %v8906_v2 }
 0xb4c   : > { %v3868_v6 = vpop.permute.xlu1 %3867 }
 0xb4d   : > { %v3887_v22 = vsel %vm12285_vm3, %v10154_v9, %v3868_v6  ;;  %vm12296_vm3 = vmmov %vm12292_vm2 }
 0xb4e   : > { %v3984_v47 = vpop.permute.xlu0 %3983 }
 0xb4f   : > { %8742 = vmatpush3.msk.msra.mxu1 %vm12289_vm12, %v3984_v47  ;;  %v4154_v47 = vand.u32 2147483647, %v10232_v52  ;;  %vm12294_vm12 = vmmov %vm12292_vm2 }
 0xb50   : > { %v10213_v26 = vpop.permute.xlu1 %3969  ;;  %8743 = vmatprep.subr.mxu1 %v8906_v2 }
 0xb52   : > { %v3975_v61 = vpop.permute.xlu0 %3974 }
 0xb53   : > { %v3987_v49 = vsel %vm12292_vm2, %v10213_v26, %v3975_v61 }
 0xb54   : > { %v4075_v30 = vpop.permute.xlu1 %4074 }
 0xb56   : > { %v4063_v61 = vpop.permute.xlu0 %4062 }
 0xb58   : > { %v3871_v43 = vpop.permute.xlu1 %3870 }
 0xb59   : > { %v3888_v29 = vsel %vm12290_vm7, %v3871_v43, %v10206_v10  ;;  %v3986_v43 = vsel %vm12294_vm12, %v3855_v4, %v3967_v60  ;;  %vm12295_vm7 = vmmov %vm12292_vm2  ;;  %v4156_v60 = vsub.f32 1.0, %v4154_v47 }
 0xb5a   : > { %8733 = vmatpush3.msra.mxu0 %v3888_v29  ;;  %vm12298_vm12 = vmmov %vm12292_vm2 }
 0xb5b   : > { %8734 = vmatprep.subr.mxu0 %v8906_v2 }
 0xb5c   : > { %8735 = vmatpush3.msra.mxu0 %v3887_v22  ;;  %v3978_v19 = vpop.permute.xlu1 %3977  ;;  %v4157_v22 = vsub.f32 1.0, %v4155_v8 }
 0xb5d   : > { %v3988_v46 = vsel %vm12291_vm9, %v3978_v19, %v10208_v16  ;;  %8736 = vmatprep.subr.mxu0 %v8906_v2  ;;  %vm12297_vm9 = vmmov %vm12292_vm2 }
 0xb5e   : > { %8737 = vmatpush3.msra.mxu0 %v3886_v12  ;;  %8744 = vmatpush3.msra.mxu1 %v3988_v46  ;;  %v3985_v29 = vsel %vm12297_vm9, %v10167_v48, %v10159_v17  ;;  %v4077_v48 = vsel %vm12298_vm12, %v10193_v45, %v10206_v10  ;;  %v4159_v19 = vmax.f32 %v4157_v22, 0.0  ;;  %v4158_v46 = vmax.f32 %v4156_v60, 0.0 }
 0xb5f   : > { %8739 = vmatmul.mubr.msk.f32.vlgmr.msra.gmra.mxu0 %vm12293_vm5, %v10228_v13  ;;  %8745 = vmatprep.subr.mxu1 %v8906_v2  ;;  %v8273_v45 = vadd.f32 -1.0, %v10232_v52  ;;  %vm4413_vm9 = vcmp.lt.s32.totalorder %v9093_v37, 3  ;;  %vm4412_vm12 = vcmp.lt.s32.totalorder %v9091_v36, 3 }
 0xb60   : > { %8754 = vmatprep.subr.mxu0 %v8906_v2  ;;  %8746 = vmatpush3.msra.mxu1 %v3987_v49  ;;  %v4072_v6 = vpop.permute.xlu1 %4071  ;;  %vm4414_vm13 = vmand %vm12303_vm15, %vm4412_vm12  ;;  %vm12123_vm15 = vcmp.ge.s32.totalorder %v9093_v37, 2  ;;  %vm4743_vm12 = vcmp.ge.s32.totalorder %v9093_v37, 11 }
 0xb61   : > { %8755 = vmatpush3.msk.msra.mxu0 %vm12295_vm7, %v4075_v30  ;;  %v4079_v12 = vsel %vm12296_vm3, %v10179_v63, %v4072_v6  ;;  %8747 = vmatprep.subr.mxu1 %v8906_v2  ;;  %vm12299_vm7 = vmmov %vm12292_vm2  ;;  %v4166_v6 = vand.u32 2147483647, %v8273_v45  ;;  %v4420_v45 = vsel %vm4414_vm13, %v9232_v56, 0.0 }
 0xb62   : > { %8756 = vmatprep.subr.mxu0 %v8906_v2  ;;  %8748 = vmatpush3.msra.mxu1 %v3986_v43  ;;  %v4076_v49 = vsel %vm12299_vm7, %v10154_v9, %v10185_v38  ;;  %vm12300_vm3 = vmmov %vm12293_vm5  ;;  %v8274_v38 = vadd.f32 -1.0, %v4153_v11  ;;  %vm4579_vm7 = vcmp.ge.s32.totalorder %v9093_v37, 4 }
 0xb63   : > { %8757 = vmatpush3.msra.mxu0 %v4079_v12  ;;  %8749 = vmatprep.subr.mxu1 %v8906_v2  ;;  %v4168_v43 = vsub.f32 1.0, %v4166_v6  ;;  %v8286_v12 = vadd.f32 -2.0, %v4153_v11  ;;  %v8285_v11 = vadd.f32 -2.0, %v10232_v52 }
 0xb64   : > { %8750 = vmatpush3.msra.mxu1 %v3985_v29  ;;  %v4068_v4 = vpop.permute.xlu1 %4067  ;;  %8758 = vmatprep.subr.mxu0 %v8906_v2  ;;  %v4167_v8 = vand.u32 2147483647, %v8274_v38 }
 0xb65   : > { %v4078_v30 = vsel %vm12292_vm2, %v4063_v61, %v4068_v4  ;;  %8752 = vmatmul.mubr.msk.f32.vlgmr.msra.gmra.mxu1 %vm12293_vm5, %v10228_v13  ;;  %8764 = vmatprep.mubr.msk.f32.mxu0 %vm12195_vm6, %v8906_v2  ;;  %v4170_v22 = vmax.f32 %v4168_v43, 0.0  ;;  %v4327_v61 = vand.u32 2147483647, %v8286_v12  ;;  %vm12301_vm2 = vcmp.ge.s32.totalorder %v9093_v37, 0 }
 0xb66   : > { %8759 = vmatpush3.msra.mxu0 %v4078_v30  ;;  %4243 = vmatprep.mubr.f32.mxu1 %v8906_v2  ;;  %v4169_v47 = vsub.f32 1.0, %v4167_v8  ;;  %vm4415_vm5 = vmand %vm12301_vm2, %vm4413_vm9  ;;  %v4326_v30 = vand.u32 2147483647, %v8285_v11  ;;  %vm4497_vm2 = vcmp.lt.s32.totalorder %v9093_v37, 5  ;;  %v4422_v43 = vmul.f32 0.33333334, %v4420_v45 }
 0xb67   : > { %8760 = vmatprep.subr.mxu0 %v8906_v2  ;;  %v4329_v4 = vsub.f32 1.0, %v4327_v61  ;;  %vm10309_vm9 = vmand %vm4579_vm7, %vm3501_vm1  ;;  %vm4578_vm1 = vcmp.ge.s32.totalorder %v9091_v36, 4  ;;  %vm4745_vm7 = vcmp.lt.s32.totalorder %v9093_v37, 14 }
 0xb68   : > { %8761 = vmatpush3.msra.mxu0 %v4077_v48  ;;  %v4171_v29 = vmax.f32 %v4169_v47, 0.0  ;;  %v4421_v48 = vsel %vm4415_vm5, %v9243_v58, 0.0  ;;  %v4587_v6 = vsel %vm10309_vm9, %v9243_v58, 0.0  ;;  %vm10332_vm13 = vmand %vm12123_vm15, %vm4497_vm2  ;;  %vm12124_vm2 = vcmp.ge.s32.totalorder %v9091_v36, 2 }
 0xb69   : > { %8762 = vmatprep.subr.mxu0 %v8906_v2  ;;  %v4331_v60 = vmax.f32 %v4329_v4, 0.0  ;;  %v4505_v4 = vsel %vm10332_vm13, %v9243_v58, 0.0  ;;  %vm12314_vm13 = vcmask 130048  }
 0xb6a   : > { %8763 = vmatpush3.msra.mxu0 %v4076_v49  ;;  %8275 = vmatprep.subr.msk.mxu1 %vm9857_vm4, %v4171_v29  ;;  %v4328_v49 = vsub.f32 1.0, %v4326_v30 }
 0xb6b   : > { %8765 = vmatmul.mubr.msk.f32.vlgmr.msra.gmra.mxu0 %vm12300_vm3, %v10228_v13  ;;  %8280 = vmatprep.subr.msk.mxu0 %vm9857_vm4, %v4159_v19  ;;  %vm12302_vm3 = vcmask 130048  }
 0xb6c   : > { %8281 = vmatpush1.msk.msra.mxu0 %vm9875_vm10, %v4158_v46  ;;  %4317 = vmatprep.mubr.f32.mxu0 %v8906_v2  ;;  %v4330_v8 = vmax.f32 %v4328_v49, 0.0  ;;  %vm12306_vm5 = vmmov %vm12302_vm3 }
 0xb6d   : > { %8282 = vmatprep.subr.msk.mxu0 %vm9886_vm14, %v4159_v19  ;;  %8276 = vmatpush1.msk.msra.mxu1 %vm9875_vm10, %v4170_v22 }
 0xb6e   : > { %8283 = vmatpush1.msk.msra.mxu0 %vm9900_vm11, %v4158_v46  ;;  %8277 = vmatprep.subr.msk.mxu1 %vm9886_vm14, %v4171_v29  ;;  %v4423_v46 = vmul.f32 0.33333334, %v4421_v48  ;;  %v4507_v48 = vmul.f32 0.33333334, %v4505_v4 }
 0xb6f   : > { %8292 = vmatprep.subr.msk.mxu0 %vm9857_vm4, %v12242_v42  ;;  %8278 = vmatpush1.msk.msra.mxu1 %vm9900_vm11, %v4170_v22  ;;  %v4589_v22 = vmul.f32 0.33333334, %v4587_v6 }
 0xb70   : > { %8287 = vmatprep.subr.msk.mxu1 %vm9857_vm4, %v4331_v60 }
 0xc1f   : > { %v3961_v19 = vpop.f32.mrf.mxu0 }
 0xc20   : > { %8284 = vmatmul.mubr.msk.f32.vlgmr.msra.gmra.mxu0 %vm12302_vm3, %v3961_v19  ;;  %vm12309_vm3 = vcmp.lt.s32.totalorder %v9091_v36, 7 }
 0xc21   : > { %8293 = vmatpush1.xpose.msk.msra.mxu0 %vm9875_vm10, %v12242_v42  ;;  %4488 = vmatprep.mubr.f32.mxu0 %v4423_v46  ;;  %v8740_v52 = vpop.f32.mrf.mxu0  ;;  %vm10345_vm9 = vmand %vm4578_vm1, %vm12309_vm3  ;;  %vm4661_vm3 = vcmp.lt.s32.totalorder %v9093_v37, 12 }
 0xc22   : > { %8294 = vmatprep.subr.msk.mxu0 %vm9886_vm14, %v12242_v42  ;;  %vm10362_vm1 = vmand %vm4743_vm12, %vm4745_vm7  ;;  %v4586_v30 = vsel %vm10345_vm9, %v9232_v56, 0.0  ;;  %vm12317_vm7 = vcmp.ge.s32.totalorder %v9093_v37, 9 }
 0xc23   : > { %v4753_v49 = vsel %vm10362_vm1, %v9243_v58, 0.0  ;;  %vm10391_vm9 = vmand %vm12317_vm7, %vm4661_vm3  ;;  %v4588_v38 = vmul.f32 0.33333334, %v4586_v30  ;;  %vm4660_vm3 = vcmp.lt.s32.totalorder %v9091_v36, 12  ;;  %vm12322_vm7 = vcmp.ge.s32.totalorder %v9091_v36, 9 }
 0xc24   : > { %v4669_v6 = vsel %vm10391_vm9, %v9243_v58, 0.0  ;;  %vm4662_vm9 = vmand %vm12322_vm7, %vm4660_vm3  ;;  %vm12324_vm3 = vcmp.lt.s32.totalorder %v9091_v36, 16  ;;  %vm12325_vm7 = vcmask 1043456  }
 0xc25   : > { %8295 = vmatpush1.xpose.msk.msra.mxu0 %vm9900_vm11, %v12242_v42  ;;  %v4057_v47 = vpop.f32.mrf.mxu1  ;;  %v4671_v12 = vmul.f32 0.33333334, %v4669_v6  ;;  %v4668_v61 = vsel %vm4662_vm9, %v9232_v56, 0.0  ;;  %vm12326_vm9 = vcmask 7168  }
 0xc26   : > { %8279 = vmatmul.mubr.msk.f32.vlgmr.msra.gmra.mxu1 %vm12306_vm5, %v4057_v47  ;;  %8300 = vmatprep.subr.msk.mxu0 %vm9857_vm4, %v12242_v42  ;;  %vm4496_vm5 = vcmp.lt.s32.totalorder %v9091_v36, 5 }
 0xc27   : > { %v8753_v29 = vpop.f32.mrf.mxu1  ;;  %8288 = vmatpush1.msk.msra.mxu1 %vm9875_vm10, %v4330_v8  ;;  %4403 = vmatprep.mubr.f32.mxu1 %v8906_v2  ;;  %vm10376_vm12 = vmand %vm12124_vm2, %vm4496_vm5  ;;  %vm4742_vm5 = vcmp.ge.s32.totalorder %v9091_v36, 11 }
 0xc28   : > { %4489 = vmatmul.mubr.f32.vlgmr.msra.gmra.mxu0 %v4422_v43  ;;  %8289 = vmatprep.subr.msk.mxu1 %vm9886_vm14, %v4331_v60  ;;  %v4504_v45 = vsel %vm10376_vm12, %v9232_v56, 0.0  ;;  %vm4827_vm12 = vcmp.ge.s32.totalorder %v9093_v37, 13  ;;  %v4670_v60 = vmul.f32 0.33333334, %v4668_v61 }
 0xc29   : > { %8301 = vmatpush1.xpose.msk.msra.mxu0 %vm9875_vm10, %v12242_v42  ;;  %4654 = vmatprep.mubr.f32.mxu0 %v4589_v22  ;;  %v4506_v43 = vmul.f32 0.33333334, %v4504_v45 }
 0xc2a   : > { %8290 = vmatpush1.msk.msra.mxu1 %vm9900_vm11, %v4330_v8  ;;  %8302 = vmatprep.subr.msk.mxu0 %vm9886_vm14, %v12242_v42  ;;  %v4755_v8 = vmul.f32 0.33333334, %v4753_v49 }
 0xc2b   : > { %v4148_v11 = vpop.f32.mrf.mxu0  ;;  %8296 = vmatprep.subr.msk.mxu1 %vm9857_vm4, %v12242_v42 }
 0xc2c   : > { %8291 = vmatmul.mubr.msk.f32.vlgmr.msra.gmra.mxu1 %vm12314_vm13, %v4148_v11  ;;  %vm4744_vm13 = vcmp.lt.s32.totalorder %v9091_v36, 14 }
 0xc2d   : > { %8297 = vmatpush1.xpose.msk.msra.mxu1 %vm9875_vm10, %v12242_v42  ;;  %8303 = vmatpush1.xpose.msk.msra.mxu0 %vm9900_vm11, %v12242_v42  ;;  %v8766_v46 = vpop.f32.mrf.mxu0  ;;  %vm10415_vm1 = vmand %vm4742_vm5, %vm4744_vm13  ;;  %vm12323_vm5 = vcmp.lt.s32.totalorder %v9093_v37, 16 }
 0xc2e   : > { %4572 = vmatprep.mubr.f32.mxu1 %v4507_v48  ;;  %8298 = vmatprep.subr.msk.mxu1 %vm9886_vm14, %v12242_v42  ;;  %v4752_v29 = vsel %vm10415_vm1, %v9232_v56, 0.0  ;;  %vm4829_vm13 = vmand %vm4827_vm12, %vm12323_vm5  ;;  %vm4826_vm1 = vcmp.ge.s32.totalorder %v9091_v36, 13  ;;  %vm12327_vm5 = vcmask 138240  }
 0xc2f   : > { %8308 = vmatprep.subr.msk.mxu0 %vm9857_vm4, %v12242_v42  ;;  %v4754_v22 = vmul.f32 0.33333334, %v4752_v29  ;;  %v4835_v4 = vsel %vm4829_vm13, %v9243_v58, 0.0  ;;  %vm4828_vm12 = vmand %vm4826_vm1, %vm12324_vm3 }
 0xc30   : > { %4655 = vmatmul.mubr.f32.vlgmr.msra.gmra.mxu0 %v4588_v38  ;;  %v4837_v11 = vmul.f32 0.33333334, %v4835_v4  ;;  %v4834_v30 = vsel %vm4828_vm12, %v9232_v56, 0.0  ;;  %vm12328_vm13 = vmmov %vm12326_vm9 }
 0xc31   : > { %8299 = vmatpush1.xpose.msk.msra.mxu1 %vm9900_vm11, %v12242_v42  ;;  %8309 = vmatpush1.xpose.msk.msra.mxu0 %vm9875_vm10, %v12242_v42  ;;  %v4836_v48 = vmul.f32 0.33333334, %v4834_v30  ;;  %vm12329_vm1 = vmmov %vm12327_vm5 }
 0xc32   : > { %4820 = vmatprep.mubr.f32.mxu0 %v4755_v8  ;;  %8304 = vmatprep.subr.msk.mxu1 %vm9857_vm4, %v12242_v42  ;;  %vm12330_vm3 = vmmov %vm12325_vm7 }
 0xc33   : > { %8310 = vmatprep.subr.msk.mxu0 %vm9886_vm14, %v12242_v42  ;;  %vm12331_vm12 = vmmov %vm12326_vm9 }
 0xc34   : > { %4573 = vmatmul.mubr.f32.vlgmr.msra.gmra.mxu1 %v4506_v43 }
 0xc35   : > { %8305 = vmatpush1.xpose.msk.msra.mxu1 %vm9875_vm10, %v12242_v42  ;;  %4736 = vmatprep.mubr.f32.mxu1 %v4671_v12 }
 0xc36   : > { %8311 = vmatpush1.xpose.msk.msra.mxu0 %vm9900_vm11, %v12242_v42  ;;  %8306 = vmatprep.subr.msk.mxu1 %vm9886_vm14, %v12242_v42 }
 0xc37   : > { %8767 = vmatprep.subr.mxu0 %v8906_v2 }
 0xc39   : > { %4821 = vmatmul.mubr.f32.vlgmr.msra.gmra.mxu0 %v4754_v22  ;;  %8307 = vmatpush1.xpose.msk.msra.mxu1 %vm9900_vm11, %v12242_v42 }
 0xc3a   : > { %8312 = vmatprep.subr.msk.mxu1 %vm9857_vm4, %v12242_v42  ;;  %8777 = vmatprep.mubr.msk.f32.mxu0 %vm12195_vm6, %v8906_v2 }
 0xc3c   : > { %4737 = vmatmul.mubr.f32.vlgmr.msra.gmra.mxu1 %v4670_v60 }
 0xc3d   : > { %8313 = vmatpush1.xpose.msk.msra.mxu1 %vm9875_vm10, %v12242_v42  ;;  %4902 = vmatprep.mubr.f32.mxu1 %v4837_v11 }
 0xc3e   : > { %8314 = vmatprep.subr.msk.mxu1 %vm9886_vm14, %v12242_v42 }
 0xc41   : > { %8315 = vmatpush1.xpose.msk.msra.mxu1 %vm9900_vm11, %v12242_v42 }
 0xc42   : > { %8780 = vmatprep.subr.mxu1 %v8906_v2 }
 0xc44   : > { %4903 = vmatmul.mubr.f32.vlgmr.msra.gmra.mxu1 %v4836_v48 }
 0xc45   : > { %8781 = vmatpush3.msk.msra.mxu1 %vm12325_vm7, %v10179_v63  ;;  %8790 = vmatprep.mubr.msk.f32.mxu1 %vm12195_vm6, %v8906_v2  ;;  %vm12332_vm7 = vmmov %vm12329_vm1 }
 0xc46   : > { %8782 = vmatprep.subr.mxu1 %v8906_v2 }
 0xce0   : > { %v4319_v19 = vpop.f32.mrf.mxu0 }
 0xce2   : > { %v4321_v46 = vpop.f32.mrf.mxu0 }
 0xce6   : > { %v4245_v49 = vpop.f32.mrf.mxu1 }
 0xce7   : > { %v4320_v52 = vadd.f32 %v4319_v19, %v4245_v49 }
 0xce8   : > { %v4490_v38 = vpop.f32.mrf.mxu0  ;;  %v4247_v45 = vpop.f32.mrf.mxu1 }
 0xce9   : > { %v4322_v8 = vadd.f32 %v4321_v46, %v4247_v45 }
 0xcea   : > { %v4492_v6 = vpop.f32.mrf.mxu0 }
 0xcec   : > { %v4405_v47 = vpop.f32.mrf.mxu1 }
 0xced   : > { %v4410_v43 = vadd.f32 %v4405_v47, %v4320_v52 }
 0xcee   : > { %v4407_v12 = vpop.f32.mrf.mxu1 }
 0xcef   : > { %v10474_v29 = vadd.f32 %v4410_v43, %v9830_v25  ;;  %v4411_v22 = vadd.f32 %v4407_v12, %v4322_v8 }
 0xcf0   : > { %v4656_v61 = vpop.f32.mrf.mxu0 }
 0xcf1   : > { %v10477_v4 = vadd.f32 %v4411_v22, %v9832_v28  ;;  %4921 = vrot.lane.b32.xlu1 %v4656_v61, %s12129_s20 }
 0xcf2   : > { %v4658_v60 = vpop.f32.mrf.mxu0 }
 0xcf4   : > { %v4574_v11 = vpop.f32.mrf.mxu1 }
 0xcf5   : > { %4915 = vrot.lane.b32.xlu0 %v4574_v11, %s12129_s20 }
 0xcf6   : > { %v4576_v30 = vpop.f32.mrf.mxu1 }
 0xcf9   : > { %v4822_v48 = vpop.f32.mrf.mxu0  ;;  %4909 = vrot.lane.b32.xlu0 %v4490_v38, %s12129_s20 }
 0xcfb   : > { %v4824_v19 = vpop.f32.mrf.mxu0 }
 0xcfc   : > { %v4738_v46 = vpop.f32.mrf.mxu1 }
 0xcfd   : > { %4933 = vrot.lane.b32.xlu0 %v4822_v48, %s12129_s20  ;;  %4927 = vrot.lane.b32.xlu1 %v4738_v46, %s12129_s20 }
 0xcfe   : > { %v4740_v25 = vpop.f32.mrf.mxu1 }
 0xd04   : > { %v4904_v49 = vpop.f32.mrf.mxu1 }
 0xd05   : > { %4939 = vrot.lane.b32.xlu1 %v4904_v49, %s12129_s20 }
 0xd06   : > { %v4906_v28 = vpop.f32.mrf.mxu1 }
 0xd63   : > { %v4922_v52 = vpop.permute.xlu1 %4921 }
 0xd64   : > { %v4924_v45 = vsel %vm12326_vm9, 0.0, %v4922_v52  ;;  %vm12333_vm9 = vmmov %vm12330_vm3 }
 0xd65   : > { %v10487_v8 = vsel %vm12327_vm5, %v4924_v45, 0.0  ;;  %vm12334_vm5 = vmmov %vm12331_vm12 }
 0xd66   : > { %4966 = vrot.lane.b32.xlu0 %v10487_v8, %s12125_s30  ;;  %v4956_v47 = vrot.slane %v10487_v8, 4 }
 0xd67   : > { %v4916_v38 = vpop.permute.xlu0 %4915 }
 0xd68   : > { %v4918_v6 = vsel %vm12328_vm13, 0.0, %v4916_v38  ;;  %vm12335_vm13 = vmmov %vm12329_vm1 }
 0xd69   : > { %v4919_v43 = vsel %vm12329_vm1, %v4918_v6, 0.0  ;;  %vm12336_vm1 = vmmov %vm12334_vm5 }
 0xd6a   : > { %4957 = vrot.lane.b32.xlu0 %v4956_v47, %s12127_s19  ;;  %v10496_v12 = vsel %vm12330_vm3, %v4919_v43, %v4956_v47  ;;  %v4945_v61 = vrot.slane %v4919_v43, 4  ;;  %vm12337_vm3 = vmmov %vm12332_vm7 }
 0xd6b   : > { %v4910_v22 = vpop.permute.xlu0 %4909 }
 0xd6c   : > { %v4912_v60 = vsel %vm12331_vm12, 0.0, %v4910_v22  ;;  %vm12338_vm12 = vmmov %vm12336_vm1 }
 0xd6d   : > { %v4913_v11 = vsel %vm12332_vm7, %v4912_v60, 0.0  ;;  %vm12339_vm7 = vmmov %vm12337_vm3 }
 0xd6e   : > { %5051 = vrot.lane.b32.xlu0 %v4919_v43, %s12125_s30  ;;  %4960 = vrot.lane.b32.xlu1 %v4913_v11, %s12125_s30  ;;  %v10503_v30 = vsel %vm12333_vm9, %v4913_v11, %v4945_v61  ;;  %v4948_v48 = vrot.slane %v4913_v11, 4 }
 0xd6f   : > { %v4928_v19 = vpop.permute.xlu1 %4927  ;;  %v4934_v25 = vpop.permute.xlu0 %4933 }
 0xd70   : > { %v4930_v46 = vsel %vm12334_vm5, 0.0, %v4928_v19  ;;  %v4936_v28 = vsel %vm12336_vm1, 0.0, %v4934_v25  ;;  %vm12340_vm5 = vmmov %vm12333_vm9 }
 0xd71   : > { %v10512_v49 = vsel %vm12335_vm13, %v4930_v46, 0.0  ;;  %v10519_v52 = vsel %vm12337_vm3, %v4936_v28, 0.0  ;;  %vm12341_vm13 = vmmov %vm12340_vm5 }
 0xd72   : > { %4963 = vrot.lane.b32.xlu0 %v4945_v61, %s12125_s30  ;;  %4949 = vrot.lane.b32.xlu1 %v4948_v48, %s12127_s19  ;;  %v10525_v38 = vrot.slane %v10519_v52, 4  ;;  %vm12342_vm1 = vmmov %vm12340_vm5 }
 0xd73   : > { %vm12343_vm3 = vmmov %vm12342_vm1 }
 0xd76   : > { %5045 = vrot.lane.b32.xlu0 %v4945_v61, %s12127_s19  ;;  %5048 = vrot.lane.b32.xlu1 %v10487_v8, %s12127_s19 }
 0xd77   : > { %v4940_v45 = vpop.permute.xlu1 %4939 }
 0xd78   : > { %v4942_v6 = vsel %vm12338_vm12, 0.0, %v4940_v45  ;;  %vm12344_vm12 = vmmov %vm12342_vm1 }
 0xd79   : > { %v10536_v22 = vsel %vm12339_vm7, %v4942_v6, 0.0  ;;  %vm12345_vm7 = vmmov %vm12342_vm1 }
 0xd7a   : > { %5137 = vrot.lane.b32.xlu0 %v10512_v49, %s12125_s30  ;;  %5054 = vrot.lane.b32.xlu1 %v4956_v47, %s12125_s30  ;;  %v10533_v47 = vrot.slane %v10512_v49, 4 }
 0xd7e   : > { %5227 = vrot.lane.b32.xlu0 %v10519_v52, %s12125_s30  ;;  %4952 = vrot.lane.b32.xlu1 %v4919_v43, %s12127_s19  ;;  %v5310_v43 = vrot.slane %v10536_v22, 4 }
 0xd82   : > { %5221 = vrot.lane.b32.xlu0 %v10525_v38, %s12127_s19  ;;  %5216 = vrot.lane.b32.xlu1 %v10512_v49, %s12127_s19 }
 0xd86   : > { %5133 = vrot.lane.b32.xlu1 %v10533_v47, %s12127_s19  ;;  %5318 = vrot.lane.b32.xlu0 %v10536_v22, %s12125_s30 }
 0xd8a   : > { %5315 = vrot.lane.b32.xlu1 %v10525_v38, %s12125_s30  ;;  %5306 = vrot.lane.b32.xlu0 %v10519_v52, %s12127_s19 }
 0xd8e   : > { %5224 = vrot.lane.b32.xlu1 %v10533_v47, %s12125_s30  ;;  %s8926_s30 = smov 94  }
 0xd92   : > { %5311 = vrot.lane.b32.xlu1 %v5310_v43, %s12127_s19 }
 0xdd8   : > { %v4967_v61 = vpop.permute.xlu0 %4966 }
 0xdd9   : > { %8768 = vmatpush3.msk.msra.mxu0 %vm12333_vm9, %v4967_v61  ;;  %vm12346_vm9 = vcmask 293888  }
 0xdda   : > { %8769 = vmatprep.subr.mxu0 %v8906_v2 }
 0xddc   : > { %v4958_v60 = vpop.permute.xlu0 %4957 }
 0xde0   : > { %v5052_v11 = vpop.permute.xlu0 %5051  ;;  %v4961_v48 = vpop.permute.xlu1 %4960 }
 0xde4   : > { %v4964_v19 = vpop.permute.xlu0 %4963  ;;  %v4950_v46 = vpop.permute.xlu1 %4949 }
 0xde5   : > { %v4971_v25 = vsel %vm12340_vm5, %v4961_v48, %v4964_v19  ;;  %vm12347_vm5 = vmmov %vm12342_vm1 }
 0xde6   : > { %8770 = vmatpush3.msra.mxu0 %v4971_v25 }
 0xde7   : > { %8771 = vmatprep.subr.mxu0 %v8906_v2 }
 0xde8   : > { %v5046_v28 = vpop.permute.xlu0 %5045  ;;  %v5049_v45 = vpop.permute.xlu1 %5048 }
 0xde9   : > { %v5059_v14 = vsel %vm12342_vm1, %v5049_v45, %v10206_v10  ;;  %v5058_v48 = vsel %vm12343_vm3, %v10154_v9, %v5046_v28  ;;  %v12350_v28 = vcvt.s32.f32 %v9091_v36  ;;  %vm12351_vm3 = vmmov %vm12342_vm1 }
 0xdeb   : > { %v10584_v45 = vmul.f32 0.26666668, %v12350_v28 }
 0xdec   : > { %v5138_v6 = vpop.permute.xlu0 %5137  ;;  %v5055_v50 = vpop.permute.xlu1 %5054 }
 0xded   : > { %v5060_v43 = vsel %vm12341_vm13, %v5052_v11, %v5055_v50  ;;  %v4969_v50 = vsel %vm12345_vm7, %v10487_v8, %v4950_v46  ;;  %vm12348_vm13 = vmmov %vm12346_vm9 }
 0xdee   : > { %8783 = vmatpush3.msra.mxu1 %v5060_v43  ;;  %vm12353_vm7 = vmmov %vm12342_vm1 }
 0xdef   : > { %8784 = vmatprep.subr.mxu1 %v8906_v2 }
 0xdf0   : > { %8785 = vmatpush3.msra.mxu1 %v5059_v14  ;;  %v4953_v1 = vpop.permute.xlu1 %4952  ;;  %v5228_v25 = vpop.permute.xlu0 %5227 }
 0xdf1   : > { %v4970_v19 = vsel %vm12344_vm12, %v4953_v1, %v4958_v60  ;;  %8786 = vmatprep.subr.mxu1 %v8906_v2  ;;  %v12349_v1 = vcvt.s32.f32 %v9093_v37  ;;  %vm12352_vm12 = vmmov %vm12342_vm1 }
 0xdf2   : > { %8772 = vmatpush3.msra.mxu0 %v4970_v19  ;;  %8787 = vmatpush3.msra.mxu1 %v5058_v48 }
 0xdf3   : > { %8773 = vmatprep.subr.mxu0 %v8906_v2  ;;  %8788 = vmatprep.subr.mxu1 %v8906_v2  ;;  %v10577_v11 = vmul.f32 0.26666668, %v12349_v1 }
 0xdf4   : > { %8774 = vmatpush3.msra.mxu0 %v4969_v50  ;;  %8789 = vmatpush3.msra.mxu1 %v10496_v12  ;;  %v5217_v14 = vpop.permute.xlu1 %5216  ;;  %v5222_v12 = vpop.permute.xlu0 %5221 }
 0xdf5   : > { %8775 = vmatprep.subr.mxu0 %v8906_v2  ;;  %8791 = vmatmul.mubr.msk.f32.vlgmr.msra.gmra.mxu1 %vm12346_vm9, %v10228_v13  ;;  %v8327_v19 = vadd.f32 -1.0, %v10577_v11  ;;  %vm12354_vm9 = vmmov %vm12342_vm1 }
 0xdf6   : > { %8806 = vmatprep.subr.mxu1 %v8906_v2  ;;  %8776 = vmatpush3.msra.mxu0 %v10503_v30  ;;  %v5142_v30 = vsel %vm12351_vm3, %v4967_v61, %v10208_v16  ;;  %v5140_v16 = vsel %vm12353_vm7, %v10512_v49, %v4958_v60  ;;  %v5139_v61 = vsel %vm12354_vm9, %v10487_v8, %v10159_v17  ;;  %vm12356_vm3 = vmmov %vm12342_vm1 }
 0xdf7   : > { %8807 = vmatpush3.msk.msra.mxu1 %vm12347_vm5, %v5228_v25  ;;  %8778 = vmatmul.mubr.msk.f32.vlgmr.msra.gmra.mxu0 %vm12348_vm13, %v10228_v13  ;;  %v8326_v25 = vadd.f32 -1.0, %v10584_v45  ;;  %v5411_v1 = vand.u32 2147483647, %v8327_v19  ;;  %vm12355_vm5 = vmmov %vm12342_vm1  ;;  %v5231_v60 = vsel %vm12356_vm3, %v5217_v14, %v5222_v12 }
 0xdf8   : > { %8793 = vmatprep.subr.mxu0 %v8906_v2  ;;  %v5134_v46 = vpop.permute.xlu1 %5133  ;;  %8803 = vmatprep.mubr.msk.f32.mxu0 %vm12195_vm6, %v8906_v2  ;;  %v5319_v50 = vpop.permute.xlu0 %5318  ;;  %vm12358_vm7 = vmmov %vm12342_vm1 }
 0xdf9   : > { %8794 = vmatpush3.msk.msra.mxu0 %vm12342_vm1, %v5138_v6  ;;  %8808 = vmatprep.subr.mxu1 %v8906_v2  ;;  %v5141_v43 = vsel %vm12352_vm12, %v10213_v26, %v5134_v46  ;;  %vm12357_vm12 = vmmov %vm12342_vm1 }
 0xdfa   : > { %8795 = vmatprep.subr.mxu0 %v8906_v2  ;;  %8816 = vmatprep.mubr.msk.f32.mxu1 %vm12195_vm6, %v8906_v2  ;;  %vm12359_vm9 = vmmov %vm12342_vm1 }
 0xdfb   : > { %8796 = vmatpush3.msra.mxu0 %v5142_v30  ;;  %v5410_v30 = vand.u32 2147483647, %v8326_v25  ;;  %v5230_v14 = vsel %vm12359_vm9, %v10519_v52, %v10206_v10  ;;  %v5320_v10 = vsel %vm12356_vm3, %v10512_v49, %v10525_v38  ;;  %v8346_v52 = vadd.f32 -3.0, %v10577_v11 }
 0xdfc   : > { %8797 = vmatprep.subr.mxu0 %v8906_v2  ;;  %v5316_v48 = vpop.permute.xlu1 %5315  ;;  %v8345_v38 = vadd.f32 -3.0, %v10584_v45 }
 0xdfd   : > { %8798 = vmatpush3.msra.mxu0 %v5141_v43  ;;  %v5307_v43 = vpop.permute.xlu0 %5306  ;;  %v5323_v17 = vsel %vm12357_vm12, %v5138_v6, %v5316_v48  ;;  %v5412_v25 = vsub.f32 1.0, %v5410_v30  ;;  %v8338_v30 = vadd.f32 -2.0, %v10584_v45 }
 0xdfe   : > { %8799 = vmatprep.subr.mxu0 %v8906_v2 }
 0xdff   : > { %8800 = vmatpush3.msra.mxu0 %v5140_v16 }
 0xe00   : > { %8801 = vmatprep.subr.mxu0 %v8906_v2  ;;  %v5225_v26 = vpop.permute.xlu1 %5224 }
 0xe01   : > { %8802 = vmatpush3.msra.mxu0 %v5139_v61  ;;  %v5232_v28 = vsel %vm12355_vm5, %v10179_v63, %v5225_v26  ;;  %v5413_v63 = vsub.f32 1.0, %v5411_v1  ;;  %vm12360_vm5 = vmmov %vm12342_vm1  ;;  %v8339_v1 = vadd.f32 -2.0, %v10577_v11 }
 0xe02   : > { %8804 = vmatmul.mubr.msk.f32.vlgmr.msra.gmra.mxu0 %vm12348_vm13, %v10228_v13  ;;  %8819 = vmatprep.subr.mxu0 %v8906_v2  ;;  %v5229_v6 = vsel %vm12360_vm5, %v10154_v9, %v10533_v47  ;;  %vm12361_vm13 = vmmov %vm12342_vm1  ;;  %v5399_v9 = vand.u32 2147483647, %v10577_v11  ;;  %v5659_v47 = vand.u32 2147483647, %v8346_v52 }
 0xe03   : > { %8809 = vmatpush3.msra.mxu1 %v5232_v28  ;;  %8820 = vmatpush3.msk.msra.mxu0 %vm12342_vm1, %v5319_v50  ;;  %v5321_v12 = vsel %vm12361_vm13, %v10536_v22, %v5134_v46  ;;  %v5415_v48 = vmax.f32 %v5413_v63, 0.0  ;;  %v5414_v50 = vmax.f32 %v5412_v25, 0.0  ;;  %vm12362_vm1 = vcmask 293888  }
 0xe04   : > { %8810 = vmatprep.subr.mxu1 %v8906_v2  ;;  %8821 = vmatprep.subr.mxu0 %v8906_v2  ;;  %v5312_v8 = vpop.permute.xlu1 %5311  ;;  %vm12363_vm12 = vmmov %vm12362_vm1  ;;  %v5401_v49 = vsub.f32 1.0, %v5399_v9  ;;  %v5658_v22 = vand.u32 2147483647, %v8345_v38  ;;  %v5661_v46 = vsub.f32 1.0, %v5659_v47  ;;  %v5398_v28 = vand.u32 2147483647, %v10584_v45 }
 0xe05   : > { %8811 = vmatpush3.msra.mxu1 %v5231_v60  ;;  %8822 = vmatpush3.msra.mxu0 %v5323_v17  ;;  %v5322_v19 = vsel %vm12358_vm7, %v5307_v43, %v5312_v8  ;;  %v5571_v60 = vand.u32 2147483647, %v8339_v1  ;;  %v8353_v43 = vadd.f32 -4.0, %v10577_v11  ;;  %v5570_v8 = vand.u32 2147483647, %v8338_v30 }
 0xe06   : > { %8812 = vmatprep.subr.mxu1 %v8906_v2  ;;  %8823 = vmatprep.subr.mxu0 %v8906_v2  ;;  %v5660_v16 = vsub.f32 1.0, %v5658_v22  ;;  %v5663_v61 = vmax.f32 %v5661_v46, 0.0  ;;  %v5400_v17 = vsub.f32 1.0, %v5398_v28  ;;  %vm12371_vm13 = vnez %v12187_v55 }
 0xe07   : > { %8813 = vmatpush3.msra.mxu1 %v5230_v14  ;;  %8824 = vmatpush3.msra.mxu0 %v5322_v19  ;;  %v5573_v63 = vsub.f32 1.0, %v5571_v60  ;;  %v5747_v19 = vand.u32 2147483647, %v8353_v43  ;;  %v5572_v14 = vsub.f32 1.0, %v5570_v8 }
 0xe08   : > { %8814 = vmatprep.subr.mxu1 %v8906_v2  ;;  %8825 = vmatprep.subr.mxu0 %v8906_v2  ;;  %v5662_v26 = vmax.f32 %v5660_v16, 0.0  ;;  %v5402_v25 = vmax.f32 %v5400_v17, 0.0 }
 0xe09   : > { %8815 = vmatpush3.msra.mxu1 %v5229_v6  ;;  %8826 = vmatpush3.msra.mxu0 %v5321_v12  ;;  %v8352_v6 = vadd.f32 -4.0, %v10584_v45  ;;  %v5574_v9 = vmax.f32 %v5572_v14, 0.0 }
 0xe0a   : > { %8817 = vmatmul.mubr.msk.f32.vlgmr.msra.gmra.mxu1 %vm12362_vm1, %v10228_v13  ;;  %8827 = vmatprep.subr.mxu0 %v8906_v2 }
 0xe0b   : > { %8828 = vmatpush3.msra.mxu0 %v5320_v10  ;;  %8829 = vmatprep.mubr.msk.f32.mxu0 %vm12195_vm6, %v8906_v2  ;;  %vm12364_vm6 = vcmask 130048  }
 0xe0c   : > { %8830 = vmatmul.mubr.msk.f32.vlgmr.msra.gmra.mxu0 %vm12363_vm12, %v10228_v13  ;;  %8328 = vmatprep.subr.msk.mxu1 %vm9857_vm4, %v5415_v48  ;;  %v5403_v13 = vmax.f32 %v5401_v49, 0.0  ;;  %v5746_v49 = vand.u32 2147483647, %v8352_v6  ;;  %vm12365_vm7 = vmmov %vm12364_vm6 }
 0xe0d   : > { %8329 = vmatpush1.msk.msra.mxu1 %vm9875_vm10, %v5414_v50  ;;  %5487 = vmatprep.mubr.f32.mxu1 %v8906_v2  ;;  %vm12366_vm9 = vmmov %vm12364_vm6 }
 0xe0e   : > { %8330 = vmatprep.subr.msk.mxu1 %vm9886_vm14, %v5415_v48  ;;  %5735 = vmatprep.mubr.f32.mxu0 %v8906_v2  ;;  %v5575_v48 = vmax.f32 %v5573_v63, 0.0 }
 0xe0f   : > { %8331 = vmatpush1.msk.msra.mxu1 %vm9900_vm11, %v5414_v50  ;;  %8347 = vmatprep.subr.msk.mxu0 %vm9857_vm4, %v5663_v61  ;;  %v5749_v50 = vsub.f32 1.0, %v5747_v19 }
 0xe10   : > { %8333 = vmatprep.subr.msk.mxu1 %vm9857_vm4, %v5403_v13  ;;  %8348 = vmatpush1.msk.msra.mxu0 %vm9875_vm10, %v5662_v26 }
 0xe11   : > { %8349 = vmatprep.subr.msk.mxu0 %vm9886_vm14, %v5663_v61  ;;  %v5751_v45 = vmax.f32 %v5749_v50, 0.0 }
 0xe12   : > { %8350 = vmatpush1.msk.msra.mxu0 %vm9900_vm11, %v5662_v26 }
 0xe13   : > { %8359 = vmatprep.subr.msk.mxu0 %vm9857_vm4, %v12242_v42 }
 0xeb5   : > { %v5127_v12 = vpop.f32.mrf.mxu1 }
 0xeb6   : > { %8332 = vmatmul.mubr.msk.f32.vlgmr.msra.gmra.mxu1 %vm12364_vm6, %v5127_v12 }
 0xeb7   : > { %v5040_v10 = vpop.f32.mrf.mxu0  ;;  %8334 = vmatpush1.msk.msra.mxu1 %vm9875_vm10, %v5402_v25  ;;  %5561 = vmatprep.mubr.f32.mxu1 %v8906_v2  ;;  %v8792_v11 = vpop.f32.mrf.mxu1 }
 0xeb8   : > { %8335 = vmatprep.subr.msk.mxu1 %vm9886_vm14, %v5403_v13  ;;  %v5748_v13 = vsub.f32 1.0, %v5746_v49 }
 0xeb9   : > { %v8779_v52 = vpop.f32.mrf.mxu0  ;;  %8336 = vmatpush1.msk.msra.mxu1 %vm9900_vm11, %v5402_v25 }
 0xeba   : > { %8337 = vmatmul.mubr.msk.f32.vlgmr.msra.gmra.mxu1 %vm12365_vm7, %v5040_v10  ;;  %8340 = vmatprep.subr.msk.mxu1 %vm9857_vm4, %v5575_v48  ;;  %v5750_v38 = vmax.f32 %v5748_v13, 0.0 }
 0xebb   : > { %8341 = vmatpush1.msk.msra.mxu1 %vm9875_vm10, %v5574_v9  ;;  %5647 = vmatprep.mubr.f32.mxu1 %v8906_v2 }
 0xebc   : > { %8342 = vmatprep.subr.msk.mxu1 %vm9886_vm14, %v5575_v48 }
 0xebd   : > { %8343 = vmatpush1.msk.msra.mxu1 %vm9900_vm11, %v5574_v9 }
 0xebe   : > { %8354 = vmatprep.subr.msk.mxu1 %vm9857_vm4, %v5751_v45  ;;  %vm12367_vm4 = vmmov %vm12364_vm6  ;;  %vm12381_vm6 = vcmask 916480  }
 0xebf   : > { %vm12368_vm5 = vmmov %vm12367_vm4 }
 0xec0   : > { %vm12380_vm12 = vmmov %vm12367_vm4 }
 0xec1   : > { %vm12382_vm7 = vmmov %vm12381_vm6 }
 0xec2   : > { %v5211_v47 = vpop.f32.mrf.mxu0 }
 0xec3   : > { %8344 = vmatmul.mubr.msk.f32.vlgmr.msra.gmra.mxu1 %vm12366_vm9, %v5211_v47  ;;  %vm12383_vm9 = vcmp.le.s32.totalorder %v9087_v33, 14 }
 0xec4   : > { %v8805_v22 = vpop.f32.mrf.mxu0  ;;  %8355 = vmatpush1.msk.msra.mxu1 %vm9875_vm10, %v5750_v38  ;;  %5823 = vmatprep.mubr.f32.mxu1 %v8906_v2 }
 0xec5   : > { %8356 = vmatprep.subr.msk.mxu1 %vm9886_vm14, %v5751_v45 }
 0xec6   : > { %8357 = vmatpush1.msk.msra.mxu1 %vm9900_vm11, %v5750_v38 }
 0xec7   : > { %8364 = vmatprep.subr.msk.mxu1 %vm9395_vm8, %v12242_v42  ;;  %vm12369_vm8 = vmmov %vm12367_vm4 }
 0xeca   : > { %v5301_v21 = vpop.f32.mrf.mxu1 }
 0xecb   : > { %8351 = vmatmul.mubr.msk.f32.vlgmr.msra.gmra.mxu0 %vm12367_vm4, %v5301_v21 }
 0xecc   : > { %v8818_v46 = vpop.f32.mrf.mxu1  ;;  %v5392_v16 = vpop.f32.mrf.mxu0  ;;  %8360 = vmatpush1.msk.msra.mxu0 %vm9875_vm10, %v12242_v42  ;;  %5899 = vmatprep.mubr.f32.mxu0 %v8906_v2  ;;  %vm12370_vm10 = vnez %v12185_v3 }
 0xecd   : > { %8358 = vmatmul.mubr.msk.f32.vlgmr.msra.gmra.mxu1 %vm12368_vm5, %v5392_v16  ;;  %8361 = vmatprep.subr.msk.mxu0 %vm9886_vm14, %v12242_v42  ;;  %vm12372_vm14 = vmmov %vm12367_vm4  ;;  %vm12384_vm4 = vcmp.le.s32.totalorder %v9085_v32, 14 }
 0xece   : > { %v8831_v61 = vpop.f32.mrf.mxu0  ;;  %8362 = vmatpush1.msk.msra.mxu0 %vm9900_vm11, %v12242_v42  ;;  %8365 = vmatpush1.msk.msra.mxu1 %vm9401_vm0, %v12242_v42  ;;  %vm12373_vm11 = vmmov %vm12356_vm3 }
 0xecf   : > { %8363 = vmatmul.mubr.msk.f32.vlgmr.msra.gmra.mxu0 %vm12369_vm8, %v10008_v5  ;;  %8366 = vmatprep.subr.msk.mxu1 %vm12370_vm10, %v12242_v42  ;;  %vm12374_vm0 = vmmov %vm12356_vm3 }
 0xed0   : > { %8367 = vmatpush1.msk.msra.mxu1 %vm12371_vm13, %v12242_v42  ;;  %5973 = vmatprep.mubr.f32.mxu1 %v8906_v2  ;;  %vm12375_vm1 = vmmov %vm12374_vm0 }
 0xed1   : > { %8368 = vmatmul.mubr.msk.f32.vlgmr.msra.gmra.mxu1 %vm12372_vm14, %v9723_v23  ;;  %v2799_v23 = vadd.f32 %v10006_v51, %v9933_v7  ;;  %vm12376_vm3 = vmmov %vm12374_vm0  ;;  %vm12389_vm14 = vcmask 924672  }
 0xed2   : > { %6464 = vmatprep.mubr.f32.mxu1 %v8906_v2  ;;  %vm12385_vm5 = vmmov %vm12381_vm6 }
 0xed3   : > { %vm12386_vm8 = vmmov %vm12385_vm5 }
 0xed4   : > { %vm12387_vm10 = vmmov %vm12383_vm9 }
 0xed5   : > { %vm12388_vm13 = vmmov %vm12384_vm4 }
 0xf76   : > { %v5489_v53 = vpop.f32.mrf.mxu1 }
 0xf78   : > { %v5491_v34 = vpop.f32.mrf.mxu1 }
 0xf7a   : > { %v5563_v15 = vpop.f32.mrf.mxu1 }
 0xf7b   : > { %v5564_v5 = vadd.f32 %v5563_v15, %v5489_v53 }
 0xf7c   : > { %v5565_v62 = vpop.f32.mrf.mxu1 }
 0xf7d   : > { %v5566_v3 = vadd.f32 %v5565_v62, %v5491_v34 }
 0xf83   : > { %v5649_v27 = vpop.f32.mrf.mxu1 }
 0xf84   : > { %v5654_v1 = vadd.f32 %v5649_v27, %v5564_v5 }
 0xf85   : > { %v5651_v26 = vpop.f32.mrf.mxu1 }
 0xf86   : > { %v5655_v30 = vadd.f32 %v5651_v26, %v5566_v3 }
 0xf8b   : > { %v5737_v28 = vpop.f32.mrf.mxu0 }
 0xf8c   : > { %v5742_v55 = vadd.f32 %v5737_v28, %v5654_v1 }
 0xf8d   : > { %v5739_v42 = vpop.f32.mrf.mxu0  ;;  %v5825_v60 = vpop.f32.mrf.mxu1 }
 0xf8e   : > { %v5743_v43 = vadd.f32 %v5739_v42, %v5655_v30  ;;  %v5830_v17 = vadd.f32 %v5825_v60, %v5742_v55 }
 0xf8f   : > { %v5827_v8 = vpop.f32.mrf.mxu1  ;;  %v5901_v51 = vpop.f32.mrf.mxu0 }
 0xf90   : > { %v5982_v63 = vadd.f32 %v5830_v17, %v9935_v20  ;;  %v5831_v19 = vadd.f32 %v5827_v8, %v5743_v43  ;;  %v5902_v50 = vadd.f32 %v5901_v51, %v9718_v18 }
 0xf91   : > { %v5975_v48 = vpop.f32.mrf.mxu1  ;;  %v5903_v18 = vpop.f32.mrf.mxu0 }
 0xf92   : > { %v5992_v25 = vrot.slane %v5982_v63, 4  ;;  %v5983_v14 = vadd.f32 %v5831_v19, %v2799_v23  ;;  %v5976_v20 = vadd.f32 %v5975_v48, %v10144_v35  ;;  %v5904_v9 = vadd.f32 %v5903_v18, %v9721_v54  ;;  %v10803_v54 = vld [vmem:[%s12048_s8] sm:$0xff] }
 0xf93   : > { %v5977_v35 = vpop.f32.mrf.mxu1 }
 0xf94   : > { %v10732_v6 = vsel %vm12373_vm11, %v10474_v29, %v5992_v25  ;;  %v5993_v12 = vrot.slane %v5983_v14, 4  ;;  %v5986_v29 = vrot.slane %v5976_v20, 4  ;;  %v5978_v10 = vadd.f32 %v5977_v35, %v10146_v31  ;;  %vm12390_vm11 = vmmov %vm12389_vm14 }
 0xf95   : > { %6078 = vrot.lane.b32.xlu1 %v10732_v6, %s12129_s20  ;;  %6140 = vrot.lane.b32.xlu0 %v10732_v6, %s12139_s18  ;;  %v6181_v31 = vcombine.high %v10803_v54, %v10803_v54 }
 0xf96   : > { %v10740_v7 = vsel %vm12374_vm0, %v10477_v4, %v5993_v12  ;;  %v10753_v4 = vsel %vm12375_vm1, %v5902_v50, %v5986_v29  ;;  %v5987_v11 = vrot.slane %v5978_v10, 4  ;;  %vm12391_vm0 = vnez %v12161_v57  ;;  %vm12392_vm1 = vmmov %vm12390_vm11 }
 0xf97   : > { %8401 = vmatprep.mubr.msk.f32.mxu0 %vm12380_vm12, %v6181_v31  ;;  %vm12394_vm12 = vmmov %vm12392_vm1 }
 0xf98   : > { %v10774_v49 = vsel %vm12376_vm3, %v5904_v9, %v5987_v11  ;;  %vm12393_vm3 = vnez %v12163_v59 }
 0xf99   : > { %6056 = vrot.lane.b32.xlu1 %v10732_v6, %s12136_s22  ;;  %6118 = vrot.lane.b32.xlu0 %v10732_v6, %s12132_s1 }
 0xf9d   : > { %6096 = vrot.lane.b32.xlu0 %v10732_v6, %s12127_s19  ;;  %6142 = vrot.lane.b32.xlu1 %v10740_v7, %s12139_s18 }
 0xfa1   : > { %6136 = vrot.lane.b32.xlu0 %v10753_v4, %s12139_s18  ;;  %6120 = vrot.lane.b32.xlu1 %v10740_v7, %s12132_s1 }
 0xfa5   : > { %6114 = vrot.lane.b32.xlu0 %v10753_v4, %s12132_s1  ;;  %6098 = vrot.lane.b32.xlu1 %v10740_v7, %s12127_s19 }
 0xfa9   : > { %6092 = vrot.lane.b32.xlu0 %v10753_v4, %s12127_s19  ;;  %6076 = vrot.lane.b32.xlu1 %v10753_v4, %s12129_s20 }
 0xfad   : > { %6072 = vrot.lane.b32.xlu0 %v10740_v7, %s12129_s20  ;;  %6054 = vrot.lane.b32.xlu1 %v10753_v4, %s12136_s22 }
 0xfb1   : > { %6050 = vrot.lane.b32.xlu0 %v10740_v7, %s12136_s22  ;;  %6138 = vrot.lane.b32.xlu1 %v10774_v49, %s12139_s18 }
 0xfb5   : > { %6028 = vrot.lane.b32.xlu0 %v10740_v7, %s12377_s26  ;;  %6116 = vrot.lane.b32.xlu1 %v10774_v49, %s12132_s1 }
 0xfb9   : > { %6004 = vrot.lane.b32.xlu0 %v10740_v7, %s12378_s21  ;;  %6094 = vrot.lane.b32.xlu1 %v10774_v49, %s12127_s19 }
 0xfbd   : > { %6162 = vrot.lane.b32.xlu0 %v10732_v6, %s12379_s23  ;;  %6034 = vrot.lane.b32.xlu1 %v10732_v6, %s12377_s26 }
 0xfc1   : > { %6070 = vrot.lane.b32.xlu0 %v10774_v49, %s12129_s20  ;;  %6032 = vrot.lane.b32.xlu1 %v10753_v4, %s12377_s26 }
 0xfc5   : > { %6048 = vrot.lane.b32.xlu0 %v10774_v49, %s12136_s22  ;;  %6012 = vrot.lane.b32.xlu1 %v10732_v6, %s12378_s21 }
 0xfc9   : > { %6026 = vrot.lane.b32.xlu0 %v10774_v49, %s12377_s26  ;;  %6010 = vrot.lane.b32.xlu1 %v10753_v4, %s12378_s21 }
 0xfcd   : > { %6002 = vrot.lane.b32.xlu0 %v10774_v49, %s12378_s21  ;;  %6164 = vrot.lane.b32.xlu1 %v10740_v7, %s12379_s23 }
 0xfd1   : > { %6158 = vrot.lane.b32.xlu0 %v10753_v4, %s12379_s23  ;;  %6160 = vrot.lane.b32.xlu1 %v10774_v49, %s12379_s23 }
0x1007   : > { %v6079_v52 = vpop.permute.xlu1 %6078  ;;  %v6141_v45 = vpop.permute.xlu0 %6140 }
0x100b   : > { %v6057_v13 = vpop.permute.xlu1 %6056  ;;  %v6119_v38 = vpop.permute.xlu0 %6118 }
0x100f   : > { %v6097_v47 = vpop.permute.xlu0 %6096  ;;  %v6143_v22 = vpop.permute.xlu1 %6142 }
0x1010   : > { %v6145_v21 = vsel %vm12381_vm6, %v6141_v45, %v6143_v22  ;;  %v6153_v46 = vsel %vm12382_vm7, %v6143_v22, %v6141_v45  ;;  %vm12395_vm6 = vcmask 1039360  }
0x1011   : > { %8369 = vmatprep.subr.msk.mxu0 %vm12383_vm9, %v6153_v46  ;;  %vm12396_vm7 = vmmov %vm12395_vm6  ;;  %vm12397_vm9 = vcmp.le.s32.totalorder %v9093_v37, 14 }
0x1012   : > { %8370 = vmatpush1.msk.msra.mxu0 %vm12384_vm4, %v6145_v21  ;;  %vm12398_vm4 = vmmov %vm12395_vm6 }
0x1013   : > { %v6137_v16 = vpop.permute.xlu0 %6136  ;;  %v6121_v61 = vpop.permute.xlu1 %6120 }
0x1014   : > { %v6131_v30 = vsel %vm12389_vm14, %v6121_v61, %v6119_v38  ;;  %v6123_v55 = vsel %vm12390_vm11, %v6119_v38, %v6121_v61  ;;  %vm12403_vm14 = vcmask 7168  }
0x1015   : > { %vm12404_vm11 = vmmov %vm12403_vm14 }
0x1017   : > { %v6115_v53 = vpop.permute.xlu0 %6114  ;;  %v6099_v34 = vpop.permute.xlu1 %6098 }
0x1018   : > { %v6109_v8 = vsel %vm12395_vm6, %v6099_v34, %v6097_v47  ;;  %v6101_v23 = vsel %vm12396_vm7, %v6097_v47, %v6099_v34  ;;  %vm12407_vm6 = vcmp.ge.s32.totalorder %v9091_v36, 1  ;;  %vm12408_vm7 = vmmov %vm12404_vm11 }
0x101b   : > { %v6093_v15 = vpop.permute.xlu0 %6092  ;;  %v6077_v62 = vpop.permute.xlu1 %6076 }
0x101f   : > { %v6073_v27 = vpop.permute.xlu0 %6072  ;;  %v6055_v5 = vpop.permute.xlu1 %6054 }
0x1020   : > { %v6081_v20 = vsel %vm12403_vm14, %v6079_v52, %v6073_v27  ;;  %v6087_v51 = vsel %vm12404_vm11, %v6073_v27, %v6079_v52  ;;  %vm12415_vm14 = vnez %v12167_v24 }
0x1023   : > { %v6051_v26 = vpop.permute.xlu0 %6050  ;;  %v6139_v3 = vpop.permute.xlu1 %6138 }
0x1024   : > { %v6144_v1 = vsel %vm12385_vm5, %v6137_v16, %v6139_v3  ;;  %v6152_v28 = vsel %vm12386_vm8, %v6139_v3, %v6137_v16  ;;  %vm12399_vm5 = vcmp.le.s32.totalorder %v9091_v36, 14  ;;  %vm12400_vm8 = vmmov %vm12398_vm4 }
0x1025   : > { %8371 = vmatprep.subr.msk.mxu0 %vm12387_vm10, %v6152_v28  ;;  %vm12401_vm10 = vmmov %vm12397_vm9 }
0x1026   : > { %8372 = vmatpush1.msk.msra.mxu0 %vm12388_vm13, %v6144_v1  ;;  %vm12402_vm13 = vmmov %vm12399_vm5 }
0x1027   : > { %v6029_v42 = vpop.permute.xlu0 %6028  ;;  %8373 = vmatprep.subr.msk.mxu0 %vm12391_vm0, %v6131_v30  ;;  %v6117_v60 = vpop.permute.xlu1 %6116 }
0x1028   : > { %v6122_v43 = vsel %vm12392_vm1, %v6115_v53, %v6117_v60  ;;  %8374 = vmatpush1.msk.msra.mxu0 %vm12393_vm3, %v6123_v55  ;;  %v6130_v17 = vsel %vm12394_vm12, %v6117_v60, %v6115_v53  ;;  %vm12405_vm1 = vcmp.ge.s32.totalorder %v9093_v37, 1  ;;  %vm12406_vm12 = vmmov %vm12404_vm11 }
0x1029   : > { %8375 = vmatprep.subr.msk.mxu0 %vm12391_vm0, %v6130_v17 }
0x102a   : > { %8376 = vmatpush1.msk.msra.mxu0 %vm12393_vm3, %v6122_v43 }
0x102b   : > { %v6005_v63 = vpop.permute.xlu0 %6004  ;;  %8377 = vmatprep.subr.msk.mxu0 %vm12397_vm9, %v6109_v8  ;;  %v6095_v19 = vpop.permute.xlu1 %6094  ;;  %vm12409_vm9 = vmmov %vm12405_vm1 }
0x102c   : > { %v6100_v25 = vsel %vm12398_vm4, %v6093_v15, %v6095_v19  ;;  %8378 = vmatpush1.msk.msra.mxu0 %vm12399_vm5, %v6101_v23  ;;  %v6108_v14 = vsel %vm12400_vm8, %v6095_v19, %v6093_v15  ;;  %vm12410_vm4 = vmmov %vm12407_vm6  ;;  %vm12411_vm5 = vcmask 121856  }
0x102d   : > { %8379 = vmatprep.subr.msk.mxu0 %vm12401_vm10, %v6108_v14  ;;  %vm12412_vm8 = vmmov %vm12411_vm5  ;;  %vm12413_vm10 = vnez %v12165_v0 }
0x102e   : > { %8380 = vmatpush1.msk.msra.mxu0 %vm12402_vm13, %v6100_v25  ;;  %vm12414_vm13 = vmmov %vm12411_vm5 }
0x102f   : > { %v6163_v12 = vpop.permute.xlu0 %6162  ;;  %6196 = vmatprep.subr.mxu0 %v10740_v7  ;;  %v6035_v48 = vpop.permute.xlu1 %6034  ;;  %v6059_v7 = vsel %vm12411_vm5, %v6057_v13, %v6051_v26  ;;  %vm12416_vm11 = vmmov %vm12411_vm5 }
0x1030   : > { %6197 = vmatpush1.msra.mxu0 %v10732_v6 }
0x1031   : > { %6198 = vmatprep.subr.mxu0 %v10774_v49 }
0x1032   : > { %6199 = vmatpush1.msra.mxu0 %v10753_v4  ;;  %v6065_v4 = vsel %vm12412_vm8, %v6051_v26, %v6057_v13 }
0x1033   : > { %v6071_v29 = vpop.permute.xlu0 %6070  ;;  %8381 = vmatprep.subr.msk.mxu0 %vm12405_vm1, %v6081_v20  ;;  %v6033_v50 = vpop.permute.xlu1 %6032  ;;  %vm12417_vm1 = vcmask 130048  }
0x1034   : > { %v6086_v35 = vsel %vm12406_vm12, %v6071_v29, %v6077_v62  ;;  %8382 = vmatpush1.msk.msra.mxu0 %vm12407_vm6, %v6087_v51  ;;  %v6080_v6 = vsel %vm12408_vm7, %v6077_v62, %v6071_v29  ;;  %v6037_v49 = vsel %vm12417_vm1, %v6035_v48, %v6029_v42  ;;  %vm12418_vm12 = vmmov %vm12417_vm1  ;;  %vm12419_vm6 = vcmp.ge.s32.totalorder %v9087_v33, 1 }
0x1035   : > { %8383 = vmatprep.subr.msk.mxu0 %vm12409_vm9, %v6080_v6  ;;  %v6043_v31 = vsel %vm12418_vm12, %v6029_v42, %v6035_v48  ;;  %vm12420_vm7 = vmmov %vm12417_vm1  ;;  %vm12421_vm9 = vcmp.ge.s32.totalorder %v9085_v32, 1 }
0x1036   : > { %8384 = vmatpush1.msk.msra.mxu0 %vm12410_vm4, %v6086_v35  ;;  %vm12422_vm4 = vmmov %vm12417_vm1  ;;  %vm12427_vm1 = vnez %v12169_v39 }
0x1037   : > { %v6049_v10 = vpop.permute.xlu0 %6048  ;;  %8385 = vmatprep.subr.msk.mxu0 %vm12413_vm10, %v6059_v7  ;;  %v6013_v18 = vpop.permute.xlu1 %6012  ;;  %vm12423_vm5 = vmmov %vm12419_vm6 }
0x1038   : > { %v6064_v11 = vsel %vm12414_vm13, %v6049_v10, %v6055_v5  ;;  %8386 = vmatpush1.msk.msra.mxu0 %vm12415_vm14, %v6065_v4  ;;  %v6058_v9 = vsel %vm12416_vm11, %v6055_v5, %v6049_v10  ;;  %vm12424_vm8 = vmmov %vm12421_vm9  ;;  %vm12425_vm13 = vcmask 138240  }
0x1039   : > { %8387 = vmatprep.subr.msk.mxu0 %vm12413_vm10, %v6058_v9  ;;  %v6015_v47 = vsel %vm12425_vm13, %v6013_v18, %v6005_v63  ;;  %vm12426_vm11 = vmmov %vm12425_vm13  ;;  %vm12435_vm13 = vnez %v12157_v40 }
0x103a   : > { %8388 = vmatpush1.msk.msra.mxu0 %vm12415_vm14, %v6064_v11  ;;  %v6021_v22 = vsel %vm12426_vm11, %v6005_v63, %v6013_v18  ;;  %vm12428_vm12 = vmmov %vm12426_vm11 }
0x103b   : > { %v6027_v52 = vpop.permute.xlu0 %6026  ;;  %8389 = vmatprep.subr.msk.mxu0 %vm12419_vm6, %v6037_v49  ;;  %v6011_v45 = vpop.permute.xlu1 %6010  ;;  %vm12429_vm6 = vnez %v12171_v44 }
0x103c   : > { %v6042_v13 = vsel %vm12420_vm7, %v6027_v52, %v6033_v50  ;;  %8390 = vmatpush1.msk.msra.mxu0 %vm12421_vm9, %v6043_v31  ;;  %v6036_v38 = vsel %vm12422_vm4, %v6033_v50, %v6027_v52  ;;  %vm12430_vm7 = vmmov %vm12426_vm11  ;;  %vm12431_vm9 = vcmask 908288  }
0x103d   : > { %8391 = vmatprep.subr.msk.mxu0 %vm12423_vm5, %v6036_v38  ;;  %vm12432_vm4 = vmmov %vm12431_vm9  ;;  %vm12433_vm5 = vnez %v12159_v41 }
0x103e   : > { %8392 = vmatpush1.msk.msra.mxu0 %vm12424_vm8, %v6042_v13  ;;  %vm12434_vm8 = vmmov %vm12432_vm4 }
0x103f   : > { %v6003_v21 = vpop.permute.xlu0 %6002  ;;  %8393 = vmatprep.subr.msk.mxu0 %vm12427_vm1, %v6015_v47  ;;  %v6165_v46 = vpop.permute.xlu1 %6164  ;;  %vm12436_vm11 = vmmov %vm12432_vm4 }
0x1040   : > { %v6020_v16 = vsel %vm12428_vm12, %v6003_v21, %v6011_v45  ;;  %8394 = vmatpush1.msk.msra.mxu0 %vm12429_vm6, %v6021_v22  ;;  %v6014_v61 = vsel %vm12430_vm7, %v6011_v45, %v6003_v21  ;;  %v6175_v53 = vsel %vm12431_vm9, %v6165_v46, %v6163_v12  ;;  %v6167_v34 = vsel %vm12432_vm4, %v6163_v12, %v6165_v46  ;;  %vm12438_vm7 = vmmov %vm12432_vm4 }
0x1041   : > { %8395 = vmatprep.subr.msk.mxu0 %vm12427_vm1, %v6014_v61  ;;  %vm12437_vm12 = vcmask 916480   ;;  %vm12439_vm9 = vmmov %vm12432_vm4 }
0x1042   : > { %8396 = vmatpush1.msk.msra.mxu0 %vm12429_vm6, %v6020_v16  ;;  %vm12440_vm4 = vmmov %vm12437_vm12 }
0x1043   : > { %v6159_v15 = vpop.permute.xlu0 %6158  ;;  %8397 = vmatprep.subr.msk.mxu0 %vm12433_vm5, %v6175_v53  ;;  %v6161_v62 = vpop.permute.xlu1 %6160 }
0x1044   : > { %v6166_v27 = vsel %vm12434_vm8, %v6159_v15, %v6161_v62  ;;  %8398 = vmatpush2.msk.msra.mxu0 %vm12435_vm13, %v6167_v34  ;;  %v6174_v5 = vsel %vm12436_vm11, %v6161_v62, %v6159_v15  ;;  %vm12441_vm8 = vcmask 1043456   ;;  %vm12442_vm11 = vcmp.le.s32.totalorder %v9085_v32, 14 }
0x1045   : > { %8399 = vmatprep.subr.msk.mxu0 %vm12433_vm5, %v6174_v5  ;;  %vm12443_vm15 = vmmov %vm12441_vm8 }
0x1046   : > { %8400 = vmatpush2.msk.msra.mxu0 %vm12435_vm13, %v6166_v27 }
0x1047   : > { %6249 = vmatmul.mubr.f32.vlgmr.msra.gmra.mxu0 %v10803_v54 }
0x1048   : > { %7396 = vmatprep.mubr.f32.mxu0 %v8906_v2 }
0x1107   : > { %v6250_v26 = vpop.f32.mrf.mxu0 }
0x1108   : > { %v8402_v3 = vmul.f32 -1.442695, %v6250_v26 }
0x1109   : > { %v6252_v1 = vpop.f32.mrf.mxu0 }
0x110a   : > { %8876 = vpow2.f32 %v8402_v3  ;;  %v8403_v28 = vmul.f32 -1.442695, %v6252_v1 }
0x110c   : > { %8878 = vpow2.f32 %v8403_v28 }
0x1117   : > { %v8877_v30 = vpop.eup %8876 }
0x1118   : > { %v6261_v55 = vadd.f32 1.0, %v8877_v30 }
0x1119   : > { %v8879_v42 = vpop.eup %8878 }
0x111a   : > { %8880 = vrcp.f32 %v6261_v55  ;;  %v6262_v60 = vadd.f32 1.0, %v8879_v42 }
0x111c   : > { %8882 = vrcp.f32 %v6262_v60 }
0x1127   : > { %v8881_v43 = vpop.eup %8880 }
0x1128   : > { %v10923_v17 = vmul.f32 %v8881_v43, %v9232_v56 }
0x1129   : > { %v8883_v54 = vpop.eup %8882 }
0x112a   : > { %6307 = vrot.lane.b32.xlu1 %v10923_v17, %s12129_s20  ;;  %6337 = vrot.lane.b32.xlu0 %v10923_v17, %s12139_s18  ;;  %v10934_v8 = vmul.f32 %v8883_v54, %v9243_v58 }
0x112e   : > { %6285 = vrot.lane.b32.xlu1 %v10923_v17, %s12377_s26  ;;  %6348 = vrot.lane.b32.xlu0 %v10923_v17, %s12379_s23 }
0x1132   : > { %6315 = vrot.lane.b32.xlu0 %v10923_v17, %s12127_s19  ;;  %6339 = vrot.lane.b32.xlu1 %v10934_v8, %s12139_s18 }
0x1136   : > { %6326 = vrot.lane.b32.xlu0 %v10923_v17, %s12132_s1  ;;  %6350 = vrot.lane.b32.xlu1 %v10934_v8, %s12379_s23 }
0x113a   : > { %6304 = vrot.lane.b32.xlu0 %v10934_v8, %s12129_s20  ;;  %6317 = vrot.lane.b32.xlu1 %v10934_v8, %s12127_s19 }
0x113e   : > { %6282 = vrot.lane.b32.xlu0 %v10934_v8, %s12377_s26  ;;  %6328 = vrot.lane.b32.xlu1 %v10934_v8, %s12132_s1 }
0x1142   : > { %6293 = vrot.lane.b32.xlu0 %v10934_v8, %s12136_s22  ;;  %6296 = vrot.lane.b32.xlu1 %v10923_v17, %s12136_s22 }
0x1146   : > { %6270 = vrot.lane.b32.xlu0 %v10934_v8, %s12378_s21  ;;  %6274 = vrot.lane.b32.xlu1 %v10923_v17, %s12378_s21 }
0x119c   : > { %v6308_v56 = vpop.permute.xlu1 %6307  ;;  %v6338_v58 = vpop.permute.xlu0 %6337 }
0x11a0   : > { %v6286_v23 = vpop.permute.xlu1 %6285  ;;  %v6349_v63 = vpop.permute.xlu0 %6348 }
0x11a4   : > { %v6316_v19 = vpop.permute.xlu0 %6315  ;;  %v6340_v25 = vpop.permute.xlu1 %6339 }
0x11a5   : > { %v6341_v48 = vsel %vm12437_vm12, %v6338_v58, %v6340_v25  ;;  %v6345_v29 = vsel %vm12440_vm4, %v6340_v25, %v6338_v58  ;;  %vm12444_vm12 = vcmp.le.s32.totalorder %v9087_v33, 14 }
0x11a6   : > { %v6346_v6 = vsel %vm12442_vm11, %v6341_v48, 0.0  ;;  %v6347_v10 = vsel %vm12444_vm12, %v6345_v29, 0.0  ;;  %vm12450_vm11 = vcmp.le.s32.totalorder %v9091_v36, 14  ;;  %vm12452_vm12 = vcmp.ge.s32.totalorder %v9093_v37, 1 }
0x11a7   : > { %v6379_v45 = vrot.slane %v6346_v6, 4  ;;  %v6380_v13 = vrot.slane %v6347_v10, 4 }
0x11a8   : > { %v6327_v14 = vpop.permute.xlu0 %6326  ;;  %v6351_v12 = vpop.permute.xlu1 %6350 }
0x11a9   : > { %v6352_v20 = vsel %vm12438_vm7, %v6349_v63, %v6351_v12  ;;  %v6356_v51 = vsel %vm12439_vm9, %v6351_v12, %v6349_v63  ;;  %vm12445_vm7 = vcmask 7168   ;;  %vm12446_vm9 = vcmask 1039360  }
0x11aa   : > { %v6357_v50 = vsel %vm12435_vm13, %v6352_v20, 0.0  ;;  %v6358_v35 = vsel %vm12433_vm5, %v6356_v51, 0.0  ;;  %vm12447_vm4 = vmmov %vm12446_vm9 }
0x11ab   : > { %8404 = vmatprep.subr.msk.mxu1 %vm12441_vm8, %v6358_v35  ;;  %vm12448_vm2 = vmmov %vm12445_vm7  ;;  %vm12449_vm8 = vcmp.le.s32.totalorder %v9093_v37, 14 }
0x11ac   : > { %v6305_v7 = vpop.permute.xlu0 %6304  ;;  %8405 = vmatpush1.msk.msra.mxu1 %vm12443_vm15, %v6357_v50  ;;  %v6318_v4 = vpop.permute.xlu1 %6317  ;;  %vm12451_vm15 = vcmp.ge.s32.totalorder %v9091_v36, 1 }
0x11ad   : > { %v6312_v18 = vsel %vm12445_vm7, %v6305_v7, %v6308_v56  ;;  %v6319_v11 = vsel %vm12446_vm9, %v6316_v19, %v6318_v4  ;;  %v6323_v9 = vsel %vm12447_vm4, %v6318_v4, %v6316_v19  ;;  %v6309_v49 = vsel %vm12448_vm2, %v6308_v56, %v6305_v7  ;;  %v557_v7 = vld [vmem:[%s12049_s9] sm:$0xf] }
0x11ae   : > { %v6325_v31 = vsel %vm12449_vm8, %v6323_v9, 0.0  ;;  %v6324_v52 = vsel %vm12450_vm11, %v6319_v11, 0.0  ;;  %v6313_v38 = vsel %vm12451_vm15, %v6312_v18, 0.0  ;;  %v6314_v21 = vsel %vm12452_vm12, %v6309_v49, 0.0 }
0x11af   : > { %v6374_v46 = vrot.slane %v6325_v31, 4  ;;  %vm12453_vm7 = vcmask 924672   ;;  %v6373_v53 = vrot.slane %v6324_v52, 4  ;;  %vm12455_vm9 = vcmask 130048  }
0x11b0   : > { %v6283_v47 = vpop.permute.xlu0 %6282  ;;  %v6329_v22 = vpop.permute.xlu1 %6328  ;;  %vm12454_vm2 = vmmov %vm12453_vm7  ;;  %vm12457_vm8 = vcmask 1043456   ;;  %v6367_v3 = vrot.slane %v6313_v38, 4  ;;  %v6368_v1 = vrot.slane %v6314_v21, 4  ;;  %vm12459_vm15 = vcmp.ge.s32.totalorder %v9085_v32, 1 }
0x11b1   : > { %v6330_v16 = vsel %vm12453_vm7, %v6327_v14, %v6329_v22  ;;  %v6334_v61 = vsel %vm12454_vm2, %v6329_v22, %v6327_v14  ;;  %v6290_v34 = vsel %vm12455_vm9, %v6283_v47, %v6286_v23  ;;  %vm12456_vm4 = vmmov %vm12455_vm9  ;;  %vm12460_vm12 = vcmask 121856  }
0x11b2   : > { %v6335_v15 = vsel %vm12393_vm3, %v6330_v16, 0.0  ;;  %v6336_v62 = vsel %vm12391_vm0, %v6334_v61, 0.0  ;;  %v6287_v27 = vsel %vm12456_vm4, %v6286_v23, %v6283_v47  ;;  %vm12458_vm11 = vmmov %vm12457_vm8  ;;  %v6291_v55 = vsel %vm12459_vm15, %v6290_v34, 0.0 }
0x11b3   : > { %v6390_v5 = vsel %vm12457_vm8, %v6336_v62, %v6380_v13  ;;  %v6389_v26 = vsel %vm12458_vm11, %v6335_v15, %v6379_v45  ;;  %vm12461_vm7 = vmmov %vm12460_vm12  ;;  %vm12463_vm9 = vcmp.ge.s32.totalorder %v9087_v33, 1  ;;  %v6361_v12 = vrot.slane %v6291_v55, 4 }
0x11b4   : > { %v6294_v28 = vpop.permute.xlu0 %6293  ;;  %6424 = vmatprep.subr.mxu1 %v6390_v5  ;;  %v6297_v30 = vpop.permute.xlu1 %6296  ;;  %vm12462_vm2 = vmmov %vm12457_vm8  ;;  %v6292_v54 = vsel %vm12463_vm9, %v6287_v27, 0.0  ;;  %vm12467_vm15 = vcmask 138240   ;;  %vm12470_vm9 = vcmask 293888  }
0x11b5   : > { %v6298_v42 = vsel %vm12460_vm12, %v6297_v30, %v6294_v28  ;;  %v6301_v60 = vsel %vm12461_vm7, %v6294_v28, %v6297_v30  ;;  %6425 = vmatpush1.msra.mxu1 %v6389_v26  ;;  %v6388_v43 = vsel %vm12462_vm2, %v10934_v8, %v6374_v46  ;;  %vm12464_vm4 = vmmov %vm12462_vm2  ;;  %v6362_v48 = vrot.slane %v6292_v54, 4 }
0x11b6   : > { %v6302_v56 = vsel %vm12415_vm14, %v6301_v60, 0.0  ;;  %6426 = vmatprep.subr.mxu1 %v6388_v43  ;;  %v6387_v58 = vsel %vm12464_vm4, %v10923_v17, %v6373_v53  ;;  %v6303_v23 = vsel %vm12413_vm10, %v6298_v42, 0.0  ;;  %vm12465_vm8 = vmmov %vm12462_vm2  ;;  %vm12471_vm4 = vcmask 916480  }
0x11b7   : > { %6427 = vmatpush1.msra.mxu1 %v6387_v58  ;;  %v6386_v63 = vsel %vm12465_vm8, %v6303_v23, %v6368_v1  ;;  %vm12466_vm11 = vmmov %vm12462_vm2  ;;  %vm12472_vm8 = vcmask 908288  }
0x11b8   : > { %v6385_v19 = vsel %vm12466_vm11, %v6302_v56, %v6367_v3  ;;  %v6271_v25 = vpop.permute.xlu0 %6270  ;;  %6428 = vmatprep.subr.mxu1 %v6386_v63  ;;  %v6275_v14 = vpop.permute.xlu1 %6274  ;;  %vm12468_vm12 = vmmov %vm12467_vm15 }
0x11b9   : > { %v6276_v20 = vsel %vm12467_vm15, %v6275_v14, %v6271_v25  ;;  %v6279_v51 = vsel %vm12468_vm12, %v6271_v25, %v6275_v14  ;;  %6429 = vmatpush1.msra.mxu1 %v6385_v19  ;;  %vm12469_vm7 = vmmov %vm12462_vm2 }
0x11ba   : > { %v6280_v29 = vsel %vm12429_vm6, %v6279_v51, 0.0  ;;  %v6281_v50 = vsel %vm12427_vm1, %v6276_v20, 0.0  ;;  %vm12473_vm11 = vmmov %vm12472_vm8 }
0x11bb   : > { %v6384_v35 = vsel %vm12469_vm7, %v6281_v50, %v6362_v48  ;;  %v6383_v6 = vsel %vm12462_vm2, %v6280_v29, %v6361_v12  ;;  %vm12474_vm15 = vmmov %vm12471_vm4  ;;  %vm12476_vm7 = vcmp.le.s32.totalorder %v9085_v32, 14 }
0x11bc   : > { %6430 = vmatprep.subr.mxu1 %v6384_v35  ;;  %vm12475_vm12 = vmmov %vm12462_vm2 }
0x11bd   : > { %6431 = vmatpush1.msra.mxu1 %v6383_v6 }
0x11be   : > { %8406 = vmatmul.mubr.msk.f32.vlgmr.msra.gmra.mxu1 %vm12470_vm9, %v557_v7  ;;  %vm12477_vm9 = vcmp.le.s32.totalorder %v9087_v33, 14 }
0x11bf   : > { %6668 = vmatprep.mubr.f32.mxu1 %v8906_v2 }
0x127e   : > { %v6466_v4 = vpop.f32.mrf.mxu1 }
0x127f   : > { %v11025_v10 = vmax.f32 %v6466_v4, 0.0 }
0x1280   : > { %v6468_v18 = vpop.f32.mrf.mxu1 }
0x1281   : > { %6511 = vrot.lane.b32.xlu1 %v11025_v10, %s12129_s20  ;;  %6541 = vrot.lane.b32.xlu0 %v11025_v10, %s12139_s18  ;;  %v11035_v11 = vmax.f32 %v6468_v18, 0.0 }
0x1285   : > { %6489 = vrot.lane.b32.xlu1 %v11025_v10, %s12377_s26  ;;  %6552 = vrot.lane.b32.xlu0 %v11025_v10, %s12379_s23 }
0x1289   : > { %6519 = vrot.lane.b32.xlu0 %v11025_v10, %s12127_s19  ;;  %6543 = vrot.lane.b32.xlu1 %v11035_v11, %s12139_s18 }
0x128d   : > { %6530 = vrot.lane.b32.xlu0 %v11025_v10, %s12132_s1  ;;  %6554 = vrot.lane.b32.xlu1 %v11035_v11, %s12379_s23 }
0x1291   : > { %6508 = vrot.lane.b32.xlu0 %v11035_v11, %s12129_s20  ;;  %6521 = vrot.lane.b32.xlu1 %v11035_v11, %s12127_s19  ;;  %s12134_s19 = smov 2  }
0x1295   : > { %6486 = vrot.lane.b32.xlu0 %v11035_v11, %s12377_s26  ;;  %6532 = vrot.lane.b32.xlu1 %v11035_v11, %s12132_s1  ;;  %s8929_s1 = smov 98  }
0x1299   : > { %6497 = vrot.lane.b32.xlu0 %v11035_v11, %s12136_s22  ;;  %6500 = vrot.lane.b32.xlu1 %v11025_v10, %s12136_s22 }
0x129d   : > { %6474 = vrot.lane.b32.xlu0 %v11035_v11, %s12378_s21  ;;  %6478 = vrot.lane.b32.xlu1 %v11025_v10, %s12378_s21 }
0x12f3   : > { %v6512_v9 = vpop.permute.xlu1 %6511  ;;  %v6542_v49 = vpop.permute.xlu0 %6541 }
0x12f7   : > { %v6490_v31 = vpop.permute.xlu1 %6489  ;;  %v6553_v52 = vpop.permute.xlu0 %6552 }
0x12fb   : > { %v6520_v45 = vpop.permute.xlu0 %6519  ;;  %v6544_v13 = vpop.permute.xlu1 %6543 }
0x12fc   : > { %v6545_v22 = vsel %vm12471_vm4, %v6542_v49, %v6544_v13  ;;  %v6549_v16 = vsel %vm12474_vm15, %v6544_v13, %v6542_v49  ;;  %vm12478_vm4 = vcmask 7168  }
0x12fd   : > { %v6550_v34 = vsel %vm12476_vm7, %v6545_v22, 0.0  ;;  %v6551_v27 = vsel %vm12477_vm9, %v6549_v16, 0.0  ;;  %vm12481_vm15 = vmmov %vm12478_vm4  ;;  %vm12483_vm7 = vcmp.le.s32.totalorder %v9091_v36, 14  ;;  %vm12485_vm9 = vcmp.ge.s32.totalorder %v9093_v37, 1 }
0x12fe   : > { %v6583_v55 = vrot.slane %v6550_v34, 4  ;;  %v6584_v42 = vrot.slane %v6551_v27, 4 }
0x12ff   : > { %v6531_v38 = vpop.permute.xlu0 %6530  ;;  %v6555_v47 = vpop.permute.xlu1 %6554 }
0x1300   : > { %v6556_v21 = vsel %vm12472_vm8, %v6553_v52, %v6555_v47  ;;  %v6560_v46 = vsel %vm12473_vm11, %v6555_v47, %v6553_v52  ;;  %vm12479_vm8 = vcmask 1039360  }
0x1301   : > { %v6561_v61 = vsel %vm12435_vm13, %v6556_v21, 0.0  ;;  %v6562_v53 = vsel %vm12433_vm5, %v6560_v46, 0.0  ;;  %vm12480_vm11 = vmmov %vm12479_vm8 }
0x1302   : > { %8407 = vmatprep.subr.msk.mxu1 %vm12475_vm12, %v6562_v53  ;;  %vm12482_vm12 = vcmp.le.s32.totalorder %v9093_v37, 14 }
0x1303   : > { %v6509_v15 = vpop.permute.xlu0 %6508  ;;  %8408 = vmatpush1.msk.msra.mxu1 %vm12462_vm2, %v6561_v61  ;;  %v6522_v62 = vpop.permute.xlu1 %6521  ;;  %vm12484_vm2 = vcmp.ge.s32.totalorder %v9091_v36, 1 }
0x1304   : > { %v6516_v5 = vsel %vm12478_vm4, %v6509_v15, %v6512_v9  ;;  %v6523_v26 = vsel %vm12479_vm8, %v6520_v45, %v6522_v62  ;;  %v6527_v3 = vsel %vm12480_vm11, %v6522_v62, %v6520_v45  ;;  %v6513_v1 = vsel %vm12481_vm15, %v6512_v9, %v6509_v15  ;;  %v558_v15 = vld [vmem:[%s12050_s10] sm:$0xf] }
0x1305   : > { %v6529_v28 = vsel %vm12482_vm12, %v6527_v3, 0.0  ;;  %v6528_v30 = vsel %vm12483_vm7, %v6523_v26, 0.0  ;;  %v6517_v60 = vsel %vm12484_vm2, %v6516_v5, 0.0  ;;  %v6518_v56 = vsel %vm12485_vm9, %v6513_v1, 0.0 }
0x1306   : > { %v6578_v58 = vrot.slane %v6529_v28, 4  ;;  %vm12486_vm4 = vcmask 924672   ;;  %v6577_v19 = vrot.slane %v6528_v30, 4  ;;  %vm12488_vm11 = vcmask 130048  }
0x1307   : > { %v6487_v43 = vpop.permute.xlu0 %6486  ;;  %v6533_v54 = vpop.permute.xlu1 %6532  ;;  %vm12487_vm8 = vmmov %vm12486_vm4  ;;  %vm12490_vm12 = vcmask 1043456   ;;  %v6571_v29 = vrot.slane %v6517_v60, 4  ;;  %v6572_v50 = vrot.slane %v6518_v56, 4  ;;  %vm12492_vm2 = vcmp.ge.s32.totalorder %v9085_v32, 1 }
0x1308   : > { %v6534_v23 = vsel %vm12486_vm4, %v6531_v38, %v6533_v54  ;;  %v6538_v63 = vsel %vm12487_vm8, %v6533_v54, %v6531_v38  ;;  %v6494_v25 = vsel %vm12488_vm11, %v6487_v43, %v6490_v31  ;;  %vm12489_vm15 = vmmov %vm12488_vm11  ;;  %vm12493_vm9 = vcmask 121856  }
0x1309   : > { %v6539_v14 = vsel %vm12393_vm3, %v6534_v23, 0.0  ;;  %v6540_v12 = vsel %vm12391_vm0, %v6538_v63, 0.0  ;;  %v6491_v48 = vsel %vm12489_vm15, %v6490_v31, %v6487_v43  ;;  %vm12491_vm7 = vmmov %vm12490_vm12  ;;  %v6495_v7 = vsel %vm12492_vm2, %v6494_v25, 0.0 }
0x130a   : > { %v6594_v20 = vsel %vm12490_vm12, %v6540_v12, %v6584_v42  ;;  %v6593_v51 = vsel %vm12491_vm7, %v6539_v14, %v6583_v55  ;;  %vm12494_vm4 = vmmov %vm12493_vm9  ;;  %vm12496_vm11 = vcmp.ge.s32.totalorder %v9087_v33, 1  ;;  %v6565_v22 = vrot.slane %v6495_v7, 4 }
0x130b   : > { %v6498_v35 = vpop.permute.xlu0 %6497  ;;  %6628 = vmatprep.subr.mxu1 %v6594_v20  ;;  %v6501_v6 = vpop.permute.xlu1 %6500  ;;  %vm12495_vm8 = vmmov %vm12491_vm7  ;;  %v6496_v49 = vsel %vm12496_vm11, %v6491_v48, 0.0  ;;  %vm12499_vm2 = vcmask 138240   ;;  %vm12503_vm11 = vcmask 293888  }
0x130c   : > { %v6502_v4 = vsel %vm12493_vm9, %v6501_v6, %v6498_v35  ;;  %v6505_v18 = vsel %vm12494_vm4, %v6498_v35, %v6501_v6  ;;  %6629 = vmatpush1.msra.mxu1 %v6593_v51  ;;  %v6592_v9 = vsel %vm12495_vm8, %v11035_v11, %v6578_v58  ;;  %vm12497_vm15 = vmmov %vm12491_vm7  ;;  %v6566_v21 = vrot.slane %v6496_v49, 4 }
0x130d   : > { %v6506_v31 = vsel %vm12415_vm14, %v6505_v18, 0.0  ;;  %6630 = vmatprep.subr.mxu1 %v6592_v9  ;;  %v6591_v52 = vsel %vm12497_vm15, %v11025_v10, %v6577_v19  ;;  %v6507_v45 = vsel %vm12413_vm10, %v6502_v4, 0.0  ;;  %vm12498_vm12 = vmmov %vm12491_vm7 }
0x130e   : > { %6631 = vmatpush1.msra.mxu1 %v6591_v52  ;;  %v6590_v13 = vsel %vm12498_vm12, %v6507_v45, %v6572_v50  ;;  %v6589_v38 = vsel %vm12491_vm7, %v6506_v31, %v6571_v29  ;;  %vm12500_vm9 = vmmov %vm12499_vm2 }
0x130f   : > { %v6475_v47 = vpop.permute.xlu0 %6474  ;;  %6632 = vmatprep.subr.mxu1 %v6590_v13  ;;  %v6479_v11 = vpop.permute.xlu1 %6478  ;;  %vm12501_vm4 = vmmov %vm12491_vm7  ;;  %vm6689_vm7 = vcmask 31744  }
0x1310   : > { %v6480_v46 = vsel %vm12499_vm2, %v6479_v11, %v6475_v47  ;;  %v6483_v16 = vsel %vm12500_vm9, %v6475_v47, %v6479_v11  ;;  %6633 = vmatpush1.msra.mxu1 %v6589_v38  ;;  %vm12502_vm8 = vmmov %vm12501_vm4  ;;  %vm12145_vm2 = vcmp.le.s32.totalorder %v9091_v36, 13  ;;  %vm12144_vm9 = vcmp.le.s32.totalorder %v9093_v37, 13 }
0x1311   : > { %v6484_v10 = vsel %vm12429_vm6, %v6483_v16, 0.0  ;;  %v6485_v61 = vsel %vm12427_vm1, %v6480_v46, 0.0  ;;  %vm12504_vm15 = vmmov %vm12501_vm4  ;;  %vm12522_vm6 = vcmp.le.s32.totalorder %v9091_v36, 14 }
0x1312   : > { %v6588_v53 = vsel %vm12501_vm4, %v6485_v61, %v6566_v21  ;;  %v6587_v34 = vsel %vm12502_vm8, %v6484_v10, %v6565_v22  ;;  %vm12505_vm12 = vmmov %vm12501_vm4  ;;  %vm7176_vm4 = vcmp.le.s32.totalorder %v9085_v32, 13  ;;  %vm7177_vm8 = vcmp.le.s32.totalorder %v9087_v33, 13 }
0x1313   : > { %6634 = vmatprep.subr.mxu1 %v6588_v53  ;;  %vm11270_vm1 = vmand %vm12522_vm6, %vm7176_vm4  ;;  %vm7208_vm6 = vcmask 785408  }
0x1314   : > { %6635 = vmatpush1.msra.mxu1 %v6587_v34 }
0x1315   : > { %8409 = vmatmul.mubr.msk.f32.vlgmr.msra.gmra.mxu1 %vm12503_vm11, %v558_v15  ;;  %vm7242_vm11 = vcmask 769024  }
0x1316   : > { %6763 = vmatprep.mubr.f32.mxu1 %v8906_v2 }
0x13d5   : > { %v6670_v62 = vpop.f32.mrf.mxu1 }
0x13d6   : > { %v8410_v27 = vmul.f32 -1.442695, %v6670_v62 }
0x13d7   : > { %v6672_v5 = vpop.f32.mrf.mxu1 }
0x13d8   : > { %8884 = vpow2.f32 %v8410_v27  ;;  %v8411_v26 = vmul.f32 -1.442695, %v6672_v5 }
0x13da   : > { %8886 = vpow2.f32 %v8411_v26 }
0x13e5   : > { %v8885_v3 = vpop.eup %8884 }
0x13e6   : > { %v6681_v1 = vadd.f32 1.0, %v8885_v3 }
0x13e7   : > { %v8887_v28 = vpop.eup %8886 }
0x13e8   : > { %8888 = vrcp.f32 %v6681_v1  ;;  %v6682_v30 = vadd.f32 1.0, %v8887_v28 }
0x13ea   : > { %8890 = vrcp.f32 %v6682_v30 }
0x13f5   : > { %v8889_v55 = vpop.eup %8888 }
0x13f6   : > { %v11127_v42 = vmul.f32 %v8889_v55, %v10923_v17  ;;  %v559_v17 = vld [vmem:[%s12051_s11] sm:$0xf] }
0x13f7   : > { %v8891_v60 = vpop.eup %8890 }
0x13f8   : > { %v11130_v43 = vmul.f32 %v8891_v60, %v10934_v8  ;;  %6806 = vrot.lane.b32.xlu1 %v11127_v42, %s12129_s20  ;;  %7220 = vrot.lane.b32.xlu0 %v11127_v42, %s8924_s28  ;;  %s12506_s20 = smov 96  }
0x13fa   : > { %8412 = vmatprep.subr.msk.mxu1 %vm12504_vm15, %v11130_v43  ;;  %vm11256_vm15 = vmand %vm12145_vm2, %vm7176_vm4 }
0x13fb   : > { %8413 = vmatpush1.msk.msra.mxu1 %vm12505_vm12, %v11127_v42  ;;  %vm7249_vm12 = vmand %vm12144_vm9, %vm7177_vm8  ;;  %vm12525_vm9 = vcmp.le.s32.totalorder %v9093_v37, 14 }
0x13fc   : > { %7083 = vrot.lane.b32.xlu1 %v11127_v42, %s12131_s29  ;;  %7238 = vrot.lane.b32.xlu0 %v11127_v42, %s8926_s30  ;;  %s8928_s29 = smov 110   ;;  %vm7231_vm2 = vmand %vm12525_vm9, %vm7177_vm8  ;;  %vm12528_vm9 = vcmp.ge.s32.totalorder %v9091_v36, 1 }
0x13fd   : > { %8414 = vmatmul.mubr.msk.f32.vlgmr.msra.gmra.mxu1 %vm6689_vm7, %v559_v17  ;;  %vm7224_vm7 = vcmask 777216  }
0x13fe   : > { %6963 = vmatprep.mubr.f32.mxu1 %v8906_v2 }
0x1400   : > { %7101 = vrot.lane.b32.xlu1 %v11127_v42, %s12134_s19  ;;  %7186 = vrot.lane.b32.xlu0 %v11127_v42, %s12135_s27  ;;  %s12138_s19 = smov 18   ;;  %s12141_s27 = smov 31  }
0x1404   : > { %6784 = vrot.lane.b32.xlu1 %v11127_v42, %s12377_s26  ;;  %7204 = vrot.lane.b32.xlu0 %v11127_v42, %s12506_s20 }
0x1408   : > { %6795 = vrot.lane.b32.xlu1 %v11127_v42, %s12136_s22  ;;  %7148 = vrot.lane.b32.xlu0 %v11127_v42, %s8928_s29  ;;  %s12507_s22 = smov 113  }
0x140c   : > { %6773 = vrot.lane.b32.xlu1 %v11127_v42, %s12378_s21  ;;  %7166 = vrot.lane.b32.xlu0 %v11127_v42, %s8929_s1 }
0x1410   : > { %7065 = vrot.lane.b32.xlu1 %v11127_v42, %s12138_s19  ;;  %6836 = vrot.lane.b32.xlu0 %v11127_v42, %s12139_s18  ;;  %s12508_s19 = smov 127   ;;  %s12509_s18 = smov 97  }
0x1414   : > { %7027 = vrot.lane.b32.xlu1 %v11127_v42, %s12141_s27  ;;  %6847 = vrot.lane.b32.xlu0 %v11127_v42, %s12379_s23  ;;  %s12510_s27 = smov 126  }
0x1418   : > { %6825 = vrot.lane.b32.xlu0 %v11127_v42, %s12507_s22  ;;  %7222 = vrot.lane.b32.xlu1 %v11130_v43, %s8924_s28  ;;  %s12512_s28 = smov 14  }
0x141c   : > { %7130 = vrot.lane.b32.xlu0 %v11127_v42, %s8932_s2  ;;  %7240 = vrot.lane.b32.xlu1 %v11130_v43, %s8926_s30  ;;  %s12518_s30 = smov 33  }
0x1420   : > { %6814 = vrot.lane.b32.xlu0 %v11127_v42, %s12508_s19  ;;  %7188 = vrot.lane.b32.xlu1 %v11130_v43, %s12509_s18  ;;  %s12513_s18 = smov 2  }
0x1424   : > { %7114 = vrot.lane.b32.xlu0 %v11127_v42, %s12510_s27  ;;  %7206 = vrot.lane.b32.xlu1 %v11130_v43, %s12506_s20  ;;  %s12514_s20 = smov 112  }
0x1428   : > { %6803 = vrot.lane.b32.xlu0 %v11130_v43, %s12511_s3  ;;  %7150 = vrot.lane.b32.xlu1 %v11130_v43, %s8928_s29  ;;  %s12517_s29 = smov 31  }
0x142c   : > { %7080 = vrot.lane.b32.xlu0 %v11130_v43, %s12512_s28  ;;  %7168 = vrot.lane.b32.xlu1 %v11130_v43, %s8929_s1  ;;  %s12515_s1 = smov 15   ;;  %s8933_s28 = smov 30  }
0x1430   : > { %7098 = vrot.lane.b32.xlu0 %v11130_v43, %s12513_s18  ;;  %6838 = vrot.lane.b32.xlu1 %v11130_v43, %s12514_s20  ;;  %s8934_s18 = smov 34  }
0x1434   : > { %6781 = vrot.lane.b32.xlu0 %v11130_v43, %s12377_s26  ;;  %6849 = vrot.lane.b32.xlu1 %v11130_v43, %s12379_s23 }
0x1438   : > { %6792 = vrot.lane.b32.xlu0 %v11130_v43, %s12515_s1  ;;  %6827 = vrot.lane.b32.xlu1 %v11130_v43, %s12507_s22 }
0x143c   : > { %6770 = vrot.lane.b32.xlu0 %v11130_v43, %s12378_s21  ;;  %7132 = vrot.lane.b32.xlu1 %v11130_v43, %s8932_s2  ;;  %s12519_s2 = smov 32  }
0x1440   : > { %7062 = vrot.lane.b32.xlu0 %v11130_v43, %s12516_s4  ;;  %6816 = vrot.lane.b32.xlu1 %v11130_v43, %s12508_s19 }
0x1444   : > { %7024 = vrot.lane.b32.xlu0 %v11130_v43, %s12517_s29  ;;  %7116 = vrot.lane.b32.xlu1 %v11130_v43, %s12510_s27 }
0x1448   : > { %7042 = vrot.lane.b32.xlu0 %v11130_v43, %s8933_s28  ;;  %7045 = vrot.lane.b32.xlu1 %v11127_v42, %s8933_s28 }
0x144c   : > { %6990 = vrot.lane.b32.xlu0 %v11130_v43, %s12518_s30  ;;  %6993 = vrot.lane.b32.xlu1 %v11127_v42, %s12518_s30 }
0x1450   : > { %7008 = vrot.lane.b32.xlu0 %v11130_v43, %s12519_s2  ;;  %7011 = vrot.lane.b32.xlu1 %v11127_v42, %s12519_s2 }
0x1454   : > { %6970 = vrot.lane.b32.xlu0 %v11130_v43, %s8934_s18  ;;  %6973 = vrot.lane.b32.xlu1 %v11127_v42, %s8934_s18 }
0x146a   : > { %v11222_v8 = vpop.permute.xlu1 %6806  ;;  %v7221_v54 = vpop.permute.xlu0 %7220 }
0x146e   : > { %v11224_v56 = vpop.permute.xlu1 %7083  ;;  %v7239_v58 = vpop.permute.xlu0 %7238 }
0x1472   : > { %v11226_v23 = vpop.permute.xlu1 %7101  ;;  %v7187_v63 = vpop.permute.xlu0 %7186 }
0x1476   : > { %v11228_v19 = vpop.permute.xlu1 %6784  ;;  %v7205_v25 = vpop.permute.xlu0 %7204 }
0x147a   : > { %v11230_v14 = vpop.permute.xlu1 %6795  ;;  %v11232_v12 = vpop.permute.xlu0 %7148 }
0x147e   : > { %v11234_v48 = vpop.permute.xlu1 %6773  ;;  %v11236_v20 = vpop.permute.xlu0 %7166 }
0x1482   : > { %v11238_v51 = vpop.permute.xlu1 %7065  ;;  %v11240_v29 = vpop.permute.xlu0 %6836 }
0x1486   : > { %v11242_v50 = vpop.permute.xlu1 %7027  ;;  %v11244_v35 = vpop.permute.xlu0 %6847 }
0x148a   : > { %v11247_v6 = vpop.permute.xlu0 %6825  ;;  %v7223_v7 = vpop.permute.xlu1 %7222 }
0x148b   : > { %v7225_v38 = vsel %vm7224_vm7, %v7221_v54, %v7223_v7  ;;  %v7229_v47 = vsel %vm7224_vm7, %v7223_v7, %v7221_v54 }
0x148c   : > { %v7236_v21 = vsel %vm11270_vm1, %v7225_v38, 0.0  ;;  %v7237_v46 = vsel %vm7231_vm2, %v7229_v47, 0.0 }
0x148d   : > { %v7312_v61 = vrot.slane %v7236_v21, 4  ;;  %v7313_v53 = vrot.slane %v7237_v46, 4 }
0x148e   : > { %v11264_v18 = vpop.permute.xlu0 %7130  ;;  %v7241_v9 = vpop.permute.xlu1 %7240 }
0x148f   : > { %v7243_v49 = vsel %vm7242_vm11, %v7239_v58, %v7241_v9  ;;  %v7247_v31 = vsel %vm7242_vm11, %v7241_v9, %v7239_v58  ;;  %vm12526_vm11 = vcmask 1043456  }
0x1490   : > { %v7254_v45 = vsel %vm11256_vm15, %v7243_v49, 0.0  ;;  %v7255_v13 = vsel %vm7249_vm12, %v7247_v31, 0.0  ;;  %vm12527_vm14 = vmmov %vm12526_vm11  ;;  %vm7190_vm15 = vcmask 793600  }
0x1491   : > { %8418 = vmatprep.subr.msk.mxu0 %vm12526_vm11, %v7255_v13  ;;  %vm11292_vm12 = vmand %vm12528_vm9, %vm7176_vm4  ;;  %vm12539_vm9 = vcmp.ge.s32.totalorder %v9093_v37, 2 }
0x1492   : > { %v11281_v11 = vpop.permute.xlu0 %6814  ;;  %8419 = vmatpush1.msk.msra.mxu0 %vm12527_vm14, %v7254_v45  ;;  %v7189_v22 = vpop.permute.xlu1 %7188  ;;  %vm12531_vm14 = vcmp.ge.s32.totalorder %v9093_v37, 1  ;;  %vm12534_vm2 = vmmov %vm12526_vm11  ;;  %vm7170_vm11 = vcmask 801792  }
0x1493   : > { %vm11304_vm1 = vmand %vm12531_vm14, %vm7177_vm8  ;;  %v7191_v3 = vsel %vm7190_vm15, %v7187_v63, %v7189_v22  ;;  %v7195_v1 = vsel %vm7190_vm15, %v7189_v22, %v7187_v63 }
0x1494   : > { %vm12535_vm7 = vmmov %vm12534_vm2  ;;  %v7202_v17 = vsel %vm11292_vm12, %v7191_v3, 0.0  ;;  %v7203_v54 = vsel %vm11304_vm1, %v7195_v1, 0.0  ;;  %vm12540_vm12 = vcmp.le.s32.totalorder %v9085_v32, 14 }
0x1495   : > { %vm7179_vm14 = vmand %vm12539_vm9, %vm7177_vm8  ;;  %v7306_v7 = vrot.slane %v7202_v17, 4  ;;  %v7307_v4 = vrot.slane %v7203_v54, 4 }
0x1496   : > { %v11286_v16 = vpop.permute.xlu0 %7114  ;;  %v7207_v10 = vpop.permute.xlu1 %7206 }
0x1497   : > { %v7209_v34 = vsel %vm7208_vm6, %v7205_v25, %v7207_v10  ;;  %v7213_v15 = vsel %vm7208_vm6, %v7207_v10, %v7205_v25  ;;  %vm12536_vm6 = vcmp.ge.s32.totalorder %v9091_v36, 2 }
0x1498   : > { %v7218_v27 = vsel %vm7176_vm4, %v7209_v34, 0.0  ;;  %v7219_v5 = vsel %vm7177_vm8, %v7213_v15, 0.0  ;;  %vm11318_vm15 = vmand %vm12536_vm6, %vm7176_vm4  ;;  %vm12541_vm4 = vcmp.le.s32.totalorder %v9091_v36, 13  ;;  %vm12544_vm8 = vcmp.le.s32.totalorder %v9087_v33, 14 }
0x1499   : > { %v7321_v28 = vsel %vm12534_vm2, %v7219_v5, %v7313_v53  ;;  %v7320_v30 = vsel %vm12535_vm7, %v7218_v27, %v7312_v61  ;;  %vm7152_vm2 = vcmask 900096   ;;  %vm11332_vm1 = vmand %vm12541_vm4, %vm12540_vm12  ;;  %vm12545_vm7 = vcmp.le.s32.totalorder %v9093_v37, 13 }
0x149a   : > { %v6804_v55 = vpop.permute.xlu0 %6803  ;;  %7340 = vmatprep.subr.mxu0 %v7321_v28  ;;  %v7151_v60 = vpop.permute.xlu1 %7150  ;;  %vm11342_vm6 = vmand %vm12545_vm7, %vm12544_vm8  ;;  %vm12554_vm4 = vcmp.le.s32.totalorder %v9085_v32, 14 }
0x149b   : > { %7341 = vmatpush1.msra.mxu0 %v7320_v30  ;;  %v7157_v38 = vsel %vm7152_vm2, %v7151_v60, %v11232_v12 }
0x149c   : > { %v7165_v61 = vsel %vm11342_vm6, %v7157_v38, 0.0 }
0x149d   : > { %v7301_v27 = vrot.slane %v7165_v61, 4 }
0x149e   : > { %v7081_v63 = vpop.permute.xlu0 %7080  ;;  %v7169_v25 = vpop.permute.xlu1 %7168 }
0x149f   : > { %v7171_v9 = vsel %vm7170_vm11, %v11236_v20, %v7169_v25  ;;  %v7175_v49 = vsel %vm7170_vm11, %v7169_v25, %v11236_v20  ;;  %v7153_v20 = vsel %vm7152_vm2, %v11232_v12, %v7151_v60  ;;  %vm12548_vm11 = vcmask 1043456  }
0x14a0   : > { %v7184_v52 = vsel %vm11318_vm15, %v7171_v9, 0.0  ;;  %v7185_v45 = vsel %vm7179_vm14, %v7175_v49, 0.0  ;;  %vm12549_vm9 = vmmov %vm12548_vm11  ;;  %v7164_v10 = vsel %vm11332_vm1, %v7153_v20, 0.0  ;;  %vm12550_vm15 = vcmask 916480  }
0x14a1   : > { %v7319_v47 = vsel %vm12548_vm11, %v7185_v45, %v7307_v4  ;;  %v7318_v22 = vsel %vm12549_vm9, %v7184_v52, %v7306_v7  ;;  %vm12551_vm14 = vmmov %vm12550_vm15  ;;  %v7300_v62 = vrot.slane %v7164_v10, 4  ;;  %vm12552_vm2 = vcmask 908288  }
0x14a2   : > { %v11350_v21 = vpop.permute.xlu0 %7098  ;;  %7342 = vmatprep.subr.mxu0 %v7319_v47  ;;  %v6839_v46 = vpop.permute.xlu1 %6838  ;;  %vm12553_vm12 = vmmov %vm12552_vm2  ;;  %vm12559_vm11 = vcmask 7168  }
0x14a3   : > { %7343 = vmatpush1.msra.mxu0 %v7318_v22  ;;  %v6840_v53 = vsel %vm12550_vm15, %v11240_v29, %v6839_v46  ;;  %v6844_v12 = vsel %vm12551_vm14, %v6839_v46, %v11240_v29  ;;  %vm12555_vm1 = vmmov %vm12544_vm8  ;;  %vm12562_vm14 = vcmask 924672  }
0x14a4   : > { %v6845_v3 = vsel %vm12554_vm4, %v6840_v53, 0.0  ;;  %v6846_v1 = vsel %vm12555_vm1, %v6844_v12, 0.0  ;;  %vm12556_vm8 = vmmov %vm12549_vm9 }
0x14a5   : > { %vm12557_vm7 = vmmov %vm12556_vm8  ;;  %v6878_v25 = vrot.slane %v6845_v3, 4  ;;  %v6879_v7 = vrot.slane %v6846_v1, 4 }
0x14a6   : > { %v11360_v34 = vpop.permute.xlu0 %6781  ;;  %v6850_v15 = vpop.permute.xlu1 %6849  ;;  %vm12558_vm6 = vmmov %vm12557_vm7 }
0x14a7   : > { %v6851_v5 = vsel %vm12552_vm2, %v11244_v35, %v6850_v15  ;;  %v6855_v26 = vsel %vm12553_vm12, %v6850_v15, %v11244_v35  ;;  %v6808_v35 = vsel %vm12559_vm11, %v11222_v8, %v6804_v55  ;;  %vm12560_vm9 = vmmov %vm12559_vm11  ;;  %vm7085_vm12 = vcmask 113664  }
0x14a8   : > { %v6856_v29 = vsel %vm12435_vm13, %v6851_v5, 0.0  ;;  %v6857_v28 = vsel %vm12433_vm5, %v6855_v26, 0.0  ;;  %v6811_v17 = vsel %vm12560_vm9, %v6804_v55, %v11222_v8  ;;  %vm12561_vm15 = vmmov %vm12558_vm6  ;;  %vm12569_vm11 = vcmp.le.s32.totalorder %v9091_v36, 13 }
0x14a9   : > { %8415 = vmatprep.subr.msk.mxu1 %vm12556_vm8, %v6857_v28  ;;  %v7317_v30 = vsel %vm12557_vm7, %v6857_v28, %v7301_v27  ;;  %v7316_v60 = vsel %vm12558_vm6, %v6856_v29, %v7300_v62  ;;  %vm12563_vm2 = vmmov %vm12562_vm14  ;;  %vm12566_vm8 = vcmp.ge.s32.totalorder %v9091_v36, 1  ;;  %vm12567_vm7 = vcmp.ge.s32.totalorder %v9093_v37, 1 }
0x14aa   : > { %v6793_v54 = vpop.permute.xlu0 %6792  ;;  %7344 = vmatprep.subr.mxu0 %v7317_v30  ;;  %v6828_v58 = vpop.permute.xlu1 %6827  ;;  %8416 = vmatpush1.msk.msra.mxu1 %vm12561_vm15, %v6856_v29  ;;  %vm12564_vm4 = vmmov %vm12558_vm6  ;;  %v11394_v52 = vsel %vm12566_vm8, %v6811_v17, 0.0  ;;  %v11398_v45 = vsel %vm12567_vm7, %v6808_v35, 0.0  ;;  %vm12568_vm6 = vcmp.ge.s32.totalorder %v9085_v32, 1  ;;  %vm12147_vm15 = vcmask 15360  }
0x14ab   : > { %v6829_v4 = vsel %vm12562_vm14, %v11247_v6, %v6828_v58  ;;  %v6833_v9 = vsel %vm12563_vm2, %v6828_v58, %v11247_v6  ;;  %7345 = vmatpush1.msra.mxu0 %v7316_v60  ;;  %vm12565_vm1 = vmmov %vm12564_vm4  ;;  %vm12572_vm14 = vcmp.ge.s32.totalorder %v9087_v33, 1  ;;  %vm12573_vm2 = vcmp.le.s32.totalorder %v9093_v37, 13 }
0x14ac   : > { %v6834_v49 = vsel %vm12393_vm3, %v6829_v4, 0.0  ;;  %v6835_v8 = vsel %vm12391_vm0, %v6833_v9, 0.0  ;;  %vm11404_vm9 = vmand %vm12569_vm11, %vm12568_vm6  ;;  %v11417_v47 = vsel %vm7085_vm12, %v11224_v56, %v7081_v63  ;;  %v11420_v22 = vsel %vm7085_vm12, %v7081_v63, %v11224_v56 }
0x14ad   : > { %v6889_v55 = vsel %vm12564_vm4, %v6835_v8, %v6879_v7  ;;  %v6888_v31 = vsel %vm12565_vm1, %v6834_v49, %v6878_v25  ;;  %vm11412_vm4 = vmand %vm12573_vm2, %vm12572_vm14  ;;  %vm7134_vm1 = vcmask 932864   ;;  %v6866_v46 = vrot.slane %v11394_v52, 4 }
0x14ae   : > { %v6771_v13 = vpop.permute.xlu0 %6770  ;;  %7346 = vmatprep.subr.mxu0 %v6889_v55  ;;  %v7133_v20 = vpop.permute.xlu1 %7132  ;;  %6923 = vmatprep.subr.mxu1 %v6889_v55  ;;  %v6867_v10 = vrot.slane %v11398_v45, 4  ;;  %v7107_v61 = vsel %vm12147_vm15, %v11350_v21, %v11226_v23  ;;  %vm12576_vm6 = vcmp.le.s32.totalorder %v9085_v32, 14  ;;  %vm12577_vm11 = vcmp.ge.s32.totalorder %v9091_v36, 2 }
0x14af   : > { %6924 = vmatpush1.msra.mxu1 %v6888_v31  ;;  %7347 = vmatpush1.msra.mxu0 %v6888_v31  ;;  %vm11432_vm12 = vmand %vm12577_vm11, %vm12576_vm6  ;;  %vm7118_vm7 = vcmask 1031168   ;;  %v7096_v63 = vsel %vm11404_vm9, %v11420_v22, 0.0  ;;  %v7097_v53 = vsel %vm11412_vm4, %v11417_v47, 0.0  ;;  %vm12580_vm8 = vcmp.le.s32.totalorder %v9087_v33, 14 }
0x14b0   : > { %vm12581_vm15 = vcmp.ge.s32.totalorder %v9093_v37, 2  ;;  %v7135_v15 = vsel %vm7134_vm1, %v11264_v18, %v7133_v20  ;;  %v7139_v62 = vsel %vm7134_vm1, %v7133_v20, %v11264_v18  ;;  %vm12584_vm11 = vcmask 130048  }
0x14b1   : > { %vm11447_vm6 = vmand %vm12581_vm15, %vm12580_vm8  ;;  %v6786_v26 = vsel %vm12584_vm11, %v11228_v19, %v11360_v34  ;;  %vm12585_vm2 = vcmask 121856   ;;  %vm12586_vm15 = vcmask 1039360   ;;  %vm12588_vm14 = vcmask 15360  }
0x14b2   : > { %v7063_v27 = vpop.permute.xlu0 %7062  ;;  %v6817_v5 = vpop.permute.xlu1 %6816  ;;  %v6797_v3 = vsel %vm12585_vm2, %v11230_v14, %v6793_v54  ;;  %vm12587_vm8 = vmmov %vm12586_vm15  ;;  %v7104_v18 = vsel %vm12588_vm14, %v11226_v23, %v11350_v21  ;;  %vm12589_vm1 = vcmp.ge.s32.totalorder %v9091_v36, 2  ;;  %vm12590_vm9 = vcmp.le.s32.totalorder %v9091_v36, 14 }
0x14b3   : > { %v6818_v1 = vsel %vm12586_vm15, %v11281_v11, %v6817_v5  ;;  %v6822_v29 = vsel %vm12587_vm8, %v6817_v5, %v11281_v11  ;;  %v11469_v28 = vsel %vm12589_vm1, %v7107_v61, 0.0  ;;  %vm12591_vm11 = vcmp.le.s32.totalorder %v9093_v37, 14 }
0x14b4   : > { %v6823_v30 = vsel %vm12590_vm9, %v6818_v1, 0.0  ;;  %v6824_v60 = vsel %vm12591_vm11, %v6822_v29, 0.0  ;;  %v7146_v35 = vsel %vm11432_vm12, %v7135_v15, 0.0  ;;  %v7147_v11 = vsel %vm11447_vm6, %v7139_v62, 0.0 }
0x14b5   : > { %v6872_v17 = vrot.slane %v6823_v30, 4  ;;  %v6873_v58 = vrot.slane %v6824_v60, 4  ;;  %vm12592_vm14 = vcmask 130048   ;;  %vm12593_vm2 = vcmp.ge.s32.totalorder %v9087_v33, 1 }
0x14b6   : > { %v6789_v23 = vsel %vm12592_vm14, %v11360_v34, %v11228_v19  ;;  %v6791_v21 = vsel %vm12593_vm2, %v6786_v26, 0.0  ;;  %vm12594_vm9 = vcmask 121856   ;;  %v11488_v7 = vsel %vm12413_vm10, %v6797_v3, 0.0  ;;  %v7025_v4 = vpop.permute.xlu0 %7024  ;;  %v7117_v9 = vpop.permute.xlu1 %7116 }
0x14b7   : > { %v6800_v25 = vsel %vm12594_vm9, %v6793_v54, %v11230_v14  ;;  %vm12595_vm6 = vcmask 138240   ;;  %v7119_v19 = vsel %vm7118_vm7, %v11286_v16, %v7117_v9  ;;  %v7123_v34 = vsel %vm7118_vm7, %v7117_v9, %v11286_v16 }
0x14b8   : > { %v6775_v49 = vsel %vm12595_vm6, %v11234_v48, %v6771_v13  ;;  %vm12596_vm15 = vmmov %vm12595_vm6  ;;  %v7282_v14 = vrot.slane %v7146_v35, 4  ;;  %v7283_v54 = vrot.slane %v7147_v11, 4  ;;  %vm12597_vm8 = vcmp.le.s32.totalorder %v9091_v36, 13 }
0x14b9   : > { %v6778_v8 = vsel %vm12596_vm15, %v6771_v13, %v11234_v48  ;;  %v7128_v55 = vsel %vm12597_vm8, %v7119_v19, 0.0  ;;  %vm12598_vm1 = vcmp.le.s32.totalorder %v9093_v37, 13  ;;  %vm12599_vm11 = vcmp.ge.s32.totalorder %v9085_v32, 1 }
0x14ba   : > { %v7129_v31 = vsel %vm12598_vm1, %v7123_v34, 0.0  ;;  %v6790_v6 = vsel %vm12599_vm11, %v6789_v23, 0.0  ;;  %vm12600_vm14 = vnez %v12167_v24  ;;  %vm12601_vm2 = vmmov %vm12599_vm11  ;;  %vm12602_vm9 = vcmp.ge.s32.totalorder %v9091_v36, 2  ;;  %v7043_v12 = vpop.permute.xlu0 %7042  ;;  %v7046_v62 = vpop.permute.xlu1 %7045 }
0x14bb   : > { %v6801_v48 = vsel %vm12600_vm14, %v6800_v25, 0.0  ;;  %vm11510_vm6 = vmand %vm12602_vm9, %vm12601_vm2  ;;  %vm12605_vm7 = vcmask 1043456   ;;  %vm12607_vm8 = vcmp.ge.s32.totalorder %v9093_v37, 2  ;;  %vm12608_vm1 = vnez %v12169_v39 }
0x14bc   : > { %v6887_v13 = vsel %vm12605_vm7, %v11130_v43, %v6873_v58  ;;  %vm12606_vm15 = vmmov %vm12605_vm7  ;;  %v7113_v22 = vsel %vm12607_vm8, %v7104_v18, 0.0  ;;  %v6780_v61 = vsel %vm12608_vm1, %v6775_v49, 0.0  ;;  %vm12609_vm11 = vcmp.ge.s32.totalorder %v9087_v33, 1 }
0x14bd   : > { %v6886_v20 = vsel %vm12606_vm15, %v11127_v42, %v6872_v17  ;;  %vm12610_vm12 = vmmov %vm12607_vm8  ;;  %6925 = vmatprep.subr.mxu1 %v6887_v13  ;;  %v7296_v5 = vsel %vm12605_vm7, %v7128_v55, %v7282_v14  ;;  %v6861_v26 = vrot.slane %v6791_v21, 4  ;;  %vm12614_vm15 = vnez %v12171_v44 }
0x14be   : > { %vm11526_vm2 = vmand %vm12610_vm12, %vm12609_vm11  ;;  %v6779_v3 = vsel %vm12614_vm15, %v6778_v8, 0.0  ;;  %vm12615_vm8 = vcmask 146432   ;;  %vm12616_vm1 = vcmp.ge.s32.totalorder %v9085_v32, 2  ;;  %vm12617_vm12 = vcmp.le.s32.totalorder %v9091_v36, 14  ;;  %6926 = vmatpush1.msra.mxu1 %v6886_v20  ;;  %v6991_v9 = vpop.permute.xlu0 %6990  ;;  %v6994_v8 = vpop.permute.xlu1 %6993 }
0x14bf   : > { %vm12613_vm9 = vmmov %vm12605_vm7  ;;  %v7068_v1 = vsel %vm12615_vm8, %v11238_v51, %v7063_v27  ;;  %v6860_v30 = vrot.slane %v6790_v6, 4  ;;  %vm12623_vm15 = vcmp.le.s32.totalorder %v9093_v37, 14  ;;  %v7276_v58 = vrot.slane %v7096_v63, 4  ;;  %v560_v63 = vld [vmem:[%s12052_s12] sm:$0xf] }
0x14c0   : > { %v7297_v15 = vsel %vm12613_vm9, %v7129_v31, %v7283_v54  ;;  %vm11540_vm11 = vmand %vm12617_vm12, %vm12616_vm1  ;;  %vm12626_vm1 = vcmask 252928   ;;  %vm12633_vm10 = vcmask 244736   ;;  %v7079_v25 = vsel %vm11526_vm2, %v7068_v1, 0.0 }
0x14c1   : > { %7348 = vmatprep.subr.mxu0 %v7297_v15  ;;  %vm12620_vm9 = vmmov %vm12605_vm7  ;;  %v7033_v11 = vsel %vm12626_vm1, %v7025_v4, %v11242_v50  ;;  %v7048_v23 = vsel %vm12633_vm10, %v7046_v62, %v7043_v12  ;;  %vm12637_vm4 = vcmp.ge.s32.totalorder %v9085_v32, 2  ;;  %vm12638_vm2 = vcmp.le.s32.totalorder %v9091_v36, 13 }
0x14c2   : > { %v6885_v18 = vsel %vm12620_vm9, %v11488_v7, %v6867_v10  ;;  %vm12621_vm7 = vmmov %vm12615_vm8  ;;  %vm12622_vm8 = vcmp.ge.s32.totalorder %v9087_v33, 2  ;;  %7349 = vmatpush1.msra.mxu0 %v7296_v5  ;;  %v7040_v38 = vsel %vm11540_vm11, %v7033_v11, 0.0  ;;  %vm12644_vm11 = vcmp.ge.s32.totalorder %v9091_v36, 1 }
0x14c3   : > { %v7071_v60 = vsel %vm12621_vm7, %v7063_v27, %v11238_v51  ;;  %vm11554_vm14 = vmand %vm12623_vm15, %vm12622_vm8  ;;  %6927 = vmatprep.subr.mxu1 %v6885_v18  ;;  %vm12630_vm15 = vcmp.le.s32.totalorder %v9093_v37, 13  ;;  %7350 = vmatprep.subr.mxu0 %v6887_v13  ;;  %v7264_v6 = vrot.slane %v7040_v38, 4  ;;  %v7009_v13 = vpop.permute.xlu0 %7008 }
0x14c4   : > { %vm12627_vm12 = vmmov %vm12620_vm9  ;;  %7351 = vmatpush1.msra.mxu0 %v6886_v20  ;;  %v7078_v19 = vsel %vm11510_vm6, %v7071_v60, 0.0  ;;  %v7012_v20 = vpop.permute.xlu1 %7011 }
0x14c5   : > { %v6884_v17 = vsel %vm12627_vm12, %v6801_v48, %v6866_v46  ;;  %vm12628_vm9 = vmmov %vm12626_vm1 }
0x14c6   : > { %v7030_v51 = vsel %vm12628_vm9, %v11242_v50, %v7025_v4  ;;  %vm12629_vm7 = vmmov %vm12622_vm8  ;;  %6928 = vmatpush1.msra.mxu1 %v6884_v17  ;;  %v7277_v50 = vrot.slane %v7097_v53, 4 }
0x14c7   : > { %vm11569_vm8 = vmand %vm12630_vm15, %vm12629_vm7  ;;  %vm12641_vm7 = vcmask 244736   ;;  %v6971_v18 = vpop.permute.xlu0 %6970 }
0x14c8   : > { %vm12634_vm1 = vmmov %vm12627_vm12  ;;  %v7051_v53 = vsel %vm12641_vm7, %v7043_v12, %v7046_v62  ;;  %v7061_v34 = vsel %vm11569_vm8, %v7048_v23, 0.0  ;;  %vm12649_vm8 = vcmp.ge.s32.totalorder %v9093_v37, 1  ;;  %vm12652_vm7 = vcmask 269312  }
0x14c9   : > { %v6883_v21 = vsel %vm12634_vm1, %v6780_v61, %v6861_v26  ;;  %vm12635_vm12 = vmmov %vm12634_vm1  ;;  %v6996_v54 = vsel %vm12652_vm7, %v6994_v8, %v6991_v9 }
0x14ca   : > { %6929 = vmatprep.subr.mxu1 %v6883_v21  ;;  %v6882_v4 = vsel %vm12635_vm12, %v6779_v3, %v6860_v30  ;;  %vm12636_vm10 = vmmov %vm12634_vm1  ;;  %vm12647_vm12 = vcmask 293888   ;;  %v6974_v30 = vpop.permute.xlu1 %6973 }
0x14cb   : > { %v7295_v49 = vsel %vm12636_vm10, %v7113_v22, %v6867_v10  ;;  %vm11596_vm9 = vmand %vm12638_vm2, %vm12637_vm4  ;;  %6930 = vmatpush1.msra.mxu1 %v6882_v4  ;;  %v7041_v10 = vsel %vm11554_vm14, %v7030_v51, 0.0  ;;  %v7293_v52 = vsel %vm12636_vm10, %v11488_v7, %v7277_v50  ;;  %vm12648_vm14 = vcmp.ge.s32.totalorder %v9087_v33, 2 }
0x14cc   : > { %7352 = vmatprep.subr.mxu0 %v7295_v49  ;;  %vm12642_vm15 = vmmov %vm12634_vm1  ;;  %8417 = vmatmul.mubr.msk.f32.vlgmr.msra.gmra.mxu1 %vm12647_vm12, %v560_v63  ;;  %v7270_v7 = vrot.slane %v7078_v19, 4  ;;  %v7060_v16 = vsel %vm11596_vm9, %v7051_v53, 0.0  ;;  %v7265_v22 = vrot.slane %v7041_v10, 4  ;;  %vm12656_vm9 = vcmp.ge.s32.totalorder %v9085_v32, 2  ;;  %v6765_v63 = vpop.f32.mrf.mxu1 }
0x14cd   : > { %v7294_v45 = vsel %vm12642_vm15, %v11469_v28, %v6866_v46  ;;  %vm12643_vm6 = vmmov %vm12637_vm4  ;;  %vm7013_vm4 = vcmask 261120   ;;  %v7271_v46 = vrot.slane %v7079_v25, 4  ;;  %7729 = vmatprep.mubr.f32.mxu1 %v8906_v2 }
0x14ce   : > { %vm11613_vm1 = vmand %vm12644_vm11, %vm12643_vm6  ;;  %7353 = vmatpush1.msra.mxu0 %v7294_v45  ;;  %vm6975_vm11 = vcmask 277504   ;;  %v7014_v61 = vsel %vm7013_vm4, %v7012_v20, %v7009_v13  ;;  %v7017_v56 = vsel %vm7013_vm4, %v7009_v13, %v7012_v20  ;;  %v6767_v50 = vpop.f32.mrf.mxu1 }
0x14cf   : > { %vm11624_vm2 = vmand %vm12649_vm8, %vm12648_vm14  ;;  %7354 = vmatprep.subr.mxu0 %v7293_v52  ;;  %v7022_v62 = vsel %vm12656_vm9, %v7017_v56, 0.0  ;;  %vm12659_vm8 = vcmp.ge.s32.totalorder %v9091_v36, 2  ;;  %v6976_v11 = vsel %vm6975_vm11, %v6974_v30, %v6971_v18  ;;  %v6979_v17 = vsel %vm6975_vm11, %v6971_v18, %v6974_v30 }
0x14d0   : > { %vm12653_vm15 = vmmov %vm12652_vm7  ;;  %v7007_v15 = vsel %vm11624_vm2, %v6996_v54, 0.0 }
0x14d1   : > { %v6999_v55 = vsel %vm12653_vm15, %v6991_v9, %v6994_v8  ;;  %vm12654_vm6 = vmmov %vm12636_vm10  ;;  %vm12665_vm15 = vcmp.ge.s32.totalorder %v9093_v37, 2  ;;  %v7259_v35 = vrot.slane %v7007_v15, 4 }
0x14d2   : > { %v7292_v31 = vsel %vm12654_vm6, %v6801_v48, %v7276_v58  ;;  %vm12655_vm12 = vmmov %vm12654_vm6  ;;  %v7006_v48 = vsel %vm11613_vm1, %v6999_v55, 0.0 }
0x14d3   : > { %7355 = vmatpush1.msra.mxu0 %v7292_v31  ;;  %v7291_v12 = vsel %vm12655_vm12, %v7061_v34, %v7271_v46  ;;  %vm12657_vm10 = vmmov %vm12648_vm14  ;;  %v7258_v60 = vrot.slane %v7006_v48, 4 }
0x14d4   : > { %7356 = vmatprep.subr.mxu0 %v6883_v21  ;;  %v7023_v5 = vsel %vm12657_vm10, %v7014_v61, 0.0  ;;  %vm12658_vm14 = vmmov %vm12656_vm9  ;;  %v561_v21 = vld [vmem:[%s12053_s13] sm:$0xf] }
0x14d5   : > { %7357 = vmatpush1.msra.mxu0 %v6882_v4  ;;  %vm11649_vm4 = vmand %vm12659_vm8, %vm12658_vm14  ;;  %vm7322_vm14 = vcmask 818176  }
0x14d6   : > { %7358 = vmatprep.subr.mxu0 %v7291_v12  ;;  %vm12662_vm1 = vmmov %vm12654_vm6  ;;  %v6988_v58 = vsel %vm11649_vm4, %v6979_v17, 0.0  ;;  %vm12671_vm4 = vcmask 916480  }
0x14d7   : > { %v7290_v3 = vsel %vm12662_vm1, %v7060_v16, %v7270_v7  ;;  %vm12663_vm7 = vmmov %vm12662_vm1 }
0x14d8   : > { %v7289_v1 = vsel %vm12663_vm7, %v7023_v5, %v7265_v22  ;;  %vm12664_vm2 = vmmov %vm12657_vm10  ;;  %7359 = vmatpush1.msra.mxu0 %v7290_v3  ;;  %vm12673_vm7 = vcmask 908288  }
0x14d9   : > { %vm6983_vm6 = vmand %vm12665_vm15, %vm12664_vm2  ;;  %7360 = vmatprep.subr.mxu0 %v7289_v1 }
0x14da   : > { %vm12666_vm12 = vmmov %vm12662_vm1  ;;  %v6989_v51 = vsel %vm6983_vm6, %v6976_v11, 0.0  ;;  %vm12676_vm6 = vcmp.le.s32.totalorder %v9085_v32, 14 }
0x14db   : > { %v7288_v29 = vsel %vm12666_vm12, %v7022_v62, %v7264_v6  ;;  %vm12667_vm9 = vmmov %vm12662_vm1  ;;  %vm12677_vm12 = vcmp.le.s32.totalorder %v9087_v33, 14 }
0x14dc   : > { %7361 = vmatpush1.msra.mxu0 %v7288_v29  ;;  %v7287_v27 = vsel %vm12667_vm9, %v6989_v51, %v7259_v35  ;;  %vm12668_vm10 = vmmov %vm12662_vm1 }
0x14dd   : > { %v7286_v23 = vsel %vm12668_vm10, %v6988_v58, %v7258_v60  ;;  %7362 = vmatprep.subr.mxu0 %v7287_v27  ;;  %vm12669_vm11 = vmmov %vm12662_vm1 }
0x14de   : > { %7363 = vmatpush1.msra.mxu0 %v7286_v23  ;;  %vm12670_vm8 = vmmov %vm12662_vm1 }
0x14df   : > { %8420 = vmatmul.mubr.msk.f32.vlgmr.msra.gmra.mxu0 %vm7322_vm14, %v561_v21  ;;  %vm12672_vm1 = vmmov %vm12671_vm4 }
0x14e0   : > { %7902 = vmatprep.mubr.f32.mxu0 %v8906_v2  ;;  %vm12674_vm2 = vmmov %vm12673_vm7 }
0x14e1   : > { %vm12675_vm15 = vmmov %vm12670_vm8 }
0x14e2   : > { %vm12678_vm9 = vmmov %vm12674_vm2 }
0x14e3   : > { %vm12679_vm10 = vmmov %vm12670_vm8 }
0x14e4   : > { %vm12680_vm14 = vmmov %vm12674_vm2 }
0x158c   : > { %v6965_v25 = vpop.f32.mrf.mxu1 }
0x158d   : > { %v7405_v4 = vrot.slane %v6965_v25, 4 }
0x158e   : > { %v6967_v9 = vpop.f32.mrf.mxu1 }
0x158f   : > { %v11671_v49 = vsel %vm12669_vm11, %v6765_v63, %v7405_v4  ;;  %v7406_v8 = vrot.slane %v6967_v9, 4  ;;  %vm12681_vm11 = vmmov %vm12672_vm1 }
0x1590   : > { %7547 = vrot.lane.b32.xlu0 %v11671_v49, %s12514_s20 }
0x1591   : > { %v11676_v19 = vsel %vm12670_vm8, %v6767_v50, %v7406_v8  ;;  %vm12682_vm8 = vmmov %vm12672_vm1 }
0x1592   : > { %7549 = vrot.lane.b32.xlu1 %v11676_v19, %s12514_s20 }
0x1594   : > { %7569 = vrot.lane.b32.xlu0 %v11671_v49, %s12379_s23 }
0x1596   : > { %7571 = vrot.lane.b32.xlu1 %v11676_v19, %s12379_s23 }
0x1598   : > { %7503 = vrot.lane.b32.xlu0 %v11671_v49, %s12508_s19 }
0x159a   : > { %7505 = vrot.lane.b32.xlu1 %v11676_v19, %s12508_s19 }
0x159c   : > { %7525 = vrot.lane.b32.xlu0 %v11671_v49, %s12507_s22 }
0x159e   : > { %7527 = vrot.lane.b32.xlu1 %v11676_v19, %s12507_s22 }
0x159f   : > { %v11694_v38 = vpop.f32.mrf.mxu0 }
0x15a0   : > { %7487 = vrot.lane.b32.xlu0 %v11671_v49, %s12511_s3 }
0x15a1   : > { %v11708_v47 = vpop.f32.mrf.mxu0 }
0x15a2   : > { %7489 = vrot.lane.b32.xlu1 %v11694_v38, %s12511_s3 }
0x15a4   : > { %7481 = vrot.lane.b32.xlu0 %v11676_v19, %s12511_s3 }
0x15a6   : > { %7467 = vrot.lane.b32.xlu1 %v11694_v38, %s12515_s1 }
0x15a8   : > { %7437 = vrot.lane.b32.xlu0 %v11676_v19, %s12377_s26 }
0x15aa   : > { %7445 = vrot.lane.b32.xlu1 %v11694_v38, %s12377_s26 }
0x15ac   : > { %7573 = vrot.lane.b32.xlu0 %v11694_v38, %s12379_s23 }
0x15ae   : > { %7575 = vrot.lane.b32.xlu1 %v11708_v47, %s12379_s23 }
0x15b0   : > { %7551 = vrot.lane.b32.xlu0 %v11694_v38, %s12514_s20 }
0x15b2   : > { %7553 = vrot.lane.b32.xlu1 %v11708_v47, %s12514_s20 }
0x15b4   : > { %7529 = vrot.lane.b32.xlu0 %v11694_v38, %s12507_s22 }
0x15b6   : > { %7531 = vrot.lane.b32.xlu1 %v11708_v47, %s12507_s22 }
0x15b8   : > { %7507 = vrot.lane.b32.xlu0 %v11694_v38, %s12508_s19 }
0x15ba   : > { %7509 = vrot.lane.b32.xlu1 %v11708_v47, %s12508_s19 }
0x15bc   : > { %7443 = vrot.lane.b32.xlu0 %v11671_v49, %s12377_s26 }
0x15be   : > { %7483 = vrot.lane.b32.xlu1 %v11708_v47, %s12511_s3 }
0x15c0   : > { %7461 = vrot.lane.b32.xlu0 %v11708_v47, %s12515_s1 }
0x15c2   : > { %7465 = vrot.lane.b32.xlu1 %v11671_v49, %s12515_s1 }
0x15c4   : > { %7459 = vrot.lane.b32.xlu0 %v11676_v19, %s12515_s1 }
0x15c6   : > { %7439 = vrot.lane.b32.xlu1 %v11708_v47, %s12377_s26 }
0x15c8   : > { %7415 = vrot.lane.b32.xlu0 %v11708_v47, %s12378_s21 }
0x15ca   : > { %7423 = vrot.lane.b32.xlu1 %v11694_v38, %s12378_s21 }
0x15cc   : > { %7413 = vrot.lane.b32.xlu0 %v11676_v19, %s12378_s21 }
0x15ce   : > { %7421 = vrot.lane.b32.xlu1 %v11671_v49, %s12378_s21 }
0x1602   : > { %v7548_v53 = vpop.permute.xlu0 %7547 }
0x1604   : > { %v7550_v45 = vpop.permute.xlu1 %7549 }
0x1605   : > { %v7555_v22 = vsel %vm12671_vm4, %v7548_v53, %v7550_v45  ;;  %v7563_v61 = vsel %vm12672_vm1, %v7550_v45, %v7548_v53  ;;  %vm12683_vm4 = vmmov %vm12676_vm6 }
0x1606   : > { %v7570_v10 = vpop.permute.xlu0 %7569  ;;  %v7565_v5 = vsel %vm12676_vm6, %v7555_v22, 0.0  ;;  %v7566_v26 = vsel %vm12677_vm12, %v7563_v61, 0.0  ;;  %vm12684_vm1 = vmmov %vm12677_vm12 }
0x1607   : > { %v7637_v17 = vrot.slane %v7565_v5, 4  ;;  %v7638_v58 = vrot.slane %v7566_v26, 4  ;;  %vm12688_vm6 = vmmov %vm12679_vm10 }
0x1608   : > { %v7572_v34 = vpop.permute.xlu1 %7571  ;;  %vm12689_vm12 = vmmov %vm12688_vm6 }
0x1609   : > { %v7585_v3 = vsel %vm12678_vm9, %v7572_v34, %v7570_v10  ;;  %v7577_v29 = vsel %vm12680_vm14, %v7570_v10, %v7572_v34  ;;  %vm12692_vm14 = vmmov %vm12688_vm6 }
0x160a   : > { %v7504_v14 = vpop.permute.xlu0 %7503 }
0x160c   : > { %v7506_v52 = vpop.permute.xlu1 %7505 }
0x160e   : > { %v7526_v46 = vpop.permute.xlu0 %7525 }
0x1610   : > { %v7528_v28 = vpop.permute.xlu1 %7527 }
0x1612   : > { %v11744_v54 = vpop.permute.xlu0 %7487 }
0x1614   : > { %v11746_v55 = vpop.permute.xlu1 %7489 }
0x1616   : > { %v11748_v31 = vpop.permute.xlu0 %7481 }
0x1618   : > { %v11750_v7 = vpop.permute.xlu1 %7467 }
0x161a   : > { %v11752_v6 = vpop.permute.xlu0 %7437 }
0x161c   : > { %v11754_v16 = vpop.permute.xlu1 %7445 }
0x161e   : > { %v7574_v13 = vpop.permute.xlu0 %7573 }
0x1620   : > { %v7576_v20 = vpop.permute.xlu1 %7575 }
0x1621   : > { %v7578_v56 = vsel %vm12673_vm7, %v7574_v13, %v7576_v20  ;;  %v7586_v12 = vsel %vm12674_vm2, %v7576_v20, %v7574_v13  ;;  %vm12685_vm7 = vcmask 1039360   ;;  %vm12686_vm2 = vcmask 924672  }
0x1622   : > { %v7589_v48 = vsel %vm12435_vm13, %v7578_v56, 0.0  ;;  %v7590_v15 = vsel %vm12433_vm5, %v7586_v12, 0.0  ;;  %v7552_v62 = vpop.permute.xlu0 %7551  ;;  %v7519_v23 = vsel %vm12685_vm7, %v7506_v52, %v7504_v14  ;;  %vm12690_vm9 = vmmov %vm12685_vm7  ;;  %v7533_v56 = vsel %vm12686_vm2, %v7526_v46, %v7528_v28 }
0x1623   : > { %8421 = vmatprep.subr.msk.mxu1 %vm12675_vm15, %v7590_v15  ;;  %vm12687_vm15 = vmmov %vm12686_vm2  ;;  %v7511_v9 = vsel %vm12690_vm9, %v7504_v14, %v7506_v52 }
0x1624   : > { %8422 = vmatpush1.msk.msra.mxu1 %vm12679_vm10, %v7589_v48  ;;  %v7554_v1 = vpop.permute.xlu1 %7553  ;;  %vm12691_vm10 = vmmov %vm12688_vm6 }
0x1625   : > { %v7556_v18 = vsel %vm12681_vm11, %v7552_v62, %v7554_v1  ;;  %v7564_v30 = vsel %vm12682_vm8, %v7554_v1, %v7552_v62  ;;  %8423 = vmatprep.subr.msk.mxu1 %vm12433_vm5, %v7585_v3  ;;  %vm12693_vm11 = vcmp.le.s32.totalorder %v9093_v37, 14  ;;  %vm12694_vm8 = vcmp.le.s32.totalorder %v9091_v36, 14 }
0x1626   : > { %v7567_v60 = vsel %vm12683_vm4, %v7556_v18, 0.0  ;;  %v7568_v35 = vsel %vm12684_vm1, %v7564_v30, 0.0  ;;  %v7530_v11 = vpop.permute.xlu0 %7529  ;;  %8424 = vmatpush1.msk.msra.mxu1 %vm12435_vm13, %v7577_v29  ;;  %v7522_v13 = vsel %vm12693_vm11, %v7519_v23, 0.0  ;;  %v7521_v14 = vsel %vm12694_vm8, %v7511_v9, 0.0  ;;  %vm12695_vm4 = vmmov %vm12686_vm2 }
0x1627   : > { %v7639_v51 = vrot.slane %v7567_v60, 4  ;;  %v7641_v27 = vrot.slane %v7568_v35, 4  ;;  %v7541_v52 = vsel %vm12695_vm4, %v7528_v28, %v7526_v46  ;;  %vm12696_vm1 = vmmov %vm12685_vm7  ;;  %v7624_v62 = vrot.slane %v7522_v13, 4 }
0x1628   : > { %v7532_v21 = vpop.permute.xlu1 %7531  ;;  %vm12697_vm7 = vmmov %vm12696_vm1  ;;  %v7623_v3 = vrot.slane %v7521_v14, 4  ;;  %vm12706_vm4 = vcmask 1043456  }
0x1629   : > { %v7534_v63 = vsel %vm12686_vm2, %v7530_v11, %v7532_v21  ;;  %v7542_v50 = vsel %vm12687_vm15, %v7532_v21, %v7530_v11  ;;  %v7642_v25 = vsel %vm12688_vm6, %v7638_v58, %v7641_v27  ;;  %v7640_v4 = vsel %vm12689_vm12, %v7637_v17, %v7639_v51  ;;  %vm12698_vm15 = vmmov %vm12694_vm8 }
0x162a   : > { %v7545_v8 = vsel %vm12393_vm3, %v7534_v63, 0.0  ;;  %v7546_v53 = vsel %vm12391_vm0, %v7542_v50, 0.0  ;;  %v7508_v45 = vpop.permute.xlu0 %7507  ;;  %7673 = vmatprep.subr.mxu1 %v7642_v25  ;;  %vm12699_vm6 = vmmov %vm12693_vm11  ;;  %vm12700_vm12 = vcmask 7168   ;;  %vm12704_vm11 = vcmp.ge.s32.totalorder %v9091_v36, 1 }
0x162b   : > { %7674 = vmatpush1.msra.mxu1 %v7640_v4  ;;  %v7654_v10 = vsel %vm12691_vm10, %v7546_v53, %v7638_v58  ;;  %v7653_v34 = vsel %vm12692_vm14, %v7545_v8, %v7637_v17  ;;  %v7491_v46 = vsel %vm12700_vm12, %v11744_v54, %v11748_v31  ;;  %vm12701_vm9 = vmmov %vm12700_vm12  ;;  %vm12705_vm8 = vcmp.ge.s32.totalorder %v9093_v37, 1 }
0x162c   : > { %7675 = vmatprep.subr.mxu1 %v7654_v10  ;;  %v7510_v20 = vpop.permute.xlu1 %7509  ;;  %v7497_v1 = vsel %vm12701_vm9, %v11748_v31, %v11744_v54  ;;  %vm12702_vm10 = vmmov %vm12701_vm9  ;;  %vm12712_vm12 = vcmask 121856  }
0x162d   : > { %v7512_v22 = vsel %vm12696_vm1, %v7508_v45, %v7510_v20  ;;  %v7520_v61 = vsel %vm12697_vm7, %v7510_v20, %v7508_v45  ;;  %7676 = vmatpush1.msra.mxu1 %v7653_v34  ;;  %vm12703_vm14 = vmmov %vm12701_vm9 }
0x162e   : > { %v7523_v12 = vsel %vm12698_vm15, %v7512_v22, 0.0  ;;  %v7524_v48 = vsel %vm12699_vm6, %v7520_v61, 0.0  ;;  %v7444_v15 = vpop.permute.xlu0 %7443  ;;  %8425 = vmatprep.subr.msk.mxu1 %vm12391_vm0, %v7541_v52  ;;  %vm12707_vm1 = vmmov %vm12706_vm4  ;;  %vm12711_vm6 = vcmask 130048  }
0x162f   : > { %v7625_v5 = vrot.slane %v7523_v12, 4  ;;  %v7627_v26 = vrot.slane %v7524_v48, 4  ;;  %8426 = vmatpush1.msk.msra.mxu1 %vm12393_vm3, %v7533_v56  ;;  %vm12708_vm7 = vmmov %vm12705_vm8  ;;  %v7453_v58 = vsel %vm12711_vm6, %v11752_v6, %v7444_v15 }
0x1630   : > { %v7484_v28 = vpop.permute.xlu1 %7483  ;;  %v7500_v54 = vsel %vm12708_vm7, %v7491_v46, 0.0  ;;  %vm12709_vm2 = vmmov %vm12707_vm1 }
0x1631   : > { %v7492_v29 = vsel %vm12702_vm10, %v11746_v55, %v7484_v28  ;;  %v7498_v18 = vsel %vm12703_vm14, %v7484_v28, %v11746_v55  ;;  %v7628_v11 = vsel %vm12706_vm4, %v7624_v62, %v7627_v26  ;;  %v7626_v17 = vsel %vm12707_vm1, %v7623_v3, %v7625_v5  ;;  %vm12710_vm15 = vmmov %vm12704_vm11 }
0x1632   : > { %v7501_v30 = vsel %vm12704_vm11, %v7498_v18, 0.0  ;;  %v7502_v60 = vsel %vm12705_vm8, %v7492_v29, 0.0  ;;  %v7462_v35 = vpop.permute.xlu0 %7461  ;;  %7679 = vmatprep.subr.mxu1 %v7628_v11  ;;  %v7652_v31 = vsel %vm12709_vm2, %v11708_v47, %v7624_v62  ;;  %v7499_v55 = vsel %vm12710_vm15, %v7497_v1, 0.0  ;;  %vm12713_vm9 = vmmov %vm12711_vm6  ;;  %v562_v11 = vld [vmem:[%s12054_s14] sm:$0xf] }
0x1633   : > { %v7613_v51 = vrot.slane %v7502_v60, 4  ;;  %v7470_v27 = vsel %vm12712_vm12, %v11750_v7, %v7462_v35  ;;  %7680 = vmatpush1.msra.mxu1 %v7626_v17  ;;  %v7447_v21 = vsel %vm12713_vm9, %v7444_v15, %v11752_v6  ;;  %v7611_v63 = vrot.slane %v7501_v30, 4  ;;  %vm12714_vm10 = vmmov %vm12712_vm12 }
0x1634   : > { %v7466_v23 = vpop.permute.xlu1 %7465  ;;  %v7476_v50 = vsel %vm12714_vm10, %v7462_v35, %v11750_v7  ;;  %7681 = vmatprep.subr.mxu1 %v7652_v31  ;;  %vm12715_vm14 = vmmov %vm12707_vm1  ;;  %v7610_v25 = vrot.slane %v7500_v54, 4  ;;  %v7609_v9 = vrot.slane %v7499_v55, 4  ;;  %vm12716_vm11 = vcmp.ge.s32.totalorder %v9085_v32, 1 }
0x1635   : > { %v7651_v47 = vsel %vm12715_vm14, %v11694_v38, %v7623_v3  ;;  %v7455_v8 = vsel %vm12716_vm11, %v7453_v58, 0.0  ;;  %vm12717_vm8 = vnez %v12165_v0  ;;  %vm12718_vm4 = vcmp.ge.s32.totalorder %v9087_v33, 1  ;;  %vm12720_vm7 = vmmov %vm12709_vm2 }
0x1636   : > { %7682 = vmatpush1.msra.mxu1 %v7651_v47  ;;  %v7460_v4 = vpop.permute.xlu0 %7459  ;;  %v7480_v53 = vsel %vm12717_vm8, %v7470_v27, 0.0  ;;  %v7456_v6 = vsel %vm12718_vm4, %v7447_v21, 0.0  ;;  %vm12719_vm1 = vnez %v12167_v24  ;;  %v7614_v38 = vsel %vm12720_vm7, %v7610_v25, %v7613_v51  ;;  %vm12721_vm2 = vmmov %vm12711_vm6  ;;  %v8892_v24 = vld [vmem:[%s9041_s0] sm:$0xff] }
0x1637   : > { %7683 = vmatprep.subr.mxu1 %v11676_v19  ;;  %v7479_v7 = vsel %vm12719_vm1, %v7476_v50, 0.0  ;;  %vm12722_vm15 = vmmov %vm12721_vm2  ;;  %v7595_v13 = vrot.slane %v7455_v8, 4  ;;  %v7596_v22 = vrot.slane %v7456_v6, 4 }
0x1638   : > { %7684 = vmatpush1.msra.mxu1 %v11671_v49  ;;  %v7440_v45 = vpop.permute.xlu1 %7439  ;;  %vm12723_vm6 = vmmov %vm12720_vm7  ;;  %vm12730_vm7 = vcmask 138240  }
0x1639   : > { %7685 = vmatprep.subr.mxu1 %v7614_v38  ;;  %v7448_v10 = vsel %vm12721_vm2, %v11754_v16, %v7440_v45  ;;  %v7454_v34 = vsel %vm12722_vm15, %v7440_v45, %v11754_v16  ;;  %v7612_v19 = vsel %vm12723_vm6, %v7609_v9, %v7611_v63  ;;  %vm12724_vm12 = vmmov %vm12716_vm11  ;;  %vm12728_vm11 = vcmask 121856  }
0x163a   : > { %v7457_v20 = vsel %vm12724_vm12, %v7454_v34, 0.0  ;;  %vm12725_vm9 = vmmov %vm12718_vm4  ;;  %7686 = vmatpush1.msra.mxu1 %v7612_v19  ;;  %v7416_v49 = vpop.permute.xlu0 %7415  ;;  %v7469_v16 = vsel %vm12728_vm11, %v7466_v23, %v7460_v4  ;;  %vm12733_vm12 = vnez %v12171_v44 }
0x163b   : > { %v7458_v14 = vsel %vm12725_vm9, %v7448_v10, 0.0  ;;  %vm12726_vm10 = vmmov %vm12723_vm6  ;;  %v7597_v61 = vrot.slane %v7457_v20, 4  ;;  %vm12734_vm9 = vnez %v12169_v39 }
0x163c   : > { %v7650_v52 = vsel %vm12726_vm10, %v7480_v53, %v7610_v25  ;;  %v7599_v56 = vrot.slane %v7458_v14, 4  ;;  %vm12727_vm14 = vmmov %vm12723_vm6  ;;  %v7424_v15 = vpop.permute.xlu1 %7423 }
0x163d   : > { %7687 = vmatprep.subr.mxu1 %v7650_v52  ;;  %v7649_v12 = vsel %vm12727_vm14, %v7479_v7, %v7609_v9  ;;  %vm12729_vm4 = vmmov %vm12728_vm11  ;;  %v7426_v62 = vsel %vm12730_vm7, %v7424_v15, %v7416_v49  ;;  %v7598_v3 = vsel %vm12723_vm6, %v7595_v13, %v7597_v61 }
0x163e   : > { %v7475_v48 = vsel %vm12729_vm4, %v7460_v4, %v7466_v23  ;;  %7688 = vmatpush1.msra.mxu1 %v7649_v12  ;;  %vm12731_vm2 = vmmov %vm12730_vm7  ;;  %v7436_v28 = vsel %vm12734_vm9, %v7426_v62, 0.0  ;;  %v7414_v18 = vpop.permute.xlu0 %7413  ;;  %vm7655_vm7 = vcmask 883712  }
0x163f   : > { %8427 = vmatprep.subr.msk.mxu1 %vm12717_vm8, %v7469_v16  ;;  %v7432_v5 = vsel %vm12731_vm2, %v7416_v49, %v7424_v15  ;;  %vm12732_vm15 = vmmov %vm12723_vm6  ;;  %v563_v15 = vld [vmem:[%s12055_s15] sm:$0xff] }
0x1640   : > { %v7600_v26 = vsel %vm12732_vm15, %v7596_v22, %v7599_v56  ;;  %v7435_v46 = vsel %vm12733_vm12, %v7432_v5, 0.0  ;;  %8428 = vmatpush1.msk.msra.mxu1 %vm12719_vm1, %v7475_v48  ;;  %vm12735_vm10 = vmmov %vm12723_vm6  ;;  %v7422_v30 = vpop.permute.xlu1 %7421 }
0x1641   : > { %7691 = vmatprep.subr.mxu1 %v7600_v26  ;;  %v7648_v1 = vsel %vm12735_vm10, %v7436_v28, %v7596_v22  ;;  %vm12736_vm14 = vmmov %vm12723_vm6 }
0x1642   : > { %v7647_v29 = vsel %vm12736_vm14, %v7435_v46, %v7595_v13  ;;  %7692 = vmatpush1.msra.mxu1 %v7598_v3  ;;  %vm12737_vm11 = vmmov %vm12731_vm2  ;;  %vm12743_vm14 = vcmask 916480  }
0x1643   : > { %7693 = vmatprep.subr.mxu1 %v7648_v1  ;;  %v7425_v60 = vsel %vm12737_vm11, %v7422_v30, %v7414_v18  ;;  %vm12738_vm4 = vmmov %vm12731_vm2 }
0x1644   : > { %v7431_v35 = vsel %vm12738_vm4, %v7414_v18, %v7422_v30  ;;  %7694 = vmatpush1.msra.mxu1 %v7647_v29  ;;  %vm12739_vm2 = vmmov %vm12723_vm6  ;;  %vm12741_vm6 = vcmask 908288   ;;  %vm12745_vm4 = vcmp.le.s32.totalorder %v9087_v33, 14 }
0x1645   : > { %8429 = vmatprep.subr.msk.mxu1 %vm12734_vm9, %v7425_v60  ;;  %vm12740_vm15 = vmmov %vm12739_vm2 }
0x1646   : > { %8430 = vmatpush1.msk.msra.mxu1 %vm12733_vm12, %v7431_v35  ;;  %vm12742_vm10 = vmmov %vm12741_vm6 }
0x1647   : > { %8431 = vmatmul.mubr.msk.f32.vlgmr.msra.gmra.mxu1 %vm7655_vm7, %v562_v11  ;;  %vm12744_vm11 = vmmov %vm12743_vm14  ;;  %vm12746_vm7 = vcmp.le.s32.totalorder %v9085_v32, 14 }
0x1648   : > { %8066 = vmatprep.mubr.f32.mxu1 %v8906_v2 }
0x1707   : > { %v7731_v17 = vpop.f32.mrf.mxu1 }
0x1708   : > { %v7738_v54 = vrot.slane %v7731_v17, 4 }
0x1709   : > { %v7733_v31 = vpop.f32.mrf.mxu1 }
0x170a   : > { %v7742_v55 = vsel %vm12739_vm2, %v11127_v42, %v7738_v54  ;;  %v7739_v58 = vrot.slane %v7733_v31, 4  ;;  %vm12747_vm2 = vcmask 924672  }
0x170b   : > { %7782 = vrot.lane.b32.xlu1 %v7742_v55, %s12511_s3  ;;  %7823 = vrot.lane.b32.xlu0 %v7742_v55, %s12379_s23 }
0x170c   : > { %v7743_v51 = vsel %vm12740_vm15, %v11130_v43, %v7739_v58  ;;  %vm12748_vm15 = vmmov %vm12747_vm2 }
0x170f   : > { %7812 = vrot.lane.b32.xlu0 %v7742_v55, %s12514_s20  ;;  %7825 = vrot.lane.b32.xlu1 %v7743_v51, %s12379_s23 }
0x1713   : > { %7801 = vrot.lane.b32.xlu0 %v7742_v55, %s12507_s22  ;;  %7814 = vrot.lane.b32.xlu1 %v7743_v51, %s12514_s20 }
0x1717   : > { %7790 = vrot.lane.b32.xlu0 %v7742_v55, %s12508_s19  ;;  %7803 = vrot.lane.b32.xlu1 %v7743_v51, %s12507_s22 }
0x171b   : > { %7779 = vrot.lane.b32.xlu0 %v7743_v51, %s12511_s3  ;;  %7792 = vrot.lane.b32.xlu1 %v7743_v51, %s12508_s19 }
0x171f   : > { %7768 = vrot.lane.b32.xlu0 %v7743_v51, %s12515_s1  ;;  %7771 = vrot.lane.b32.xlu1 %v7742_v55, %s12515_s1 }
0x1723   : > { %7757 = vrot.lane.b32.xlu0 %v7743_v51, %s12377_s26  ;;  %7760 = vrot.lane.b32.xlu1 %v7742_v55, %s12377_s26 }
0x1727   : > { %7745 = vrot.lane.b32.xlu0 %v7743_v51, %s12378_s21  ;;  %7749 = vrot.lane.b32.xlu1 %v7742_v55, %s12378_s21 }
0x177d   : > { %v7783_v2 = vpop.permute.xlu1 %7782  ;;  %v7824_v42 = vpop.permute.xlu0 %7823 }
0x1781   : > { %v7813_v43 = vpop.permute.xlu0 %7812  ;;  %v7826_v27 = vpop.permute.xlu1 %7825 }
0x1782   : > { %v7827_v23 = vsel %vm12741_vm6, %v7824_v42, %v7826_v27  ;;  %v7831_v21 = vsel %vm12742_vm10, %v7826_v27, %v7824_v42  ;;  %vm12749_vm6 = vcmask 1039360  }
0x1783   : > { %8432 = vmatprep.subr.msk.mxu0 %vm12433_vm5, %v7831_v21  ;;  %vm12750_vm10 = vmmov %vm12749_vm6 }
0x1784   : > { %8433 = vmatpush1.msk.msra.mxu0 %vm12435_vm13, %v7827_v23 }
0x1785   : > { %v7802_v63 = vpop.permute.xlu0 %7801  ;;  %v7815_v50 = vpop.permute.xlu1 %7814 }
0x1786   : > { %v7816_v47 = vsel %vm12743_vm14, %v7813_v43, %v7815_v50  ;;  %v7820_v25 = vsel %vm12744_vm11, %v7815_v50, %v7813_v43  ;;  %vm12751_vm14 = vcmp.le.s32.totalorder %v9093_v37, 14  ;;  %vm12752_vm11 = vcmp.le.s32.totalorder %v9091_v36, 14 }
0x1787   : > { %8434 = vmatprep.subr.msk.mxu0 %vm12745_vm4, %v7820_v25  ;;  %vm12753_vm4 = vcmask 7168  }
0x1788   : > { %8435 = vmatpush1.msk.msra.mxu0 %vm12746_vm7, %v7816_v47  ;;  %vm12754_vm7 = vmmov %vm12753_vm4  ;;  %v564_v47 = vld [vmem:[%s12056_s16] sm:$0xf] }
0x1789   : > { %v7791_v4 = vpop.permute.xlu0 %7790  ;;  %v7804_v9 = vpop.permute.xlu1 %7803 }
0x178a   : > { %v7805_v8 = vsel %vm12747_vm2, %v7802_v63, %v7804_v9  ;;  %v7809_v53 = vsel %vm12748_vm15, %v7804_v9, %v7802_v63  ;;  %vm12755_vm2 = vcmp.ge.s32.totalorder %v9093_v37, 1  ;;  %vm12756_vm15 = vcmask 121856  }
0x178b   : > { %8436 = vmatprep.subr.msk.mxu0 %vm12391_vm0, %v7809_v53 }
0x178c   : > { %8437 = vmatpush1.msk.msra.mxu0 %vm12393_vm3, %v7805_v8 }
0x178d   : > { %v7780_v6 = vpop.permute.xlu0 %7779  ;;  %v7793_v7 = vpop.permute.xlu1 %7792 }
0x178e   : > { %v7794_v38 = vsel %vm12749_vm6, %v7791_v4, %v7793_v7  ;;  %v7798_v45 = vsel %vm12750_vm10, %v7793_v7, %v7791_v4  ;;  %v7784_v19 = vsel %vm12753_vm4, %v7783_v2, %v7780_v6  ;;  %v7787_v13 = vsel %vm12754_vm7, %v7780_v6, %v7783_v2  ;;  %vm12758_vm10 = vmmov %vm12756_vm15  ;;  %v12789_v4 = vld [vmem:[#allocation2_spill] sm:$0xff] }
0x178f   : > { %8438 = vmatprep.subr.msk.mxu0 %vm12751_vm14, %v7798_v45  ;;  %vm12757_vm6 = vcmp.ge.s32.totalorder %v9091_v36, 1  ;;  %vm12759_vm14 = vcmask 130048   ;;  %vm12761_vm4 = vcmp.ge.s32.totalorder %v9087_v33, 1  ;;  %vm12762_vm7 = vcmp.ge.s32.totalorder %v9085_v32, 1 }
0x1790   : > { %8439 = vmatpush1.msk.msra.mxu0 %vm12752_vm11, %v7794_v38  ;;  %vm12760_vm11 = vmmov %vm12759_vm14 }
0x1791   : > { %v7769_v10 = vpop.permute.xlu0 %7768  ;;  %7860 = vmatprep.subr.mxu0 %v7743_v51  ;;  %v7772_v34 = vpop.permute.xlu1 %7771 }
0x1792   : > { %7861 = vmatpush1.msra.mxu0 %v7742_v55  ;;  %v7773_v20 = vsel %vm12756_vm15, %v7772_v34, %v7769_v10  ;;  %v7776_v14 = vsel %vm12758_vm10, %v7769_v10, %v7772_v34  ;;  %vm12765_vm10 = vcmask 908288  }
0x1793   : > { %8440 = vmatprep.subr.msk.mxu0 %vm12755_vm2, %v7784_v19  ;;  %vm12763_vm2 = vcmask 138240  }
0x1794   : > { %8441 = vmatpush1.msk.msra.mxu0 %vm12757_vm6, %v7787_v13  ;;  %vm12764_vm15 = vmmov %vm12763_vm2  ;;  %vm7834_vm6 = vcmask 588800  }
0x1795   : > { %v7758_v49 = vpop.permute.xlu0 %7757  ;;  %8442 = vmatprep.subr.msk.mxu0 %vm12717_vm8, %v7773_v20  ;;  %v7761_v52 = vpop.permute.xlu1 %7760 }
0x1796   : > { %v7762_v22 = vsel %vm12759_vm14, %v7761_v52, %v7758_v49  ;;  %v7765_v61 = vsel %vm12760_vm11, %v7758_v49, %v7761_v52  ;;  %8443 = vmatpush1.msk.msra.mxu0 %vm12719_vm1, %v7776_v14  ;;  %vm12766_vm14 = vmmov %vm12765_vm10  ;;  %vm12767_vm11 = vcmask 916480  }
0x1797   : > { %8444 = vmatprep.subr.msk.mxu0 %vm12761_vm4, %v7762_v22  ;;  %vm12768_vm4 = vmmov %vm12767_vm11 }
0x1798   : > { %8445 = vmatpush1.msk.msra.mxu0 %vm12762_vm7, %v7765_v61  ;;  %vm12769_vm7 = vcmp.le.s32.totalorder %v9087_v33, 14 }
0x1799   : > { %v7746_v56 = vpop.permute.xlu0 %7745  ;;  %v7750_v12 = vpop.permute.xlu1 %7749 }
0x179a   : > { %v7751_v16 = vsel %vm12763_vm2, %v7750_v12, %v7746_v56  ;;  %v7754_v48 = vsel %vm12764_vm15, %v7746_v56, %v7750_v12  ;;  %vm12770_vm2 = vcmp.le.s32.totalorder %v9085_v32, 14  ;;  %vm12771_vm15 = vcmask 924672  }
0x179b   : > { %8446 = vmatprep.subr.msk.mxu0 %vm12734_vm9, %v7751_v16 }
0x179c   : > { %8447 = vmatpush1.msk.msra.mxu0 %vm12733_vm12, %v7754_v48 }
0x179d   : > { %8448 = vmatmul.mubr.msk.f32.vlgmr.msra.gmra.mxu0 %vm7834_vm6, %v563_v15 }
0x185d   : > { %v7904_v62 = vpop.f32.mrf.mxu0 }
0x185e   : > { %7947 = vrot.lane.b32.xlu1 %v7904_v62, %s12511_s3  ;;  %7988 = vrot.lane.b32.xlu0 %v7904_v62, %s12379_s23 }
0x185f   : > { %v7906_v5 = vpop.f32.mrf.mxu0 }
0x1862   : > { %7977 = vrot.lane.b32.xlu0 %v7904_v62, %s12514_s20  ;;  %7990 = vrot.lane.b32.xlu1 %v7906_v5, %s12379_s23 }
0x1866   : > { %7966 = vrot.lane.b32.xlu0 %v7904_v62, %s12507_s22  ;;  %7979 = vrot.lane.b32.xlu1 %v7906_v5, %s12514_s20 }
0x186a   : > { %7955 = vrot.lane.b32.xlu0 %v7904_v62, %s12508_s19  ;;  %7968 = vrot.lane.b32.xlu1 %v7906_v5, %s12507_s22  ;;  %s12790_s22 = sshll.u32 %s12792_s25, 3 }
0x186b   : > { %s548_s23 = scalar_lea.vmem %s12057_s17, %s12790_s22 }
0x186e   : > { %7944 = vrot.lane.b32.xlu0 %v7906_v5, %s12511_s3  ;;  %7957 = vrot.lane.b32.xlu1 %v7906_v5, %s12508_s19 }
0x1872   : > { %7933 = vrot.lane.b32.xlu0 %v7906_v5, %s12515_s1  ;;  %7936 = vrot.lane.b32.xlu1 %v7904_v62, %s12515_s1 }
0x1876   : > { %7922 = vrot.lane.b32.xlu0 %v7906_v5, %s12377_s26  ;;  %7925 = vrot.lane.b32.xlu1 %v7904_v62, %s12377_s26 }
0x187a   : > { %7910 = vrot.lane.b32.xlu0 %v7906_v5, %s12378_s21  ;;  %7914 = vrot.lane.b32.xlu1 %v7904_v62, %s12378_s21 }
0x18d0   : > { %v7948_v26 = vpop.permute.xlu1 %7947  ;;  %v7989_v3 = vpop.permute.xlu0 %7988 }
0x18d4   : > { %v7978_v46 = vpop.permute.xlu0 %7977  ;;  %v7991_v28 = vpop.permute.xlu1 %7990 }
0x18d5   : > { %v7992_v1 = vsel %vm12765_vm10, %v7989_v3, %v7991_v28  ;;  %v7996_v29 = vsel %vm12766_vm14, %v7991_v28, %v7989_v3  ;;  %vm12775_vm14 = vcmp.le.s32.totalorder %v9093_v37, 14 }
0x18d6   : > { %8449 = vmatprep.subr.msk.mxu1 %vm12433_vm5, %v7996_v29  ;;  %vm12772_vm5 = vmmov %vm12771_vm15 }
0x18d7   : > { %8450 = vmatpush1.msk.msra.mxu1 %vm12435_vm13, %v7992_v1  ;;  %vm12773_vm13 = vcmask 1039360  }
0x18d8   : > { %v7967_v18 = vpop.permute.xlu0 %7966  ;;  %v7980_v30 = vpop.permute.xlu1 %7979  ;;  %vm12774_vm10 = vmmov %vm12773_vm13 }
0x18d9   : > { %v7981_v60 = vsel %vm12767_vm11, %v7978_v46, %v7980_v30  ;;  %v7985_v35 = vsel %vm12768_vm4, %v7980_v30, %v7978_v46  ;;  %vm12776_vm11 = vcmp.le.s32.totalorder %v9091_v36, 14  ;;  %vm12777_vm4 = vcmask 7168  }
0x18da   : > { %8451 = vmatprep.subr.msk.mxu1 %vm12769_vm7, %v7985_v35  ;;  %vm12780_vm7 = vcmask 121856  }
0x18db   : > { %8452 = vmatpush1.msk.msra.mxu1 %vm12770_vm2, %v7981_v60  ;;  %vm12781_vm2 = vcmp.ge.s32.totalorder %v9091_v36, 1 }
0x18dc   : > { %v7956_v11 = vpop.permute.xlu0 %7955  ;;  %v7969_v17 = vpop.permute.xlu1 %7968 }
0x18dd   : > { %v7970_v41 = vsel %vm12771_vm15, %v7967_v18, %v7969_v17  ;;  %v7974_v54 = vsel %vm12772_vm5, %v7969_v17, %v7967_v18  ;;  %vm12782_vm15 = vmmov %vm12780_vm7  ;;  %vm12783_vm5 = vcmask 130048  }
0x18de   : > { %8453 = vmatprep.subr.msk.mxu1 %vm12391_vm0, %v7974_v54  ;;  %vm12778_vm0 = vmmov %vm12777_vm4 }
0x18df   : > { %8454 = vmatpush1.msk.msra.mxu1 %vm12393_vm3, %v7970_v41  ;;  %vm12779_vm3 = vcmp.ge.s32.totalorder %v9093_v37, 1 }
0x18e0   : > { %v7945_v40 = vpop.permute.xlu0 %7944  ;;  %v7958_v31 = vpop.permute.xlu1 %7957 }
0x18e1   : > { %v7959_v55 = vsel %vm12773_vm13, %v7956_v11, %v7958_v31  ;;  %v7963_v58 = vsel %vm12774_vm10, %v7958_v31, %v7956_v11  ;;  %v7949_v57 = vsel %vm12777_vm4, %v7948_v26, %v7945_v40  ;;  %v7952_v59 = vsel %vm12778_vm0, %v7945_v40, %v7948_v26  ;;  %vm12784_vm13 = vmmov %vm12783_vm5 }
0x18e2   : > { %8455 = vmatprep.subr.msk.mxu1 %vm12775_vm14, %v7963_v58  ;;  %vm12785_vm10 = vcmp.ge.s32.totalorder %v9087_v33, 1  ;;  %vm12786_vm14 = vcmp.ge.s32.totalorder %v9085_v32, 1 }
0x18e3   : > { %8456 = vmatpush1.msk.msra.mxu1 %vm12776_vm11, %v7959_v55  ;;  %vm12787_vm11 = vcmask 138240  }
0x18e4   : > { %v7934_v51 = vpop.permute.xlu0 %7933  ;;  %8024 = vmatprep.subr.mxu1 %v7906_v5  ;;  %v7937_v2 = vpop.permute.xlu1 %7936 }
0x18e5   : > { %8025 = vmatpush1.msra.mxu1 %v7904_v62  ;;  %v7938_v42 = vsel %vm12780_vm7, %v7937_v2, %v7934_v51  ;;  %v7941_v43 = vsel %vm12782_vm15, %v7934_v51, %v7937_v2 }
0x18e6   : > { %8457 = vmatprep.subr.msk.mxu1 %vm12779_vm3, %v7949_v57 }
0x18e7   : > { %8458 = vmatpush1.msk.msra.mxu1 %vm12781_vm2, %v7952_v59 }
0x18e8   : > { %v7923_v27 = vpop.permute.xlu0 %7922  ;;  %8459 = vmatprep.subr.msk.mxu1 %vm12717_vm8, %v7938_v42  ;;  %v7926_v23 = vpop.permute.xlu1 %7925  ;;  %vm12788_vm8 = vmmov %vm12787_vm11 }
0x18e9   : > { %v7927_v21 = vsel %vm12783_vm5, %v7926_v23, %v7923_v27  ;;  %v7930_v63 = vsel %vm12784_vm13, %v7923_v27, %v7926_v23  ;;  %8460 = vmatpush1.msk.msra.mxu1 %vm12719_vm1, %v7941_v43 }
0x18ea   : > { %8461 = vmatprep.subr.msk.mxu1 %vm12785_vm10, %v7927_v21 }
0x18eb   : > { %8462 = vmatpush1.msk.msra.mxu1 %vm12786_vm14, %v7930_v63 }
0x18ec   : > { %v7911_v36 = vpop.permute.xlu0 %7910  ;;  %v7915_v37 = vpop.permute.xlu1 %7914 }
0x18ed   : > { %v7916_v0 = vsel %vm12787_vm11, %v7915_v37, %v7911_v36  ;;  %v7919_v50 = vsel %vm12788_vm8, %v7911_v36, %v7915_v37 }
0x18ee   : > { %8463 = vmatprep.subr.msk.mxu1 %vm12734_vm9, %v7916_v0 }
0x18ef   : > { %8464 = vmatpush1.msk.msra.mxu1 %vm12733_vm12, %v7919_v50 }
0x18f0   : > { %8465 = vmatmul.mubr.msk.f32.vlgmr.msra.gmra.mxu1 %vm7834_vm6, %v564_v47 }
0x19b0   : > { %v8068_v32 = vpop.f32.mrf.mxu1 }
0x19b1   : > { %v8069_v25 = vadd.f32 %v8892_v24, %v8068_v32 }
0x19b2   : > { %v8070_v33 = vpop.f32.mrf.mxu1 }
0x19b3   : > { %v8071_v9 = vadd.f32 %v8070_v33, %v12789_v4 }
0x19b5   : > { %v8075_v8 = vcombine.low %v8069_v25, %v8071_v9 }
0x19b7   : > { %8077 = vst [vmem:[%s548_s23] sm:$0xff] %v8075_v8 }
0x19b8 PF: > { %s27_s24 = sadd.s32 1, %s8899_s24  }
0x19b9   : > { %p24_p4 = scmp.ge.s32.totalorder %s27_s24, 4  }
0x19bb   :  { %26 = sbr.rel (!%p24_p4) target bundleno = 6 (0x6), region = 118 }

</bundles_post_ra>
